<compile_context>
chip_gen: v6e
topology: v6e:2x2x1
jax: 0.10.0
libtpu: 0.0.40
codegen_flags: <defaults>
</compile_context>

<pallas_src>
import functools

import jax
import jax.numpy as jnp
from jax.experimental import pallas as pl
from jax.experimental.pallas import tpu as pltpu


# ----------------------------------------------------------------------------
# Shape arithmetic identical to the PyTorch module
# ----------------------------------------------------------------------------
def resize(x, kernel_size, dilation, stride, padding):
    return int(1 + (x + 2 * padding - dilation * (kernel_size - 1) - 1) / stride)


def _derive_shapes(specs):
    H, W, C0, C1, C2, K, F1, F2, nDigits, P = specs
    H1 = resize(H, K, 1, 1, P);   W1 = resize(W, K, 1, 1, P)     # conv1 out
    Hp1 = resize(H1, 2, 1, 2, 0); Wp1 = resize(W1, 2, 1, 2, 0)   # pool1 out
    H2 = resize(Hp1, K, 1, 1, P); W2 = resize(Wp1, K, 1, 1, P)   # conv2 out
    Hp2 = resize(H2, 2, 1, 2, 0); Wp2 = resize(W2, 2, 1, 2, 0)   # pool2 out
    return H1, W1, Hp1, Wp1, H2, W2, Hp2, Wp2


# ----------------------------------------------------------------------------
# Fused LeNet kernel (one grid step == one batch element)
# ----------------------------------------------------------------------------
def _lenet_fused_kernel(
    # inputs
    x_ref,                     # (1, H, W)  VMEM  - one input image
    w1_ref, b1_ref,            # SMEM scalar tables: conv1 weights/bias
    w2_ref, b2_ref,            # SMEM scalar tables: conv2 weights/bias
    l0w_ref, l0b_ref,          # (in, F1) / (1, F1)   VMEM
    l1w_ref, l1b_ref,          # (F1, F2) / (1, F2)   VMEM
    l2w_ref, l2b_ref,          # (F2, 10) / (1, 10)   VMEM
    # output
    out_ref,                   # (1, 1, nDigits)
    # VMEM scratch (all per-core, tiny)
    xpad, act1, hm1, p1pad, act2, hm2, p2, flat,
    *, H, W, K, P, C1, C2,
    H1, W1, Hp1, Wp1, H2, W2, Hp2, Wp2, slope):

    def leaky(v):
        return jnp.where(v >= 0, v, slope * v)

    # ---- stage 0: zero-pad the input image into VMEM scratch ---------------
    xpad[...] = jnp.zeros_like(xpad)
    xpad[:, P:P + H, P:P + W] = x_ref[...]

    # ---- stage 1: conv1 (Cin = 1) + LeakyReLU (direct VPU form) ------------
    # The K*K shifted windows are loaded once and reused for every out-channel;
    # the per-tap scalar weights come from SMEM.
    win1 = [xpad[:, ki:ki + H1, kj:kj + W1]
            for ki in range(K) for kj in range(K)]             # K*K x (1,H1,W1)
    for co in range(C1):
        base = co * K * K
        acc = win1[0] * w1_ref[base]
        for r in range(1, K * K):
            acc = acc + win1[r] * w1_ref[base + r]
        act1[:, co, :, :] = leaky(acc + b1_ref[co])

    # ---- stage 2: 2x2 max-pool #1, written into the interior of a zero-
    #      padded scratch so conv2 can read its shifted windows directly -----
    p1pad[...] = jnp.zeros_like(p1pad)
    for i in range(Hp1):                                       # pool rows (H)
        blk = act1[:, :, 2 * i:2 * i + 2, :]                   # (1,C1,2,W1)
        hm1[:, :, i:i + 1, :] = jnp.max(blk, axis=2, keepdims=True)
    for j in range(Wp1):                                       # pool cols (W)
        blk = hm1[:, :, :, 2 * j:2 * j + 2]                    # (1,C1,Hp1,2)
        p1pad[:, :, P:P + Hp1, P + j:P + j + 1] = jnp.max(
            blk, axis=3, keepdims=True)

    # ---- stage 3: conv2 + LeakyReLU -----------------------------------------
    # feature order (c, ki, kj) matches torch's w.view(Cout, Cin*K*K) layout.
    win2 = [p1pad[:, c, ki:ki + H2, kj:kj + W2]
            for c in range(C1) for ki in range(K) for kj in range(K)]
    KK = C1 * K * K
    for co in range(C2):
        base = co * KK
        acc = win2[0] * w2_ref[base]
        for r in range(1, KK):
            acc = acc + win2[r] * w2_ref[base + r]
        act2[:, co, :, :] = leaky(acc + b2_ref[co])

    # ---- stage 4: 2x2 max-pool #2 -------------------------------------------
    for i in range(Hp2):
        blk = act2[:, :, 2 * i:2 * i + 2, :]
        hm2[:, :, i:i + 1, :] = jnp.max(blk, axis=2, keepdims=True)
    for j in range(Wp2):
        blk = hm2[:, :, :, 2 * j:2 * j + 2]
        p2[:, :, :, j:j + 1] = jnp.max(blk, axis=3, keepdims=True)

    # ---- stage 5: NCHW flatten (== torch .view(nBatch, -1)) -----------------
    for c in range(C2):
        for i in range(Hp2):
            off = c * Hp2 * Wp2 + i * Wp2
            flat[:, off:off + Wp2] = p2[:, c, i, :]

    # ---- stage 6: linear0/1/2 on the MXU (weights pre-transposed (in,out)) --
    h = flat[...]                                              # (1, C2*Hp2*Wp2)
    h = leaky(jnp.dot(h, l0w_ref[...],
                      preferred_element_type=jnp.float32) + l0b_ref[...])
    h = leaky(jnp.dot(h, l1w_ref[...],
                      preferred_element_type=jnp.float32) + l1b_ref[...])
    out_ref[0] = (jnp.dot(h, l2w_ref[...],
                          preferred_element_type=jnp.float32) + l2b_ref[...])


# ----------------------------------------------------------------------------
# Wrapper: one pallas_call for the whole network
# ----------------------------------------------------------------------------
def lenet_forward(params, x, *, specs):
    H, W, C0, C1, C2, K, F1, F2, nDigits, P = specs
    B = x.shape[0]
    assert x.shape == (B, 1, H, W)     # nn.Conv2d(1, C1, ...) in the reference

    H1, W1, Hp1, Wp1, H2, W2, Hp2, Wp2 = _derive_shapes(specs)
    flat_size = C2 * Hp2 * Wp2
    f32 = jnp.float32

    kern = functools.partial(
        _lenet_fused_kernel,
        H=H, W=W, K=K, P=P, C1=C1, C2=C2,
        H1=H1, W1=W1, Hp1=Hp1, Wp1=Wp1, H2=H2, W2=W2, Hp2=Hp2, Wp2=Wp2,
        slope=0.01)

    smem = pl.BlockSpec(memory_space=pltpu.MemorySpace.SMEM)

    def full2d(shape):
        return pl.BlockSpec(shape, lambda b: (0, 0))

    out = pl.pallas_call(
        kern,
        out_shape=jax.ShapeDtypeStruct((B, 1, nDigits), f32),
        grid=(B,),
        in_specs=[
            pl.BlockSpec((1, H, W), lambda b: (b, 0, 0)),   # one image / step
            smem, smem, smem, smem,                         # conv scalar tables
            full2d((flat_size, F1)), full2d((1, F1)),
            full2d((F1, F2)),        full2d((1, F2)),
            full2d((F2, nDigits)),   full2d((1, nDigits)),
        ],
        out_specs=pl.BlockSpec((1, 1, nDigits), lambda b: (b, 0, 0)),
        scratch_shapes=[
            pltpu.VMEM((1, H + 2 * P, W + 2 * P), f32),          # padded input
            pltpu.VMEM((1, C1, H1, W1), f32),                    # conv1 out
            pltpu.VMEM((1, C1, Hp1, W1), f32),                   # pool1 row-max
            pltpu.VMEM((1, C1, Hp1 + 2 * P, Wp1 + 2 * P), f32),  # padded pool1
            pltpu.VMEM((1, C2, H2, W2), f32),                    # conv2 out
            pltpu.VMEM((1, C2, Hp2, W2), f32),                   # pool2 row-max
            pltpu.VMEM((1, C2, Hp2, Wp2), f32),                  # pool2 out
            pltpu.VMEM((1, flat_size), f32),                     # flat features
        ],
        compiler_params=pltpu.CompilerParams(
            dimension_semantics=("parallel",)),   # batch across TCs (v7x)
    )(
        x.reshape(B, H, W),
        params["conv1_w"], params["conv1_b"],
        params["conv2_w"], params["conv2_b"],
        params["lin0_w"], params["lin0_b"],
        params["lin1_w"], params["lin1_b"],
        params["lin2_w"], params["lin2_b"],
    )
    return out.reshape(B, nDigits)


# ----------------------------------------------------------------------------
# Parameter init (kernel-ready layouts: no per-forward transposes)
# ----------------------------------------------------------------------------
def init_lenet_params(key, specs):
    H, W, C0, C1, C2, K, F1, F2, nDigits, P = specs
    _, _, _, _, _, _, Hp2, Wp2 = _derive_shapes(specs)
    size = Hp2 * Wp2 * C2

    keys = jax.random.split(key, 10)

    def kaiming(k, shape, fan_in):
        return jnp.sqrt(2.0 / fan_in) * jax.random.normal(k, shape, dtype=jnp.float32)

    return {
        # conv params flattened in (Cout, Cin, kh, kw) order -> SMEM tables
        "conv1_w": kaiming(keys[0], (C1, 1, K, K), 1 * K * K).reshape(-1),
        "conv1_b": 0.01 * jax.random.normal(keys[1], (C1,), dtype=jnp.float32),
        "conv2_w": kaiming(keys[2], (C2, C1, K, K), C1 * K * K).reshape(-1),
        "conv2_b": 0.01 * jax.random.normal(keys[3], (C2,), dtype=jnp.float32),
        # linear weights stored PRE-TRANSPOSED as (in, out); biases as (1, out)
        "lin0_w": kaiming(keys[4], (size, F1), size),
        "lin0_b": 0.01 * jax.random.normal(keys[5], (1, F1), dtype=jnp.float32),
        "lin1_w": kaiming(keys[6], (F1, F2), F1),
        "lin1_b": 0.01 * jax.random.normal(keys[7], (1, F2), dtype=jnp.float32),
        "lin2_w": kaiming(keys[8], (F2, nDigits), F2),
        "lin2_b": 0.01 * jax.random.normal(keys[9], (1, nDigits), dtype=jnp.float32),
    }


# ----------------------------------------------------------------------------
# Pure-JAX reference (same math) used only to verify the fused kernel
# ----------------------------------------------------------------------------
def _lenet_reference(params, x, *, specs):
    H, W, C0, C1, C2, K, F1, F2, nDigits, P = specs
    B = x.shape[0]
    leaky = lambda v: jnp.where(v >= 0, v, 0.01 * v)
    w1 = params["conv1_w"].reshape(C1, 1, K, K)
    w2 = params["conv2_w"].reshape(C2, C1, K, K)

    def conv(h, w, b):
        y = jax.lax.conv_general_dilated(
            h, w, window_strides=(1, 1), padding=((P, P), (P, P)),
            dimension_numbers=("NCHW", "OIHW", "NCHW"))
        return y + b.reshape(1, -1, 1, 1)

    def pool(h):
        return jax.lax.reduce_window(
            h, -jnp.inf, jax.lax.max, (1, 1, 2, 2), (1, 1, 2, 2), "VALID")

    h = pool(leaky(conv(x, w1, params["conv1_b"])))
    h = pool(leaky(conv(h, w2, params["conv2_b"])))
    h = h.reshape(B, -1)
    h = leaky(h @ params["lin0_w"] + params["lin0_b"])
    h = leaky(h @ params["lin1_w"] + params["lin1_b"])
    return h @ params["lin2_w"] + params["lin2_b"]


if __name__ == "__main__":
    # specs = (H, W, C0, C1, C2, kernel_size, F1, F2, nDigits, padding)
    specs = (16, 16, 1, 4, 8, 3, 32, 16, 10, 1)

    key = jax.random.PRNGKey(0)
    k_param, k_x = jax.random.split(key)
    params = init_lenet_params(k_param, specs)

    B = 2
    x = jax.random.normal(k_x, (B, 1, specs[0], specs[1]), dtype=jnp.float32)

    fwd = jax.jit(functools.partial(lenet_forward, specs=specs))
    logits = fwd(params, x)
    jax.block_until_ready(logits)

    assert logits.shape == (B, specs[8])
    assert logits.dtype == jnp.float32

    # verify against a plain-JAX implementation of the same module
    ref = _lenet_reference(params, x, specs=specs)
    max_err = float(jnp.max(jnp.abs(logits - ref)))
    assert max_err < 1e-3, f"mismatch vs pure-JAX reference: {max_err}"

    print("KERNEL_OK")
</pallas_src>

<mosaic_0001>
module attributes {stable_mosaic.version = 11 : i64} {
  func.func @_lenet_fused_kernel(%arg0: i32, %arg1: memref<1x16x16xf32, #tpu.memory_space<vmem>>, %arg2: memref<36xf32, #tpu.memory_space<smem>>, %arg3: memref<4xf32, #tpu.memory_space<smem>>, %arg4: memref<288xf32, #tpu.memory_space<smem>>, %arg5: memref<8xf32, #tpu.memory_space<smem>>, %arg6: memref<128x32xf32, #tpu.memory_space<vmem>>, %arg7: memref<1x32xf32, #tpu.memory_space<vmem>>, %arg8: memref<32x16xf32, #tpu.memory_space<vmem>>, %arg9: memref<1x16xf32, #tpu.memory_space<vmem>>, %arg10: memref<16x10xf32, #tpu.memory_space<vmem>>, %arg11: memref<1x10xf32, #tpu.memory_space<vmem>>, %arg12: memref<1x1x10xf32, #tpu.memory_space<vmem>>, %arg13: memref<1x18x18xf32, #tpu.memory_space<vmem>>, %arg14: memref<1x4x16x16xf32, #tpu.memory_space<vmem>>, %arg15: memref<1x4x8x16xf32, #tpu.memory_space<vmem>>, %arg16: memref<1x4x10x10xf32, #tpu.memory_space<vmem>>, %arg17: memref<1x8x8x8xf32, #tpu.memory_space<vmem>>, %arg18: memref<1x8x4x8xf32, #tpu.memory_space<vmem>>, %arg19: memref<1x8x4x4xf32, #tpu.memory_space<vmem>>, %arg20: memref<1x128xf32, #tpu.memory_space<vmem>>) attributes {dimension_semantics = [#tpu.dimension_semantics<parallel>], iteration_bounds = array<i64: 2>, scalar_prefetch = 0 : i64, scratch_operands = 8 : i64, tpu.core_type = #tpu.core_type<tc>, window_params = [{transform_indices = @transform_0, window_bounds = array<i64: 1, 16, 16>}, {transform_indices = @transform_1, window_bounds = array<i64: 36>}, {transform_indices = @transform_2, window_bounds = array<i64: 4>}, {transform_indices = @transform_3, window_bounds = array<i64: 288>}, {transform_indices = @transform_4, window_bounds = array<i64: 8>}, {pipeline_mode = #tpu.pipeline_mode<synchronous>, transform_indices = @transform_5, window_bounds = array<i64: 128, 32>}, {pipeline_mode = #tpu.pipeline_mode<synchronous>, transform_indices = @transform_6, window_bounds = array<i64: 1, 32>}, {pipeline_mode = #tpu.pipeline_mode<synchronous>, transform_indices = @transform_7, window_bounds = array<i64: 32, 16>}, {pipeline_mode = #tpu.pipeline_mode<synchronous>, transform_indices = @transform_8, window_bounds = array<i64: 1, 16>}, {pipeline_mode = #tpu.pipeline_mode<synchronous>, transform_indices = @transform_9, window_bounds = array<i64: 16, 10>}, {pipeline_mode = #tpu.pipeline_mode<synchronous>, transform_indices = @transform_10, window_bounds = array<i64: 1, 10>}, {transform_indices = @transform_11, window_bounds = array<i64: 1, 1, 10>}]} {
    %cst = arith.constant 0.000000e+00 : f32
    %0 = vector.broadcast %cst : f32 to vector<1x18x18xf32>
    %c0 = arith.constant 0 : index
    %c0_0 = arith.constant 0 : index
    %c0_1 = arith.constant 0 : index
    %1 = vector.load %arg13[%c0, %c0_0, %c0_1] : memref<1x18x18xf32, #tpu.memory_space<vmem>>, vector<1x18x18xf32>
    tpu.vector_store %arg13[%c0, %c0_0, %c0_1], %0 {strides = array<i32>} : memref<1x18x18xf32, #tpu.memory_space<vmem>>, vector<1x18x18xf32>,
    %c0_2 = arith.constant 0 : index
    %c0_3 = arith.constant 0 : index
    %c0_4 = arith.constant 0 : index
    %2 = vector.load %arg1[%c0_2, %c0_3, %c0_4] : memref<1x16x16xf32, #tpu.memory_space<vmem>>, vector<1x16x16xf32>
    %c0_5 = arith.constant 0 : index
    %c1 = arith.constant 1 : index
    %c1_6 = arith.constant 1 : index
    %3 = vector.load %arg13[%c0_5, %c1, %c1_6] : memref<1x18x18xf32, #tpu.memory_space<vmem>>, vector<1x16x16xf32>
    tpu.vector_store %arg13[%c0_5, %c1, %c1_6], %2 {strides = array<i32>} : memref<1x18x18xf32, #tpu.memory_space<vmem>>, vector<1x16x16xf32>,
    %c0_7 = arith.constant 0 : index
    %c0_8 = arith.constant 0 : index
    %c0_9 = arith.constant 0 : index
    %4 = vector.load %arg13[%c0_7, %c0_8, %c0_9] : memref<1x18x18xf32, #tpu.memory_space<vmem>>, vector<1x16x16xf32>
    %c0_10 = arith.constant 0 : index
    %c0_11 = arith.constant 0 : index
    %c1_12 = arith.constant 1 : index
    %5 = vector.load %arg13[%c0_10, %c0_11, %c1_12] : memref<1x18x18xf32, #tpu.memory_space<vmem>>, vector<1x16x16xf32>
    %c0_13 = arith.constant 0 : index
    %c0_14 = arith.constant 0 : index
    %c2 = arith.constant 2 : index
    %6 = vector.load %arg13[%c0_13, %c0_14, %c2] : memref<1x18x18xf32, #tpu.memory_space<vmem>>, vector<1x16x16xf32>
    %c0_15 = arith.constant 0 : index
    %c1_16 = arith.constant 1 : index
    %c0_17 = arith.constant 0 : index
    %7 = vector.load %arg13[%c0_15, %c1_16, %c0_17] : memref<1x18x18xf32, #tpu.memory_space<vmem>>, vector<1x16x16xf32>
    %c0_18 = arith.constant 0 : index
    %c1_19 = arith.constant 1 : index
    %c1_20 = arith.constant 1 : index
    %8 = vector.load %arg13[%c0_18, %c1_19, %c1_20] : memref<1x18x18xf32, #tpu.memory_space<vmem>>, vector<1x16x16xf32>
    %c0_21 = arith.constant 0 : index
    %c1_22 = arith.constant 1 : index
    %c2_23 = arith.constant 2 : index
    %9 = vector.load %arg13[%c0_21, %c1_22, %c2_23] : memref<1x18x18xf32, #tpu.memory_space<vmem>>, vector<1x16x16xf32>
    %c0_24 = arith.constant 0 : index
    %c2_25 = arith.constant 2 : index
    %c0_26 = arith.constant 0 : index
    %10 = vector.load %arg13[%c0_24, %c2_25, %c0_26] : memref<1x18x18xf32, #tpu.memory_space<vmem>>, vector<1x16x16xf32>
    %c0_27 = arith.constant 0 : index
    %c2_28 = arith.constant 2 : index
    %c1_29 = arith.constant 1 : index
    %11 = vector.load %arg13[%c0_27, %c2_28, %c1_29] : memref<1x18x18xf32, #tpu.memory_space<vmem>>, vector<1x16x16xf32>
    %c0_30 = arith.constant 0 : index
    %c2_31 = arith.constant 2 : index
    %c2_32 = arith.constant 2 : index
    %12 = vector.load %arg13[%c0_30, %c2_31, %c2_32] : memref<1x18x18xf32, #tpu.memory_space<vmem>>, vector<1x16x16xf32>
    %c0_33 = arith.constant 0 : index
    %13 = memref.load %arg2[%c0_33] : memref<36xf32, #tpu.memory_space<smem>>
    %14 = vector.broadcast %13 : f32 to vector<1x16x16xf32>
    %15 = arith.mulf %4, %14 : vector<1x16x16xf32>
    %c1_34 = arith.constant 1 : index
    %16 = memref.load %arg2[%c1_34] : memref<36xf32, #tpu.memory_space<smem>>
    %17 = vector.broadcast %16 : f32 to vector<1x16x16xf32>
    %18 = arith.mulf %5, %17 : vector<1x16x16xf32>
    %19 = arith.addf %15, %18 : vector<1x16x16xf32>
    %c2_35 = arith.constant 2 : index
    %20 = memref.load %arg2[%c2_35] : memref<36xf32, #tpu.memory_space<smem>>
    %21 = vector.broadcast %20 : f32 to vector<1x16x16xf32>
    %22 = arith.mulf %6, %21 : vector<1x16x16xf32>
    %23 = arith.addf %19, %22 : vector<1x16x16xf32>
    %c3 = arith.constant 3 : index
    %24 = memref.load %arg2[%c3] : memref<36xf32, #tpu.memory_space<smem>>
    %25 = vector.broadcast %24 : f32 to vector<1x16x16xf32>
    %26 = arith.mulf %7, %25 : vector<1x16x16xf32>
    %27 = arith.addf %23, %26 : vector<1x16x16xf32>
    %c4 = arith.constant 4 : index
    %28 = memref.load %arg2[%c4] : memref<36xf32, #tpu.memory_space<smem>>
    %29 = vector.broadcast %28 : f32 to vector<1x16x16xf32>
    %30 = arith.mulf %8, %29 : vector<1x16x16xf32>
    %31 = arith.addf %27, %30 : vector<1x16x16xf32>
    %c5 = arith.constant 5 : index
    %32 = memref.load %arg2[%c5] : memref<36xf32, #tpu.memory_space<smem>>
    %33 = vector.broadcast %32 : f32 to vector<1x16x16xf32>
    %34 = arith.mulf %9, %33 : vector<1x16x16xf32>
    %35 = arith.addf %31, %34 : vector<1x16x16xf32>
    %c6 = arith.constant 6 : index
    %36 = memref.load %arg2[%c6] : memref<36xf32, #tpu.memory_space<smem>>
    %37 = vector.broadcast %36 : f32 to vector<1x16x16xf32>
    %38 = arith.mulf %10, %37 : vector<1x16x16xf32>
    %39 = arith.addf %35, %38 : vector<1x16x16xf32>
    %c7 = arith.constant 7 : index
    %40 = memref.load %arg2[%c7] : memref<36xf32, #tpu.memory_space<smem>>
    %41 = vector.broadcast %40 : f32 to vector<1x16x16xf32>
    %42 = arith.mulf %11, %41 : vector<1x16x16xf32>
    %43 = arith.addf %39, %42 : vector<1x16x16xf32>
    %c8 = arith.constant 8 : index
    %44 = memref.load %arg2[%c8] : memref<36xf32, #tpu.memory_space<smem>>
    %45 = vector.broadcast %44 : f32 to vector<1x16x16xf32>
    %46 = arith.mulf %12, %45 : vector<1x16x16xf32>
    %47 = arith.addf %43, %46 : vector<1x16x16xf32>
    %c0_36 = arith.constant 0 : index
    %48 = memref.load %arg3[%c0_36] : memref<4xf32, #tpu.memory_space<smem>>
    %49 = vector.broadcast %48 : f32 to vector<1x16x16xf32>
    %50 = arith.addf %47, %49 : vector<1x16x16xf32>
    %cst_37 = arith.constant 0.000000e+00 : f32
    %51 = vector.broadcast %cst_37 : f32 to vector<1x16x16xf32>
    %52 = arith.cmpf oge, %50, %51 : vector<1x16x16xf32>
    %cst_38 = arith.constant 0.00999999977 : f32
    %53 = vector.broadcast %cst_38 : f32 to vector<1x16x16xf32>
    %54 = arith.mulf %53, %50 : vector<1x16x16xf32>
    %55 = arith.select %52, %50, %54 : vector<1x16x16xi1>, vector<1x16x16xf32>
    %c0_39 = arith.constant 0 : index
    %c0_40 = arith.constant 0 : index
    %c0_41 = arith.constant 0 : index
    %c0_42 = arith.constant 0 : index
    %56 = vector.load %arg14[%c0_39, %c0_40, %c0_41, %c0_42] : memref<1x4x16x16xf32, #tpu.memory_space<vmem>>, vector<1x1x16x16xf32>
    %57 = vector.shape_cast %56 : vector<1x1x16x16xf32> to vector<1x16x16xf32>
    %58 = vector.shape_cast %55 : vector<1x16x16xf32> to vector<1x1x16x16xf32>
    tpu.vector_store %arg14[%c0_39, %c0_40, %c0_41, %c0_42], %58 {strides = array<i32>} : memref<1x4x16x16xf32, #tpu.memory_space<vmem>>, vector<1x1x16x16xf32>,
    %c9 = arith.constant 9 : index
    %59 = memref.load %arg2[%c9] : memref<36xf32, #tpu.memory_space<smem>>
    %60 = vector.broadcast %59 : f32 to vector<1x16x16xf32>
    %61 = arith.mulf %4, %60 : vector<1x16x16xf32>
    %c10 = arith.constant 10 : index
    %62 = memref.load %arg2[%c10] : memref<36xf32, #tpu.memory_space<smem>>
    %63 = vector.broadcast %62 : f32 to vector<1x16x16xf32>
    %64 = arith.mulf %5, %63 : vector<1x16x16xf32>
    %65 = arith.addf %61, %64 : vector<1x16x16xf32>
    %c11 = arith.constant 11 : index
    %66 = memref.load %arg2[%c11] : memref<36xf32, #tpu.memory_space<smem>>
    %67 = vector.broadcast %66 : f32 to vector<1x16x16xf32>
    %68 = arith.mulf %6, %67 : vector<1x16x16xf32>
    %69 = arith.addf %65, %68 : vector<1x16x16xf32>
    %c12 = arith.constant 12 : index
    %70 = memref.load %arg2[%c12] : memref<36xf32, #tpu.memory_space<smem>>
    %71 = vector.broadcast %70 : f32 to vector<1x16x16xf32>
    %72 = arith.mulf %7, %71 : vector<1x16x16xf32>
    %73 = arith.addf %69, %72 : vector<1x16x16xf32>
    %c13 = arith.constant 13 : index
    %74 = memref.load %arg2[%c13] : memref<36xf32, #tpu.memory_space<smem>>
    %75 = vector.broadcast %74 : f32 to vector<1x16x16xf32>
    %76 = arith.mulf %8, %75 : vector<1x16x16xf32>
    %77 = arith.addf %73, %76 : vector<1x16x16xf32>
    %c14 = arith.constant 14 : index
    %78 = memref.load %arg2[%c14] : memref<36xf32, #tpu.memory_space<smem>>
    %79 = vector.broadcast %78 : f32 to vector<1x16x16xf32>
    %80 = arith.mulf %9, %79 : vector<1x16x16xf32>
    %81 = arith.addf %77, %80 : vector<1x16x16xf32>
    %c15 = arith.constant 15 : index
    %82 = memref.load %arg2[%c15] : memref<36xf32, #tpu.memory_space<smem>>
    %83 = vector.broadcast %82 : f32 to vector<1x16x16xf32>
    %84 = arith.mulf %10, %83 : vector<1x16x16xf32>
    %85 = arith.addf %81, %84 : vector<1x16x16xf32>
    %c16 = arith.constant 16 : index
    %86 = memref.load %arg2[%c16] : memref<36xf32, #tpu.memory_space<smem>>
    %87 = vector.broadcast %86 : f32 to vector<1x16x16xf32>
    %88 = arith.mulf %11, %87 : vector<1x16x16xf32>
    %89 = arith.addf %85, %88 : vector<1x16x16xf32>
    %c17 = arith.constant 17 : index
    %90 = memref.load %arg2[%c17] : memref<36xf32, #tpu.memory_space<smem>>
    %91 = vector.broadcast %90 : f32 to vector<1x16x16xf32>
    %92 = arith.mulf %12, %91 : vector<1x16x16xf32>
    %93 = arith.addf %89, %92 : vector<1x16x16xf32>
    %c1_43 = arith.constant 1 : index
    %94 = memref.load %arg3[%c1_43] : memref<4xf32, #tpu.memory_space<smem>>
    %95 = vector.broadcast %94 : f32 to vector<1x16x16xf32>
    %96 = arith.addf %93, %95 : vector<1x16x16xf32>
    %cst_44 = arith.constant 0.000000e+00 : f32
    %97 = vector.broadcast %cst_44 : f32 to vector<1x16x16xf32>
    %98 = arith.cmpf oge, %96, %97 : vector<1x16x16xf32>
    %cst_45 = arith.constant 0.00999999977 : f32
    %99 = vector.broadcast %cst_45 : f32 to vector<1x16x16xf32>
    %100 = arith.mulf %99, %96 : vector<1x16x16xf32>
    %101 = arith.select %98, %96, %100 : vector<1x16x16xi1>, vector<1x16x16xf32>
    %c0_46 = arith.constant 0 : index
    %c1_47 = arith.constant 1 : index
    %c0_48 = arith.constant 0 : index
    %c0_49 = arith.constant 0 : index
    %102 = vector.load %arg14[%c0_46, %c1_47, %c0_48, %c0_49] : memref<1x4x16x16xf32, #tpu.memory_space<vmem>>, vector<1x1x16x16xf32>
    %103 = vector.shape_cast %102 : vector<1x1x16x16xf32> to vector<1x16x16xf32>
    %104 = vector.shape_cast %101 : vector<1x16x16xf32> to vector<1x1x16x16xf32>
    tpu.vector_store %arg14[%c0_46, %c1_47, %c0_48, %c0_49], %104 {strides = array<i32>} : memref<1x4x16x16xf32, #tpu.memory_space<vmem>>, vector<1x1x16x16xf32>,
    %c18 = arith.constant 18 : index
    %105 = memref.load %arg2[%c18] : memref<36xf32, #tpu.memory_space<smem>>
    %106 = vector.broadcast %105 : f32 to vector<1x16x16xf32>
    %107 = arith.mulf %4, %106 : vector<1x16x16xf32>
    %c19 = arith.constant 19 : index
    %108 = memref.load %arg2[%c19] : memref<36xf32, #tpu.memory_space<smem>>
    %109 = vector.broadcast %108 : f32 to vector<1x16x16xf32>
    %110 = arith.mulf %5, %109 : vector<1x16x16xf32>
    %111 = arith.addf %107, %110 : vector<1x16x16xf32>
    %c20 = arith.constant 20 : index
    %112 = memref.load %arg2[%c20] : memref<36xf32, #tpu.memory_space<smem>>
    %113 = vector.broadcast %112 : f32 to vector<1x16x16xf32>
    %114 = arith.mulf %6, %113 : vector<1x16x16xf32>
    %115 = arith.addf %111, %114 : vector<1x16x16xf32>
    %c21 = arith.constant 21 : index
    %116 = memref.load %arg2[%c21] : memref<36xf32, #tpu.memory_space<smem>>
    %117 = vector.broadcast %116 : f32 to vector<1x16x16xf32>
    %118 = arith.mulf %7, %117 : vector<1x16x16xf32>
    %119 = arith.addf %115, %118 : vector<1x16x16xf32>
    %c22 = arith.constant 22 : index
    %120 = memref.load %arg2[%c22] : memref<36xf32, #tpu.memory_space<smem>>
    %121 = vector.broadcast %120 : f32 to vector<1x16x16xf32>
    %122 = arith.mulf %8, %121 : vector<1x16x16xf32>
    %123 = arith.addf %119, %122 : vector<1x16x16xf32>
    %c23 = arith.constant 23 : index
    %124 = memref.load %arg2[%c23] : memref<36xf32, #tpu.memory_space<smem>>
    %125 = vector.broadcast %124 : f32 to vector<1x16x16xf32>
    %126 = arith.mulf %9, %125 : vector<1x16x16xf32>
    %127 = arith.addf %123, %126 : vector<1x16x16xf32>
    %c24 = arith.constant 24 : index
    %128 = memref.load %arg2[%c24] : memref<36xf32, #tpu.memory_space<smem>>
    %129 = vector.broadcast %128 : f32 to vector<1x16x16xf32>
    %130 = arith.mulf %10, %129 : vector<1x16x16xf32>
    %131 = arith.addf %127, %130 : vector<1x16x16xf32>
    %c25 = arith.constant 25 : index
    %132 = memref.load %arg2[%c25] : memref<36xf32, #tpu.memory_space<smem>>
    %133 = vector.broadcast %132 : f32 to vector<1x16x16xf32>
    %134 = arith.mulf %11, %133 : vector<1x16x16xf32>
    %135 = arith.addf %131, %134 : vector<1x16x16xf32>
    %c26 = arith.constant 26 : index
    %136 = memref.load %arg2[%c26] : memref<36xf32, #tpu.memory_space<smem>>
    %137 = vector.broadcast %136 : f32 to vector<1x16x16xf32>
    %138 = arith.mulf %12, %137 : vector<1x16x16xf32>
    %139 = arith.addf %135, %138 : vector<1x16x16xf32>
    %c2_50 = arith.constant 2 : index
    %140 = memref.load %arg3[%c2_50] : memref<4xf32, #tpu.memory_space<smem>>
    %141 = vector.broadcast %140 : f32 to vector<1x16x16xf32>
    %142 = arith.addf %139, %141 : vector<1x16x16xf32>
    %cst_51 = arith.constant 0.000000e+00 : f32
    %143 = vector.broadcast %cst_51 : f32 to vector<1x16x16xf32>
    %144 = arith.cmpf oge, %142, %143 : vector<1x16x16xf32>
    %cst_52 = arith.constant 0.00999999977 : f32
    %145 = vector.broadcast %cst_52 : f32 to vector<1x16x16xf32>
    %146 = arith.mulf %145, %142 : vector<1x16x16xf32>
    %147 = arith.select %144, %142, %146 : vector<1x16x16xi1>, vector<1x16x16xf32>
    %c0_53 = arith.constant 0 : index
    %c2_54 = arith.constant 2 : index
    %c0_55 = arith.constant 0 : index
    %c0_56 = arith.constant 0 : index
    %148 = vector.load %arg14[%c0_53, %c2_54, %c0_55, %c0_56] : memref<1x4x16x16xf32, #tpu.memory_space<vmem>>, vector<1x1x16x16xf32>
    %149 = vector.shape_cast %148 : vector<1x1x16x16xf32> to vector<1x16x16xf32>
    %150 = vector.shape_cast %147 : vector<1x16x16xf32> to vector<1x1x16x16xf32>
    tpu.vector_store %arg14[%c0_53, %c2_54, %c0_55, %c0_56], %150 {strides = array<i32>} : memref<1x4x16x16xf32, #tpu.memory_space<vmem>>, vector<1x1x16x16xf32>,
    %c27 = arith.constant 27 : index
    %151 = memref.load %arg2[%c27] : memref<36xf32, #tpu.memory_space<smem>>
    %152 = vector.broadcast %151 : f32 to vector<1x16x16xf32>
    %153 = arith.mulf %4, %152 : vector<1x16x16xf32>
    %c28 = arith.constant 28 : index
    %154 = memref.load %arg2[%c28] : memref<36xf32, #tpu.memory_space<smem>>
    %155 = vector.broadcast %154 : f32 to vector<1x16x16xf32>
    %156 = arith.mulf %5, %155 : vector<1x16x16xf32>
    %157 = arith.addf %153, %156 : vector<1x16x16xf32>
    %c29 = arith.constant 29 : index
    %158 = memref.load %arg2[%c29] : memref<36xf32, #tpu.memory_space<smem>>
    %159 = vector.broadcast %158 : f32 to vector<1x16x16xf32>
    %160 = arith.mulf %6, %159 : vector<1x16x16xf32>
    %161 = arith.addf %157, %160 : vector<1x16x16xf32>
    %c30 = arith.constant 30 : index
    %162 = memref.load %arg2[%c30] : memref<36xf32, #tpu.memory_space<smem>>
    %163 = vector.broadcast %162 : f32 to vector<1x16x16xf32>
    %164 = arith.mulf %7, %163 : vector<1x16x16xf32>
    %165 = arith.addf %161, %164 : vector<1x16x16xf32>
    %c31 = arith.constant 31 : index
    %166 = memref.load %arg2[%c31] : memref<36xf32, #tpu.memory_space<smem>>
    %167 = vector.broadcast %166 : f32 to vector<1x16x16xf32>
    %168 = arith.mulf %8, %167 : vector<1x16x16xf32>
    %169 = arith.addf %165, %168 : vector<1x16x16xf32>
    %c32 = arith.constant 32 : index
    %170 = memref.load %arg2[%c32] : memref<36xf32, #tpu.memory_space<smem>>
    %171 = vector.broadcast %170 : f32 to vector<1x16x16xf32>
    %172 = arith.mulf %9, %171 : vector<1x16x16xf32>
    %173 = arith.addf %169, %172 : vector<1x16x16xf32>
    %c33 = arith.constant 33 : index
    %174 = memref.load %arg2[%c33] : memref<36xf32, #tpu.memory_space<smem>>
    %175 = vector.broadcast %174 : f32 to vector<1x16x16xf32>
    %176 = arith.mulf %10, %175 : vector<1x16x16xf32>
    %177 = arith.addf %173, %176 : vector<1x16x16xf32>
    %c34 = arith.constant 34 : index
    %178 = memref.load %arg2[%c34] : memref<36xf32, #tpu.memory_space<smem>>
    %179 = vector.broadcast %178 : f32 to vector<1x16x16xf32>
    %180 = arith.mulf %11, %179 : vector<1x16x16xf32>
    %181 = arith.addf %177, %180 : vector<1x16x16xf32>
    %c35 = arith.constant 35 : index
    %182 = memref.load %arg2[%c35] : memref<36xf32, #tpu.memory_space<smem>>
    %183 = vector.broadcast %182 : f32 to vector<1x16x16xf32>
    %184 = arith.mulf %12, %183 : vector<1x16x16xf32>
    %185 = arith.addf %181, %184 : vector<1x16x16xf32>
    %c3_57 = arith.constant 3 : index
    %186 = memref.load %arg3[%c3_57] : memref<4xf32, #tpu.memory_space<smem>>
    %187 = vector.broadcast %186 : f32 to vector<1x16x16xf32>
    %188 = arith.addf %185, %187 : vector<1x16x16xf32>
    %cst_58 = arith.constant 0.000000e+00 : f32
    %189 = vector.broadcast %cst_58 : f32 to vector<1x16x16xf32>
    %190 = arith.cmpf oge, %188, %189 : vector<1x16x16xf32>
    %cst_59 = arith.constant 0.00999999977 : f32
    %191 = vector.broadcast %cst_59 : f32 to vector<1x16x16xf32>
    %192 = arith.mulf %191, %188 : vector<1x16x16xf32>
    %193 = arith.select %190, %188, %192 : vector<1x16x16xi1>, vector<1x16x16xf32>
    %c0_60 = arith.constant 0 : index
    %c3_61 = arith.constant 3 : index
    %c0_62 = arith.constant 0 : index
    %c0_63 = arith.constant 0 : index
    %194 = vector.load %arg14[%c0_60, %c3_61, %c0_62, %c0_63] : memref<1x4x16x16xf32, #tpu.memory_space<vmem>>, vector<1x1x16x16xf32>
    %195 = vector.shape_cast %194 : vector<1x1x16x16xf32> to vector<1x16x16xf32>
    %196 = vector.shape_cast %193 : vector<1x16x16xf32> to vector<1x1x16x16xf32>
    tpu.vector_store %arg14[%c0_60, %c3_61, %c0_62, %c0_63], %196 {strides = array<i32>} : memref<1x4x16x16xf32, #tpu.memory_space<vmem>>, vector<1x1x16x16xf32>,
    %cst_64 = arith.constant 0.000000e+00 : f32
    %197 = vector.broadcast %cst_64 : f32 to vector<1x4x10x10xf32>
    %c0_65 = arith.constant 0 : index
    %c0_66 = arith.constant 0 : index
    %c0_67 = arith.constant 0 : index
    %c0_68 = arith.constant 0 : index
    %198 = vector.load %arg16[%c0_65, %c0_66, %c0_67, %c0_68] : memref<1x4x10x10xf32, #tpu.memory_space<vmem>>, vector<1x4x10x10xf32>
    tpu.vector_store %arg16[%c0_65, %c0_66, %c0_67, %c0_68], %197 {strides = array<i32>} : memref<1x4x10x10xf32, #tpu.memory_space<vmem>>, vector<1x4x10x10xf32>,
    %c0_69 = arith.constant 0 : index
    %c0_70 = arith.constant 0 : index
    %c0_71 = arith.constant 0 : index
    %c0_72 = arith.constant 0 : index
    %199 = vector.load %arg14[%c0_69, %c0_70, %c0_71, %c0_72] : memref<1x4x16x16xf32, #tpu.memory_space<vmem>>, vector<1x4x2x16xf32>
    %cst_73 = arith.constant dense<0xFF800000> : vector<1x4x16xf32>
    %200 = vector.multi_reduction <maximumf>, %199, %cst_73 [2] : vector<1x4x2x16xf32> to vector<1x4x16xf32>
    %201 = vector.shape_cast %200 : vector<1x4x16xf32> to vector<1x4x1x16xf32>
    %c0_74 = arith.constant 0 : index
    %c0_75 = arith.constant 0 : index
    %c0_76 = arith.constant 0 : index
    %c0_77 = arith.constant 0 : index
    %202 = vector.load %arg15[%c0_74, %c0_75, %c0_76, %c0_77] : memref<1x4x8x16xf32, #tpu.memory_space<vmem>>, vector<1x4x1x16xf32>
    tpu.vector_store %arg15[%c0_74, %c0_75, %c0_76, %c0_77], %201 {strides = array<i32>} : memref<1x4x8x16xf32, #tpu.memory_space<vmem>>, vector<1x4x1x16xf32>,
    %c0_78 = arith.constant 0 : index
    %c0_79 = arith.constant 0 : index
    %c2_80 = arith.constant 2 : index
    %c0_81 = arith.constant 0 : index
    %203 = vector.load %arg14[%c0_78, %c0_79, %c2_80, %c0_81] : memref<1x4x16x16xf32, #tpu.memory_space<vmem>>, vector<1x4x2x16xf32>
    %cst_82 = arith.constant dense<0xFF800000> : vector<1x4x16xf32>
    %204 = vector.multi_reduction <maximumf>, %203, %cst_82 [2] : vector<1x4x2x16xf32> to vector<1x4x16xf32>
    %205 = vector.shape_cast %204 : vector<1x4x16xf32> to vector<1x4x1x16xf32>
    %c0_83 = arith.constant 0 : index
    %c0_84 = arith.constant 0 : index
    %c1_85 = arith.constant 1 : index
    %c0_86 = arith.constant 0 : index
    %206 = vector.load %arg15[%c0_83, %c0_84, %c1_85, %c0_86] : memref<1x4x8x16xf32, #tpu.memory_space<vmem>>, vector<1x4x1x16xf32>
    tpu.vector_store %arg15[%c0_83, %c0_84, %c1_85, %c0_86], %205 {strides = array<i32>} : memref<1x4x8x16xf32, #tpu.memory_space<vmem>>, vector<1x4x1x16xf32>,
    %c0_87 = arith.constant 0 : index
    %c0_88 = arith.constant 0 : index
    %c4_89 = arith.constant 4 : index
    %c0_90 = arith.constant 0 : index
    %207 = vector.load %arg14[%c0_87, %c0_88, %c4_89, %c0_90] : memref<1x4x16x16xf32, #tpu.memory_space<vmem>>, vector<1x4x2x16xf32>
    %cst_91 = arith.constant dense<0xFF800000> : vector<1x4x16xf32>
    %208 = vector.multi_reduction <maximumf>, %207, %cst_91 [2] : vector<1x4x2x16xf32> to vector<1x4x16xf32>
    %209 = vector.shape_cast %208 : vector<1x4x16xf32> to vector<1x4x1x16xf32>
    %c0_92 = arith.constant 0 : index
    %c0_93 = arith.constant 0 : index
    %c2_94 = arith.constant 2 : index
    %c0_95 = arith.constant 0 : index
    %210 = vector.load %arg15[%c0_92, %c0_93, %c2_94, %c0_95] : memref<1x4x8x16xf32, #tpu.memory_space<vmem>>, vector<1x4x1x16xf32>
    tpu.vector_store %arg15[%c0_92, %c0_93, %c2_94, %c0_95], %209 {strides = array<i32>} : memref<1x4x8x16xf32, #tpu.memory_space<vmem>>, vector<1x4x1x16xf32>,
    %c0_96 = arith.constant 0 : index
    %c0_97 = arith.constant 0 : index
    %c6_98 = arith.constant 6 : index
    %c0_99 = arith.constant 0 : index
    %211 = vector.load %arg14[%c0_96, %c0_97, %c6_98, %c0_99] : memref<1x4x16x16xf32, #tpu.memory_space<vmem>>, vector<1x4x2x16xf32>
    %cst_100 = arith.constant dense<0xFF800000> : vector<1x4x16xf32>
    %212 = vector.multi_reduction <maximumf>, %211, %cst_100 [2] : vector<1x4x2x16xf32> to vector<1x4x16xf32>
    %213 = vector.shape_cast %212 : vector<1x4x16xf32> to vector<1x4x1x16xf32>
    %c0_101 = arith.constant 0 : index
    %c0_102 = arith.constant 0 : index
    %c3_103 = arith.constant 3 : index
    %c0_104 = arith.constant 0 : index
    %214 = vector.load %arg15[%c0_101, %c0_102, %c3_103, %c0_104] : memref<1x4x8x16xf32, #tpu.memory_space<vmem>>, vector<1x4x1x16xf32>
    tpu.vector_store %arg15[%c0_101, %c0_102, %c3_103, %c0_104], %213 {strides = array<i32>} : memref<1x4x8x16xf32, #tpu.memory_space<vmem>>, vector<1x4x1x16xf32>,
    %c0_105 = arith.constant 0 : index
    %c0_106 = arith.constant 0 : index
    %c8_107 = arith.constant 8 : index
    %c0_108 = arith.constant 0 : index
    %215 = vector.load %arg14[%c0_105, %c0_106, %c8_107, %c0_108] : memref<1x4x16x16xf32, #tpu.memory_space<vmem>>, vector<1x4x2x16xf32>
    %cst_109 = arith.constant dense<0xFF800000> : vector<1x4x16xf32>
    %216 = vector.multi_reduction <maximumf>, %215, %cst_109 [2] : vector<1x4x2x16xf32> to vector<1x4x16xf32>
    %217 = vector.shape_cast %216 : vector<1x4x16xf32> to vector<1x4x1x16xf32>
    %c0_110 = arith.constant 0 : index
    %c0_111 = arith.constant 0 : index
    %c4_112 = arith.constant 4 : index
    %c0_113 = arith.constant 0 : index
    %218 = vector.load %arg15[%c0_110, %c0_111, %c4_112, %c0_113] : memref<1x4x8x16xf32, #tpu.memory_space<vmem>>, vector<1x4x1x16xf32>
    tpu.vector_store %arg15[%c0_110, %c0_111, %c4_112, %c0_113], %217 {strides = array<i32>} : memref<1x4x8x16xf32, #tpu.memory_space<vmem>>, vector<1x4x1x16xf32>,
    %c0_114 = arith.constant 0 : index
    %c0_115 = arith.constant 0 : index
    %c10_116 = arith.constant 10 : index
    %c0_117 = arith.constant 0 : index
    %219 = vector.load %arg14[%c0_114, %c0_115, %c10_116, %c0_117] : memref<1x4x16x16xf32, #tpu.memory_space<vmem>>, vector<1x4x2x16xf32>
    %cst_118 = arith.constant dense<0xFF800000> : vector<1x4x16xf32>
    %220 = vector.multi_reduction <maximumf>, %219, %cst_118 [2] : vector<1x4x2x16xf32> to vector<1x4x16xf32>
    %221 = vector.shape_cast %220 : vector<1x4x16xf32> to vector<1x4x1x16xf32>
    %c0_119 = arith.constant 0 : index
    %c0_120 = arith.constant 0 : index
    %c5_121 = arith.constant 5 : index
    %c0_122 = arith.constant 0 : index
    %222 = vector.load %arg15[%c0_119, %c0_120, %c5_121, %c0_122] : memref<1x4x8x16xf32, #tpu.memory_space<vmem>>, vector<1x4x1x16xf32>
    tpu.vector_store %arg15[%c0_119, %c0_120, %c5_121, %c0_122], %221 {strides = array<i32>} : memref<1x4x8x16xf32, #tpu.memory_space<vmem>>, vector<1x4x1x16xf32>,
    %c0_123 = arith.constant 0 : index
    %c0_124 = arith.constant 0 : index
    %c12_125 = arith.constant 12 : index
    %c0_126 = arith.constant 0 : index
    %223 = vector.load %arg14[%c0_123, %c0_124, %c12_125, %c0_126] : memref<1x4x16x16xf32, #tpu.memory_space<vmem>>, vector<1x4x2x16xf32>
    %cst_127 = arith.constant dense<0xFF800000> : vector<1x4x16xf32>
    %224 = vector.multi_reduction <maximumf>, %223, %cst_127 [2] : vector<1x4x2x16xf32> to vector<1x4x16xf32>
    %225 = vector.shape_cast %224 : vector<1x4x16xf32> to vector<1x4x1x16xf32>
    %c0_128 = arith.constant 0 : index
    %c0_129 = arith.constant 0 : index
    %c6_130 = arith.constant 6 : index
    %c0_131 = arith.constant 0 : index
    %226 = vector.load %arg15[%c0_128, %c0_129, %c6_130, %c0_131] : memref<1x4x8x16xf32, #tpu.memory_space<vmem>>, vector<1x4x1x16xf32>
    tpu.vector_store %arg15[%c0_128, %c0_129, %c6_130, %c0_131], %225 {strides = array<i32>} : memref<1x4x8x16xf32, #tpu.memory_space<vmem>>, vector<1x4x1x16xf32>,
    %c0_132 = arith.constant 0 : index
    %c0_133 = arith.constant 0 : index
    %c14_134 = arith.constant 14 : index
    %c0_135 = arith.constant 0 : index
    %227 = vector.load %arg14[%c0_132, %c0_133, %c14_134, %c0_135] : memref<1x4x16x16xf32, #tpu.memory_space<vmem>>, vector<1x4x2x16xf32>
    %cst_136 = arith.constant dense<0xFF800000> : vector<1x4x16xf32>
    %228 = vector.multi_reduction <maximumf>, %227, %cst_136 [2] : vector<1x4x2x16xf32> to vector<1x4x16xf32>
    %229 = vector.shape_cast %228 : vector<1x4x16xf32> to vector<1x4x1x16xf32>
    %c0_137 = arith.constant 0 : index
    %c0_138 = arith.constant 0 : index
    %c7_139 = arith.constant 7 : index
    %c0_140 = arith.constant 0 : index
    %230 = vector.load %arg15[%c0_137, %c0_138, %c7_139, %c0_140] : memref<1x4x8x16xf32, #tpu.memory_space<vmem>>, vector<1x4x1x16xf32>
    tpu.vector_store %arg15[%c0_137, %c0_138, %c7_139, %c0_140], %229 {strides = array<i32>} : memref<1x4x8x16xf32, #tpu.memory_space<vmem>>, vector<1x4x1x16xf32>,
    %c0_141 = arith.constant 0 : index
    %c0_142 = arith.constant 0 : index
    %c0_143 = arith.constant 0 : index
    %c0_144 = arith.constant 0 : index
    %231 = vector.load %arg15[%c0_141, %c0_142, %c0_143, %c0_144] : memref<1x4x8x16xf32, #tpu.memory_space<vmem>>, vector<1x4x8x2xf32>
    %cst_145 = arith.constant dense<0xFF800000> : vector<1x4x8xf32>
    %232 = vector.multi_reduction <maximumf>, %231, %cst_145 [3] : vector<1x4x8x2xf32> to vector<1x4x8xf32>
    %233 = vector.shape_cast %232 : vector<1x4x8xf32> to vector<1x4x8x1xf32>
    %c0_146 = arith.constant 0 : index
    %c0_147 = arith.constant 0 : index
    %c1_148 = arith.constant 1 : index
    %c1_149 = arith.constant 1 : index
    %234 = vector.load %arg16[%c0_146, %c0_147, %c1_148, %c1_149] : memref<1x4x10x10xf32, #tpu.memory_space<vmem>>, vector<1x4x8x1xf32>
    tpu.vector_store %arg16[%c0_146, %c0_147, %c1_148, %c1_149], %233 {strides = array<i32>} : memref<1x4x10x10xf32, #tpu.memory_space<vmem>>, vector<1x4x8x1xf32>,
    %c0_150 = arith.constant 0 : index
    %c0_151 = arith.constant 0 : index
    %c0_152 = arith.constant 0 : index
    %c2_153 = arith.constant 2 : index
    %235 = vector.load %arg15[%c0_150, %c0_151, %c0_152, %c2_153] : memref<1x4x8x16xf32, #tpu.memory_space<vmem>>, vector<1x4x8x2xf32>
    %cst_154 = arith.constant dense<0xFF800000> : vector<1x4x8xf32>
    %236 = vector.multi_reduction <maximumf>, %235, %cst_154 [3] : vector<1x4x8x2xf32> to vector<1x4x8xf32>
    %237 = vector.shape_cast %236 : vector<1x4x8xf32> to vector<1x4x8x1xf32>
    %c0_155 = arith.constant 0 : index
    %c0_156 = arith.constant 0 : index
    %c1_157 = arith.constant 1 : index
    %c2_158 = arith.constant 2 : index
    %238 = vector.load %arg16[%c0_155, %c0_156, %c1_157, %c2_158] : memref<1x4x10x10xf32, #tpu.memory_space<vmem>>, vector<1x4x8x1xf32>
    tpu.vector_store %arg16[%c0_155, %c0_156, %c1_157, %c2_158], %237 {strides = array<i32>} : memref<1x4x10x10xf32, #tpu.memory_space<vmem>>, vector<1x4x8x1xf32>,
    %c0_159 = arith.constant 0 : index
    %c0_160 = arith.constant 0 : index
    %c0_161 = arith.constant 0 : index
    %c4_162 = arith.constant 4 : index
    %239 = vector.load %arg15[%c0_159, %c0_160, %c0_161, %c4_162] : memref<1x4x8x16xf32, #tpu.memory_space<vmem>>, vector<1x4x8x2xf32>
    %cst_163 = arith.constant dense<0xFF800000> : vector<1x4x8xf32>
    %240 = vector.multi_reduction <maximumf>, %239, %cst_163 [3] : vector<1x4x8x2xf32> to vector<1x4x8xf32>
    %241 = vector.shape_cast %240 : vector<1x4x8xf32> to vector<1x4x8x1xf32>
    %c0_164 = arith.constant 0 : index
    %c0_165 = arith.constant 0 : index
    %c1_166 = arith.constant 1 : index
    %c3_167 = arith.constant 3 : index
    %242 = vector.load %arg16[%c0_164, %c0_165, %c1_166, %c3_167] : memref<1x4x10x10xf32, #tpu.memory_space<vmem>>, vector<1x4x8x1xf32>
    tpu.vector_store %arg16[%c0_164, %c0_165, %c1_166, %c3_167], %241 {strides = array<i32>} : memref<1x4x10x10xf32, #tpu.memory_space<vmem>>, vector<1x4x8x1xf32>,
    %c0_168 = arith.constant 0 : index
    %c0_169 = arith.constant 0 : index
    %c0_170 = arith.constant 0 : index
    %c6_171 = arith.constant 6 : index
    %243 = vector.load %arg15[%c0_168, %c0_169, %c0_170, %c6_171] : memref<1x4x8x16xf32, #tpu.memory_space<vmem>>, vector<1x4x8x2xf32>
    %cst_172 = arith.constant dense<0xFF800000> : vector<1x4x8xf32>
    %244 = vector.multi_reduction <maximumf>, %243, %cst_172 [3] : vector<1x4x8x2xf32> to vector<1x4x8xf32>
    %245 = vector.shape_cast %244 : vector<1x4x8xf32> to vector<1x4x8x1xf32>
    %c0_173 = arith.constant 0 : index
    %c0_174 = arith.constant 0 : index
    %c1_175 = arith.constant 1 : index
    %c4_176 = arith.constant 4 : index
    %246 = vector.load %arg16[%c0_173, %c0_174, %c1_175, %c4_176] : memref<1x4x10x10xf32, #tpu.memory_space<vmem>>, vector<1x4x8x1xf32>
    tpu.vector_store %arg16[%c0_173, %c0_174, %c1_175, %c4_176], %245 {strides = array<i32>} : memref<1x4x10x10xf32, #tpu.memory_space<vmem>>, vector<1x4x8x1xf32>,
    %c0_177 = arith.constant 0 : index
    %c0_178 = arith.constant 0 : index
    %c0_179 = arith.constant 0 : index
    %c8_180 = arith.constant 8 : index
    %247 = vector.load %arg15[%c0_177, %c0_178, %c0_179, %c8_180] : memref<1x4x8x16xf32, #tpu.memory_space<vmem>>, vector<1x4x8x2xf32>
    %cst_181 = arith.constant dense<0xFF800000> : vector<1x4x8xf32>
    %248 = vector.multi_reduction <maximumf>, %247, %cst_181 [3] : vector<1x4x8x2xf32> to vector<1x4x8xf32>
    %249 = vector.shape_cast %248 : vector<1x4x8xf32> to vector<1x4x8x1xf32>
    %c0_182 = arith.constant 0 : index
    %c0_183 = arith.constant 0 : index
    %c1_184 = arith.constant 1 : index
    %c5_185 = arith.constant 5 : index
    %250 = vector.load %arg16[%c0_182, %c0_183, %c1_184, %c5_185] : memref<1x4x10x10xf32, #tpu.memory_space<vmem>>, vector<1x4x8x1xf32>
    tpu.vector_store %arg16[%c0_182, %c0_183, %c1_184, %c5_185], %249 {strides = array<i32>} : memref<1x4x10x10xf32, #tpu.memory_space<vmem>>, vector<1x4x8x1xf32>,
    %c0_186 = arith.constant 0 : index
    %c0_187 = arith.constant 0 : index
    %c0_188 = arith.constant 0 : index
    %c10_189 = arith.constant 10 : index
    %251 = vector.load %arg15[%c0_186, %c0_187, %c0_188, %c10_189] : memref<1x4x8x16xf32, #tpu.memory_space<vmem>>, vector<1x4x8x2xf32>
    %cst_190 = arith.constant dense<0xFF800000> : vector<1x4x8xf32>
    %252 = vector.multi_reduction <maximumf>, %251, %cst_190 [3] : vector<1x4x8x2xf32> to vector<1x4x8xf32>
    %253 = vector.shape_cast %252 : vector<1x4x8xf32> to vector<1x4x8x1xf32>
    %c0_191 = arith.constant 0 : index
    %c0_192 = arith.constant 0 : index
    %c1_193 = arith.constant 1 : index
    %c6_194 = arith.constant 6 : index
    %254 = vector.load %arg16[%c0_191, %c0_192, %c1_193, %c6_194] : memref<1x4x10x10xf32, #tpu.memory_space<vmem>>, vector<1x4x8x1xf32>
    tpu.vector_store %arg16[%c0_191, %c0_192, %c1_193, %c6_194], %253 {strides = array<i32>} : memref<1x4x10x10xf32, #tpu.memory_space<vmem>>, vector<1x4x8x1xf32>,
    %c0_195 = arith.constant 0 : index
    %c0_196 = arith.constant 0 : index
    %c0_197 = arith.constant 0 : index
    %c12_198 = arith.constant 12 : index
    %255 = vector.load %arg15[%c0_195, %c0_196, %c0_197, %c12_198] : memref<1x4x8x16xf32, #tpu.memory_space<vmem>>, vector<1x4x8x2xf32>
    %cst_199 = arith.constant dense<0xFF800000> : vector<1x4x8xf32>
    %256 = vector.multi_reduction <maximumf>, %255, %cst_199 [3] : vector<1x4x8x2xf32> to vector<1x4x8xf32>
    %257 = vector.shape_cast %256 : vector<1x4x8xf32> to vector<1x4x8x1xf32>
    %c0_200 = arith.constant 0 : index
    %c0_201 = arith.constant 0 : index
    %c1_202 = arith.constant 1 : index
    %c7_203 = arith.constant 7 : index
    %258 = vector.load %arg16[%c0_200, %c0_201, %c1_202, %c7_203] : memref<1x4x10x10xf32, #tpu.memory_space<vmem>>, vector<1x4x8x1xf32>
    tpu.vector_store %arg16[%c0_200, %c0_201, %c1_202, %c7_203], %257 {strides = array<i32>} : memref<1x4x10x10xf32, #tpu.memory_space<vmem>>, vector<1x4x8x1xf32>,
    %c0_204 = arith.constant 0 : index
    %c0_205 = arith.constant 0 : index
    %c0_206 = arith.constant 0 : index
    %c14_207 = arith.constant 14 : index
    %259 = vector.load %arg15[%c0_204, %c0_205, %c0_206, %c14_207] : memref<1x4x8x16xf32, #tpu.memory_space<vmem>>, vector<1x4x8x2xf32>
    %cst_208 = arith.constant dense<0xFF800000> : vector<1x4x8xf32>
    %260 = vector.multi_reduction <maximumf>, %259, %cst_208 [3] : vector<1x4x8x2xf32> to vector<1x4x8xf32>
    %261 = vector.shape_cast %260 : vector<1x4x8xf32> to vector<1x4x8x1xf32>
    %c0_209 = arith.constant 0 : index
    %c0_210 = arith.constant 0 : index
    %c1_211 = arith.constant 1 : index
    %c8_212 = arith.constant 8 : index
    %262 = vector.load %arg16[%c0_209, %c0_210, %c1_211, %c8_212] : memref<1x4x10x10xf32, #tpu.memory_space<vmem>>, vector<1x4x8x1xf32>
    tpu.vector_store %arg16[%c0_209, %c0_210, %c1_211, %c8_212], %261 {strides = array<i32>} : memref<1x4x10x10xf32, #tpu.memory_space<vmem>>, vector<1x4x8x1xf32>,
    %c0_213 = arith.constant 0 : index
    %c0_214 = arith.constant 0 : index
    %c0_215 = arith.constant 0 : index
    %c0_216 = arith.constant 0 : index
    %263 = vector.load %arg16[%c0_213, %c0_214, %c0_215, %c0_216] : memref<1x4x10x10xf32, #tpu.memory_space<vmem>>, vector<1x1x8x8xf32>
    %264 = vector.shape_cast %263 : vector<1x1x8x8xf32> to vector<1x8x8xf32>
    %c0_217 = arith.constant 0 : index
    %c0_218 = arith.constant 0 : index
    %c0_219 = arith.constant 0 : index
    %c1_220 = arith.constant 1 : index
    %265 = vector.load %arg16[%c0_217, %c0_218, %c0_219, %c1_220] : memref<1x4x10x10xf32, #tpu.memory_space<vmem>>, vector<1x1x8x8xf32>
    %266 = vector.shape_cast %265 : vector<1x1x8x8xf32> to vector<1x8x8xf32>
    %c0_221 = arith.constant 0 : index
    %c0_222 = arith.constant 0 : index
    %c0_223 = arith.constant 0 : index
    %c2_224 = arith.constant 2 : index
    %267 = vector.load %arg16[%c0_221, %c0_222, %c0_223, %c2_224] : memref<1x4x10x10xf32, #tpu.memory_space<vmem>>, vector<1x1x8x8xf32>
    %268 = vector.shape_cast %267 : vector<1x1x8x8xf32> to vector<1x8x8xf32>
    %c0_225 = arith.constant 0 : index
    %c0_226 = arith.constant 0 : index
    %c1_227 = arith.constant 1 : index
    %c0_228 = arith.constant 0 : index
    %269 = vector.load %arg16[%c0_225, %c0_226, %c1_227, %c0_228] : memref<1x4x10x10xf32, #tpu.memory_space<vmem>>, vector<1x1x8x8xf32>
    %270 = vector.shape_cast %269 : vector<1x1x8x8xf32> to vector<1x8x8xf32>
    %c0_229 = arith.constant 0 : index
    %c0_230 = arith.constant 0 : index
    %c1_231 = arith.constant 1 : index
    %c1_232 = arith.constant 1 : index
    %271 = vector.load %arg16[%c0_229, %c0_230, %c1_231, %c1_232] : memref<1x4x10x10xf32, #tpu.memory_space<vmem>>, vector<1x1x8x8xf32>
    %272 = vector.shape_cast %271 : vector<1x1x8x8xf32> to vector<1x8x8xf32>
    %c0_233 = arith.constant 0 : index
    %c0_234 = arith.constant 0 : index
    %c1_235 = arith.constant 1 : index
    %c2_236 = arith.constant 2 : index
    %273 = vector.load %arg16[%c0_233, %c0_234, %c1_235, %c2_236] : memref<1x4x10x10xf32, #tpu.memory_space<vmem>>, vector<1x1x8x8xf32>
    %274 = vector.shape_cast %273 : vector<1x1x8x8xf32> to vector<1x8x8xf32>
    %c0_237 = arith.constant 0 : index
    %c0_238 = arith.constant 0 : index
    %c2_239 = arith.constant 2 : index
    %c0_240 = arith.constant 0 : index
    %275 = vector.load %arg16[%c0_237, %c0_238, %c2_239, %c0_240] : memref<1x4x10x10xf32, #tpu.memory_space<vmem>>, vector<1x1x8x8xf32>
    %276 = vector.shape_cast %275 : vector<1x1x8x8xf32> to vector<1x8x8xf32>
    %c0_241 = arith.constant 0 : index
    %c0_242 = arith.constant 0 : index
    %c2_243 = arith.constant 2 : index
    %c1_244 = arith.constant 1 : index
    %277 = vector.load %arg16[%c0_241, %c0_242, %c2_243, %c1_244] : memref<1x4x10x10xf32, #tpu.memory_space<vmem>>, vector<1x1x8x8xf32>
    %278 = vector.shape_cast %277 : vector<1x1x8x8xf32> to vector<1x8x8xf32>
    %c0_245 = arith.constant 0 : index
    %c0_246 = arith.constant 0 : index
    %c2_247 = arith.constant 2 : index
    %c2_248 = arith.constant 2 : index
    %279 = vector.load %arg16[%c0_245, %c0_246, %c2_247, %c2_248] : memref<1x4x10x10xf32, #tpu.memory_space<vmem>>, vector<1x1x8x8xf32>
    %280 = vector.shape_cast %279 : vector<1x1x8x8xf32> to vector<1x8x8xf32>
    %c0_249 = arith.constant 0 : index
    %c1_250 = arith.constant 1 : index
    %c0_251 = arith.constant 0 : index
    %c0_252 = arith.constant 0 : index
    %281 = vector.load %arg16[%c0_249, %c1_250, %c0_251, %c0_252] : memref<1x4x10x10xf32, #tpu.memory_space<vmem>>, vector<1x1x8x8xf32>
    %282 = vector.shape_cast %281 : vector<1x1x8x8xf32> to vector<1x8x8xf32>
    %c0_253 = arith.constant 0 : index
    %c1_254 = arith.constant 1 : index
    %c0_255 = arith.constant 0 : index
    %c1_256 = arith.constant 1 : index
    %283 = vector.load %arg16[%c0_253, %c1_254, %c0_255, %c1_256] : memref<1x4x10x10xf32, #tpu.memory_space<vmem>>, vector<1x1x8x8xf32>
    %284 = vector.shape_cast %283 : vector<1x1x8x8xf32> to vector<1x8x8xf32>
    %c0_257 = arith.constant 0 : index
    %c1_258 = arith.constant 1 : index
    %c0_259 = arith.constant 0 : index
    %c2_260 = arith.constant 2 : index
    %285 = vector.load %arg16[%c0_257, %c1_258, %c0_259, %c2_260] : memref<1x4x10x10xf32, #tpu.memory_space<vmem>>, vector<1x1x8x8xf32>
    %286 = vector.shape_cast %285 : vector<1x1x8x8xf32> to vector<1x8x8xf32>
    %c0_261 = arith.constant 0 : index
    %c1_262 = arith.constant 1 : index
    %c1_263 = arith.constant 1 : index
    %c0_264 = arith.constant 0 : index
    %287 = vector.load %arg16[%c0_261, %c1_262, %c1_263, %c0_264] : memref<1x4x10x10xf32, #tpu.memory_space<vmem>>, vector<1x1x8x8xf32>
    %288 = vector.shape_cast %287 : vector<1x1x8x8xf32> to vector<1x8x8xf32>
    %c0_265 = arith.constant 0 : index
    %c1_266 = arith.constant 1 : index
    %c1_267 = arith.constant 1 : index
    %c1_268 = arith.constant 1 : index
    %289 = vector.load %arg16[%c0_265, %c1_266, %c1_267, %c1_268] : memref<1x4x10x10xf32, #tpu.memory_space<vmem>>, vector<1x1x8x8xf32>
    %290 = vector.shape_cast %289 : vector<1x1x8x8xf32> to vector<1x8x8xf32>
    %c0_269 = arith.constant 0 : index
    %c1_270 = arith.constant 1 : index
    %c1_271 = arith.constant 1 : index
    %c2_272 = arith.constant 2 : index
    %291 = vector.load %arg16[%c0_269, %c1_270, %c1_271, %c2_272] : memref<1x4x10x10xf32, #tpu.memory_space<vmem>>, vector<1x1x8x8xf32>
    %292 = vector.shape_cast %291 : vector<1x1x8x8xf32> to vector<1x8x8xf32>
    %c0_273 = arith.constant 0 : index
    %c1_274 = arith.constant 1 : index
    %c2_275 = arith.constant 2 : index
    %c0_276 = arith.constant 0 : index
    %293 = vector.load %arg16[%c0_273, %c1_274, %c2_275, %c0_276] : memref<1x4x10x10xf32, #tpu.memory_space<vmem>>, vector<1x1x8x8xf32>
    %294 = vector.shape_cast %293 : vector<1x1x8x8xf32> to vector<1x8x8xf32>
    %c0_277 = arith.constant 0 : index
    %c1_278 = arith.constant 1 : index
    %c2_279 = arith.constant 2 : index
    %c1_280 = arith.constant 1 : index
    %295 = vector.load %arg16[%c0_277, %c1_278, %c2_279, %c1_280] : memref<1x4x10x10xf32, #tpu.memory_space<vmem>>, vector<1x1x8x8xf32>
    %296 = vector.shape_cast %295 : vector<1x1x8x8xf32> to vector<1x8x8xf32>
    %c0_281 = arith.constant 0 : index
    %c1_282 = arith.constant 1 : index
    %c2_283 = arith.constant 2 : index
    %c2_284 = arith.constant 2 : index
    %297 = vector.load %arg16[%c0_281, %c1_282, %c2_283, %c2_284] : memref<1x4x10x10xf32, #tpu.memory_space<vmem>>, vector<1x1x8x8xf32>
    %298 = vector.shape_cast %297 : vector<1x1x8x8xf32> to vector<1x8x8xf32>
    %c0_285 = arith.constant 0 : index
    %c2_286 = arith.constant 2 : index
    %c0_287 = arith.constant 0 : index
    %c0_288 = arith.constant 0 : index
    %299 = vector.load %arg16[%c0_285, %c2_286, %c0_287, %c0_288] : memref<1x4x10x10xf32, #tpu.memory_space<vmem>>, vector<1x1x8x8xf32>
    %300 = vector.shape_cast %299 : vector<1x1x8x8xf32> to vector<1x8x8xf32>
    %c0_289 = arith.constant 0 : index
    %c2_290 = arith.constant 2 : index
    %c0_291 = arith.constant 0 : index
    %c1_292 = arith.constant 1 : index
    %301 = vector.load %arg16[%c0_289, %c2_290, %c0_291, %c1_292] : memref<1x4x10x10xf32, #tpu.memory_space<vmem>>, vector<1x1x8x8xf32>
    %302 = vector.shape_cast %301 : vector<1x1x8x8xf32> to vector<1x8x8xf32>
    %c0_293 = arith.constant 0 : index
    %c2_294 = arith.constant 2 : index
    %c0_295 = arith.constant 0 : index
    %c2_296 = arith.constant 2 : index
    %303 = vector.load %arg16[%c0_293, %c2_294, %c0_295, %c2_296] : memref<1x4x10x10xf32, #tpu.memory_space<vmem>>, vector<1x1x8x8xf32>
    %304 = vector.shape_cast %303 : vector<1x1x8x8xf32> to vector<1x8x8xf32>
    %c0_297 = arith.constant 0 : index
    %c2_298 = arith.constant 2 : index
    %c1_299 = arith.constant 1 : index
    %c0_300 = arith.constant 0 : index
    %305 = vector.load %arg16[%c0_297, %c2_298, %c1_299, %c0_300] : memref<1x4x10x10xf32, #tpu.memory_space<vmem>>, vector<1x1x8x8xf32>
    %306 = vector.shape_cast %305 : vector<1x1x8x8xf32> to vector<1x8x8xf32>
    %c0_301 = arith.constant 0 : index
    %c2_302 = arith.constant 2 : index
    %c1_303 = arith.constant 1 : index
    %c1_304 = arith.constant 1 : index
    %307 = vector.load %arg16[%c0_301, %c2_302, %c1_303, %c1_304] : memref<1x4x10x10xf32, #tpu.memory_space<vmem>>, vector<1x1x8x8xf32>
    %308 = vector.shape_cast %307 : vector<1x1x8x8xf32> to vector<1x8x8xf32>
    %c0_305 = arith.constant 0 : index
    %c2_306 = arith.constant 2 : index
    %c1_307 = arith.constant 1 : index
    %c2_308 = arith.constant 2 : index
    %309 = vector.load %arg16[%c0_305, %c2_306, %c1_307, %c2_308] : memref<1x4x10x10xf32, #tpu.memory_space<vmem>>, vector<1x1x8x8xf32>
    %310 = vector.shape_cast %309 : vector<1x1x8x8xf32> to vector<1x8x8xf32>
    %c0_309 = arith.constant 0 : index
    %c2_310 = arith.constant 2 : index
    %c2_311 = arith.constant 2 : index
    %c0_312 = arith.constant 0 : index
    %311 = vector.load %arg16[%c0_309, %c2_310, %c2_311, %c0_312] : memref<1x4x10x10xf32, #tpu.memory_space<vmem>>, vector<1x1x8x8xf32>
    %312 = vector.shape_cast %311 : vector<1x1x8x8xf32> to vector<1x8x8xf32>
    %c0_313 = arith.constant 0 : index
    %c2_314 = arith.constant 2 : index
    %c2_315 = arith.constant 2 : index
    %c1_316 = arith.constant 1 : index
    %313 = vector.load %arg16[%c0_313, %c2_314, %c2_315, %c1_316] : memref<1x4x10x10xf32, #tpu.memory_space<vmem>>, vector<1x1x8x8xf32>
    %314 = vector.shape_cast %313 : vector<1x1x8x8xf32> to vector<1x8x8xf32>
    %c0_317 = arith.constant 0 : index
    %c2_318 = arith.constant 2 : index
    %c2_319 = arith.constant 2 : index
    %c2_320 = arith.constant 2 : index
    %315 = vector.load %arg16[%c0_317, %c2_318, %c2_319, %c2_320] : memref<1x4x10x10xf32, #tpu.memory_space<vmem>>, vector<1x1x8x8xf32>
    %316 = vector.shape_cast %315 : vector<1x1x8x8xf32> to vector<1x8x8xf32>
    %c0_321 = arith.constant 0 : index
    %c3_322 = arith.constant 3 : index
    %c0_323 = arith.constant 0 : index
    %c0_324 = arith.constant 0 : index
    %317 = vector.load %arg16[%c0_321, %c3_322, %c0_323, %c0_324] : memref<1x4x10x10xf32, #tpu.memory_space<vmem>>, vector<1x1x8x8xf32>
    %318 = vector.shape_cast %317 : vector<1x1x8x8xf32> to vector<1x8x8xf32>
    %c0_325 = arith.constant 0 : index
    %c3_326 = arith.constant 3 : index
    %c0_327 = arith.constant 0 : index
    %c1_328 = arith.constant 1 : index
    %319 = vector.load %arg16[%c0_325, %c3_326, %c0_327, %c1_328] : memref<1x4x10x10xf32, #tpu.memory_space<vmem>>, vector<1x1x8x8xf32>
    %320 = vector.shape_cast %319 : vector<1x1x8x8xf32> to vector<1x8x8xf32>
    %c0_329 = arith.constant 0 : index
    %c3_330 = arith.constant 3 : index
    %c0_331 = arith.constant 0 : index
    %c2_332 = arith.constant 2 : index
    %321 = vector.load %arg16[%c0_329, %c3_330, %c0_331, %c2_332] : memref<1x4x10x10xf32, #tpu.memory_space<vmem>>, vector<1x1x8x8xf32>
    %322 = vector.shape_cast %321 : vector<1x1x8x8xf32> to vector<1x8x8xf32>
    %c0_333 = arith.constant 0 : index
    %c3_334 = arith.constant 3 : index
    %c1_335 = arith.constant 1 : index
    %c0_336 = arith.constant 0 : index
    %323 = vector.load %arg16[%c0_333, %c3_334, %c1_335, %c0_336] : memref<1x4x10x10xf32, #tpu.memory_space<vmem>>, vector<1x1x8x8xf32>
    %324 = vector.shape_cast %323 : vector<1x1x8x8xf32> to vector<1x8x8xf32>
    %c0_337 = arith.constant 0 : index
    %c3_338 = arith.constant 3 : index
    %c1_339 = arith.constant 1 : index
    %c1_340 = arith.constant 1 : index
    %325 = vector.load %arg16[%c0_337, %c3_338, %c1_339, %c1_340] : memref<1x4x10x10xf32, #tpu.memory_space<vmem>>, vector<1x1x8x8xf32>
    %326 = vector.shape_cast %325 : vector<1x1x8x8xf32> to vector<1x8x8xf32>
    %c0_341 = arith.constant 0 : index
    %c3_342 = arith.constant 3 : index
    %c1_343 = arith.constant 1 : index
    %c2_344 = arith.constant 2 : index
    %327 = vector.load %arg16[%c0_341, %c3_342, %c1_343, %c2_344] : memref<1x4x10x10xf32, #tpu.memory_space<vmem>>, vector<1x1x8x8xf32>
    %328 = vector.shape_cast %327 : vector<1x1x8x8xf32> to vector<1x8x8xf32>
    %c0_345 = arith.constant 0 : index
    %c3_346 = arith.constant 3 : index
    %c2_347 = arith.constant 2 : index
    %c0_348 = arith.constant 0 : index
    %329 = vector.load %arg16[%c0_345, %c3_346, %c2_347, %c0_348] : memref<1x4x10x10xf32, #tpu.memory_space<vmem>>, vector<1x1x8x8xf32>
    %330 = vector.shape_cast %329 : vector<1x1x8x8xf32> to vector<1x8x8xf32>
    %c0_349 = arith.constant 0 : index
    %c3_350 = arith.constant 3 : index
    %c2_351 = arith.constant 2 : index
    %c1_352 = arith.constant 1 : index
    %331 = vector.load %arg16[%c0_349, %c3_350, %c2_351, %c1_352] : memref<1x4x10x10xf32, #tpu.memory_space<vmem>>, vector<1x1x8x8xf32>
    %332 = vector.shape_cast %331 : vector<1x1x8x8xf32> to vector<1x8x8xf32>
    %c0_353 = arith.constant 0 : index
    %c3_354 = arith.constant 3 : index
    %c2_355 = arith.constant 2 : index
    %c2_356 = arith.constant 2 : index
    %333 = vector.load %arg16[%c0_353, %c3_354, %c2_355, %c2_356] : memref<1x4x10x10xf32, #tpu.memory_space<vmem>>, vector<1x1x8x8xf32>
    %334 = vector.shape_cast %333 : vector<1x1x8x8xf32> to vector<1x8x8xf32>
    %c0_357 = arith.constant 0 : index
    %335 = memref.load %arg4[%c0_357] : memref<288xf32, #tpu.memory_space<smem>>
    %336 = vector.broadcast %335 : f32 to vector<1x8x8xf32>
    %337 = arith.mulf %264, %336 : vector<1x8x8xf32>
    %c1_358 = arith.constant 1 : index
    %338 = memref.load %arg4[%c1_358] : memref<288xf32, #tpu.memory_space<smem>>
    %339 = vector.broadcast %338 : f32 to vector<1x8x8xf32>
    %340 = arith.mulf %266, %339 : vector<1x8x8xf32>
    %341 = arith.addf %337, %340 : vector<1x8x8xf32>
    %c2_359 = arith.constant 2 : index
    %342 = memref.load %arg4[%c2_359] : memref<288xf32, #tpu.memory_space<smem>>
    %343 = vector.broadcast %342 : f32 to vector<1x8x8xf32>
    %344 = arith.mulf %268, %343 : vector<1x8x8xf32>
    %345 = arith.addf %341, %344 : vector<1x8x8xf32>
    %c3_360 = arith.constant 3 : index
    %346 = memref.load %arg4[%c3_360] : memref<288xf32, #tpu.memory_space<smem>>
    %347 = vector.broadcast %346 : f32 to vector<1x8x8xf32>
    %348 = arith.mulf %270, %347 : vector<1x8x8xf32>
    %349 = arith.addf %345, %348 : vector<1x8x8xf32>
    %c4_361 = arith.constant 4 : index
    %350 = memref.load %arg4[%c4_361] : memref<288xf32, #tpu.memory_space<smem>>
    %351 = vector.broadcast %350 : f32 to vector<1x8x8xf32>
    %352 = arith.mulf %272, %351 : vector<1x8x8xf32>
    %353 = arith.addf %349, %352 : vector<1x8x8xf32>
    %c5_362 = arith.constant 5 : index
    %354 = memref.load %arg4[%c5_362] : memref<288xf32, #tpu.memory_space<smem>>
    %355 = vector.broadcast %354 : f32 to vector<1x8x8xf32>
    %356 = arith.mulf %274, %355 : vector<1x8x8xf32>
    %357 = arith.addf %353, %356 : vector<1x8x8xf32>
    %c6_363 = arith.constant 6 : index
    %358 = memref.load %arg4[%c6_363] : memref<288xf32, #tpu.memory_space<smem>>
    %359 = vector.broadcast %358 : f32 to vector<1x8x8xf32>
    %360 = arith.mulf %276, %359 : vector<1x8x8xf32>
    %361 = arith.addf %357, %360 : vector<1x8x8xf32>
    %c7_364 = arith.constant 7 : index
    %362 = memref.load %arg4[%c7_364] : memref<288xf32, #tpu.memory_space<smem>>
    %363 = vector.broadcast %362 : f32 to vector<1x8x8xf32>
    %364 = arith.mulf %278, %363 : vector<1x8x8xf32>
    %365 = arith.addf %361, %364 : vector<1x8x8xf32>
    %c8_365 = arith.constant 8 : index
    %366 = memref.load %arg4[%c8_365] : memref<288xf32, #tpu.memory_space<smem>>
    %367 = vector.broadcast %366 : f32 to vector<1x8x8xf32>
    %368 = arith.mulf %280, %367 : vector<1x8x8xf32>
    %369 = arith.addf %365, %368 : vector<1x8x8xf32>
    %c9_366 = arith.constant 9 : index
    %370 = memref.load %arg4[%c9_366] : memref<288xf32, #tpu.memory_space<smem>>
    %371 = vector.broadcast %370 : f32 to vector<1x8x8xf32>
    %372 = arith.mulf %282, %371 : vector<1x8x8xf32>
    %373 = arith.addf %369, %372 : vector<1x8x8xf32>
    %c10_367 = arith.constant 10 : index
    %374 = memref.load %arg4[%c10_367] : memref<288xf32, #tpu.memory_space<smem>>
    %375 = vector.broadcast %374 : f32 to vector<1x8x8xf32>
    %376 = arith.mulf %284, %375 : vector<1x8x8xf32>
    %377 = arith.addf %373, %376 : vector<1x8x8xf32>
    %c11_368 = arith.constant 11 : index
    %378 = memref.load %arg4[%c11_368] : memref<288xf32, #tpu.memory_space<smem>>
    %379 = vector.broadcast %378 : f32 to vector<1x8x8xf32>
    %380 = arith.mulf %286, %379 : vector<1x8x8xf32>
    %381 = arith.addf %377, %380 : vector<1x8x8xf32>
    %c12_369 = arith.constant 12 : index
    %382 = memref.load %arg4[%c12_369] : memref<288xf32, #tpu.memory_space<smem>>
    %383 = vector.broadcast %382 : f32 to vector<1x8x8xf32>
    %384 = arith.mulf %288, %383 : vector<1x8x8xf32>
    %385 = arith.addf %381, %384 : vector<1x8x8xf32>
    %c13_370 = arith.constant 13 : index
    %386 = memref.load %arg4[%c13_370] : memref<288xf32, #tpu.memory_space<smem>>
    %387 = vector.broadcast %386 : f32 to vector<1x8x8xf32>
    %388 = arith.mulf %290, %387 : vector<1x8x8xf32>
    %389 = arith.addf %385, %388 : vector<1x8x8xf32>
    %c14_371 = arith.constant 14 : index
    %390 = memref.load %arg4[%c14_371] : memref<288xf32, #tpu.memory_space<smem>>
    %391 = vector.broadcast %390 : f32 to vector<1x8x8xf32>
    %392 = arith.mulf %292, %391 : vector<1x8x8xf32>
    %393 = arith.addf %389, %392 : vector<1x8x8xf32>
    %c15_372 = arith.constant 15 : index
    %394 = memref.load %arg4[%c15_372] : memref<288xf32, #tpu.memory_space<smem>>
    %395 = vector.broadcast %394 : f32 to vector<1x8x8xf32>
    %396 = arith.mulf %294, %395 : vector<1x8x8xf32>
    %397 = arith.addf %393, %396 : vector<1x8x8xf32>
    %c16_373 = arith.constant 16 : index
    %398 = memref.load %arg4[%c16_373] : memref<288xf32, #tpu.memory_space<smem>>
    %399 = vector.broadcast %398 : f32 to vector<1x8x8xf32>
    %400 = arith.mulf %296, %399 : vector<1x8x8xf32>
    %401 = arith.addf %397, %400 : vector<1x8x8xf32>
    %c17_374 = arith.constant 17 : index
    %402 = memref.load %arg4[%c17_374] : memref<288xf32, #tpu.memory_space<smem>>
    %403 = vector.broadcast %402 : f32 to vector<1x8x8xf32>
    %404 = arith.mulf %298, %403 : vector<1x8x8xf32>
    %405 = arith.addf %401, %404 : vector<1x8x8xf32>
    %c18_375 = arith.constant 18 : index
    %406 = memref.load %arg4[%c18_375] : memref<288xf32, #tpu.memory_space<smem>>
    %407 = vector.broadcast %406 : f32 to vector<1x8x8xf32>
    %408 = arith.mulf %300, %407 : vector<1x8x8xf32>
    %409 = arith.addf %405, %408 : vector<1x8x8xf32>
    %c19_376 = arith.constant 19 : index
    %410 = memref.load %arg4[%c19_376] : memref<288xf32, #tpu.memory_space<smem>>
    %411 = vector.broadcast %410 : f32 to vector<1x8x8xf32>
    %412 = arith.mulf %302, %411 : vector<1x8x8xf32>
    %413 = arith.addf %409, %412 : vector<1x8x8xf32>
    %c20_377 = arith.constant 20 : index
    %414 = memref.load %arg4[%c20_377] : memref<288xf32, #tpu.memory_space<smem>>
    %415 = vector.broadcast %414 : f32 to vector<1x8x8xf32>
    %416 = arith.mulf %304, %415 : vector<1x8x8xf32>
    %417 = arith.addf %413, %416 : vector<1x8x8xf32>
    %c21_378 = arith.constant 21 : index
    %418 = memref.load %arg4[%c21_378] : memref<288xf32, #tpu.memory_space<smem>>
    %419 = vector.broadcast %418 : f32 to vector<1x8x8xf32>
    %420 = arith.mulf %306, %419 : vector<1x8x8xf32>
    %421 = arith.addf %417, %420 : vector<1x8x8xf32>
    %c22_379 = arith.constant 22 : index
    %422 = memref.load %arg4[%c22_379] : memref<288xf32, #tpu.memory_space<smem>>
    %423 = vector.broadcast %422 : f32 to vector<1x8x8xf32>
    %424 = arith.mulf %308, %423 : vector<1x8x8xf32>
    %425 = arith.addf %421, %424 : vector<1x8x8xf32>
    %c23_380 = arith.constant 23 : index
    %426 = memref.load %arg4[%c23_380] : memref<288xf32, #tpu.memory_space<smem>>
    %427 = vector.broadcast %426 : f32 to vector<1x8x8xf32>
    %428 = arith.mulf %310, %427 : vector<1x8x8xf32>
    %429 = arith.addf %425, %428 : vector<1x8x8xf32>
    %c24_381 = arith.constant 24 : index
    %430 = memref.load %arg4[%c24_381] : memref<288xf32, #tpu.memory_space<smem>>
    %431 = vector.broadcast %430 : f32 to vector<1x8x8xf32>
    %432 = arith.mulf %312, %431 : vector<1x8x8xf32>
    %433 = arith.addf %429, %432 : vector<1x8x8xf32>
    %c25_382 = arith.constant 25 : index
    %434 = memref.load %arg4[%c25_382] : memref<288xf32, #tpu.memory_space<smem>>
    %435 = vector.broadcast %434 : f32 to vector<1x8x8xf32>
    %436 = arith.mulf %314, %435 : vector<1x8x8xf32>
    %437 = arith.addf %433, %436 : vector<1x8x8xf32>
    %c26_383 = arith.constant 26 : index
    %438 = memref.load %arg4[%c26_383] : memref<288xf32, #tpu.memory_space<smem>>
    %439 = vector.broadcast %438 : f32 to vector<1x8x8xf32>
    %440 = arith.mulf %316, %439 : vector<1x8x8xf32>
    %441 = arith.addf %437, %440 : vector<1x8x8xf32>
    %c27_384 = arith.constant 27 : index
    %442 = memref.load %arg4[%c27_384] : memref<288xf32, #tpu.memory_space<smem>>
    %443 = vector.broadcast %442 : f32 to vector<1x8x8xf32>
    %444 = arith.mulf %318, %443 : vector<1x8x8xf32>
    %445 = arith.addf %441, %444 : vector<1x8x8xf32>
    %c28_385 = arith.constant 28 : index
    %446 = memref.load %arg4[%c28_385] : memref<288xf32, #tpu.memory_space<smem>>
    %447 = vector.broadcast %446 : f32 to vector<1x8x8xf32>
    %448 = arith.mulf %320, %447 : vector<1x8x8xf32>
    %449 = arith.addf %445, %448 : vector<1x8x8xf32>
    %c29_386 = arith.constant 29 : index
    %450 = memref.load %arg4[%c29_386] : memref<288xf32, #tpu.memory_space<smem>>
    %451 = vector.broadcast %450 : f32 to vector<1x8x8xf32>
    %452 = arith.mulf %322, %451 : vector<1x8x8xf32>
    %453 = arith.addf %449, %452 : vector<1x8x8xf32>
    %c30_387 = arith.constant 30 : index
    %454 = memref.load %arg4[%c30_387] : memref<288xf32, #tpu.memory_space<smem>>
    %455 = vector.broadcast %454 : f32 to vector<1x8x8xf32>
    %456 = arith.mulf %324, %455 : vector<1x8x8xf32>
    %457 = arith.addf %453, %456 : vector<1x8x8xf32>
    %c31_388 = arith.constant 31 : index
    %458 = memref.load %arg4[%c31_388] : memref<288xf32, #tpu.memory_space<smem>>
    %459 = vector.broadcast %458 : f32 to vector<1x8x8xf32>
    %460 = arith.mulf %326, %459 : vector<1x8x8xf32>
    %461 = arith.addf %457, %460 : vector<1x8x8xf32>
    %c32_389 = arith.constant 32 : index
    %462 = memref.load %arg4[%c32_389] : memref<288xf32, #tpu.memory_space<smem>>
    %463 = vector.broadcast %462 : f32 to vector<1x8x8xf32>
    %464 = arith.mulf %328, %463 : vector<1x8x8xf32>
    %465 = arith.addf %461, %464 : vector<1x8x8xf32>
    %c33_390 = arith.constant 33 : index
    %466 = memref.load %arg4[%c33_390] : memref<288xf32, #tpu.memory_space<smem>>
    %467 = vector.broadcast %466 : f32 to vector<1x8x8xf32>
    %468 = arith.mulf %330, %467 : vector<1x8x8xf32>
    %469 = arith.addf %465, %468 : vector<1x8x8xf32>
    %c34_391 = arith.constant 34 : index
    %470 = memref.load %arg4[%c34_391] : memref<288xf32, #tpu.memory_space<smem>>
    %471 = vector.broadcast %470 : f32 to vector<1x8x8xf32>
    %472 = arith.mulf %332, %471 : vector<1x8x8xf32>
    %473 = arith.addf %469, %472 : vector<1x8x8xf32>
    %c35_392 = arith.constant 35 : index
    %474 = memref.load %arg4[%c35_392] : memref<288xf32, #tpu.memory_space<smem>>
    %475 = vector.broadcast %474 : f32 to vector<1x8x8xf32>
    %476 = arith.mulf %334, %475 : vector<1x8x8xf32>
    %477 = arith.addf %473, %476 : vector<1x8x8xf32>
    %c0_393 = arith.constant 0 : index
    %478 = memref.load %arg5[%c0_393] : memref<8xf32, #tpu.memory_space<smem>>
    %479 = vector.broadcast %478 : f32 to vector<1x8x8xf32>
    %480 = arith.addf %477, %479 : vector<1x8x8xf32>
    %cst_394 = arith.constant 0.000000e+00 : f32
    %481 = vector.broadcast %cst_394 : f32 to vector<1x8x8xf32>
    %482 = arith.cmpf oge, %480, %481 : vector<1x8x8xf32>
    %cst_395 = arith.constant 0.00999999977 : f32
    %483 = vector.broadcast %cst_395 : f32 to vector<1x8x8xf32>
    %484 = arith.mulf %483, %480 : vector<1x8x8xf32>
    %485 = arith.select %482, %480, %484 : vector<1x8x8xi1>, vector<1x8x8xf32>
    %c0_396 = arith.constant 0 : index
    %c0_397 = arith.constant 0 : index
    %c0_398 = arith.constant 0 : index
    %c0_399 = arith.constant 0 : index
    %486 = vector.load %arg17[%c0_396, %c0_397, %c0_398, %c0_399] : memref<1x8x8x8xf32, #tpu.memory_space<vmem>>, vector<1x1x8x8xf32>
    %487 = vector.shape_cast %486 : vector<1x1x8x8xf32> to vector<1x8x8xf32>
    %488 = vector.shape_cast %485 : vector<1x8x8xf32> to vector<1x1x8x8xf32>
    tpu.vector_store %arg17[%c0_396, %c0_397, %c0_398, %c0_399], %488 {strides = array<i32>} : memref<1x8x8x8xf32, #tpu.memory_space<vmem>>, vector<1x1x8x8xf32>,
    %c36 = arith.constant 36 : index
    %489 = memref.load %arg4[%c36] : memref<288xf32, #tpu.memory_space<smem>>
    %490 = vector.broadcast %489 : f32 to vector<1x8x8xf32>
    %491 = arith.mulf %264, %490 : vector<1x8x8xf32>
    %c37 = arith.constant 37 : index
    %492 = memref.load %arg4[%c37] : memref<288xf32, #tpu.memory_space<smem>>
    %493 = vector.broadcast %492 : f32 to vector<1x8x8xf32>
    %494 = arith.mulf %266, %493 : vector<1x8x8xf32>
    %495 = arith.addf %491, %494 : vector<1x8x8xf32>
    %c38 = arith.constant 38 : index
    %496 = memref.load %arg4[%c38] : memref<288xf32, #tpu.memory_space<smem>>
    %497 = vector.broadcast %496 : f32 to vector<1x8x8xf32>
    %498 = arith.mulf %268, %497 : vector<1x8x8xf32>
    %499 = arith.addf %495, %498 : vector<1x8x8xf32>
    %c39 = arith.constant 39 : index
    %500 = memref.load %arg4[%c39] : memref<288xf32, #tpu.memory_space<smem>>
    %501 = vector.broadcast %500 : f32 to vector<1x8x8xf32>
    %502 = arith.mulf %270, %501 : vector<1x8x8xf32>
    %503 = arith.addf %499, %502 : vector<1x8x8xf32>
    %c40 = arith.constant 40 : index
    %504 = memref.load %arg4[%c40] : memref<288xf32, #tpu.memory_space<smem>>
    %505 = vector.broadcast %504 : f32 to vector<1x8x8xf32>
    %506 = arith.mulf %272, %505 : vector<1x8x8xf32>
    %507 = arith.addf %503, %506 : vector<1x8x8xf32>
    %c41 = arith.constant 41 : index
    %508 = memref.load %arg4[%c41] : memref<288xf32, #tpu.memory_space<smem>>
    %509 = vector.broadcast %508 : f32 to vector<1x8x8xf32>
    %510 = arith.mulf %274, %509 : vector<1x8x8xf32>
    %511 = arith.addf %507, %510 : vector<1x8x8xf32>
    %c42 = arith.constant 42 : index
    %512 = memref.load %arg4[%c42] : memref<288xf32, #tpu.memory_space<smem>>
    %513 = vector.broadcast %512 : f32 to vector<1x8x8xf32>
    %514 = arith.mulf %276, %513 : vector<1x8x8xf32>
    %515 = arith.addf %511, %514 : vector<1x8x8xf32>
    %c43 = arith.constant 43 : index
    %516 = memref.load %arg4[%c43] : memref<288xf32, #tpu.memory_space<smem>>
    %517 = vector.broadcast %516 : f32 to vector<1x8x8xf32>
    %518 = arith.mulf %278, %517 : vector<1x8x8xf32>
    %519 = arith.addf %515, %518 : vector<1x8x8xf32>
    %c44 = arith.constant 44 : index
    %520 = memref.load %arg4[%c44] : memref<288xf32, #tpu.memory_space<smem>>
    %521 = vector.broadcast %520 : f32 to vector<1x8x8xf32>
    %522 = arith.mulf %280, %521 : vector<1x8x8xf32>
    %523 = arith.addf %519, %522 : vector<1x8x8xf32>
    %c45 = arith.constant 45 : index
    %524 = memref.load %arg4[%c45] : memref<288xf32, #tpu.memory_space<smem>>
    %525 = vector.broadcast %524 : f32 to vector<1x8x8xf32>
    %526 = arith.mulf %282, %525 : vector<1x8x8xf32>
    %527 = arith.addf %523, %526 : vector<1x8x8xf32>
    %c46 = arith.constant 46 : index
    %528 = memref.load %arg4[%c46] : memref<288xf32, #tpu.memory_space<smem>>
    %529 = vector.broadcast %528 : f32 to vector<1x8x8xf32>
    %530 = arith.mulf %284, %529 : vector<1x8x8xf32>
    %531 = arith.addf %527, %530 : vector<1x8x8xf32>
    %c47 = arith.constant 47 : index
    %532 = memref.load %arg4[%c47] : memref<288xf32, #tpu.memory_space<smem>>
    %533 = vector.broadcast %532 : f32 to vector<1x8x8xf32>
    %534 = arith.mulf %286, %533 : vector<1x8x8xf32>
    %535 = arith.addf %531, %534 : vector<1x8x8xf32>
    %c48 = arith.constant 48 : index
    %536 = memref.load %arg4[%c48] : memref<288xf32, #tpu.memory_space<smem>>
    %537 = vector.broadcast %536 : f32 to vector<1x8x8xf32>
    %538 = arith.mulf %288, %537 : vector<1x8x8xf32>
    %539 = arith.addf %535, %538 : vector<1x8x8xf32>
    %c49 = arith.constant 49 : index
    %540 = memref.load %arg4[%c49] : memref<288xf32, #tpu.memory_space<smem>>
    %541 = vector.broadcast %540 : f32 to vector<1x8x8xf32>
    %542 = arith.mulf %290, %541 : vector<1x8x8xf32>
    %543 = arith.addf %539, %542 : vector<1x8x8xf32>
    %c50 = arith.constant 50 : index
    %544 = memref.load %arg4[%c50] : memref<288xf32, #tpu.memory_space<smem>>
    %545 = vector.broadcast %544 : f32 to vector<1x8x8xf32>
    %546 = arith.mulf %292, %545 : vector<1x8x8xf32>
    %547 = arith.addf %543, %546 : vector<1x8x8xf32>
    %c51 = arith.constant 51 : index
    %548 = memref.load %arg4[%c51] : memref<288xf32, #tpu.memory_space<smem>>
    %549 = vector.broadcast %548 : f32 to vector<1x8x8xf32>
    %550 = arith.mulf %294, %549 : vector<1x8x8xf32>
    %551 = arith.addf %547, %550 : vector<1x8x8xf32>
    %c52 = arith.constant 52 : index
    %552 = memref.load %arg4[%c52] : memref<288xf32, #tpu.memory_space<smem>>
    %553 = vector.broadcast %552 : f32 to vector<1x8x8xf32>
    %554 = arith.mulf %296, %553 : vector<1x8x8xf32>
    %555 = arith.addf %551, %554 : vector<1x8x8xf32>
    %c53 = arith.constant 53 : index
    %556 = memref.load %arg4[%c53] : memref<288xf32, #tpu.memory_space<smem>>
    %557 = vector.broadcast %556 : f32 to vector<1x8x8xf32>
    %558 = arith.mulf %298, %557 : vector<1x8x8xf32>
    %559 = arith.addf %555, %558 : vector<1x8x8xf32>
    %c54 = arith.constant 54 : index
    %560 = memref.load %arg4[%c54] : memref<288xf32, #tpu.memory_space<smem>>
    %561 = vector.broadcast %560 : f32 to vector<1x8x8xf32>
    %562 = arith.mulf %300, %561 : vector<1x8x8xf32>
    %563 = arith.addf %559, %562 : vector<1x8x8xf32>
    %c55 = arith.constant 55 : index
    %564 = memref.load %arg4[%c55] : memref<288xf32, #tpu.memory_space<smem>>
    %565 = vector.broadcast %564 : f32 to vector<1x8x8xf32>
    %566 = arith.mulf %302, %565 : vector<1x8x8xf32>
    %567 = arith.addf %563, %566 : vector<1x8x8xf32>
    %c56 = arith.constant 56 : index
    %568 = memref.load %arg4[%c56] : memref<288xf32, #tpu.memory_space<smem>>
    %569 = vector.broadcast %568 : f32 to vector<1x8x8xf32>
    %570 = arith.mulf %304, %569 : vector<1x8x8xf32>
    %571 = arith.addf %567, %570 : vector<1x8x8xf32>
    %c57 = arith.constant 57 : index
    %572 = memref.load %arg4[%c57] : memref<288xf32, #tpu.memory_space<smem>>
    %573 = vector.broadcast %572 : f32 to vector<1x8x8xf32>
    %574 = arith.mulf %306, %573 : vector<1x8x8xf32>
    %575 = arith.addf %571, %574 : vector<1x8x8xf32>
    %c58 = arith.constant 58 : index
    %576 = memref.load %arg4[%c58] : memref<288xf32, #tpu.memory_space<smem>>
    %577 = vector.broadcast %576 : f32 to vector<1x8x8xf32>
    %578 = arith.mulf %308, %577 : vector<1x8x8xf32>
    %579 = arith.addf %575, %578 : vector<1x8x8xf32>
    %c59 = arith.constant 59 : index
    %580 = memref.load %arg4[%c59] : memref<288xf32, #tpu.memory_space<smem>>
    %581 = vector.broadcast %580 : f32 to vector<1x8x8xf32>
    %582 = arith.mulf %310, %581 : vector<1x8x8xf32>
    %583 = arith.addf %579, %582 : vector<1x8x8xf32>
    %c60 = arith.constant 60 : index
    %584 = memref.load %arg4[%c60] : memref<288xf32, #tpu.memory_space<smem>>
    %585 = vector.broadcast %584 : f32 to vector<1x8x8xf32>
    %586 = arith.mulf %312, %585 : vector<1x8x8xf32>
    %587 = arith.addf %583, %586 : vector<1x8x8xf32>
    %c61 = arith.constant 61 : index
    %588 = memref.load %arg4[%c61] : memref<288xf32, #tpu.memory_space<smem>>
    %589 = vector.broadcast %588 : f32 to vector<1x8x8xf32>
    %590 = arith.mulf %314, %589 : vector<1x8x8xf32>
    %591 = arith.addf %587, %590 : vector<1x8x8xf32>
    %c62 = arith.constant 62 : index
    %592 = memref.load %arg4[%c62] : memref<288xf32, #tpu.memory_space<smem>>
    %593 = vector.broadcast %592 : f32 to vector<1x8x8xf32>
    %594 = arith.mulf %316, %593 : vector<1x8x8xf32>
    %595 = arith.addf %591, %594 : vector<1x8x8xf32>
    %c63 = arith.constant 63 : index
    %596 = memref.load %arg4[%c63] : memref<288xf32, #tpu.memory_space<smem>>
    %597 = vector.broadcast %596 : f32 to vector<1x8x8xf32>
    %598 = arith.mulf %318, %597 : vector<1x8x8xf32>
    %599 = arith.addf %595, %598 : vector<1x8x8xf32>
    %c64 = arith.constant 64 : index
    %600 = memref.load %arg4[%c64] : memref<288xf32, #tpu.memory_space<smem>>
    %601 = vector.broadcast %600 : f32 to vector<1x8x8xf32>
    %602 = arith.mulf %320, %601 : vector<1x8x8xf32>
    %603 = arith.addf %599, %602 : vector<1x8x8xf32>
    %c65 = arith.constant 65 : index
    %604 = memref.load %arg4[%c65] : memref<288xf32, #tpu.memory_space<smem>>
    %605 = vector.broadcast %604 : f32 to vector<1x8x8xf32>
    %606 = arith.mulf %322, %605 : vector<1x8x8xf32>
    %607 = arith.addf %603, %606 : vector<1x8x8xf32>
    %c66 = arith.constant 66 : index
    %608 = memref.load %arg4[%c66] : memref<288xf32, #tpu.memory_space<smem>>
    %609 = vector.broadcast %608 : f32 to vector<1x8x8xf32>
    %610 = arith.mulf %324, %609 : vector<1x8x8xf32>
    %611 = arith.addf %607, %610 : vector<1x8x8xf32>
    %c67 = arith.constant 67 : index
    %612 = memref.load %arg4[%c67] : memref<288xf32, #tpu.memory_space<smem>>
    %613 = vector.broadcast %612 : f32 to vector<1x8x8xf32>
    %614 = arith.mulf %326, %613 : vector<1x8x8xf32>
    %615 = arith.addf %611, %614 : vector<1x8x8xf32>
    %c68 = arith.constant 68 : index
    %616 = memref.load %arg4[%c68] : memref<288xf32, #tpu.memory_space<smem>>
    %617 = vector.broadcast %616 : f32 to vector<1x8x8xf32>
    %618 = arith.mulf %328, %617 : vector<1x8x8xf32>
    %619 = arith.addf %615, %618 : vector<1x8x8xf32>
    %c69 = arith.constant 69 : index
    %620 = memref.load %arg4[%c69] : memref<288xf32, #tpu.memory_space<smem>>
    %621 = vector.broadcast %620 : f32 to vector<1x8x8xf32>
    %622 = arith.mulf %330, %621 : vector<1x8x8xf32>
    %623 = arith.addf %619, %622 : vector<1x8x8xf32>
    %c70 = arith.constant 70 : index
    %624 = memref.load %arg4[%c70] : memref<288xf32, #tpu.memory_space<smem>>
    %625 = vector.broadcast %624 : f32 to vector<1x8x8xf32>
    %626 = arith.mulf %332, %625 : vector<1x8x8xf32>
    %627 = arith.addf %623, %626 : vector<1x8x8xf32>
    %c71 = arith.constant 71 : index
    %628 = memref.load %arg4[%c71] : memref<288xf32, #tpu.memory_space<smem>>
    %629 = vector.broadcast %628 : f32 to vector<1x8x8xf32>
    %630 = arith.mulf %334, %629 : vector<1x8x8xf32>
    %631 = arith.addf %627, %630 : vector<1x8x8xf32>
    %c1_400 = arith.constant 1 : index
    %632 = memref.load %arg5[%c1_400] : memref<8xf32, #tpu.memory_space<smem>>
    %633 = vector.broadcast %632 : f32 to vector<1x8x8xf32>
    %634 = arith.addf %631, %633 : vector<1x8x8xf32>
    %cst_401 = arith.constant 0.000000e+00 : f32
    %635 = vector.broadcast %cst_401 : f32 to vector<1x8x8xf32>
    %636 = arith.cmpf oge, %634, %635 : vector<1x8x8xf32>
    %cst_402 = arith.constant 0.00999999977 : f32
    %637 = vector.broadcast %cst_402 : f32 to vector<1x8x8xf32>
    %638 = arith.mulf %637, %634 : vector<1x8x8xf32>
    %639 = arith.select %636, %634, %638 : vector<1x8x8xi1>, vector<1x8x8xf32>
    %c0_403 = arith.constant 0 : index
    %c1_404 = arith.constant 1 : index
    %c0_405 = arith.constant 0 : index
    %c0_406 = arith.constant 0 : index
    %640 = vector.load %arg17[%c0_403, %c1_404, %c0_405, %c0_406] : memref<1x8x8x8xf32, #tpu.memory_space<vmem>>, vector<1x1x8x8xf32>
    %641 = vector.shape_cast %640 : vector<1x1x8x8xf32> to vector<1x8x8xf32>
    %642 = vector.shape_cast %639 : vector<1x8x8xf32> to vector<1x1x8x8xf32>
    tpu.vector_store %arg17[%c0_403, %c1_404, %c0_405, %c0_406], %642 {strides = array<i32>} : memref<1x8x8x8xf32, #tpu.memory_space<vmem>>, vector<1x1x8x8xf32>,
    %c72 = arith.constant 72 : index
    %643 = memref.load %arg4[%c72] : memref<288xf32, #tpu.memory_space<smem>>
    %644 = vector.broadcast %643 : f32 to vector<1x8x8xf32>
    %645 = arith.mulf %264, %644 : vector<1x8x8xf32>
    %c73 = arith.constant 73 : index
    %646 = memref.load %arg4[%c73] : memref<288xf32, #tpu.memory_space<smem>>
    %647 = vector.broadcast %646 : f32 to vector<1x8x8xf32>
    %648 = arith.mulf %266, %647 : vector<1x8x8xf32>
    %649 = arith.addf %645, %648 : vector<1x8x8xf32>
    %c74 = arith.constant 74 : index
    %650 = memref.load %arg4[%c74] : memref<288xf32, #tpu.memory_space<smem>>
    %651 = vector.broadcast %650 : f32 to vector<1x8x8xf32>
    %652 = arith.mulf %268, %651 : vector<1x8x8xf32>
    %653 = arith.addf %649, %652 : vector<1x8x8xf32>
    %c75 = arith.constant 75 : index
    %654 = memref.load %arg4[%c75] : memref<288xf32, #tpu.memory_space<smem>>
    %655 = vector.broadcast %654 : f32 to vector<1x8x8xf32>
    %656 = arith.mulf %270, %655 : vector<1x8x8xf32>
    %657 = arith.addf %653, %656 : vector<1x8x8xf32>
    %c76 = arith.constant 76 : index
    %658 = memref.load %arg4[%c76] : memref<288xf32, #tpu.memory_space<smem>>
    %659 = vector.broadcast %658 : f32 to vector<1x8x8xf32>
    %660 = arith.mulf %272, %659 : vector<1x8x8xf32>
    %661 = arith.addf %657, %660 : vector<1x8x8xf32>
    %c77 = arith.constant 77 : index
    %662 = memref.load %arg4[%c77] : memref<288xf32, #tpu.memory_space<smem>>
    %663 = vector.broadcast %662 : f32 to vector<1x8x8xf32>
    %664 = arith.mulf %274, %663 : vector<1x8x8xf32>
    %665 = arith.addf %661, %664 : vector<1x8x8xf32>
    %c78 = arith.constant 78 : index
    %666 = memref.load %arg4[%c78] : memref<288xf32, #tpu.memory_space<smem>>
    %667 = vector.broadcast %666 : f32 to vector<1x8x8xf32>
    %668 = arith.mulf %276, %667 : vector<1x8x8xf32>
    %669 = arith.addf %665, %668 : vector<1x8x8xf32>
    %c79 = arith.constant 79 : index
    %670 = memref.load %arg4[%c79] : memref<288xf32, #tpu.memory_space<smem>>
    %671 = vector.broadcast %670 : f32 to vector<1x8x8xf32>
    %672 = arith.mulf %278, %671 : vector<1x8x8xf32>
    %673 = arith.addf %669, %672 : vector<1x8x8xf32>
    %c80 = arith.constant 80 : index
    %674 = memref.load %arg4[%c80] : memref<288xf32, #tpu.memory_space<smem>>
    %675 = vector.broadcast %674 : f32 to vector<1x8x8xf32>
    %676 = arith.mulf %280, %675 : vector<1x8x8xf32>
    %677 = arith.addf %673, %676 : vector<1x8x8xf32>
    %c81 = arith.constant 81 : index
    %678 = memref.load %arg4[%c81] : memref<288xf32, #tpu.memory_space<smem>>
    %679 = vector.broadcast %678 : f32 to vector<1x8x8xf32>
    %680 = arith.mulf %282, %679 : vector<1x8x8xf32>
    %681 = arith.addf %677, %680 : vector<1x8x8xf32>
    %c82 = arith.constant 82 : index
    %682 = memref.load %arg4[%c82] : memref<288xf32, #tpu.memory_space<smem>>
    %683 = vector.broadcast %682 : f32 to vector<1x8x8xf32>
    %684 = arith.mulf %284, %683 : vector<1x8x8xf32>
    %685 = arith.addf %681, %684 : vector<1x8x8xf32>
    %c83 = arith.constant 83 : index
    %686 = memref.load %arg4[%c83] : memref<288xf32, #tpu.memory_space<smem>>
    %687 = vector.broadcast %686 : f32 to vector<1x8x8xf32>
    %688 = arith.mulf %286, %687 : vector<1x8x8xf32>
    %689 = arith.addf %685, %688 : vector<1x8x8xf32>
    %c84 = arith.constant 84 : index
    %690 = memref.load %arg4[%c84] : memref<288xf32, #tpu.memory_space<smem>>
    %691 = vector.broadcast %690 : f32 to vector<1x8x8xf32>
    %692 = arith.mulf %288, %691 : vector<1x8x8xf32>
    %693 = arith.addf %689, %692 : vector<1x8x8xf32>
    %c85 = arith.constant 85 : index
    %694 = memref.load %arg4[%c85] : memref<288xf32, #tpu.memory_space<smem>>
    %695 = vector.broadcast %694 : f32 to vector<1x8x8xf32>
    %696 = arith.mulf %290, %695 : vector<1x8x8xf32>
    %697 = arith.addf %693, %696 : vector<1x8x8xf32>
    %c86 = arith.constant 86 : index
    %698 = memref.load %arg4[%c86] : memref<288xf32, #tpu.memory_space<smem>>
    %699 = vector.broadcast %698 : f32 to vector<1x8x8xf32>
    %700 = arith.mulf %292, %699 : vector<1x8x8xf32>
    %701 = arith.addf %697, %700 : vector<1x8x8xf32>
    %c87 = arith.constant 87 : index
    %702 = memref.load %arg4[%c87] : memref<288xf32, #tpu.memory_space<smem>>
    %703 = vector.broadcast %702 : f32 to vector<1x8x8xf32>
    %704 = arith.mulf %294, %703 : vector<1x8x8xf32>
    %705 = arith.addf %701, %704 : vector<1x8x8xf32>
    %c88 = arith.constant 88 : index
    %706 = memref.load %arg4[%c88] : memref<288xf32, #tpu.memory_space<smem>>
    %707 = vector.broadcast %706 : f32 to vector<1x8x8xf32>
    %708 = arith.mulf %296, %707 : vector<1x8x8xf32>
    %709 = arith.addf %705, %708 : vector<1x8x8xf32>
    %c89 = arith.constant 89 : index
    %710 = memref.load %arg4[%c89] : memref<288xf32, #tpu.memory_space<smem>>
    %711 = vector.broadcast %710 : f32 to vector<1x8x8xf32>
    %712 = arith.mulf %298, %711 : vector<1x8x8xf32>
    %713 = arith.addf %709, %712 : vector<1x8x8xf32>
    %c90 = arith.constant 90 : index
    %714 = memref.load %arg4[%c90] : memref<288xf32, #tpu.memory_space<smem>>
    %715 = vector.broadcast %714 : f32 to vector<1x8x8xf32>
    %716 = arith.mulf %300, %715 : vector<1x8x8xf32>
    %717 = arith.addf %713, %716 : vector<1x8x8xf32>
    %c91 = arith.constant 91 : index
    %718 = memref.load %arg4[%c91] : memref<288xf32, #tpu.memory_space<smem>>
    %719 = vector.broadcast %718 : f32 to vector<1x8x8xf32>
    %720 = arith.mulf %302, %719 : vector<1x8x8xf32>
    %721 = arith.addf %717, %720 : vector<1x8x8xf32>
    %c92 = arith.constant 92 : index
    %722 = memref.load %arg4[%c92] : memref<288xf32, #tpu.memory_space<smem>>
    %723 = vector.broadcast %722 : f32 to vector<1x8x8xf32>
    %724 = arith.mulf %304, %723 : vector<1x8x8xf32>
    %725 = arith.addf %721, %724 : vector<1x8x8xf32>
    %c93 = arith.constant 93 : index
    %726 = memref.load %arg4[%c93] : memref<288xf32, #tpu.memory_space<smem>>
    %727 = vector.broadcast %726 : f32 to vector<1x8x8xf32>
    %728 = arith.mulf %306, %727 : vector<1x8x8xf32>
    %729 = arith.addf %725, %728 : vector<1x8x8xf32>
    %c94 = arith.constant 94 : index
    %730 = memref.load %arg4[%c94] : memref<288xf32, #tpu.memory_space<smem>>
    %731 = vector.broadcast %730 : f32 to vector<1x8x8xf32>
    %732 = arith.mulf %308, %731 : vector<1x8x8xf32>
    %733 = arith.addf %729, %732 : vector<1x8x8xf32>
    %c95 = arith.constant 95 : index
    %734 = memref.load %arg4[%c95] : memref<288xf32, #tpu.memory_space<smem>>
    %735 = vector.broadcast %734 : f32 to vector<1x8x8xf32>
    %736 = arith.mulf %310, %735 : vector<1x8x8xf32>
    %737 = arith.addf %733, %736 : vector<1x8x8xf32>
    %c96 = arith.constant 96 : index
    %738 = memref.load %arg4[%c96] : memref<288xf32, #tpu.memory_space<smem>>
    %739 = vector.broadcast %738 : f32 to vector<1x8x8xf32>
    %740 = arith.mulf %312, %739 : vector<1x8x8xf32>
    %741 = arith.addf %737, %740 : vector<1x8x8xf32>
    %c97 = arith.constant 97 : index
    %742 = memref.load %arg4[%c97] : memref<288xf32, #tpu.memory_space<smem>>
    %743 = vector.broadcast %742 : f32 to vector<1x8x8xf32>
    %744 = arith.mulf %314, %743 : vector<1x8x8xf32>
    %745 = arith.addf %741, %744 : vector<1x8x8xf32>
    %c98 = arith.constant 98 : index
    %746 = memref.load %arg4[%c98] : memref<288xf32, #tpu.memory_space<smem>>
    %747 = vector.broadcast %746 : f32 to vector<1x8x8xf32>
    %748 = arith.mulf %316, %747 : vector<1x8x8xf32>
    %749 = arith.addf %745, %748 : vector<1x8x8xf32>
    %c99 = arith.constant 99 : index
    %750 = memref.load %arg4[%c99] : memref<288xf32, #tpu.memory_space<smem>>
    %751 = vector.broadcast %750 : f32 to vector<1x8x8xf32>
    %752 = arith.mulf %318, %751 : vector<1x8x8xf32>
    %753 = arith.addf %749, %752 : vector<1x8x8xf32>
    %c100 = arith.constant 100 : index
    %754 = memref.load %arg4[%c100] : memref<288xf32, #tpu.memory_space<smem>>
    %755 = vector.broadcast %754 : f32 to vector<1x8x8xf32>
    %756 = arith.mulf %320, %755 : vector<1x8x8xf32>
    %757 = arith.addf %753, %756 : vector<1x8x8xf32>
    %c101 = arith.constant 101 : index
    %758 = memref.load %arg4[%c101] : memref<288xf32, #tpu.memory_space<smem>>
    %759 = vector.broadcast %758 : f32 to vector<1x8x8xf32>
    %760 = arith.mulf %322, %759 : vector<1x8x8xf32>
    %761 = arith.addf %757, %760 : vector<1x8x8xf32>
    %c102 = arith.constant 102 : index
    %762 = memref.load %arg4[%c102] : memref<288xf32, #tpu.memory_space<smem>>
    %763 = vector.broadcast %762 : f32 to vector<1x8x8xf32>
    %764 = arith.mulf %324, %763 : vector<1x8x8xf32>
    %765 = arith.addf %761, %764 : vector<1x8x8xf32>
    %c103 = arith.constant 103 : index
    %766 = memref.load %arg4[%c103] : memref<288xf32, #tpu.memory_space<smem>>
    %767 = vector.broadcast %766 : f32 to vector<1x8x8xf32>
    %768 = arith.mulf %326, %767 : vector<1x8x8xf32>
    %769 = arith.addf %765, %768 : vector<1x8x8xf32>
    %c104 = arith.constant 104 : index
    %770 = memref.load %arg4[%c104] : memref<288xf32, #tpu.memory_space<smem>>
    %771 = vector.broadcast %770 : f32 to vector<1x8x8xf32>
    %772 = arith.mulf %328, %771 : vector<1x8x8xf32>
    %773 = arith.addf %769, %772 : vector<1x8x8xf32>
    %c105 = arith.constant 105 : index
    %774 = memref.load %arg4[%c105] : memref<288xf32, #tpu.memory_space<smem>>
    %775 = vector.broadcast %774 : f32 to vector<1x8x8xf32>
    %776 = arith.mulf %330, %775 : vector<1x8x8xf32>
    %777 = arith.addf %773, %776 : vector<1x8x8xf32>
    %c106 = arith.constant 106 : index
    %778 = memref.load %arg4[%c106] : memref<288xf32, #tpu.memory_space<smem>>
    %779 = vector.broadcast %778 : f32 to vector<1x8x8xf32>
    %780 = arith.mulf %332, %779 : vector<1x8x8xf32>
    %781 = arith.addf %777, %780 : vector<1x8x8xf32>
    %c107 = arith.constant 107 : index
    %782 = memref.load %arg4[%c107] : memref<288xf32, #tpu.memory_space<smem>>
    %783 = vector.broadcast %782 : f32 to vector<1x8x8xf32>
    %784 = arith.mulf %334, %783 : vector<1x8x8xf32>
    %785 = arith.addf %781, %784 : vector<1x8x8xf32>
    %c2_407 = arith.constant 2 : index
    %786 = memref.load %arg5[%c2_407] : memref<8xf32, #tpu.memory_space<smem>>
    %787 = vector.broadcast %786 : f32 to vector<1x8x8xf32>
    %788 = arith.addf %785, %787 : vector<1x8x8xf32>
    %cst_408 = arith.constant 0.000000e+00 : f32
    %789 = vector.broadcast %cst_408 : f32 to vector<1x8x8xf32>
    %790 = arith.cmpf oge, %788, %789 : vector<1x8x8xf32>
    %cst_409 = arith.constant 0.00999999977 : f32
    %791 = vector.broadcast %cst_409 : f32 to vector<1x8x8xf32>
    %792 = arith.mulf %791, %788 : vector<1x8x8xf32>
    %793 = arith.select %790, %788, %792 : vector<1x8x8xi1>, vector<1x8x8xf32>
    %c0_410 = arith.constant 0 : index
    %c2_411 = arith.constant 2 : index
    %c0_412 = arith.constant 0 : index
    %c0_413 = arith.constant 0 : index
    %794 = vector.load %arg17[%c0_410, %c2_411, %c0_412, %c0_413] : memref<1x8x8x8xf32, #tpu.memory_space<vmem>>, vector<1x1x8x8xf32>
    %795 = vector.shape_cast %794 : vector<1x1x8x8xf32> to vector<1x8x8xf32>
    %796 = vector.shape_cast %793 : vector<1x8x8xf32> to vector<1x1x8x8xf32>
    tpu.vector_store %arg17[%c0_410, %c2_411, %c0_412, %c0_413], %796 {strides = array<i32>} : memref<1x8x8x8xf32, #tpu.memory_space<vmem>>, vector<1x1x8x8xf32>,
    %c108 = arith.constant 108 : index
    %797 = memref.load %arg4[%c108] : memref<288xf32, #tpu.memory_space<smem>>
    %798 = vector.broadcast %797 : f32 to vector<1x8x8xf32>
    %799 = arith.mulf %264, %798 : vector<1x8x8xf32>
    %c109 = arith.constant 109 : index
    %800 = memref.load %arg4[%c109] : memref<288xf32, #tpu.memory_space<smem>>
    %801 = vector.broadcast %800 : f32 to vector<1x8x8xf32>
    %802 = arith.mulf %266, %801 : vector<1x8x8xf32>
    %803 = arith.addf %799, %802 : vector<1x8x8xf32>
    %c110 = arith.constant 110 : index
    %804 = memref.load %arg4[%c110] : memref<288xf32, #tpu.memory_space<smem>>
    %805 = vector.broadcast %804 : f32 to vector<1x8x8xf32>
    %806 = arith.mulf %268, %805 : vector<1x8x8xf32>
    %807 = arith.addf %803, %806 : vector<1x8x8xf32>
    %c111 = arith.constant 111 : index
    %808 = memref.load %arg4[%c111] : memref<288xf32, #tpu.memory_space<smem>>
    %809 = vector.broadcast %808 : f32 to vector<1x8x8xf32>
    %810 = arith.mulf %270, %809 : vector<1x8x8xf32>
    %811 = arith.addf %807, %810 : vector<1x8x8xf32>
    %c112 = arith.constant 112 : index
    %812 = memref.load %arg4[%c112] : memref<288xf32, #tpu.memory_space<smem>>
    %813 = vector.broadcast %812 : f32 to vector<1x8x8xf32>
    %814 = arith.mulf %272, %813 : vector<1x8x8xf32>
    %815 = arith.addf %811, %814 : vector<1x8x8xf32>
    %c113 = arith.constant 113 : index
    %816 = memref.load %arg4[%c113] : memref<288xf32, #tpu.memory_space<smem>>
    %817 = vector.broadcast %816 : f32 to vector<1x8x8xf32>
    %818 = arith.mulf %274, %817 : vector<1x8x8xf32>
    %819 = arith.addf %815, %818 : vector<1x8x8xf32>
    %c114 = arith.constant 114 : index
    %820 = memref.load %arg4[%c114] : memref<288xf32, #tpu.memory_space<smem>>
    %821 = vector.broadcast %820 : f32 to vector<1x8x8xf32>
    %822 = arith.mulf %276, %821 : vector<1x8x8xf32>
    %823 = arith.addf %819, %822 : vector<1x8x8xf32>
    %c115 = arith.constant 115 : index
    %824 = memref.load %arg4[%c115] : memref<288xf32, #tpu.memory_space<smem>>
    %825 = vector.broadcast %824 : f32 to vector<1x8x8xf32>
    %826 = arith.mulf %278, %825 : vector<1x8x8xf32>
    %827 = arith.addf %823, %826 : vector<1x8x8xf32>
    %c116 = arith.constant 116 : index
    %828 = memref.load %arg4[%c116] : memref<288xf32, #tpu.memory_space<smem>>
    %829 = vector.broadcast %828 : f32 to vector<1x8x8xf32>
    %830 = arith.mulf %280, %829 : vector<1x8x8xf32>
    %831 = arith.addf %827, %830 : vector<1x8x8xf32>
    %c117 = arith.constant 117 : index
    %832 = memref.load %arg4[%c117] : memref<288xf32, #tpu.memory_space<smem>>
    %833 = vector.broadcast %832 : f32 to vector<1x8x8xf32>
    %834 = arith.mulf %282, %833 : vector<1x8x8xf32>
    %835 = arith.addf %831, %834 : vector<1x8x8xf32>
    %c118 = arith.constant 118 : index
    %836 = memref.load %arg4[%c118] : memref<288xf32, #tpu.memory_space<smem>>
    %837 = vector.broadcast %836 : f32 to vector<1x8x8xf32>
    %838 = arith.mulf %284, %837 : vector<1x8x8xf32>
    %839 = arith.addf %835, %838 : vector<1x8x8xf32>
    %c119 = arith.constant 119 : index
    %840 = memref.load %arg4[%c119] : memref<288xf32, #tpu.memory_space<smem>>
    %841 = vector.broadcast %840 : f32 to vector<1x8x8xf32>
    %842 = arith.mulf %286, %841 : vector<1x8x8xf32>
    %843 = arith.addf %839, %842 : vector<1x8x8xf32>
    %c120 = arith.constant 120 : index
    %844 = memref.load %arg4[%c120] : memref<288xf32, #tpu.memory_space<smem>>
    %845 = vector.broadcast %844 : f32 to vector<1x8x8xf32>
    %846 = arith.mulf %288, %845 : vector<1x8x8xf32>
    %847 = arith.addf %843, %846 : vector<1x8x8xf32>
    %c121 = arith.constant 121 : index
    %848 = memref.load %arg4[%c121] : memref<288xf32, #tpu.memory_space<smem>>
    %849 = vector.broadcast %848 : f32 to vector<1x8x8xf32>
    %850 = arith.mulf %290, %849 : vector<1x8x8xf32>
    %851 = arith.addf %847, %850 : vector<1x8x8xf32>
    %c122 = arith.constant 122 : index
    %852 = memref.load %arg4[%c122] : memref<288xf32, #tpu.memory_space<smem>>
    %853 = vector.broadcast %852 : f32 to vector<1x8x8xf32>
    %854 = arith.mulf %292, %853 : vector<1x8x8xf32>
    %855 = arith.addf %851, %854 : vector<1x8x8xf32>
    %c123 = arith.constant 123 : index
    %856 = memref.load %arg4[%c123] : memref<288xf32, #tpu.memory_space<smem>>
    %857 = vector.broadcast %856 : f32 to vector<1x8x8xf32>
    %858 = arith.mulf %294, %857 : vector<1x8x8xf32>
    %859 = arith.addf %855, %858 : vector<1x8x8xf32>
    %c124 = arith.constant 124 : index
    %860 = memref.load %arg4[%c124] : memref<288xf32, #tpu.memory_space<smem>>
    %861 = vector.broadcast %860 : f32 to vector<1x8x8xf32>
    %862 = arith.mulf %296, %861 : vector<1x8x8xf32>
    %863 = arith.addf %859, %862 : vector<1x8x8xf32>
    %c125 = arith.constant 125 : index
    %864 = memref.load %arg4[%c125] : memref<288xf32, #tpu.memory_space<smem>>
    %865 = vector.broadcast %864 : f32 to vector<1x8x8xf32>
    %866 = arith.mulf %298, %865 : vector<1x8x8xf32>
    %867 = arith.addf %863, %866 : vector<1x8x8xf32>
    %c126 = arith.constant 126 : index
    %868 = memref.load %arg4[%c126] : memref<288xf32, #tpu.memory_space<smem>>
    %869 = vector.broadcast %868 : f32 to vector<1x8x8xf32>
    %870 = arith.mulf %300, %869 : vector<1x8x8xf32>
    %871 = arith.addf %867, %870 : vector<1x8x8xf32>
    %c127 = arith.constant 127 : index
    %872 = memref.load %arg4[%c127] : memref<288xf32, #tpu.memory_space<smem>>
    %873 = vector.broadcast %872 : f32 to vector<1x8x8xf32>
    %874 = arith.mulf %302, %873 : vector<1x8x8xf32>
    %875 = arith.addf %871, %874 : vector<1x8x8xf32>
    %c128 = arith.constant 128 : index
    %876 = memref.load %arg4[%c128] : memref<288xf32, #tpu.memory_space<smem>>
    %877 = vector.broadcast %876 : f32 to vector<1x8x8xf32>
    %878 = arith.mulf %304, %877 : vector<1x8x8xf32>
    %879 = arith.addf %875, %878 : vector<1x8x8xf32>
    %c129 = arith.constant 129 : index
    %880 = memref.load %arg4[%c129] : memref<288xf32, #tpu.memory_space<smem>>
    %881 = vector.broadcast %880 : f32 to vector<1x8x8xf32>
    %882 = arith.mulf %306, %881 : vector<1x8x8xf32>
    %883 = arith.addf %879, %882 : vector<1x8x8xf32>
    %c130 = arith.constant 130 : index
    %884 = memref.load %arg4[%c130] : memref<288xf32, #tpu.memory_space<smem>>
    %885 = vector.broadcast %884 : f32 to vector<1x8x8xf32>
    %886 = arith.mulf %308, %885 : vector<1x8x8xf32>
    %887 = arith.addf %883, %886 : vector<1x8x8xf32>
    %c131 = arith.constant 131 : index
    %888 = memref.load %arg4[%c131] : memref<288xf32, #tpu.memory_space<smem>>
    %889 = vector.broadcast %888 : f32 to vector<1x8x8xf32>
    %890 = arith.mulf %310, %889 : vector<1x8x8xf32>
    %891 = arith.addf %887, %890 : vector<1x8x8xf32>
    %c132 = arith.constant 132 : index
    %892 = memref.load %arg4[%c132] : memref<288xf32, #tpu.memory_space<smem>>
    %893 = vector.broadcast %892 : f32 to vector<1x8x8xf32>
    %894 = arith.mulf %312, %893 : vector<1x8x8xf32>
    %895 = arith.addf %891, %894 : vector<1x8x8xf32>
    %c133 = arith.constant 133 : index
    %896 = memref.load %arg4[%c133] : memref<288xf32, #tpu.memory_space<smem>>
    %897 = vector.broadcast %896 : f32 to vector<1x8x8xf32>
    %898 = arith.mulf %314, %897 : vector<1x8x8xf32>
    %899 = arith.addf %895, %898 : vector<1x8x8xf32>
    %c134 = arith.constant 134 : index
    %900 = memref.load %arg4[%c134] : memref<288xf32, #tpu.memory_space<smem>>
    %901 = vector.broadcast %900 : f32 to vector<1x8x8xf32>
    %902 = arith.mulf %316, %901 : vector<1x8x8xf32>
    %903 = arith.addf %899, %902 : vector<1x8x8xf32>
    %c135 = arith.constant 135 : index
    %904 = memref.load %arg4[%c135] : memref<288xf32, #tpu.memory_space<smem>>
    %905 = vector.broadcast %904 : f32 to vector<1x8x8xf32>
    %906 = arith.mulf %318, %905 : vector<1x8x8xf32>
    %907 = arith.addf %903, %906 : vector<1x8x8xf32>
    %c136 = arith.constant 136 : index
    %908 = memref.load %arg4[%c136] : memref<288xf32, #tpu.memory_space<smem>>
    %909 = vector.broadcast %908 : f32 to vector<1x8x8xf32>
    %910 = arith.mulf %320, %909 : vector<1x8x8xf32>
    %911 = arith.addf %907, %910 : vector<1x8x8xf32>
    %c137 = arith.constant 137 : index
    %912 = memref.load %arg4[%c137] : memref<288xf32, #tpu.memory_space<smem>>
    %913 = vector.broadcast %912 : f32 to vector<1x8x8xf32>
    %914 = arith.mulf %322, %913 : vector<1x8x8xf32>
    %915 = arith.addf %911, %914 : vector<1x8x8xf32>
    %c138 = arith.constant 138 : index
    %916 = memref.load %arg4[%c138] : memref<288xf32, #tpu.memory_space<smem>>
    %917 = vector.broadcast %916 : f32 to vector<1x8x8xf32>
    %918 = arith.mulf %324, %917 : vector<1x8x8xf32>
    %919 = arith.addf %915, %918 : vector<1x8x8xf32>
    %c139 = arith.constant 139 : index
    %920 = memref.load %arg4[%c139] : memref<288xf32, #tpu.memory_space<smem>>
    %921 = vector.broadcast %920 : f32 to vector<1x8x8xf32>
    %922 = arith.mulf %326, %921 : vector<1x8x8xf32>
    %923 = arith.addf %919, %922 : vector<1x8x8xf32>
    %c140 = arith.constant 140 : index
    %924 = memref.load %arg4[%c140] : memref<288xf32, #tpu.memory_space<smem>>
    %925 = vector.broadcast %924 : f32 to vector<1x8x8xf32>
    %926 = arith.mulf %328, %925 : vector<1x8x8xf32>
    %927 = arith.addf %923, %926 : vector<1x8x8xf32>
    %c141 = arith.constant 141 : index
    %928 = memref.load %arg4[%c141] : memref<288xf32, #tpu.memory_space<smem>>
    %929 = vector.broadcast %928 : f32 to vector<1x8x8xf32>
    %930 = arith.mulf %330, %929 : vector<1x8x8xf32>
    %931 = arith.addf %927, %930 : vector<1x8x8xf32>
    %c142 = arith.constant 142 : index
    %932 = memref.load %arg4[%c142] : memref<288xf32, #tpu.memory_space<smem>>
    %933 = vector.broadcast %932 : f32 to vector<1x8x8xf32>
    %934 = arith.mulf %332, %933 : vector<1x8x8xf32>
    %935 = arith.addf %931, %934 : vector<1x8x8xf32>
    %c143 = arith.constant 143 : index
    %936 = memref.load %arg4[%c143] : memref<288xf32, #tpu.memory_space<smem>>
    %937 = vector.broadcast %936 : f32 to vector<1x8x8xf32>
    %938 = arith.mulf %334, %937 : vector<1x8x8xf32>
    %939 = arith.addf %935, %938 : vector<1x8x8xf32>
    %c3_414 = arith.constant 3 : index
    %940 = memref.load %arg5[%c3_414] : memref<8xf32, #tpu.memory_space<smem>>
    %941 = vector.broadcast %940 : f32 to vector<1x8x8xf32>
    %942 = arith.addf %939, %941 : vector<1x8x8xf32>
    %cst_415 = arith.constant 0.000000e+00 : f32
    %943 = vector.broadcast %cst_415 : f32 to vector<1x8x8xf32>
    %944 = arith.cmpf oge, %942, %943 : vector<1x8x8xf32>
    %cst_416 = arith.constant 0.00999999977 : f32
    %945 = vector.broadcast %cst_416 : f32 to vector<1x8x8xf32>
    %946 = arith.mulf %945, %942 : vector<1x8x8xf32>
    %947 = arith.select %944, %942, %946 : vector<1x8x8xi1>, vector<1x8x8xf32>
    %c0_417 = arith.constant 0 : index
    %c3_418 = arith.constant 3 : index
    %c0_419 = arith.constant 0 : index
    %c0_420 = arith.constant 0 : index
    %948 = vector.load %arg17[%c0_417, %c3_418, %c0_419, %c0_420] : memref<1x8x8x8xf32, #tpu.memory_space<vmem>>, vector<1x1x8x8xf32>
    %949 = vector.shape_cast %948 : vector<1x1x8x8xf32> to vector<1x8x8xf32>
    %950 = vector.shape_cast %947 : vector<1x8x8xf32> to vector<1x1x8x8xf32>
    tpu.vector_store %arg17[%c0_417, %c3_418, %c0_419, %c0_420], %950 {strides = array<i32>} : memref<1x8x8x8xf32, #tpu.memory_space<vmem>>, vector<1x1x8x8xf32>,
    %c144 = arith.constant 144 : index
    %951 = memref.load %arg4[%c144] : memref<288xf32, #tpu.memory_space<smem>>
    %952 = vector.broadcast %951 : f32 to vector<1x8x8xf32>
    %953 = arith.mulf %264, %952 : vector<1x8x8xf32>
    %c145 = arith.constant 145 : index
    %954 = memref.load %arg4[%c145] : memref<288xf32, #tpu.memory_space<smem>>
    %955 = vector.broadcast %954 : f32 to vector<1x8x8xf32>
    %956 = arith.mulf %266, %955 : vector<1x8x8xf32>
    %957 = arith.addf %953, %956 : vector<1x8x8xf32>
    %c146 = arith.constant 146 : index
    %958 = memref.load %arg4[%c146] : memref<288xf32, #tpu.memory_space<smem>>
    %959 = vector.broadcast %958 : f32 to vector<1x8x8xf32>
    %960 = arith.mulf %268, %959 : vector<1x8x8xf32>
    %961 = arith.addf %957, %960 : vector<1x8x8xf32>
    %c147 = arith.constant 147 : index
    %962 = memref.load %arg4[%c147] : memref<288xf32, #tpu.memory_space<smem>>
    %963 = vector.broadcast %962 : f32 to vector<1x8x8xf32>
    %964 = arith.mulf %270, %963 : vector<1x8x8xf32>
    %965 = arith.addf %961, %964 : vector<1x8x8xf32>
    %c148 = arith.constant 148 : index
    %966 = memref.load %arg4[%c148] : memref<288xf32, #tpu.memory_space<smem>>
    %967 = vector.broadcast %966 : f32 to vector<1x8x8xf32>
    %968 = arith.mulf %272, %967 : vector<1x8x8xf32>
    %969 = arith.addf %965, %968 : vector<1x8x8xf32>
    %c149 = arith.constant 149 : index
    %970 = memref.load %arg4[%c149] : memref<288xf32, #tpu.memory_space<smem>>
    %971 = vector.broadcast %970 : f32 to vector<1x8x8xf32>
    %972 = arith.mulf %274, %971 : vector<1x8x8xf32>
    %973 = arith.addf %969, %972 : vector<1x8x8xf32>
    %c150 = arith.constant 150 : index
    %974 = memref.load %arg4[%c150] : memref<288xf32, #tpu.memory_space<smem>>
    %975 = vector.broadcast %974 : f32 to vector<1x8x8xf32>
    %976 = arith.mulf %276, %975 : vector<1x8x8xf32>
    %977 = arith.addf %973, %976 : vector<1x8x8xf32>
    %c151 = arith.constant 151 : index
    %978 = memref.load %arg4[%c151] : memref<288xf32, #tpu.memory_space<smem>>
    %979 = vector.broadcast %978 : f32 to vector<1x8x8xf32>
    %980 = arith.mulf %278, %979 : vector<1x8x8xf32>
    %981 = arith.addf %977, %980 : vector<1x8x8xf32>
    %c152 = arith.constant 152 : index
    %982 = memref.load %arg4[%c152] : memref<288xf32, #tpu.memory_space<smem>>
    %983 = vector.broadcast %982 : f32 to vector<1x8x8xf32>
    %984 = arith.mulf %280, %983 : vector<1x8x8xf32>
    %985 = arith.addf %981, %984 : vector<1x8x8xf32>
    %c153 = arith.constant 153 : index
    %986 = memref.load %arg4[%c153] : memref<288xf32, #tpu.memory_space<smem>>
    %987 = vector.broadcast %986 : f32 to vector<1x8x8xf32>
    %988 = arith.mulf %282, %987 : vector<1x8x8xf32>
    %989 = arith.addf %985, %988 : vector<1x8x8xf32>
    %c154 = arith.constant 154 : index
    %990 = memref.load %arg4[%c154] : memref<288xf32, #tpu.memory_space<smem>>
    %991 = vector.broadcast %990 : f32 to vector<1x8x8xf32>
    %992 = arith.mulf %284, %991 : vector<1x8x8xf32>
    %993 = arith.addf %989, %992 : vector<1x8x8xf32>
    %c155 = arith.constant 155 : index
    %994 = memref.load %arg4[%c155] : memref<288xf32, #tpu.memory_space<smem>>
    %995 = vector.broadcast %994 : f32 to vector<1x8x8xf32>
    %996 = arith.mulf %286, %995 : vector<1x8x8xf32>
    %997 = arith.addf %993, %996 : vector<1x8x8xf32>
    %c156 = arith.constant 156 : index
    %998 = memref.load %arg4[%c156] : memref<288xf32, #tpu.memory_space<smem>>
    %999 = vector.broadcast %998 : f32 to vector<1x8x8xf32>
    %1000 = arith.mulf %288, %999 : vector<1x8x8xf32>
    %1001 = arith.addf %997, %1000 : vector<1x8x8xf32>
    %c157 = arith.constant 157 : index
    %1002 = memref.load %arg4[%c157] : memref<288xf32, #tpu.memory_space<smem>>
    %1003 = vector.broadcast %1002 : f32 to vector<1x8x8xf32>
    %1004 = arith.mulf %290, %1003 : vector<1x8x8xf32>
    %1005 = arith.addf %1001, %1004 : vector<1x8x8xf32>
    %c158 = arith.constant 158 : index
    %1006 = memref.load %arg4[%c158] : memref<288xf32, #tpu.memory_space<smem>>
    %1007 = vector.broadcast %1006 : f32 to vector<1x8x8xf32>
    %1008 = arith.mulf %292, %1007 : vector<1x8x8xf32>
    %1009 = arith.addf %1005, %1008 : vector<1x8x8xf32>
    %c159 = arith.constant 159 : index
    %1010 = memref.load %arg4[%c159] : memref<288xf32, #tpu.memory_space<smem>>
    %1011 = vector.broadcast %1010 : f32 to vector<1x8x8xf32>
    %1012 = arith.mulf %294, %1011 : vector<1x8x8xf32>
    %1013 = arith.addf %1009, %1012 : vector<1x8x8xf32>
    %c160 = arith.constant 160 : index
    %1014 = memref.load %arg4[%c160] : memref<288xf32, #tpu.memory_space<smem>>
    %1015 = vector.broadcast %1014 : f32 to vector<1x8x8xf32>
    %1016 = arith.mulf %296, %1015 : vector<1x8x8xf32>
    %1017 = arith.addf %1013, %1016 : vector<1x8x8xf32>
    %c161 = arith.constant 161 : index
    %1018 = memref.load %arg4[%c161] : memref<288xf32, #tpu.memory_space<smem>>
    %1019 = vector.broadcast %1018 : f32 to vector<1x8x8xf32>
    %1020 = arith.mulf %298, %1019 : vector<1x8x8xf32>
    %1021 = arith.addf %1017, %1020 : vector<1x8x8xf32>
    %c162 = arith.constant 162 : index
    %1022 = memref.load %arg4[%c162] : memref<288xf32, #tpu.memory_space<smem>>
    %1023 = vector.broadcast %1022 : f32 to vector<1x8x8xf32>
    %1024 = arith.mulf %300, %1023 : vector<1x8x8xf32>
    %1025 = arith.addf %1021, %1024 : vector<1x8x8xf32>
    %c163 = arith.constant 163 : index
    %1026 = memref.load %arg4[%c163] : memref<288xf32, #tpu.memory_space<smem>>
    %1027 = vector.broadcast %1026 : f32 to vector<1x8x8xf32>
    %1028 = arith.mulf %302, %1027 : vector<1x8x8xf32>
    %1029 = arith.addf %1025, %1028 : vector<1x8x8xf32>
    %c164 = arith.constant 164 : index
    %1030 = memref.load %arg4[%c164] : memref<288xf32, #tpu.memory_space<smem>>
    %1031 = vector.broadcast %1030 : f32 to vector<1x8x8xf32>
    %1032 = arith.mulf %304, %1031 : vector<1x8x8xf32>
    %1033 = arith.addf %1029, %1032 : vector<1x8x8xf32>
    %c165 = arith.constant 165 : index
    %1034 = memref.load %arg4[%c165] : memref<288xf32, #tpu.memory_space<smem>>
    %1035 = vector.broadcast %1034 : f32 to vector<1x8x8xf32>
    %1036 = arith.mulf %306, %1035 : vector<1x8x8xf32>
    %1037 = arith.addf %1033, %1036 : vector<1x8x8xf32>
    %c166 = arith.constant 166 : index
    %1038 = memref.load %arg4[%c166] : memref<288xf32, #tpu.memory_space<smem>>
    %1039 = vector.broadcast %1038 : f32 to vector<1x8x8xf32>
    %1040 = arith.mulf %308, %1039 : vector<1x8x8xf32>
    %1041 = arith.addf %1037, %1040 : vector<1x8x8xf32>
    %c167 = arith.constant 167 : index
    %1042 = memref.load %arg4[%c167] : memref<288xf32, #tpu.memory_space<smem>>
    %1043 = vector.broadcast %1042 : f32 to vector<1x8x8xf32>
    %1044 = arith.mulf %310, %1043 : vector<1x8x8xf32>
    %1045 = arith.addf %1041, %1044 : vector<1x8x8xf32>
    %c168 = arith.constant 168 : index
    %1046 = memref.load %arg4[%c168] : memref<288xf32, #tpu.memory_space<smem>>
    %1047 = vector.broadcast %1046 : f32 to vector<1x8x8xf32>
    %1048 = arith.mulf %312, %1047 : vector<1x8x8xf32>
    %1049 = arith.addf %1045, %1048 : vector<1x8x8xf32>
    %c169 = arith.constant 169 : index
    %1050 = memref.load %arg4[%c169] : memref<288xf32, #tpu.memory_space<smem>>
    %1051 = vector.broadcast %1050 : f32 to vector<1x8x8xf32>
    %1052 = arith.mulf %314, %1051 : vector<1x8x8xf32>
    %1053 = arith.addf %1049, %1052 : vector<1x8x8xf32>
    %c170 = arith.constant 170 : index
    %1054 = memref.load %arg4[%c170] : memref<288xf32, #tpu.memory_space<smem>>
    %1055 = vector.broadcast %1054 : f32 to vector<1x8x8xf32>
    %1056 = arith.mulf %316, %1055 : vector<1x8x8xf32>
    %1057 = arith.addf %1053, %1056 : vector<1x8x8xf32>
    %c171 = arith.constant 171 : index
    %1058 = memref.load %arg4[%c171] : memref<288xf32, #tpu.memory_space<smem>>
    %1059 = vector.broadcast %1058 : f32 to vector<1x8x8xf32>
    %1060 = arith.mulf %318, %1059 : vector<1x8x8xf32>
    %1061 = arith.addf %1057, %1060 : vector<1x8x8xf32>
    %c172 = arith.constant 172 : index
    %1062 = memref.load %arg4[%c172] : memref<288xf32, #tpu.memory_space<smem>>
    %1063 = vector.broadcast %1062 : f32 to vector<1x8x8xf32>
    %1064 = arith.mulf %320, %1063 : vector<1x8x8xf32>
    %1065 = arith.addf %1061, %1064 : vector<1x8x8xf32>
    %c173 = arith.constant 173 : index
    %1066 = memref.load %arg4[%c173] : memref<288xf32, #tpu.memory_space<smem>>
    %1067 = vector.broadcast %1066 : f32 to vector<1x8x8xf32>
    %1068 = arith.mulf %322, %1067 : vector<1x8x8xf32>
    %1069 = arith.addf %1065, %1068 : vector<1x8x8xf32>
    %c174 = arith.constant 174 : index
    %1070 = memref.load %arg4[%c174] : memref<288xf32, #tpu.memory_space<smem>>
    %1071 = vector.broadcast %1070 : f32 to vector<1x8x8xf32>
    %1072 = arith.mulf %324, %1071 : vector<1x8x8xf32>
    %1073 = arith.addf %1069, %1072 : vector<1x8x8xf32>
    %c175 = arith.constant 175 : index
    %1074 = memref.load %arg4[%c175] : memref<288xf32, #tpu.memory_space<smem>>
    %1075 = vector.broadcast %1074 : f32 to vector<1x8x8xf32>
    %1076 = arith.mulf %326, %1075 : vector<1x8x8xf32>
    %1077 = arith.addf %1073, %1076 : vector<1x8x8xf32>
    %c176 = arith.constant 176 : index
    %1078 = memref.load %arg4[%c176] : memref<288xf32, #tpu.memory_space<smem>>
    %1079 = vector.broadcast %1078 : f32 to vector<1x8x8xf32>
    %1080 = arith.mulf %328, %1079 : vector<1x8x8xf32>
    %1081 = arith.addf %1077, %1080 : vector<1x8x8xf32>
    %c177 = arith.constant 177 : index
    %1082 = memref.load %arg4[%c177] : memref<288xf32, #tpu.memory_space<smem>>
    %1083 = vector.broadcast %1082 : f32 to vector<1x8x8xf32>
    %1084 = arith.mulf %330, %1083 : vector<1x8x8xf32>
    %1085 = arith.addf %1081, %1084 : vector<1x8x8xf32>
    %c178 = arith.constant 178 : index
    %1086 = memref.load %arg4[%c178] : memref<288xf32, #tpu.memory_space<smem>>
    %1087 = vector.broadcast %1086 : f32 to vector<1x8x8xf32>
    %1088 = arith.mulf %332, %1087 : vector<1x8x8xf32>
    %1089 = arith.addf %1085, %1088 : vector<1x8x8xf32>
    %c179 = arith.constant 179 : index
    %1090 = memref.load %arg4[%c179] : memref<288xf32, #tpu.memory_space<smem>>
    %1091 = vector.broadcast %1090 : f32 to vector<1x8x8xf32>
    %1092 = arith.mulf %334, %1091 : vector<1x8x8xf32>
    %1093 = arith.addf %1089, %1092 : vector<1x8x8xf32>
    %c4_421 = arith.constant 4 : index
    %1094 = memref.load %arg5[%c4_421] : memref<8xf32, #tpu.memory_space<smem>>
    %1095 = vector.broadcast %1094 : f32 to vector<1x8x8xf32>
    %1096 = arith.addf %1093, %1095 : vector<1x8x8xf32>
    %cst_422 = arith.constant 0.000000e+00 : f32
    %1097 = vector.broadcast %cst_422 : f32 to vector<1x8x8xf32>
    %1098 = arith.cmpf oge, %1096, %1097 : vector<1x8x8xf32>
    %cst_423 = arith.constant 0.00999999977 : f32
    %1099 = vector.broadcast %cst_423 : f32 to vector<1x8x8xf32>
    %1100 = arith.mulf %1099, %1096 : vector<1x8x8xf32>
    %1101 = arith.select %1098, %1096, %1100 : vector<1x8x8xi1>, vector<1x8x8xf32>
    %c0_424 = arith.constant 0 : index
    %c4_425 = arith.constant 4 : index
    %c0_426 = arith.constant 0 : index
    %c0_427 = arith.constant 0 : index
    %1102 = vector.load %arg17[%c0_424, %c4_425, %c0_426, %c0_427] : memref<1x8x8x8xf32, #tpu.memory_space<vmem>>, vector<1x1x8x8xf32>
    %1103 = vector.shape_cast %1102 : vector<1x1x8x8xf32> to vector<1x8x8xf32>
    %1104 = vector.shape_cast %1101 : vector<1x8x8xf32> to vector<1x1x8x8xf32>
    tpu.vector_store %arg17[%c0_424, %c4_425, %c0_426, %c0_427], %1104 {strides = array<i32>} : memref<1x8x8x8xf32, #tpu.memory_space<vmem>>, vector<1x1x8x8xf32>,
    %c180 = arith.constant 180 : index
    %1105 = memref.load %arg4[%c180] : memref<288xf32, #tpu.memory_space<smem>>
    %1106 = vector.broadcast %1105 : f32 to vector<1x8x8xf32>
    %1107 = arith.mulf %264, %1106 : vector<1x8x8xf32>
    %c181 = arith.constant 181 : index
    %1108 = memref.load %arg4[%c181] : memref<288xf32, #tpu.memory_space<smem>>
    %1109 = vector.broadcast %1108 : f32 to vector<1x8x8xf32>
    %1110 = arith.mulf %266, %1109 : vector<1x8x8xf32>
    %1111 = arith.addf %1107, %1110 : vector<1x8x8xf32>
    %c182 = arith.constant 182 : index
    %1112 = memref.load %arg4[%c182] : memref<288xf32, #tpu.memory_space<smem>>
    %1113 = vector.broadcast %1112 : f32 to vector<1x8x8xf32>
    %1114 = arith.mulf %268, %1113 : vector<1x8x8xf32>
    %1115 = arith.addf %1111, %1114 : vector<1x8x8xf32>
    %c183 = arith.constant 183 : index
    %1116 = memref.load %arg4[%c183] : memref<288xf32, #tpu.memory_space<smem>>
    %1117 = vector.broadcast %1116 : f32 to vector<1x8x8xf32>
    %1118 = arith.mulf %270, %1117 : vector<1x8x8xf32>
    %1119 = arith.addf %1115, %1118 : vector<1x8x8xf32>
    %c184 = arith.constant 184 : index
    %1120 = memref.load %arg4[%c184] : memref<288xf32, #tpu.memory_space<smem>>
    %1121 = vector.broadcast %1120 : f32 to vector<1x8x8xf32>
    %1122 = arith.mulf %272, %1121 : vector<1x8x8xf32>
    %1123 = arith.addf %1119, %1122 : vector<1x8x8xf32>
    %c185 = arith.constant 185 : index
    %1124 = memref.load %arg4[%c185] : memref<288xf32, #tpu.memory_space<smem>>
    %1125 = vector.broadcast %1124 : f32 to vector<1x8x8xf32>
    %1126 = arith.mulf %274, %1125 : vector<1x8x8xf32>
    %1127 = arith.addf %1123, %1126 : vector<1x8x8xf32>
    %c186 = arith.constant 186 : index
    %1128 = memref.load %arg4[%c186] : memref<288xf32, #tpu.memory_space<smem>>
    %1129 = vector.broadcast %1128 : f32 to vector<1x8x8xf32>
    %1130 = arith.mulf %276, %1129 : vector<1x8x8xf32>
    %1131 = arith.addf %1127, %1130 : vector<1x8x8xf32>
    %c187 = arith.constant 187 : index
    %1132 = memref.load %arg4[%c187] : memref<288xf32, #tpu.memory_space<smem>>
    %1133 = vector.broadcast %1132 : f32 to vector<1x8x8xf32>
    %1134 = arith.mulf %278, %1133 : vector<1x8x8xf32>
    %1135 = arith.addf %1131, %1134 : vector<1x8x8xf32>
    %c188 = arith.constant 188 : index
    %1136 = memref.load %arg4[%c188] : memref<288xf32, #tpu.memory_space<smem>>
    %1137 = vector.broadcast %1136 : f32 to vector<1x8x8xf32>
    %1138 = arith.mulf %280, %1137 : vector<1x8x8xf32>
    %1139 = arith.addf %1135, %1138 : vector<1x8x8xf32>
    %c189 = arith.constant 189 : index
    %1140 = memref.load %arg4[%c189] : memref<288xf32, #tpu.memory_space<smem>>
    %1141 = vector.broadcast %1140 : f32 to vector<1x8x8xf32>
    %1142 = arith.mulf %282, %1141 : vector<1x8x8xf32>
    %1143 = arith.addf %1139, %1142 : vector<1x8x8xf32>
    %c190 = arith.constant 190 : index
    %1144 = memref.load %arg4[%c190] : memref<288xf32, #tpu.memory_space<smem>>
    %1145 = vector.broadcast %1144 : f32 to vector<1x8x8xf32>
    %1146 = arith.mulf %284, %1145 : vector<1x8x8xf32>
    %1147 = arith.addf %1143, %1146 : vector<1x8x8xf32>
    %c191 = arith.constant 191 : index
    %1148 = memref.load %arg4[%c191] : memref<288xf32, #tpu.memory_space<smem>>
    %1149 = vector.broadcast %1148 : f32 to vector<1x8x8xf32>
    %1150 = arith.mulf %286, %1149 : vector<1x8x8xf32>
    %1151 = arith.addf %1147, %1150 : vector<1x8x8xf32>
    %c192 = arith.constant 192 : index
    %1152 = memref.load %arg4[%c192] : memref<288xf32, #tpu.memory_space<smem>>
    %1153 = vector.broadcast %1152 : f32 to vector<1x8x8xf32>
    %1154 = arith.mulf %288, %1153 : vector<1x8x8xf32>
    %1155 = arith.addf %1151, %1154 : vector<1x8x8xf32>
    %c193 = arith.constant 193 : index
    %1156 = memref.load %arg4[%c193] : memref<288xf32, #tpu.memory_space<smem>>
    %1157 = vector.broadcast %1156 : f32 to vector<1x8x8xf32>
    %1158 = arith.mulf %290, %1157 : vector<1x8x8xf32>
    %1159 = arith.addf %1155, %1158 : vector<1x8x8xf32>
    %c194 = arith.constant 194 : index
    %1160 = memref.load %arg4[%c194] : memref<288xf32, #tpu.memory_space<smem>>
    %1161 = vector.broadcast %1160 : f32 to vector<1x8x8xf32>
    %1162 = arith.mulf %292, %1161 : vector<1x8x8xf32>
    %1163 = arith.addf %1159, %1162 : vector<1x8x8xf32>
    %c195 = arith.constant 195 : index
    %1164 = memref.load %arg4[%c195] : memref<288xf32, #tpu.memory_space<smem>>
    %1165 = vector.broadcast %1164 : f32 to vector<1x8x8xf32>
    %1166 = arith.mulf %294, %1165 : vector<1x8x8xf32>
    %1167 = arith.addf %1163, %1166 : vector<1x8x8xf32>
    %c196 = arith.constant 196 : index
    %1168 = memref.load %arg4[%c196] : memref<288xf32, #tpu.memory_space<smem>>
    %1169 = vector.broadcast %1168 : f32 to vector<1x8x8xf32>
    %1170 = arith.mulf %296, %1169 : vector<1x8x8xf32>
    %1171 = arith.addf %1167, %1170 : vector<1x8x8xf32>
    %c197 = arith.constant 197 : index
    %1172 = memref.load %arg4[%c197] : memref<288xf32, #tpu.memory_space<smem>>
    %1173 = vector.broadcast %1172 : f32 to vector<1x8x8xf32>
    %1174 = arith.mulf %298, %1173 : vector<1x8x8xf32>
    %1175 = arith.addf %1171, %1174 : vector<1x8x8xf32>
    %c198 = arith.constant 198 : index
    %1176 = memref.load %arg4[%c198] : memref<288xf32, #tpu.memory_space<smem>>
    %1177 = vector.broadcast %1176 : f32 to vector<1x8x8xf32>
    %1178 = arith.mulf %300, %1177 : vector<1x8x8xf32>
    %1179 = arith.addf %1175, %1178 : vector<1x8x8xf32>
    %c199 = arith.constant 199 : index
    %1180 = memref.load %arg4[%c199] : memref<288xf32, #tpu.memory_space<smem>>
    %1181 = vector.broadcast %1180 : f32 to vector<1x8x8xf32>
    %1182 = arith.mulf %302, %1181 : vector<1x8x8xf32>
    %1183 = arith.addf %1179, %1182 : vector<1x8x8xf32>
    %c200 = arith.constant 200 : index
    %1184 = memref.load %arg4[%c200] : memref<288xf32, #tpu.memory_space<smem>>
    %1185 = vector.broadcast %1184 : f32 to vector<1x8x8xf32>
    %1186 = arith.mulf %304, %1185 : vector<1x8x8xf32>
    %1187 = arith.addf %1183, %1186 : vector<1x8x8xf32>
    %c201 = arith.constant 201 : index
    %1188 = memref.load %arg4[%c201] : memref<288xf32, #tpu.memory_space<smem>>
    %1189 = vector.broadcast %1188 : f32 to vector<1x8x8xf32>
    %1190 = arith.mulf %306, %1189 : vector<1x8x8xf32>
    %1191 = arith.addf %1187, %1190 : vector<1x8x8xf32>
    %c202 = arith.constant 202 : index
    %1192 = memref.load %arg4[%c202] : memref<288xf32, #tpu.memory_space<smem>>
    %1193 = vector.broadcast %1192 : f32 to vector<1x8x8xf32>
    %1194 = arith.mulf %308, %1193 : vector<1x8x8xf32>
    %1195 = arith.addf %1191, %1194 : vector<1x8x8xf32>
    %c203 = arith.constant 203 : index
    %1196 = memref.load %arg4[%c203] : memref<288xf32, #tpu.memory_space<smem>>
    %1197 = vector.broadcast %1196 : f32 to vector<1x8x8xf32>
    %1198 = arith.mulf %310, %1197 : vector<1x8x8xf32>
    %1199 = arith.addf %1195, %1198 : vector<1x8x8xf32>
    %c204 = arith.constant 204 : index
    %1200 = memref.load %arg4[%c204] : memref<288xf32, #tpu.memory_space<smem>>
    %1201 = vector.broadcast %1200 : f32 to vector<1x8x8xf32>
    %1202 = arith.mulf %312, %1201 : vector<1x8x8xf32>
    %1203 = arith.addf %1199, %1202 : vector<1x8x8xf32>
    %c205 = arith.constant 205 : index
    %1204 = memref.load %arg4[%c205] : memref<288xf32, #tpu.memory_space<smem>>
    %1205 = vector.broadcast %1204 : f32 to vector<1x8x8xf32>
    %1206 = arith.mulf %314, %1205 : vector<1x8x8xf32>
    %1207 = arith.addf %1203, %1206 : vector<1x8x8xf32>
    %c206 = arith.constant 206 : index
    %1208 = memref.load %arg4[%c206] : memref<288xf32, #tpu.memory_space<smem>>
    %1209 = vector.broadcast %1208 : f32 to vector<1x8x8xf32>
    %1210 = arith.mulf %316, %1209 : vector<1x8x8xf32>
    %1211 = arith.addf %1207, %1210 : vector<1x8x8xf32>
    %c207 = arith.constant 207 : index
    %1212 = memref.load %arg4[%c207] : memref<288xf32, #tpu.memory_space<smem>>
    %1213 = vector.broadcast %1212 : f32 to vector<1x8x8xf32>
    %1214 = arith.mulf %318, %1213 : vector<1x8x8xf32>
    %1215 = arith.addf %1211, %1214 : vector<1x8x8xf32>
    %c208 = arith.constant 208 : index
    %1216 = memref.load %arg4[%c208] : memref<288xf32, #tpu.memory_space<smem>>
    %1217 = vector.broadcast %1216 : f32 to vector<1x8x8xf32>
    %1218 = arith.mulf %320, %1217 : vector<1x8x8xf32>
    %1219 = arith.addf %1215, %1218 : vector<1x8x8xf32>
    %c209 = arith.constant 209 : index
    %1220 = memref.load %arg4[%c209] : memref<288xf32, #tpu.memory_space<smem>>
    %1221 = vector.broadcast %1220 : f32 to vector<1x8x8xf32>
    %1222 = arith.mulf %322, %1221 : vector<1x8x8xf32>
    %1223 = arith.addf %1219, %1222 : vector<1x8x8xf32>
    %c210 = arith.constant 210 : index
    %1224 = memref.load %arg4[%c210] : memref<288xf32, #tpu.memory_space<smem>>
    %1225 = vector.broadcast %1224 : f32 to vector<1x8x8xf32>
    %1226 = arith.mulf %324, %1225 : vector<1x8x8xf32>
    %1227 = arith.addf %1223, %1226 : vector<1x8x8xf32>
    %c211 = arith.constant 211 : index
    %1228 = memref.load %arg4[%c211] : memref<288xf32, #tpu.memory_space<smem>>
    %1229 = vector.broadcast %1228 : f32 to vector<1x8x8xf32>
    %1230 = arith.mulf %326, %1229 : vector<1x8x8xf32>
    %1231 = arith.addf %1227, %1230 : vector<1x8x8xf32>
    %c212 = arith.constant 212 : index
    %1232 = memref.load %arg4[%c212] : memref<288xf32, #tpu.memory_space<smem>>
    %1233 = vector.broadcast %1232 : f32 to vector<1x8x8xf32>
    %1234 = arith.mulf %328, %1233 : vector<1x8x8xf32>
    %1235 = arith.addf %1231, %1234 : vector<1x8x8xf32>
    %c213 = arith.constant 213 : index
    %1236 = memref.load %arg4[%c213] : memref<288xf32, #tpu.memory_space<smem>>
    %1237 = vector.broadcast %1236 : f32 to vector<1x8x8xf32>
    %1238 = arith.mulf %330, %1237 : vector<1x8x8xf32>
    %1239 = arith.addf %1235, %1238 : vector<1x8x8xf32>
    %c214 = arith.constant 214 : index
    %1240 = memref.load %arg4[%c214] : memref<288xf32, #tpu.memory_space<smem>>
    %1241 = vector.broadcast %1240 : f32 to vector<1x8x8xf32>
    %1242 = arith.mulf %332, %1241 : vector<1x8x8xf32>
    %1243 = arith.addf %1239, %1242 : vector<1x8x8xf32>
    %c215 = arith.constant 215 : index
    %1244 = memref.load %arg4[%c215] : memref<288xf32, #tpu.memory_space<smem>>
    %1245 = vector.broadcast %1244 : f32 to vector<1x8x8xf32>
    %1246 = arith.mulf %334, %1245 : vector<1x8x8xf32>
    %1247 = arith.addf %1243, %1246 : vector<1x8x8xf32>
    %c5_428 = arith.constant 5 : index
    %1248 = memref.load %arg5[%c5_428] : memref<8xf32, #tpu.memory_space<smem>>
    %1249 = vector.broadcast %1248 : f32 to vector<1x8x8xf32>
    %1250 = arith.addf %1247, %1249 : vector<1x8x8xf32>
    %cst_429 = arith.constant 0.000000e+00 : f32
    %1251 = vector.broadcast %cst_429 : f32 to vector<1x8x8xf32>
    %1252 = arith.cmpf oge, %1250, %1251 : vector<1x8x8xf32>
    %cst_430 = arith.constant 0.00999999977 : f32
    %1253 = vector.broadcast %cst_430 : f32 to vector<1x8x8xf32>
    %1254 = arith.mulf %1253, %1250 : vector<1x8x8xf32>
    %1255 = arith.select %1252, %1250, %1254 : vector<1x8x8xi1>, vector<1x8x8xf32>
    %c0_431 = arith.constant 0 : index
    %c5_432 = arith.constant 5 : index
    %c0_433 = arith.constant 0 : index
    %c0_434 = arith.constant 0 : index
    %1256 = vector.load %arg17[%c0_431, %c5_432, %c0_433, %c0_434] : memref<1x8x8x8xf32, #tpu.memory_space<vmem>>, vector<1x1x8x8xf32>
    %1257 = vector.shape_cast %1256 : vector<1x1x8x8xf32> to vector<1x8x8xf32>
    %1258 = vector.shape_cast %1255 : vector<1x8x8xf32> to vector<1x1x8x8xf32>
    tpu.vector_store %arg17[%c0_431, %c5_432, %c0_433, %c0_434], %1258 {strides = array<i32>} : memref<1x8x8x8xf32, #tpu.memory_space<vmem>>, vector<1x1x8x8xf32>,
    %c216 = arith.constant 216 : index
    %1259 = memref.load %arg4[%c216] : memref<288xf32, #tpu.memory_space<smem>>
    %1260 = vector.broadcast %1259 : f32 to vector<1x8x8xf32>
    %1261 = arith.mulf %264, %1260 : vector<1x8x8xf32>
    %c217 = arith.constant 217 : index
    %1262 = memref.load %arg4[%c217] : memref<288xf32, #tpu.memory_space<smem>>
    %1263 = vector.broadcast %1262 : f32 to vector<1x8x8xf32>
    %1264 = arith.mulf %266, %1263 : vector<1x8x8xf32>
    %1265 = arith.addf %1261, %1264 : vector<1x8x8xf32>
    %c218 = arith.constant 218 : index
    %1266 = memref.load %arg4[%c218] : memref<288xf32, #tpu.memory_space<smem>>
    %1267 = vector.broadcast %1266 : f32 to vector<1x8x8xf32>
    %1268 = arith.mulf %268, %1267 : vector<1x8x8xf32>
    %1269 = arith.addf %1265, %1268 : vector<1x8x8xf32>
    %c219 = arith.constant 219 : index
    %1270 = memref.load %arg4[%c219] : memref<288xf32, #tpu.memory_space<smem>>
    %1271 = vector.broadcast %1270 : f32 to vector<1x8x8xf32>
    %1272 = arith.mulf %270, %1271 : vector<1x8x8xf32>
    %1273 = arith.addf %1269, %1272 : vector<1x8x8xf32>
    %c220 = arith.constant 220 : index
    %1274 = memref.load %arg4[%c220] : memref<288xf32, #tpu.memory_space<smem>>
    %1275 = vector.broadcast %1274 : f32 to vector<1x8x8xf32>
    %1276 = arith.mulf %272, %1275 : vector<1x8x8xf32>
    %1277 = arith.addf %1273, %1276 : vector<1x8x8xf32>
    %c221 = arith.constant 221 : index
    %1278 = memref.load %arg4[%c221] : memref<288xf32, #tpu.memory_space<smem>>
    %1279 = vector.broadcast %1278 : f32 to vector<1x8x8xf32>
    %1280 = arith.mulf %274, %1279 : vector<1x8x8xf32>
    %1281 = arith.addf %1277, %1280 : vector<1x8x8xf32>
    %c222 = arith.constant 222 : index
    %1282 = memref.load %arg4[%c222] : memref<288xf32, #tpu.memory_space<smem>>
    %1283 = vector.broadcast %1282 : f32 to vector<1x8x8xf32>
    %1284 = arith.mulf %276, %1283 : vector<1x8x8xf32>
    %1285 = arith.addf %1281, %1284 : vector<1x8x8xf32>
    %c223 = arith.constant 223 : index
    %1286 = memref.load %arg4[%c223] : memref<288xf32, #tpu.memory_space<smem>>
    %1287 = vector.broadcast %1286 : f32 to vector<1x8x8xf32>
    %1288 = arith.mulf %278, %1287 : vector<1x8x8xf32>
    %1289 = arith.addf %1285, %1288 : vector<1x8x8xf32>
    %c224 = arith.constant 224 : index
    %1290 = memref.load %arg4[%c224] : memref<288xf32, #tpu.memory_space<smem>>
    %1291 = vector.broadcast %1290 : f32 to vector<1x8x8xf32>
    %1292 = arith.mulf %280, %1291 : vector<1x8x8xf32>
    %1293 = arith.addf %1289, %1292 : vector<1x8x8xf32>
    %c225 = arith.constant 225 : index
    %1294 = memref.load %arg4[%c225] : memref<288xf32, #tpu.memory_space<smem>>
    %1295 = vector.broadcast %1294 : f32 to vector<1x8x8xf32>
    %1296 = arith.mulf %282, %1295 : vector<1x8x8xf32>
    %1297 = arith.addf %1293, %1296 : vector<1x8x8xf32>
    %c226 = arith.constant 226 : index
    %1298 = memref.load %arg4[%c226] : memref<288xf32, #tpu.memory_space<smem>>
    %1299 = vector.broadcast %1298 : f32 to vector<1x8x8xf32>
    %1300 = arith.mulf %284, %1299 : vector<1x8x8xf32>
    %1301 = arith.addf %1297, %1300 : vector<1x8x8xf32>
    %c227 = arith.constant 227 : index
    %1302 = memref.load %arg4[%c227] : memref<288xf32, #tpu.memory_space<smem>>
    %1303 = vector.broadcast %1302 : f32 to vector<1x8x8xf32>
    %1304 = arith.mulf %286, %1303 : vector<1x8x8xf32>
    %1305 = arith.addf %1301, %1304 : vector<1x8x8xf32>
    %c228 = arith.constant 228 : index
    %1306 = memref.load %arg4[%c228] : memref<288xf32, #tpu.memory_space<smem>>
    %1307 = vector.broadcast %1306 : f32 to vector<1x8x8xf32>
    %1308 = arith.mulf %288, %1307 : vector<1x8x8xf32>
    %1309 = arith.addf %1305, %1308 : vector<1x8x8xf32>
    %c229 = arith.constant 229 : index
    %1310 = memref.load %arg4[%c229] : memref<288xf32, #tpu.memory_space<smem>>
    %1311 = vector.broadcast %1310 : f32 to vector<1x8x8xf32>
    %1312 = arith.mulf %290, %1311 : vector<1x8x8xf32>
    %1313 = arith.addf %1309, %1312 : vector<1x8x8xf32>
    %c230 = arith.constant 230 : index
    %1314 = memref.load %arg4[%c230] : memref<288xf32, #tpu.memory_space<smem>>
    %1315 = vector.broadcast %1314 : f32 to vector<1x8x8xf32>
    %1316 = arith.mulf %292, %1315 : vector<1x8x8xf32>
    %1317 = arith.addf %1313, %1316 : vector<1x8x8xf32>
    %c231 = arith.constant 231 : index
    %1318 = memref.load %arg4[%c231] : memref<288xf32, #tpu.memory_space<smem>>
    %1319 = vector.broadcast %1318 : f32 to vector<1x8x8xf32>
    %1320 = arith.mulf %294, %1319 : vector<1x8x8xf32>
    %1321 = arith.addf %1317, %1320 : vector<1x8x8xf32>
    %c232 = arith.constant 232 : index
    %1322 = memref.load %arg4[%c232] : memref<288xf32, #tpu.memory_space<smem>>
    %1323 = vector.broadcast %1322 : f32 to vector<1x8x8xf32>
    %1324 = arith.mulf %296, %1323 : vector<1x8x8xf32>
    %1325 = arith.addf %1321, %1324 : vector<1x8x8xf32>
    %c233 = arith.constant 233 : index
    %1326 = memref.load %arg4[%c233] : memref<288xf32, #tpu.memory_space<smem>>
    %1327 = vector.broadcast %1326 : f32 to vector<1x8x8xf32>
    %1328 = arith.mulf %298, %1327 : vector<1x8x8xf32>
    %1329 = arith.addf %1325, %1328 : vector<1x8x8xf32>
    %c234 = arith.constant 234 : index
    %1330 = memref.load %arg4[%c234] : memref<288xf32, #tpu.memory_space<smem>>
    %1331 = vector.broadcast %1330 : f32 to vector<1x8x8xf32>
    %1332 = arith.mulf %300, %1331 : vector<1x8x8xf32>
    %1333 = arith.addf %1329, %1332 : vector<1x8x8xf32>
    %c235 = arith.constant 235 : index
    %1334 = memref.load %arg4[%c235] : memref<288xf32, #tpu.memory_space<smem>>
    %1335 = vector.broadcast %1334 : f32 to vector<1x8x8xf32>
    %1336 = arith.mulf %302, %1335 : vector<1x8x8xf32>
    %1337 = arith.addf %1333, %1336 : vector<1x8x8xf32>
    %c236 = arith.constant 236 : index
    %1338 = memref.load %arg4[%c236] : memref<288xf32, #tpu.memory_space<smem>>
    %1339 = vector.broadcast %1338 : f32 to vector<1x8x8xf32>
    %1340 = arith.mulf %304, %1339 : vector<1x8x8xf32>
    %1341 = arith.addf %1337, %1340 : vector<1x8x8xf32>
    %c237 = arith.constant 237 : index
    %1342 = memref.load %arg4[%c237] : memref<288xf32, #tpu.memory_space<smem>>
    %1343 = vector.broadcast %1342 : f32 to vector<1x8x8xf32>
    %1344 = arith.mulf %306, %1343 : vector<1x8x8xf32>
    %1345 = arith.addf %1341, %1344 : vector<1x8x8xf32>
    %c238 = arith.constant 238 : index
    %1346 = memref.load %arg4[%c238] : memref<288xf32, #tpu.memory_space<smem>>
    %1347 = vector.broadcast %1346 : f32 to vector<1x8x8xf32>
    %1348 = arith.mulf %308, %1347 : vector<1x8x8xf32>
    %1349 = arith.addf %1345, %1348 : vector<1x8x8xf32>
    %c239 = arith.constant 239 : index
    %1350 = memref.load %arg4[%c239] : memref<288xf32, #tpu.memory_space<smem>>
    %1351 = vector.broadcast %1350 : f32 to vector<1x8x8xf32>
    %1352 = arith.mulf %310, %1351 : vector<1x8x8xf32>
    %1353 = arith.addf %1349, %1352 : vector<1x8x8xf32>
    %c240 = arith.constant 240 : index
    %1354 = memref.load %arg4[%c240] : memref<288xf32, #tpu.memory_space<smem>>
    %1355 = vector.broadcast %1354 : f32 to vector<1x8x8xf32>
    %1356 = arith.mulf %312, %1355 : vector<1x8x8xf32>
    %1357 = arith.addf %1353, %1356 : vector<1x8x8xf32>
    %c241 = arith.constant 241 : index
    %1358 = memref.load %arg4[%c241] : memref<288xf32, #tpu.memory_space<smem>>
    %1359 = vector.broadcast %1358 : f32 to vector<1x8x8xf32>
    %1360 = arith.mulf %314, %1359 : vector<1x8x8xf32>
    %1361 = arith.addf %1357, %1360 : vector<1x8x8xf32>
    %c242 = arith.constant 242 : index
    %1362 = memref.load %arg4[%c242] : memref<288xf32, #tpu.memory_space<smem>>
    %1363 = vector.broadcast %1362 : f32 to vector<1x8x8xf32>
    %1364 = arith.mulf %316, %1363 : vector<1x8x8xf32>
    %1365 = arith.addf %1361, %1364 : vector<1x8x8xf32>
    %c243 = arith.constant 243 : index
    %1366 = memref.load %arg4[%c243] : memref<288xf32, #tpu.memory_space<smem>>
    %1367 = vector.broadcast %1366 : f32 to vector<1x8x8xf32>
    %1368 = arith.mulf %318, %1367 : vector<1x8x8xf32>
    %1369 = arith.addf %1365, %1368 : vector<1x8x8xf32>
    %c244 = arith.constant 244 : index
    %1370 = memref.load %arg4[%c244] : memref<288xf32, #tpu.memory_space<smem>>
    %1371 = vector.broadcast %1370 : f32 to vector<1x8x8xf32>
    %1372 = arith.mulf %320, %1371 : vector<1x8x8xf32>
    %1373 = arith.addf %1369, %1372 : vector<1x8x8xf32>
    %c245 = arith.constant 245 : index
    %1374 = memref.load %arg4[%c245] : memref<288xf32, #tpu.memory_space<smem>>
    %1375 = vector.broadcast %1374 : f32 to vector<1x8x8xf32>
    %1376 = arith.mulf %322, %1375 : vector<1x8x8xf32>
    %1377 = arith.addf %1373, %1376 : vector<1x8x8xf32>
    %c246 = arith.constant 246 : index
    %1378 = memref.load %arg4[%c246] : memref<288xf32, #tpu.memory_space<smem>>
    %1379 = vector.broadcast %1378 : f32 to vector<1x8x8xf32>
    %1380 = arith.mulf %324, %1379 : vector<1x8x8xf32>
    %1381 = arith.addf %1377, %1380 : vector<1x8x8xf32>
    %c247 = arith.constant 247 : index
    %1382 = memref.load %arg4[%c247] : memref<288xf32, #tpu.memory_space<smem>>
    %1383 = vector.broadcast %1382 : f32 to vector<1x8x8xf32>
    %1384 = arith.mulf %326, %1383 : vector<1x8x8xf32>
    %1385 = arith.addf %1381, %1384 : vector<1x8x8xf32>
    %c248 = arith.constant 248 : index
    %1386 = memref.load %arg4[%c248] : memref<288xf32, #tpu.memory_space<smem>>
    %1387 = vector.broadcast %1386 : f32 to vector<1x8x8xf32>
    %1388 = arith.mulf %328, %1387 : vector<1x8x8xf32>
    %1389 = arith.addf %1385, %1388 : vector<1x8x8xf32>
    %c249 = arith.constant 249 : index
    %1390 = memref.load %arg4[%c249] : memref<288xf32, #tpu.memory_space<smem>>
    %1391 = vector.broadcast %1390 : f32 to vector<1x8x8xf32>
    %1392 = arith.mulf %330, %1391 : vector<1x8x8xf32>
    %1393 = arith.addf %1389, %1392 : vector<1x8x8xf32>
    %c250 = arith.constant 250 : index
    %1394 = memref.load %arg4[%c250] : memref<288xf32, #tpu.memory_space<smem>>
    %1395 = vector.broadcast %1394 : f32 to vector<1x8x8xf32>
    %1396 = arith.mulf %332, %1395 : vector<1x8x8xf32>
    %1397 = arith.addf %1393, %1396 : vector<1x8x8xf32>
    %c251 = arith.constant 251 : index
    %1398 = memref.load %arg4[%c251] : memref<288xf32, #tpu.memory_space<smem>>
    %1399 = vector.broadcast %1398 : f32 to vector<1x8x8xf32>
    %1400 = arith.mulf %334, %1399 : vector<1x8x8xf32>
    %1401 = arith.addf %1397, %1400 : vector<1x8x8xf32>
    %c6_435 = arith.constant 6 : index
    %1402 = memref.load %arg5[%c6_435] : memref<8xf32, #tpu.memory_space<smem>>
    %1403 = vector.broadcast %1402 : f32 to vector<1x8x8xf32>
    %1404 = arith.addf %1401, %1403 : vector<1x8x8xf32>
    %cst_436 = arith.constant 0.000000e+00 : f32
    %1405 = vector.broadcast %cst_436 : f32 to vector<1x8x8xf32>
    %1406 = arith.cmpf oge, %1404, %1405 : vector<1x8x8xf32>
    %cst_437 = arith.constant 0.00999999977 : f32
    %1407 = vector.broadcast %cst_437 : f32 to vector<1x8x8xf32>
    %1408 = arith.mulf %1407, %1404 : vector<1x8x8xf32>
    %1409 = arith.select %1406, %1404, %1408 : vector<1x8x8xi1>, vector<1x8x8xf32>
    %c0_438 = arith.constant 0 : index
    %c6_439 = arith.constant 6 : index
    %c0_440 = arith.constant 0 : index
    %c0_441 = arith.constant 0 : index
    %1410 = vector.load %arg17[%c0_438, %c6_439, %c0_440, %c0_441] : memref<1x8x8x8xf32, #tpu.memory_space<vmem>>, vector<1x1x8x8xf32>
    %1411 = vector.shape_cast %1410 : vector<1x1x8x8xf32> to vector<1x8x8xf32>
    %1412 = vector.shape_cast %1409 : vector<1x8x8xf32> to vector<1x1x8x8xf32>
    tpu.vector_store %arg17[%c0_438, %c6_439, %c0_440, %c0_441], %1412 {strides = array<i32>} : memref<1x8x8x8xf32, #tpu.memory_space<vmem>>, vector<1x1x8x8xf32>,
    %c252 = arith.constant 252 : index
    %1413 = memref.load %arg4[%c252] : memref<288xf32, #tpu.memory_space<smem>>
    %1414 = vector.broadcast %1413 : f32 to vector<1x8x8xf32>
    %1415 = arith.mulf %264, %1414 : vector<1x8x8xf32>
    %c253 = arith.constant 253 : index
    %1416 = memref.load %arg4[%c253] : memref<288xf32, #tpu.memory_space<smem>>
    %1417 = vector.broadcast %1416 : f32 to vector<1x8x8xf32>
    %1418 = arith.mulf %266, %1417 : vector<1x8x8xf32>
    %1419 = arith.addf %1415, %1418 : vector<1x8x8xf32>
    %c254 = arith.constant 254 : index
    %1420 = memref.load %arg4[%c254] : memref<288xf32, #tpu.memory_space<smem>>
    %1421 = vector.broadcast %1420 : f32 to vector<1x8x8xf32>
    %1422 = arith.mulf %268, %1421 : vector<1x8x8xf32>
    %1423 = arith.addf %1419, %1422 : vector<1x8x8xf32>
    %c255 = arith.constant 255 : index
    %1424 = memref.load %arg4[%c255] : memref<288xf32, #tpu.memory_space<smem>>
    %1425 = vector.broadcast %1424 : f32 to vector<1x8x8xf32>
    %1426 = arith.mulf %270, %1425 : vector<1x8x8xf32>
    %1427 = arith.addf %1423, %1426 : vector<1x8x8xf32>
    %c256 = arith.constant 256 : index
    %1428 = memref.load %arg4[%c256] : memref<288xf32, #tpu.memory_space<smem>>
    %1429 = vector.broadcast %1428 : f32 to vector<1x8x8xf32>
    %1430 = arith.mulf %272, %1429 : vector<1x8x8xf32>
    %1431 = arith.addf %1427, %1430 : vector<1x8x8xf32>
    %c257 = arith.constant 257 : index
    %1432 = memref.load %arg4[%c257] : memref<288xf32, #tpu.memory_space<smem>>
    %1433 = vector.broadcast %1432 : f32 to vector<1x8x8xf32>
    %1434 = arith.mulf %274, %1433 : vector<1x8x8xf32>
    %1435 = arith.addf %1431, %1434 : vector<1x8x8xf32>
    %c258 = arith.constant 258 : index
    %1436 = memref.load %arg4[%c258] : memref<288xf32, #tpu.memory_space<smem>>
    %1437 = vector.broadcast %1436 : f32 to vector<1x8x8xf32>
    %1438 = arith.mulf %276, %1437 : vector<1x8x8xf32>
    %1439 = arith.addf %1435, %1438 : vector<1x8x8xf32>
    %c259 = arith.constant 259 : index
    %1440 = memref.load %arg4[%c259] : memref<288xf32, #tpu.memory_space<smem>>
    %1441 = vector.broadcast %1440 : f32 to vector<1x8x8xf32>
    %1442 = arith.mulf %278, %1441 : vector<1x8x8xf32>
    %1443 = arith.addf %1439, %1442 : vector<1x8x8xf32>
    %c260 = arith.constant 260 : index
    %1444 = memref.load %arg4[%c260] : memref<288xf32, #tpu.memory_space<smem>>
    %1445 = vector.broadcast %1444 : f32 to vector<1x8x8xf32>
    %1446 = arith.mulf %280, %1445 : vector<1x8x8xf32>
    %1447 = arith.addf %1443, %1446 : vector<1x8x8xf32>
    %c261 = arith.constant 261 : index
    %1448 = memref.load %arg4[%c261] : memref<288xf32, #tpu.memory_space<smem>>
    %1449 = vector.broadcast %1448 : f32 to vector<1x8x8xf32>
    %1450 = arith.mulf %282, %1449 : vector<1x8x8xf32>
    %1451 = arith.addf %1447, %1450 : vector<1x8x8xf32>
    %c262 = arith.constant 262 : index
    %1452 = memref.load %arg4[%c262] : memref<288xf32, #tpu.memory_space<smem>>
    %1453 = vector.broadcast %1452 : f32 to vector<1x8x8xf32>
    %1454 = arith.mulf %284, %1453 : vector<1x8x8xf32>
    %1455 = arith.addf %1451, %1454 : vector<1x8x8xf32>
    %c263 = arith.constant 263 : index
    %1456 = memref.load %arg4[%c263] : memref<288xf32, #tpu.memory_space<smem>>
    %1457 = vector.broadcast %1456 : f32 to vector<1x8x8xf32>
    %1458 = arith.mulf %286, %1457 : vector<1x8x8xf32>
    %1459 = arith.addf %1455, %1458 : vector<1x8x8xf32>
    %c264 = arith.constant 264 : index
    %1460 = memref.load %arg4[%c264] : memref<288xf32, #tpu.memory_space<smem>>
    %1461 = vector.broadcast %1460 : f32 to vector<1x8x8xf32>
    %1462 = arith.mulf %288, %1461 : vector<1x8x8xf32>
    %1463 = arith.addf %1459, %1462 : vector<1x8x8xf32>
    %c265 = arith.constant 265 : index
    %1464 = memref.load %arg4[%c265] : memref<288xf32, #tpu.memory_space<smem>>
    %1465 = vector.broadcast %1464 : f32 to vector<1x8x8xf32>
    %1466 = arith.mulf %290, %1465 : vector<1x8x8xf32>
    %1467 = arith.addf %1463, %1466 : vector<1x8x8xf32>
    %c266 = arith.constant 266 : index
    %1468 = memref.load %arg4[%c266] : memref<288xf32, #tpu.memory_space<smem>>
    %1469 = vector.broadcast %1468 : f32 to vector<1x8x8xf32>
    %1470 = arith.mulf %292, %1469 : vector<1x8x8xf32>
    %1471 = arith.addf %1467, %1470 : vector<1x8x8xf32>
    %c267 = arith.constant 267 : index
    %1472 = memref.load %arg4[%c267] : memref<288xf32, #tpu.memory_space<smem>>
    %1473 = vector.broadcast %1472 : f32 to vector<1x8x8xf32>
    %1474 = arith.mulf %294, %1473 : vector<1x8x8xf32>
    %1475 = arith.addf %1471, %1474 : vector<1x8x8xf32>
    %c268 = arith.constant 268 : index
    %1476 = memref.load %arg4[%c268] : memref<288xf32, #tpu.memory_space<smem>>
    %1477 = vector.broadcast %1476 : f32 to vector<1x8x8xf32>
    %1478 = arith.mulf %296, %1477 : vector<1x8x8xf32>
    %1479 = arith.addf %1475, %1478 : vector<1x8x8xf32>
    %c269 = arith.constant 269 : index
    %1480 = memref.load %arg4[%c269] : memref<288xf32, #tpu.memory_space<smem>>
    %1481 = vector.broadcast %1480 : f32 to vector<1x8x8xf32>
    %1482 = arith.mulf %298, %1481 : vector<1x8x8xf32>
    %1483 = arith.addf %1479, %1482 : vector<1x8x8xf32>
    %c270 = arith.constant 270 : index
    %1484 = memref.load %arg4[%c270] : memref<288xf32, #tpu.memory_space<smem>>
    %1485 = vector.broadcast %1484 : f32 to vector<1x8x8xf32>
    %1486 = arith.mulf %300, %1485 : vector<1x8x8xf32>
    %1487 = arith.addf %1483, %1486 : vector<1x8x8xf32>
    %c271 = arith.constant 271 : index
    %1488 = memref.load %arg4[%c271] : memref<288xf32, #tpu.memory_space<smem>>
    %1489 = vector.broadcast %1488 : f32 to vector<1x8x8xf32>
    %1490 = arith.mulf %302, %1489 : vector<1x8x8xf32>
    %1491 = arith.addf %1487, %1490 : vector<1x8x8xf32>
    %c272 = arith.constant 272 : index
    %1492 = memref.load %arg4[%c272] : memref<288xf32, #tpu.memory_space<smem>>
    %1493 = vector.broadcast %1492 : f32 to vector<1x8x8xf32>
    %1494 = arith.mulf %304, %1493 : vector<1x8x8xf32>
    %1495 = arith.addf %1491, %1494 : vector<1x8x8xf32>
    %c273 = arith.constant 273 : index
    %1496 = memref.load %arg4[%c273] : memref<288xf32, #tpu.memory_space<smem>>
    %1497 = vector.broadcast %1496 : f32 to vector<1x8x8xf32>
    %1498 = arith.mulf %306, %1497 : vector<1x8x8xf32>
    %1499 = arith.addf %1495, %1498 : vector<1x8x8xf32>
    %c274 = arith.constant 274 : index
    %1500 = memref.load %arg4[%c274] : memref<288xf32, #tpu.memory_space<smem>>
    %1501 = vector.broadcast %1500 : f32 to vector<1x8x8xf32>
    %1502 = arith.mulf %308, %1501 : vector<1x8x8xf32>
    %1503 = arith.addf %1499, %1502 : vector<1x8x8xf32>
    %c275 = arith.constant 275 : index
    %1504 = memref.load %arg4[%c275] : memref<288xf32, #tpu.memory_space<smem>>
    %1505 = vector.broadcast %1504 : f32 to vector<1x8x8xf32>
    %1506 = arith.mulf %310, %1505 : vector<1x8x8xf32>
    %1507 = arith.addf %1503, %1506 : vector<1x8x8xf32>
    %c276 = arith.constant 276 : index
    %1508 = memref.load %arg4[%c276] : memref<288xf32, #tpu.memory_space<smem>>
    %1509 = vector.broadcast %1508 : f32 to vector<1x8x8xf32>
    %1510 = arith.mulf %312, %1509 : vector<1x8x8xf32>
    %1511 = arith.addf %1507, %1510 : vector<1x8x8xf32>
    %c277 = arith.constant 277 : index
    %1512 = memref.load %arg4[%c277] : memref<288xf32, #tpu.memory_space<smem>>
    %1513 = vector.broadcast %1512 : f32 to vector<1x8x8xf32>
    %1514 = arith.mulf %314, %1513 : vector<1x8x8xf32>
    %1515 = arith.addf %1511, %1514 : vector<1x8x8xf32>
    %c278 = arith.constant 278 : index
    %1516 = memref.load %arg4[%c278] : memref<288xf32, #tpu.memory_space<smem>>
    %1517 = vector.broadcast %1516 : f32 to vector<1x8x8xf32>
    %1518 = arith.mulf %316, %1517 : vector<1x8x8xf32>
    %1519 = arith.addf %1515, %1518 : vector<1x8x8xf32>
    %c279 = arith.constant 279 : index
    %1520 = memref.load %arg4[%c279] : memref<288xf32, #tpu.memory_space<smem>>
    %1521 = vector.broadcast %1520 : f32 to vector<1x8x8xf32>
    %1522 = arith.mulf %318, %1521 : vector<1x8x8xf32>
    %1523 = arith.addf %1519, %1522 : vector<1x8x8xf32>
    %c280 = arith.constant 280 : index
    %1524 = memref.load %arg4[%c280] : memref<288xf32, #tpu.memory_space<smem>>
    %1525 = vector.broadcast %1524 : f32 to vector<1x8x8xf32>
    %1526 = arith.mulf %320, %1525 : vector<1x8x8xf32>
    %1527 = arith.addf %1523, %1526 : vector<1x8x8xf32>
    %c281 = arith.constant 281 : index
    %1528 = memref.load %arg4[%c281] : memref<288xf32, #tpu.memory_space<smem>>
    %1529 = vector.broadcast %1528 : f32 to vector<1x8x8xf32>
    %1530 = arith.mulf %322, %1529 : vector<1x8x8xf32>
    %1531 = arith.addf %1527, %1530 : vector<1x8x8xf32>
    %c282 = arith.constant 282 : index
    %1532 = memref.load %arg4[%c282] : memref<288xf32, #tpu.memory_space<smem>>
    %1533 = vector.broadcast %1532 : f32 to vector<1x8x8xf32>
    %1534 = arith.mulf %324, %1533 : vector<1x8x8xf32>
    %1535 = arith.addf %1531, %1534 : vector<1x8x8xf32>
    %c283 = arith.constant 283 : index
    %1536 = memref.load %arg4[%c283] : memref<288xf32, #tpu.memory_space<smem>>
    %1537 = vector.broadcast %1536 : f32 to vector<1x8x8xf32>
    %1538 = arith.mulf %326, %1537 : vector<1x8x8xf32>
    %1539 = arith.addf %1535, %1538 : vector<1x8x8xf32>
    %c284 = arith.constant 284 : index
    %1540 = memref.load %arg4[%c284] : memref<288xf32, #tpu.memory_space<smem>>
    %1541 = vector.broadcast %1540 : f32 to vector<1x8x8xf32>
    %1542 = arith.mulf %328, %1541 : vector<1x8x8xf32>
    %1543 = arith.addf %1539, %1542 : vector<1x8x8xf32>
    %c285 = arith.constant 285 : index
    %1544 = memref.load %arg4[%c285] : memref<288xf32, #tpu.memory_space<smem>>
    %1545 = vector.broadcast %1544 : f32 to vector<1x8x8xf32>
    %1546 = arith.mulf %330, %1545 : vector<1x8x8xf32>
    %1547 = arith.addf %1543, %1546 : vector<1x8x8xf32>
    %c286 = arith.constant 286 : index
    %1548 = memref.load %arg4[%c286] : memref<288xf32, #tpu.memory_space<smem>>
    %1549 = vector.broadcast %1548 : f32 to vector<1x8x8xf32>
    %1550 = arith.mulf %332, %1549 : vector<1x8x8xf32>
    %1551 = arith.addf %1547, %1550 : vector<1x8x8xf32>
    %c287 = arith.constant 287 : index
    %1552 = memref.load %arg4[%c287] : memref<288xf32, #tpu.memory_space<smem>>
    %1553 = vector.broadcast %1552 : f32 to vector<1x8x8xf32>
    %1554 = arith.mulf %334, %1553 : vector<1x8x8xf32>
    %1555 = arith.addf %1551, %1554 : vector<1x8x8xf32>
    %c7_442 = arith.constant 7 : index
    %1556 = memref.load %arg5[%c7_442] : memref<8xf32, #tpu.memory_space<smem>>
    %1557 = vector.broadcast %1556 : f32 to vector<1x8x8xf32>
    %1558 = arith.addf %1555, %1557 : vector<1x8x8xf32>
    %cst_443 = arith.constant 0.000000e+00 : f32
    %1559 = vector.broadcast %cst_443 : f32 to vector<1x8x8xf32>
    %1560 = arith.cmpf oge, %1558, %1559 : vector<1x8x8xf32>
    %cst_444 = arith.constant 0.00999999977 : f32
    %1561 = vector.broadcast %cst_444 : f32 to vector<1x8x8xf32>
    %1562 = arith.mulf %1561, %1558 : vector<1x8x8xf32>
    %1563 = arith.select %1560, %1558, %1562 : vector<1x8x8xi1>, vector<1x8x8xf32>
    %c0_445 = arith.constant 0 : index
    %c7_446 = arith.constant 7 : index
    %c0_447 = arith.constant 0 : index
    %c0_448 = arith.constant 0 : index
    %1564 = vector.load %arg17[%c0_445, %c7_446, %c0_447, %c0_448] : memref<1x8x8x8xf32, #tpu.memory_space<vmem>>, vector<1x1x8x8xf32>
    %1565 = vector.shape_cast %1564 : vector<1x1x8x8xf32> to vector<1x8x8xf32>
    %1566 = vector.shape_cast %1563 : vector<1x8x8xf32> to vector<1x1x8x8xf32>
    tpu.vector_store %arg17[%c0_445, %c7_446, %c0_447, %c0_448], %1566 {strides = array<i32>} : memref<1x8x8x8xf32, #tpu.memory_space<vmem>>, vector<1x1x8x8xf32>,
    %c0_449 = arith.constant 0 : index
    %c0_450 = arith.constant 0 : index
    %c0_451 = arith.constant 0 : index
    %c0_452 = arith.constant 0 : index
    %1567 = vector.load %arg17[%c0_449, %c0_450, %c0_451, %c0_452] : memref<1x8x8x8xf32, #tpu.memory_space<vmem>>, vector<1x8x2x8xf32>
    %cst_453 = arith.constant dense<0xFF800000> : vector<1x8x8xf32>
    %1568 = vector.multi_reduction <maximumf>, %1567, %cst_453 [2] : vector<1x8x2x8xf32> to vector<1x8x8xf32>
    %1569 = vector.shape_cast %1568 : vector<1x8x8xf32> to vector<1x8x1x8xf32>
    %c0_454 = arith.constant 0 : index
    %c0_455 = arith.constant 0 : index
    %c0_456 = arith.constant 0 : index
    %c0_457 = arith.constant 0 : index
    %1570 = vector.load %arg18[%c0_454, %c0_455, %c0_456, %c0_457] : memref<1x8x4x8xf32, #tpu.memory_space<vmem>>, vector<1x8x1x8xf32>
    tpu.vector_store %arg18[%c0_454, %c0_455, %c0_456, %c0_457], %1569 {strides = array<i32>} : memref<1x8x4x8xf32, #tpu.memory_space<vmem>>, vector<1x8x1x8xf32>,
    %c0_458 = arith.constant 0 : index
    %c0_459 = arith.constant 0 : index
    %c2_460 = arith.constant 2 : index
    %c0_461 = arith.constant 0 : index
    %1571 = vector.load %arg17[%c0_458, %c0_459, %c2_460, %c0_461] : memref<1x8x8x8xf32, #tpu.memory_space<vmem>>, vector<1x8x2x8xf32>
    %cst_462 = arith.constant dense<0xFF800000> : vector<1x8x8xf32>
    %1572 = vector.multi_reduction <maximumf>, %1571, %cst_462 [2] : vector<1x8x2x8xf32> to vector<1x8x8xf32>
    %1573 = vector.shape_cast %1572 : vector<1x8x8xf32> to vector<1x8x1x8xf32>
    %c0_463 = arith.constant 0 : index
    %c0_464 = arith.constant 0 : index
    %c1_465 = arith.constant 1 : index
    %c0_466 = arith.constant 0 : index
    %1574 = vector.load %arg18[%c0_463, %c0_464, %c1_465, %c0_466] : memref<1x8x4x8xf32, #tpu.memory_space<vmem>>, vector<1x8x1x8xf32>
    tpu.vector_store %arg18[%c0_463, %c0_464, %c1_465, %c0_466], %1573 {strides = array<i32>} : memref<1x8x4x8xf32, #tpu.memory_space<vmem>>, vector<1x8x1x8xf32>,
    %c0_467 = arith.constant 0 : index
    %c0_468 = arith.constant 0 : index
    %c4_469 = arith.constant 4 : index
    %c0_470 = arith.constant 0 : index
    %1575 = vector.load %arg17[%c0_467, %c0_468, %c4_469, %c0_470] : memref<1x8x8x8xf32, #tpu.memory_space<vmem>>, vector<1x8x2x8xf32>
    %cst_471 = arith.constant dense<0xFF800000> : vector<1x8x8xf32>
    %1576 = vector.multi_reduction <maximumf>, %1575, %cst_471 [2] : vector<1x8x2x8xf32> to vector<1x8x8xf32>
    %1577 = vector.shape_cast %1576 : vector<1x8x8xf32> to vector<1x8x1x8xf32>
    %c0_472 = arith.constant 0 : index
    %c0_473 = arith.constant 0 : index
    %c2_474 = arith.constant 2 : index
    %c0_475 = arith.constant 0 : index
    %1578 = vector.load %arg18[%c0_472, %c0_473, %c2_474, %c0_475] : memref<1x8x4x8xf32, #tpu.memory_space<vmem>>, vector<1x8x1x8xf32>
    tpu.vector_store %arg18[%c0_472, %c0_473, %c2_474, %c0_475], %1577 {strides = array<i32>} : memref<1x8x4x8xf32, #tpu.memory_space<vmem>>, vector<1x8x1x8xf32>,
    %c0_476 = arith.constant 0 : index
    %c0_477 = arith.constant 0 : index
    %c6_478 = arith.constant 6 : index
    %c0_479 = arith.constant 0 : index
    %1579 = vector.load %arg17[%c0_476, %c0_477, %c6_478, %c0_479] : memref<1x8x8x8xf32, #tpu.memory_space<vmem>>, vector<1x8x2x8xf32>
    %cst_480 = arith.constant dense<0xFF800000> : vector<1x8x8xf32>
    %1580 = vector.multi_reduction <maximumf>, %1579, %cst_480 [2] : vector<1x8x2x8xf32> to vector<1x8x8xf32>
    %1581 = vector.shape_cast %1580 : vector<1x8x8xf32> to vector<1x8x1x8xf32>
    %c0_481 = arith.constant 0 : index
    %c0_482 = arith.constant 0 : index
    %c3_483 = arith.constant 3 : index
    %c0_484 = arith.constant 0 : index
    %1582 = vector.load %arg18[%c0_481, %c0_482, %c3_483, %c0_484] : memref<1x8x4x8xf32, #tpu.memory_space<vmem>>, vector<1x8x1x8xf32>
    tpu.vector_store %arg18[%c0_481, %c0_482, %c3_483, %c0_484], %1581 {strides = array<i32>} : memref<1x8x4x8xf32, #tpu.memory_space<vmem>>, vector<1x8x1x8xf32>,
    %c0_485 = arith.constant 0 : index
    %c0_486 = arith.constant 0 : index
    %c0_487 = arith.constant 0 : index
    %c0_488 = arith.constant 0 : index
    %1583 = vector.load %arg18[%c0_485, %c0_486, %c0_487, %c0_488] : memref<1x8x4x8xf32, #tpu.memory_space<vmem>>, vector<1x8x4x2xf32>
    %cst_489 = arith.constant dense<0xFF800000> : vector<1x8x4xf32>
    %1584 = vector.multi_reduction <maximumf>, %1583, %cst_489 [3] : vector<1x8x4x2xf32> to vector<1x8x4xf32>
    %1585 = vector.shape_cast %1584 : vector<1x8x4xf32> to vector<1x8x4x1xf32>
    %c0_490 = arith.constant 0 : index
    %c0_491 = arith.constant 0 : index
    %c0_492 = arith.constant 0 : index
    %c0_493 = arith.constant 0 : index
    %1586 = vector.load %arg19[%c0_490, %c0_491, %c0_492, %c0_493] : memref<1x8x4x4xf32, #tpu.memory_space<vmem>>, vector<1x8x4x1xf32>
    tpu.vector_store %arg19[%c0_490, %c0_491, %c0_492, %c0_493], %1585 {strides = array<i32>} : memref<1x8x4x4xf32, #tpu.memory_space<vmem>>, vector<1x8x4x1xf32>,
    %c0_494 = arith.constant 0 : index
    %c0_495 = arith.constant 0 : index
    %c0_496 = arith.constant 0 : index
    %c2_497 = arith.constant 2 : index
    %1587 = vector.load %arg18[%c0_494, %c0_495, %c0_496, %c2_497] : memref<1x8x4x8xf32, #tpu.memory_space<vmem>>, vector<1x8x4x2xf32>
    %cst_498 = arith.constant dense<0xFF800000> : vector<1x8x4xf32>
    %1588 = vector.multi_reduction <maximumf>, %1587, %cst_498 [3] : vector<1x8x4x2xf32> to vector<1x8x4xf32>
    %1589 = vector.shape_cast %1588 : vector<1x8x4xf32> to vector<1x8x4x1xf32>
    %c0_499 = arith.constant 0 : index
    %c0_500 = arith.constant 0 : index
    %c0_501 = arith.constant 0 : index
    %c1_502 = arith.constant 1 : index
    %1590 = vector.load %arg19[%c0_499, %c0_500, %c0_501, %c1_502] : memref<1x8x4x4xf32, #tpu.memory_space<vmem>>, vector<1x8x4x1xf32>
    tpu.vector_store %arg19[%c0_499, %c0_500, %c0_501, %c1_502], %1589 {strides = array<i32>} : memref<1x8x4x4xf32, #tpu.memory_space<vmem>>, vector<1x8x4x1xf32>,
    %c0_503 = arith.constant 0 : index
    %c0_504 = arith.constant 0 : index
    %c0_505 = arith.constant 0 : index
    %c4_506 = arith.constant 4 : index
    %1591 = vector.load %arg18[%c0_503, %c0_504, %c0_505, %c4_506] : memref<1x8x4x8xf32, #tpu.memory_space<vmem>>, vector<1x8x4x2xf32>
    %cst_507 = arith.constant dense<0xFF800000> : vector<1x8x4xf32>
    %1592 = vector.multi_reduction <maximumf>, %1591, %cst_507 [3] : vector<1x8x4x2xf32> to vector<1x8x4xf32>
    %1593 = vector.shape_cast %1592 : vector<1x8x4xf32> to vector<1x8x4x1xf32>
    %c0_508 = arith.constant 0 : index
    %c0_509 = arith.constant 0 : index
    %c0_510 = arith.constant 0 : index
    %c2_511 = arith.constant 2 : index
    %1594 = vector.load %arg19[%c0_508, %c0_509, %c0_510, %c2_511] : memref<1x8x4x4xf32, #tpu.memory_space<vmem>>, vector<1x8x4x1xf32>
    tpu.vector_store %arg19[%c0_508, %c0_509, %c0_510, %c2_511], %1593 {strides = array<i32>} : memref<1x8x4x4xf32, #tpu.memory_space<vmem>>, vector<1x8x4x1xf32>,
    %c0_512 = arith.constant 0 : index
    %c0_513 = arith.constant 0 : index
    %c0_514 = arith.constant 0 : index
    %c6_515 = arith.constant 6 : index
    %1595 = vector.load %arg18[%c0_512, %c0_513, %c0_514, %c6_515] : memref<1x8x4x8xf32, #tpu.memory_space<vmem>>, vector<1x8x4x2xf32>
    %cst_516 = arith.constant dense<0xFF800000> : vector<1x8x4xf32>
    %1596 = vector.multi_reduction <maximumf>, %1595, %cst_516 [3] : vector<1x8x4x2xf32> to vector<1x8x4xf32>
    %1597 = vector.shape_cast %1596 : vector<1x8x4xf32> to vector<1x8x4x1xf32>
    %c0_517 = arith.constant 0 : index
    %c0_518 = arith.constant 0 : index
    %c0_519 = arith.constant 0 : index
    %c3_520 = arith.constant 3 : index
    %1598 = vector.load %arg19[%c0_517, %c0_518, %c0_519, %c3_520] : memref<1x8x4x4xf32, #tpu.memory_space<vmem>>, vector<1x8x4x1xf32>
    tpu.vector_store %arg19[%c0_517, %c0_518, %c0_519, %c3_520], %1597 {strides = array<i32>} : memref<1x8x4x4xf32, #tpu.memory_space<vmem>>, vector<1x8x4x1xf32>,
    %c0_521 = arith.constant 0 : index
    %c0_522 = arith.constant 0 : index
    %c0_523 = arith.constant 0 : index
    %c0_524 = arith.constant 0 : index
    %1599 = vector.load %arg19[%c0_521, %c0_522, %c0_523, %c0_524] : memref<1x8x4x4xf32, #tpu.memory_space<vmem>>, vector<1x1x1x4xf32>
    %1600 = vector.shape_cast %1599 : vector<1x1x1x4xf32> to vector<1x4xf32>
    %c0_525 = arith.constant 0 : index
    %c0_526 = arith.constant 0 : index
    %1601 = vector.load %arg20[%c0_525, %c0_526] : memref<1x128xf32, #tpu.memory_space<vmem>>, vector<1x4xf32>
    tpu.vector_store %arg20[%c0_525, %c0_526], %1600 {strides = array<i32>} : memref<1x128xf32, #tpu.memory_space<vmem>>, vector<1x4xf32>,
    %c0_527 = arith.constant 0 : index
    %c0_528 = arith.constant 0 : index
    %c1_529 = arith.constant 1 : index
    %c0_530 = arith.constant 0 : index
    %1602 = vector.load %arg19[%c0_527, %c0_528, %c1_529, %c0_530] : memref<1x8x4x4xf32, #tpu.memory_space<vmem>>, vector<1x1x1x4xf32>
    %1603 = vector.shape_cast %1602 : vector<1x1x1x4xf32> to vector<1x4xf32>
    %c0_531 = arith.constant 0 : index
    %c4_532 = arith.constant 4 : index
    %1604 = vector.load %arg20[%c0_531, %c4_532] : memref<1x128xf32, #tpu.memory_space<vmem>>, vector<1x4xf32>
    tpu.vector_store %arg20[%c0_531, %c4_532], %1603 {strides = array<i32>} : memref<1x128xf32, #tpu.memory_space<vmem>>, vector<1x4xf32>,
    %c0_533 = arith.constant 0 : index
    %c0_534 = arith.constant 0 : index
    %c2_535 = arith.constant 2 : index
    %c0_536 = arith.constant 0 : index
    %1605 = vector.load %arg19[%c0_533, %c0_534, %c2_535, %c0_536] : memref<1x8x4x4xf32, #tpu.memory_space<vmem>>, vector<1x1x1x4xf32>
    %1606 = vector.shape_cast %1605 : vector<1x1x1x4xf32> to vector<1x4xf32>
    %c0_537 = arith.constant 0 : index
    %c8_538 = arith.constant 8 : index
    %1607 = vector.load %arg20[%c0_537, %c8_538] : memref<1x128xf32, #tpu.memory_space<vmem>>, vector<1x4xf32>
    tpu.vector_store %arg20[%c0_537, %c8_538], %1606 {strides = array<i32>} : memref<1x128xf32, #tpu.memory_space<vmem>>, vector<1x4xf32>,
    %c0_539 = arith.constant 0 : index
    %c0_540 = arith.constant 0 : index
    %c3_541 = arith.constant 3 : index
    %c0_542 = arith.constant 0 : index
    %1608 = vector.load %arg19[%c0_539, %c0_540, %c3_541, %c0_542] : memref<1x8x4x4xf32, #tpu.memory_space<vmem>>, vector<1x1x1x4xf32>
    %1609 = vector.shape_cast %1608 : vector<1x1x1x4xf32> to vector<1x4xf32>
    %c0_543 = arith.constant 0 : index
    %c12_544 = arith.constant 12 : index
    %1610 = vector.load %arg20[%c0_543, %c12_544] : memref<1x128xf32, #tpu.memory_space<vmem>>, vector<1x4xf32>
    tpu.vector_store %arg20[%c0_543, %c12_544], %1609 {strides = array<i32>} : memref<1x128xf32, #tpu.memory_space<vmem>>, vector<1x4xf32>,
    %c0_545 = arith.constant 0 : index
    %c1_546 = arith.constant 1 : index
    %c0_547 = arith.constant 0 : index
    %c0_548 = arith.constant 0 : index
    %1611 = vector.load %arg19[%c0_545, %c1_546, %c0_547, %c0_548] : memref<1x8x4x4xf32, #tpu.memory_space<vmem>>, vector<1x1x1x4xf32>
    %1612 = vector.shape_cast %1611 : vector<1x1x1x4xf32> to vector<1x4xf32>
    %c0_549 = arith.constant 0 : index
    %c16_550 = arith.constant 16 : index
    %1613 = vector.load %arg20[%c0_549, %c16_550] : memref<1x128xf32, #tpu.memory_space<vmem>>, vector<1x4xf32>
    tpu.vector_store %arg20[%c0_549, %c16_550], %1612 {strides = array<i32>} : memref<1x128xf32, #tpu.memory_space<vmem>>, vector<1x4xf32>,
    %c0_551 = arith.constant 0 : index
    %c1_552 = arith.constant 1 : index
    %c1_553 = arith.constant 1 : index
    %c0_554 = arith.constant 0 : index
    %1614 = vector.load %arg19[%c0_551, %c1_552, %c1_553, %c0_554] : memref<1x8x4x4xf32, #tpu.memory_space<vmem>>, vector<1x1x1x4xf32>
    %1615 = vector.shape_cast %1614 : vector<1x1x1x4xf32> to vector<1x4xf32>
    %c0_555 = arith.constant 0 : index
    %c20_556 = arith.constant 20 : index
    %1616 = vector.load %arg20[%c0_555, %c20_556] : memref<1x128xf32, #tpu.memory_space<vmem>>, vector<1x4xf32>
    tpu.vector_store %arg20[%c0_555, %c20_556], %1615 {strides = array<i32>} : memref<1x128xf32, #tpu.memory_space<vmem>>, vector<1x4xf32>,
    %c0_557 = arith.constant 0 : index
    %c1_558 = arith.constant 1 : index
    %c2_559 = arith.constant 2 : index
    %c0_560 = arith.constant 0 : index
    %1617 = vector.load %arg19[%c0_557, %c1_558, %c2_559, %c0_560] : memref<1x8x4x4xf32, #tpu.memory_space<vmem>>, vector<1x1x1x4xf32>
    %1618 = vector.shape_cast %1617 : vector<1x1x1x4xf32> to vector<1x4xf32>
    %c0_561 = arith.constant 0 : index
    %c24_562 = arith.constant 24 : index
    %1619 = vector.load %arg20[%c0_561, %c24_562] : memref<1x128xf32, #tpu.memory_space<vmem>>, vector<1x4xf32>
    tpu.vector_store %arg20[%c0_561, %c24_562], %1618 {strides = array<i32>} : memref<1x128xf32, #tpu.memory_space<vmem>>, vector<1x4xf32>,
    %c0_563 = arith.constant 0 : index
    %c1_564 = arith.constant 1 : index
    %c3_565 = arith.constant 3 : index
    %c0_566 = arith.constant 0 : index
    %1620 = vector.load %arg19[%c0_563, %c1_564, %c3_565, %c0_566] : memref<1x8x4x4xf32, #tpu.memory_space<vmem>>, vector<1x1x1x4xf32>
    %1621 = vector.shape_cast %1620 : vector<1x1x1x4xf32> to vector<1x4xf32>
    %c0_567 = arith.constant 0 : index
    %c28_568 = arith.constant 28 : index
    %1622 = vector.load %arg20[%c0_567, %c28_568] : memref<1x128xf32, #tpu.memory_space<vmem>>, vector<1x4xf32>
    tpu.vector_store %arg20[%c0_567, %c28_568], %1621 {strides = array<i32>} : memref<1x128xf32, #tpu.memory_space<vmem>>, vector<1x4xf32>,
    %c0_569 = arith.constant 0 : index
    %c2_570 = arith.constant 2 : index
    %c0_571 = arith.constant 0 : index
    %c0_572 = arith.constant 0 : index
    %1623 = vector.load %arg19[%c0_569, %c2_570, %c0_571, %c0_572] : memref<1x8x4x4xf32, #tpu.memory_space<vmem>>, vector<1x1x1x4xf32>
    %1624 = vector.shape_cast %1623 : vector<1x1x1x4xf32> to vector<1x4xf32>
    %c0_573 = arith.constant 0 : index
    %c32_574 = arith.constant 32 : index
    %1625 = vector.load %arg20[%c0_573, %c32_574] : memref<1x128xf32, #tpu.memory_space<vmem>>, vector<1x4xf32>
    tpu.vector_store %arg20[%c0_573, %c32_574], %1624 {strides = array<i32>} : memref<1x128xf32, #tpu.memory_space<vmem>>, vector<1x4xf32>,
    %c0_575 = arith.constant 0 : index
    %c2_576 = arith.constant 2 : index
    %c1_577 = arith.constant 1 : index
    %c0_578 = arith.constant 0 : index
    %1626 = vector.load %arg19[%c0_575, %c2_576, %c1_577, %c0_578] : memref<1x8x4x4xf32, #tpu.memory_space<vmem>>, vector<1x1x1x4xf32>
    %1627 = vector.shape_cast %1626 : vector<1x1x1x4xf32> to vector<1x4xf32>
    %c0_579 = arith.constant 0 : index
    %c36_580 = arith.constant 36 : index
    %1628 = vector.load %arg20[%c0_579, %c36_580] : memref<1x128xf32, #tpu.memory_space<vmem>>, vector<1x4xf32>
    tpu.vector_store %arg20[%c0_579, %c36_580], %1627 {strides = array<i32>} : memref<1x128xf32, #tpu.memory_space<vmem>>, vector<1x4xf32>,
    %c0_581 = arith.constant 0 : index
    %c2_582 = arith.constant 2 : index
    %c2_583 = arith.constant 2 : index
    %c0_584 = arith.constant 0 : index
    %1629 = vector.load %arg19[%c0_581, %c2_582, %c2_583, %c0_584] : memref<1x8x4x4xf32, #tpu.memory_space<vmem>>, vector<1x1x1x4xf32>
    %1630 = vector.shape_cast %1629 : vector<1x1x1x4xf32> to vector<1x4xf32>
    %c0_585 = arith.constant 0 : index
    %c40_586 = arith.constant 40 : index
    %1631 = vector.load %arg20[%c0_585, %c40_586] : memref<1x128xf32, #tpu.memory_space<vmem>>, vector<1x4xf32>
    tpu.vector_store %arg20[%c0_585, %c40_586], %1630 {strides = array<i32>} : memref<1x128xf32, #tpu.memory_space<vmem>>, vector<1x4xf32>,
    %c0_587 = arith.constant 0 : index
    %c2_588 = arith.constant 2 : index
    %c3_589 = arith.constant 3 : index
    %c0_590 = arith.constant 0 : index
    %1632 = vector.load %arg19[%c0_587, %c2_588, %c3_589, %c0_590] : memref<1x8x4x4xf32, #tpu.memory_space<vmem>>, vector<1x1x1x4xf32>
    %1633 = vector.shape_cast %1632 : vector<1x1x1x4xf32> to vector<1x4xf32>
    %c0_591 = arith.constant 0 : index
    %c44_592 = arith.constant 44 : index
    %1634 = vector.load %arg20[%c0_591, %c44_592] : memref<1x128xf32, #tpu.memory_space<vmem>>, vector<1x4xf32>
    tpu.vector_store %arg20[%c0_591, %c44_592], %1633 {strides = array<i32>} : memref<1x128xf32, #tpu.memory_space<vmem>>, vector<1x4xf32>,
    %c0_593 = arith.constant 0 : index
    %c3_594 = arith.constant 3 : index
    %c0_595 = arith.constant 0 : index
    %c0_596 = arith.constant 0 : index
    %1635 = vector.load %arg19[%c0_593, %c3_594, %c0_595, %c0_596] : memref<1x8x4x4xf32, #tpu.memory_space<vmem>>, vector<1x1x1x4xf32>
    %1636 = vector.shape_cast %1635 : vector<1x1x1x4xf32> to vector<1x4xf32>
    %c0_597 = arith.constant 0 : index
    %c48_598 = arith.constant 48 : index
    %1637 = vector.load %arg20[%c0_597, %c48_598] : memref<1x128xf32, #tpu.memory_space<vmem>>, vector<1x4xf32>
    tpu.vector_store %arg20[%c0_597, %c48_598], %1636 {strides = array<i32>} : memref<1x128xf32, #tpu.memory_space<vmem>>, vector<1x4xf32>,
    %c0_599 = arith.constant 0 : index
    %c3_600 = arith.constant 3 : index
    %c1_601 = arith.constant 1 : index
    %c0_602 = arith.constant 0 : index
    %1638 = vector.load %arg19[%c0_599, %c3_600, %c1_601, %c0_602] : memref<1x8x4x4xf32, #tpu.memory_space<vmem>>, vector<1x1x1x4xf32>
    %1639 = vector.shape_cast %1638 : vector<1x1x1x4xf32> to vector<1x4xf32>
    %c0_603 = arith.constant 0 : index
    %c52_604 = arith.constant 52 : index
    %1640 = vector.load %arg20[%c0_603, %c52_604] : memref<1x128xf32, #tpu.memory_space<vmem>>, vector<1x4xf32>
    tpu.vector_store %arg20[%c0_603, %c52_604], %1639 {strides = array<i32>} : memref<1x128xf32, #tpu.memory_space<vmem>>, vector<1x4xf32>,
    %c0_605 = arith.constant 0 : index
    %c3_606 = arith.constant 3 : index
    %c2_607 = arith.constant 2 : index
    %c0_608 = arith.constant 0 : index
    %1641 = vector.load %arg19[%c0_605, %c3_606, %c2_607, %c0_608] : memref<1x8x4x4xf32, #tpu.memory_space<vmem>>, vector<1x1x1x4xf32>
    %1642 = vector.shape_cast %1641 : vector<1x1x1x4xf32> to vector<1x4xf32>
    %c0_609 = arith.constant 0 : index
    %c56_610 = arith.constant 56 : index
    %1643 = vector.load %arg20[%c0_609, %c56_610] : memref<1x128xf32, #tpu.memory_space<vmem>>, vector<1x4xf32>
    tpu.vector_store %arg20[%c0_609, %c56_610], %1642 {strides = array<i32>} : memref<1x128xf32, #tpu.memory_space<vmem>>, vector<1x4xf32>,
    %c0_611 = arith.constant 0 : index
    %c3_612 = arith.constant 3 : index
    %c3_613 = arith.constant 3 : index
    %c0_614 = arith.constant 0 : index
    %1644 = vector.load %arg19[%c0_611, %c3_612, %c3_613, %c0_614] : memref<1x8x4x4xf32, #tpu.memory_space<vmem>>, vector<1x1x1x4xf32>
    %1645 = vector.shape_cast %1644 : vector<1x1x1x4xf32> to vector<1x4xf32>
    %c0_615 = arith.constant 0 : index
    %c60_616 = arith.constant 60 : index
    %1646 = vector.load %arg20[%c0_615, %c60_616] : memref<1x128xf32, #tpu.memory_space<vmem>>, vector<1x4xf32>
    tpu.vector_store %arg20[%c0_615, %c60_616], %1645 {strides = array<i32>} : memref<1x128xf32, #tpu.memory_space<vmem>>, vector<1x4xf32>,
    %c0_617 = arith.constant 0 : index
    %c4_618 = arith.constant 4 : index
    %c0_619 = arith.constant 0 : index
    %c0_620 = arith.constant 0 : index
    %1647 = vector.load %arg19[%c0_617, %c4_618, %c0_619, %c0_620] : memref<1x8x4x4xf32, #tpu.memory_space<vmem>>, vector<1x1x1x4xf32>
    %1648 = vector.shape_cast %1647 : vector<1x1x1x4xf32> to vector<1x4xf32>
    %c0_621 = arith.constant 0 : index
    %c64_622 = arith.constant 64 : index
    %1649 = vector.load %arg20[%c0_621, %c64_622] : memref<1x128xf32, #tpu.memory_space<vmem>>, vector<1x4xf32>
    tpu.vector_store %arg20[%c0_621, %c64_622], %1648 {strides = array<i32>} : memref<1x128xf32, #tpu.memory_space<vmem>>, vector<1x4xf32>,
    %c0_623 = arith.constant 0 : index
    %c4_624 = arith.constant 4 : index
    %c1_625 = arith.constant 1 : index
    %c0_626 = arith.constant 0 : index
    %1650 = vector.load %arg19[%c0_623, %c4_624, %c1_625, %c0_626] : memref<1x8x4x4xf32, #tpu.memory_space<vmem>>, vector<1x1x1x4xf32>
    %1651 = vector.shape_cast %1650 : vector<1x1x1x4xf32> to vector<1x4xf32>
    %c0_627 = arith.constant 0 : index
    %c68_628 = arith.constant 68 : index
    %1652 = vector.load %arg20[%c0_627, %c68_628] : memref<1x128xf32, #tpu.memory_space<vmem>>, vector<1x4xf32>
    tpu.vector_store %arg20[%c0_627, %c68_628], %1651 {strides = array<i32>} : memref<1x128xf32, #tpu.memory_space<vmem>>, vector<1x4xf32>,
    %c0_629 = arith.constant 0 : index
    %c4_630 = arith.constant 4 : index
    %c2_631 = arith.constant 2 : index
    %c0_632 = arith.constant 0 : index
    %1653 = vector.load %arg19[%c0_629, %c4_630, %c2_631, %c0_632] : memref<1x8x4x4xf32, #tpu.memory_space<vmem>>, vector<1x1x1x4xf32>
    %1654 = vector.shape_cast %1653 : vector<1x1x1x4xf32> to vector<1x4xf32>
    %c0_633 = arith.constant 0 : index
    %c72_634 = arith.constant 72 : index
    %1655 = vector.load %arg20[%c0_633, %c72_634] : memref<1x128xf32, #tpu.memory_space<vmem>>, vector<1x4xf32>
    tpu.vector_store %arg20[%c0_633, %c72_634], %1654 {strides = array<i32>} : memref<1x128xf32, #tpu.memory_space<vmem>>, vector<1x4xf32>,
    %c0_635 = arith.constant 0 : index
    %c4_636 = arith.constant 4 : index
    %c3_637 = arith.constant 3 : index
    %c0_638 = arith.constant 0 : index
    %1656 = vector.load %arg19[%c0_635, %c4_636, %c3_637, %c0_638] : memref<1x8x4x4xf32, #tpu.memory_space<vmem>>, vector<1x1x1x4xf32>
    %1657 = vector.shape_cast %1656 : vector<1x1x1x4xf32> to vector<1x4xf32>
    %c0_639 = arith.constant 0 : index
    %c76_640 = arith.constant 76 : index
    %1658 = vector.load %arg20[%c0_639, %c76_640] : memref<1x128xf32, #tpu.memory_space<vmem>>, vector<1x4xf32>
    tpu.vector_store %arg20[%c0_639, %c76_640], %1657 {strides = array<i32>} : memref<1x128xf32, #tpu.memory_space<vmem>>, vector<1x4xf32>,
    %c0_641 = arith.constant 0 : index
    %c5_642 = arith.constant 5 : index
    %c0_643 = arith.constant 0 : index
    %c0_644 = arith.constant 0 : index
    %1659 = vector.load %arg19[%c0_641, %c5_642, %c0_643, %c0_644] : memref<1x8x4x4xf32, #tpu.memory_space<vmem>>, vector<1x1x1x4xf32>
    %1660 = vector.shape_cast %1659 : vector<1x1x1x4xf32> to vector<1x4xf32>
    %c0_645 = arith.constant 0 : index
    %c80_646 = arith.constant 80 : index
    %1661 = vector.load %arg20[%c0_645, %c80_646] : memref<1x128xf32, #tpu.memory_space<vmem>>, vector<1x4xf32>
    tpu.vector_store %arg20[%c0_645, %c80_646], %1660 {strides = array<i32>} : memref<1x128xf32, #tpu.memory_space<vmem>>, vector<1x4xf32>,
    %c0_647 = arith.constant 0 : index
    %c5_648 = arith.constant 5 : index
    %c1_649 = arith.constant 1 : index
    %c0_650 = arith.constant 0 : index
    %1662 = vector.load %arg19[%c0_647, %c5_648, %c1_649, %c0_650] : memref<1x8x4x4xf32, #tpu.memory_space<vmem>>, vector<1x1x1x4xf32>
    %1663 = vector.shape_cast %1662 : vector<1x1x1x4xf32> to vector<1x4xf32>
    %c0_651 = arith.constant 0 : index
    %c84_652 = arith.constant 84 : index
    %1664 = vector.load %arg20[%c0_651, %c84_652] : memref<1x128xf32, #tpu.memory_space<vmem>>, vector<1x4xf32>
    tpu.vector_store %arg20[%c0_651, %c84_652], %1663 {strides = array<i32>} : memref<1x128xf32, #tpu.memory_space<vmem>>, vector<1x4xf32>,
    %c0_653 = arith.constant 0 : index
    %c5_654 = arith.constant 5 : index
    %c2_655 = arith.constant 2 : index
    %c0_656 = arith.constant 0 : index
    %1665 = vector.load %arg19[%c0_653, %c5_654, %c2_655, %c0_656] : memref<1x8x4x4xf32, #tpu.memory_space<vmem>>, vector<1x1x1x4xf32>
    %1666 = vector.shape_cast %1665 : vector<1x1x1x4xf32> to vector<1x4xf32>
    %c0_657 = arith.constant 0 : index
    %c88_658 = arith.constant 88 : index
    %1667 = vector.load %arg20[%c0_657, %c88_658] : memref<1x128xf32, #tpu.memory_space<vmem>>, vector<1x4xf32>
    tpu.vector_store %arg20[%c0_657, %c88_658], %1666 {strides = array<i32>} : memref<1x128xf32, #tpu.memory_space<vmem>>, vector<1x4xf32>,
    %c0_659 = arith.constant 0 : index
    %c5_660 = arith.constant 5 : index
    %c3_661 = arith.constant 3 : index
    %c0_662 = arith.constant 0 : index
    %1668 = vector.load %arg19[%c0_659, %c5_660, %c3_661, %c0_662] : memref<1x8x4x4xf32, #tpu.memory_space<vmem>>, vector<1x1x1x4xf32>
    %1669 = vector.shape_cast %1668 : vector<1x1x1x4xf32> to vector<1x4xf32>
    %c0_663 = arith.constant 0 : index
    %c92_664 = arith.constant 92 : index
    %1670 = vector.load %arg20[%c0_663, %c92_664] : memref<1x128xf32, #tpu.memory_space<vmem>>, vector<1x4xf32>
    tpu.vector_store %arg20[%c0_663, %c92_664], %1669 {strides = array<i32>} : memref<1x128xf32, #tpu.memory_space<vmem>>, vector<1x4xf32>,
    %c0_665 = arith.constant 0 : index
    %c6_666 = arith.constant 6 : index
    %c0_667 = arith.constant 0 : index
    %c0_668 = arith.constant 0 : index
    %1671 = vector.load %arg19[%c0_665, %c6_666, %c0_667, %c0_668] : memref<1x8x4x4xf32, #tpu.memory_space<vmem>>, vector<1x1x1x4xf32>
    %1672 = vector.shape_cast %1671 : vector<1x1x1x4xf32> to vector<1x4xf32>
    %c0_669 = arith.constant 0 : index
    %c96_670 = arith.constant 96 : index
    %1673 = vector.load %arg20[%c0_669, %c96_670] : memref<1x128xf32, #tpu.memory_space<vmem>>, vector<1x4xf32>
    tpu.vector_store %arg20[%c0_669, %c96_670], %1672 {strides = array<i32>} : memref<1x128xf32, #tpu.memory_space<vmem>>, vector<1x4xf32>,
    %c0_671 = arith.constant 0 : index
    %c6_672 = arith.constant 6 : index
    %c1_673 = arith.constant 1 : index
    %c0_674 = arith.constant 0 : index
    %1674 = vector.load %arg19[%c0_671, %c6_672, %c1_673, %c0_674] : memref<1x8x4x4xf32, #tpu.memory_space<vmem>>, vector<1x1x1x4xf32>
    %1675 = vector.shape_cast %1674 : vector<1x1x1x4xf32> to vector<1x4xf32>
    %c0_675 = arith.constant 0 : index
    %c100_676 = arith.constant 100 : index
    %1676 = vector.load %arg20[%c0_675, %c100_676] : memref<1x128xf32, #tpu.memory_space<vmem>>, vector<1x4xf32>
    tpu.vector_store %arg20[%c0_675, %c100_676], %1675 {strides = array<i32>} : memref<1x128xf32, #tpu.memory_space<vmem>>, vector<1x4xf32>,
    %c0_677 = arith.constant 0 : index
    %c6_678 = arith.constant 6 : index
    %c2_679 = arith.constant 2 : index
    %c0_680 = arith.constant 0 : index
    %1677 = vector.load %arg19[%c0_677, %c6_678, %c2_679, %c0_680] : memref<1x8x4x4xf32, #tpu.memory_space<vmem>>, vector<1x1x1x4xf32>
    %1678 = vector.shape_cast %1677 : vector<1x1x1x4xf32> to vector<1x4xf32>
    %c0_681 = arith.constant 0 : index
    %c104_682 = arith.constant 104 : index
    %1679 = vector.load %arg20[%c0_681, %c104_682] : memref<1x128xf32, #tpu.memory_space<vmem>>, vector<1x4xf32>
    tpu.vector_store %arg20[%c0_681, %c104_682], %1678 {strides = array<i32>} : memref<1x128xf32, #tpu.memory_space<vmem>>, vector<1x4xf32>,
    %c0_683 = arith.constant 0 : index
    %c6_684 = arith.constant 6 : index
    %c3_685 = arith.constant 3 : index
    %c0_686 = arith.constant 0 : index
    %1680 = vector.load %arg19[%c0_683, %c6_684, %c3_685, %c0_686] : memref<1x8x4x4xf32, #tpu.memory_space<vmem>>, vector<1x1x1x4xf32>
    %1681 = vector.shape_cast %1680 : vector<1x1x1x4xf32> to vector<1x4xf32>
    %c0_687 = arith.constant 0 : index
    %c108_688 = arith.constant 108 : index
    %1682 = vector.load %arg20[%c0_687, %c108_688] : memref<1x128xf32, #tpu.memory_space<vmem>>, vector<1x4xf32>
    tpu.vector_store %arg20[%c0_687, %c108_688], %1681 {strides = array<i32>} : memref<1x128xf32, #tpu.memory_space<vmem>>, vector<1x4xf32>,
    %c0_689 = arith.constant 0 : index
    %c7_690 = arith.constant 7 : index
    %c0_691 = arith.constant 0 : index
    %c0_692 = arith.constant 0 : index
    %1683 = vector.load %arg19[%c0_689, %c7_690, %c0_691, %c0_692] : memref<1x8x4x4xf32, #tpu.memory_space<vmem>>, vector<1x1x1x4xf32>
    %1684 = vector.shape_cast %1683 : vector<1x1x1x4xf32> to vector<1x4xf32>
    %c0_693 = arith.constant 0 : index
    %c112_694 = arith.constant 112 : index
    %1685 = vector.load %arg20[%c0_693, %c112_694] : memref<1x128xf32, #tpu.memory_space<vmem>>, vector<1x4xf32>
    tpu.vector_store %arg20[%c0_693, %c112_694], %1684 {strides = array<i32>} : memref<1x128xf32, #tpu.memory_space<vmem>>, vector<1x4xf32>,
    %c0_695 = arith.constant 0 : index
    %c7_696 = arith.constant 7 : index
    %c1_697 = arith.constant 1 : index
    %c0_698 = arith.constant 0 : index
    %1686 = vector.load %arg19[%c0_695, %c7_696, %c1_697, %c0_698] : memref<1x8x4x4xf32, #tpu.memory_space<vmem>>, vector<1x1x1x4xf32>
    %1687 = vector.shape_cast %1686 : vector<1x1x1x4xf32> to vector<1x4xf32>
    %c0_699 = arith.constant 0 : index
    %c116_700 = arith.constant 116 : index
    %1688 = vector.load %arg20[%c0_699, %c116_700] : memref<1x128xf32, #tpu.memory_space<vmem>>, vector<1x4xf32>
    tpu.vector_store %arg20[%c0_699, %c116_700], %1687 {strides = array<i32>} : memref<1x128xf32, #tpu.memory_space<vmem>>, vector<1x4xf32>,
    %c0_701 = arith.constant 0 : index
    %c7_702 = arith.constant 7 : index
    %c2_703 = arith.constant 2 : index
    %c0_704 = arith.constant 0 : index
    %1689 = vector.load %arg19[%c0_701, %c7_702, %c2_703, %c0_704] : memref<1x8x4x4xf32, #tpu.memory_space<vmem>>, vector<1x1x1x4xf32>
    %1690 = vector.shape_cast %1689 : vector<1x1x1x4xf32> to vector<1x4xf32>
    %c0_705 = arith.constant 0 : index
    %c120_706 = arith.constant 120 : index
    %1691 = vector.load %arg20[%c0_705, %c120_706] : memref<1x128xf32, #tpu.memory_space<vmem>>, vector<1x4xf32>
    tpu.vector_store %arg20[%c0_705, %c120_706], %1690 {strides = array<i32>} : memref<1x128xf32, #tpu.memory_space<vmem>>, vector<1x4xf32>,
    %c0_707 = arith.constant 0 : index
    %c7_708 = arith.constant 7 : index
    %c3_709 = arith.constant 3 : index
    %c0_710 = arith.constant 0 : index
    %1692 = vector.load %arg19[%c0_707, %c7_708, %c3_709, %c0_710] : memref<1x8x4x4xf32, #tpu.memory_space<vmem>>, vector<1x1x1x4xf32>
    %1693 = vector.shape_cast %1692 : vector<1x1x1x4xf32> to vector<1x4xf32>
    %c0_711 = arith.constant 0 : index
    %c124_712 = arith.constant 124 : index
    %1694 = vector.load %arg20[%c0_711, %c124_712] : memref<1x128xf32, #tpu.memory_space<vmem>>, vector<1x4xf32>
    tpu.vector_store %arg20[%c0_711, %c124_712], %1693 {strides = array<i32>} : memref<1x128xf32, #tpu.memory_space<vmem>>, vector<1x4xf32>,
    %c0_713 = arith.constant 0 : index
    %c0_714 = arith.constant 0 : index
    %1695 = vector.load %arg20[%c0_713, %c0_714] : memref<1x128xf32, #tpu.memory_space<vmem>>, vector<1x128xf32>
    %c0_715 = arith.constant 0 : index
    %c0_716 = arith.constant 0 : index
    %1696 = vector.load %arg6[%c0_715, %c0_716] : memref<128x32xf32, #tpu.memory_space<vmem>>, vector<128x32xf32>
    %cst_717 = arith.constant dense<0.000000e+00> : vector<1x32xf32>
    %1697 = tpu.matmul %1695, %1696, %cst_717 {dimension_numbers = #tpu.dot_dimension_numbers<[1], [0], [0], [1], [0, 0, 1, 1], [], []>} : vector<1x128xf32>, vector<128x32xf32>, vector<1x32xf32> -> vector<1x32xf32>
    %c0_718 = arith.constant 0 : index
    %c0_719 = arith.constant 0 : index
    %1698 = vector.load %arg7[%c0_718, %c0_719] : memref<1x32xf32, #tpu.memory_space<vmem>>, vector<1x32xf32>
    %1699 = arith.addf %1697, %1698 : vector<1x32xf32>
    %cst_720 = arith.constant 0.000000e+00 : f32
    %1700 = vector.broadcast %cst_720 : f32 to vector<1x32xf32>
    %1701 = arith.cmpf oge, %1699, %1700 : vector<1x32xf32>
    %cst_721 = arith.constant 0.00999999977 : f32
    %1702 = vector.broadcast %cst_721 : f32 to vector<1x32xf32>
    %1703 = arith.mulf %1702, %1699 : vector<1x32xf32>
    %1704 = arith.select %1701, %1699, %1703 : vector<1x32xi1>, vector<1x32xf32>
    %c0_722 = arith.constant 0 : index
    %c0_723 = arith.constant 0 : index
    %1705 = vector.load %arg8[%c0_722, %c0_723] : memref<32x16xf32, #tpu.memory_space<vmem>>, vector<32x16xf32>
    %cst_724 = arith.constant dense<0.000000e+00> : vector<1x16xf32>
    %1706 = tpu.matmul %1704, %1705, %cst_724 {dimension_numbers = #tpu.dot_dimension_numbers<[1], [0], [0], [1], [0, 0, 1, 1], [], []>} : vector<1x32xf32>, vector<32x16xf32>, vector<1x16xf32> -> vector<1x16xf32>
    %c0_725 = arith.constant 0 : index
    %c0_726 = arith.constant 0 : index
    %1707 = vector.load %arg9[%c0_725, %c0_726] : memref<1x16xf32, #tpu.memory_space<vmem>>, vector<1x16xf32>
    %1708 = arith.addf %1706, %1707 : vector<1x16xf32>
    %cst_727 = arith.constant 0.000000e+00 : f32
    %1709 = vector.broadcast %cst_727 : f32 to vector<1x16xf32>
    %1710 = arith.cmpf oge, %1708, %1709 : vector<1x16xf32>
    %cst_728 = arith.constant 0.00999999977 : f32
    %1711 = vector.broadcast %cst_728 : f32 to vector<1x16xf32>
    %1712 = arith.mulf %1711, %1708 : vector<1x16xf32>
    %1713 = arith.select %1710, %1708, %1712 : vector<1x16xi1>, vector<1x16xf32>
    %c0_729 = arith.constant 0 : index
    %c0_730 = arith.constant 0 : index
    %1714 = vector.load %arg10[%c0_729, %c0_730] : memref<16x10xf32, #tpu.memory_space<vmem>>, vector<16x10xf32>
    %cst_731 = arith.constant dense<0.000000e+00> : vector<1x10xf32>
    %1715 = tpu.matmul %1713, %1714, %cst_731 {dimension_numbers = #tpu.dot_dimension_numbers<[1], [0], [0], [1], [0, 0, 1, 1], [], []>} : vector<1x16xf32>, vector<16x10xf32>, vector<1x10xf32> -> vector<1x10xf32>
    %c0_732 = arith.constant 0 : index
    %c0_733 = arith.constant 0 : index
    %1716 = vector.load %arg11[%c0_732, %c0_733] : memref<1x10xf32, #tpu.memory_space<vmem>>, vector<1x10xf32>
    %1717 = arith.addf %1715, %1716 : vector<1x10xf32>
    %c0_734 = arith.constant 0 : index
    %c0_735 = arith.constant 0 : index
    %c0_736 = arith.constant 0 : index
    %1718 = vector.load %arg12[%c0_734, %c0_735, %c0_736] : memref<1x1x10xf32, #tpu.memory_space<vmem>>, vector<1x1x10xf32>
    %1719 = vector.shape_cast %1718 : vector<1x1x10xf32> to vector<1x10xf32>
    %1720 = vector.shape_cast %1717 : vector<1x10xf32> to vector<1x1x10xf32>
    tpu.vector_store %arg12[%c0_734, %c0_735, %c0_736], %1720 {strides = array<i32>} : memref<1x1x10xf32, #tpu.memory_space<vmem>>, vector<1x1x10xf32>,
    return
  }
  func.func @transform_0(%arg0: i32) -> (i32, i32, i32) {
    %c0_i32 = arith.constant 0 : i32
    %c0_i32_0 = arith.constant 0 : i32
    %c0_i32_1 = arith.constant 0 : i32
    return %arg0, %c0_i32, %c0_i32_0 : i32, i32, i32
  }
  func.func @transform_1(%arg0: i32) -> i32 {
    %c0_i32 = arith.constant 0 : i32
    %c0_i32_0 = arith.constant 0 : i32
    return %c0_i32 : i32
  }
  func.func @transform_2(%arg0: i32) -> i32 {
    %c0_i32 = arith.constant 0 : i32
    %c0_i32_0 = arith.constant 0 : i32
    return %c0_i32 : i32
  }
  func.func @transform_3(%arg0: i32) -> i32 {
    %c0_i32 = arith.constant 0 : i32
    %c0_i32_0 = arith.constant 0 : i32
    return %c0_i32 : i32
  }
  func.func @transform_4(%arg0: i32) -> i32 {
    %c0_i32 = arith.constant 0 : i32
    %c0_i32_0 = arith.constant 0 : i32
    return %c0_i32 : i32
  }
  func.func @transform_5(%arg0: i32) -> (i32, i32) {
    %c0_i32 = arith.constant 0 : i32
    %c0_i32_0 = arith.constant 0 : i32
    %c0_i32_1 = arith.constant 0 : i32
    return %c0_i32, %c0_i32_0 : i32, i32
  }
  func.func @transform_6(%arg0: i32) -> (i32, i32) {
    %c0_i32 = arith.constant 0 : i32
    %c0_i32_0 = arith.constant 0 : i32
    %c0_i32_1 = arith.constant 0 : i32
    return %c0_i32, %c0_i32_0 : i32, i32
  }
  func.func @transform_7(%arg0: i32) -> (i32, i32) {
    %c0_i32 = arith.constant 0 : i32
    %c0_i32_0 = arith.constant 0 : i32
    %c0_i32_1 = arith.constant 0 : i32
    return %c0_i32, %c0_i32_0 : i32, i32
  }
  func.func @transform_8(%arg0: i32) -> (i32, i32) {
    %c0_i32 = arith.constant 0 : i32
    %c0_i32_0 = arith.constant 0 : i32
    %c0_i32_1 = arith.constant 0 : i32
    return %c0_i32, %c0_i32_0 : i32, i32
  }
  func.func @transform_9(%arg0: i32) -> (i32, i32) {
    %c0_i32 = arith.constant 0 : i32
    %c0_i32_0 = arith.constant 0 : i32
    %c0_i32_1 = arith.constant 0 : i32
    return %c0_i32, %c0_i32_0 : i32, i32
  }
  func.func @transform_10(%arg0: i32) -> (i32, i32) {
    %c0_i32 = arith.constant 0 : i32
    %c0_i32_0 = arith.constant 0 : i32
    %c0_i32_1 = arith.constant 0 : i32
    return %c0_i32, %c0_i32_0 : i32, i32
  }
  func.func @transform_11(%arg0: i32) -> (i32, i32, i32) {
    %c0_i32 = arith.constant 0 : i32
    %c0_i32_0 = arith.constant 0 : i32
    %c0_i32_1 = arith.constant 0 : i32
    return %arg0, %c0_i32, %c0_i32_0 : i32, i32, i32
  }
}

</mosaic_0001>

<bundles_post_ra>
// kernel: lenet_forward.1
= control target key start
LH: loop header
LB: loop body
LE: loop exit
PB: predicated region body
PF: predicated region fallthrough
CT: control target
= control target key end

     0   :  { %s7757_s0 = inlined_call_operand.vmem [shape: f32[2,16,16], index: 0, kind: input, shape index: {}]   ;;  %s7758_s1 = inlined_call_operand.vmem [shape: f32[36], index: 1, kind: input, shape index: {}]   ;;  %s7759_s2 = inlined_call_operand.vmem [shape: f32[4], index: 2, kind: input, shape index: {}]   ;;  %s7760_s3 = inlined_call_operand.vmem [shape: f32[288], index: 3, kind: input, shape index: {}]   ;;  %s7761_s4 = inlined_call_operand.vmem [shape: f32[8], index: 4, kind: input, shape index: {}]   ;;  %s7762_s5 = inlined_call_operand.vmem [shape: f32[128,32], index: 5, kind: input, shape index: {}]   ;;  %s7763_s6 = inlined_call_operand.vmem [shape: f32[1,32], index: 6, kind: input, shape index: {}]   ;;  %s7764_s7 = inlined_call_operand.vmem [shape: f32[32,16], index: 7, kind: input, shape index: {}]   ;;  %s7765_s8 = inlined_call_operand.vmem [shape: f32[1,16], index: 8, kind: input, shape index: {}]   ;;  %s7766_s9 = inlined_call_operand.vmem [shape: f32[16,10], index: 9, kind: input, shape index: {}]   ;;  %s7767_s10 = inlined_call_operand.vmem [shape: f32[1,10], index: 10, kind: input, shape index: {}]   ;;  %s7768_s11 = inlined_call_operand.hbm [shape: f32[2,1,10], index: 11, kind: output, shape index: {}]  }
   0x1   :  { %7788 = sst [smem:[#allocation85_spill]] %s7757_s0 }
   0x2   :  { %7789 = sst [smem:[#allocation86_spill]] %s7758_s1 }
   0x3   :  { %7790 = sst [smem:[#allocation87_spill]] %s7759_s2 }
   0x4   :  { %7791 = sst [smem:[#allocation88_spill]] %s7760_s3 }
   0x5   :  { %7792 = sst [smem:[#allocation89_spill]] %s7761_s4 }
   0x6   :  { %7793 = sst [smem:[#allocation90_spill]] %s7765_s8 }
   0x7   :  { %7794 = sst [smem:[#allocation91_spill]] %s7767_s10 }
   0x8   :  { %7795 = sst [smem:[#allocation92_spill]] %s7768_s11 }
   0x9   :  { %16 = vsyncpa [#allocation12], 0 }
   0xa   :  { %17 = vsyncpa [#allocation14], 0 }
   0xb   :  { %18 = vsyncpa [#allocation17], 0 }
   0xc   :  { %19 = vsyncpa [#allocation11], 0 }
   0xd   :  { %21 = vsyncpa [#allocation11 + $0x1], 0  ;;  %s5218_s17 = smov 0   ;;  %s5220_s18 = smov 0  }
   0xe   :  { %s5222_s19 = smov 0   ;;  %s5224_s20 = smov 0  }
   0xf LB: > { %7796 = sst [smem:[#allocation23_spill]] %s5103_s17  ;;  %s5239_s21 = sadd.s32 4294967295, %s5115_s20   ;;  %s5115_s20 = sphi %s5224_s20, %s7953_s20   ;;  %s5111_s19 = sphi %s5222_s19, %s7958_s19   ;;  %s5107_s18 = sphi %s5220_s18, %s7957_s18   ;;  %s5103_s17 = sphi %s5218_s17, %s7956_s17  }
  0x10   : > { %7797 = sst [smem:[#allocation24_spill]] %s5111_s19  ;;  %s4424_s22 = sadd.s32 4294967294, %s5115_s20  }
  0x11   : > { %7798 = sst [smem:[#allocation25_spill]] %s5115_s20  ;;  %s5243_s23 = sadd.s32 1, %s5115_s20  }
  0x12   : > { %7799 = sst [smem:[#allocation26_spill]] %s5239_s21  ;;  %s270_s24 = sadd.s32 1, %s5111_s19 }
  0x13   : > { %7800 = sst [smem:[#allocation27_spill]] %s5243_s23  ;;  %s267_s25 = ssub.s32 %s5115_s20, %s5243_s23 }
  0x14   : > { %p280_p0 = scmp.ne.s32.totalorder %s5111_s19, %s5107_s18  ;;  %p268_p1 = scmp.eq.s32.totalorder %s267_s25, 0 }
  0x15   : > { %p281_p2 = scmp.eq.s32.totalorder %s5239_s21, 1  ;;  %p286_p3 = scmp.ne.s32.totalorder %s5107_s18, %s5103_s17 }
  0x16   : > { %p287_p4 = scmp.eq.s32.totalorder %s4424_s22, 1  ;;  %p4425_p7 = scmp.ge.s32.totalorder %s5115_s20, 1 }
  0x17   : > { %s5254_s26 = scalar_select %p268_p1, %s5111_s19, %s270_s24  }
  0x18   : > { %p5256_p5 = por %p281_p2, %p280_p0  ;;  %p5260_p6 = por %p287_p4, %p286_p3 }
  0x19   : > { %7801 = sst [smem:[#allocation28_spill]] %s5254_s26  ;;  %p294_p8 = scmp.lt.s32.totalorder %s5115_s20, 3 }
  0x1a   : > { %s7802_s27 = scalar_select %p5256_p5, 1, 0 }
  0x1b   : > { %s7804_s28 = scalar_select %p5260_p6, 1, 0 }
  0x1c   : > { %7803 = sst [smem:[#allocation29_spill]] %s7802_s27  ;;  %p7769_p9 = scmp.eq.s32.totalorder %s5239_s21, 0 }
  0x1d   : > { %7805 = sst [smem:[#allocation30_spill]] %s7804_s28  ;;  %p5267_p10 = pnand %p4425_p7, %p294_p8 }
  0x1e   : > { %s7807_s2 = sld [smem:[#allocation87_spill]] }
  0x1f   : > { %s7806_s29 = scalar_select %p5267_p10, 1, 0 }
  0x20   : > { %p4872_p11 = pneg %p5267_p10  ;;  %s7808_s1 = sld [smem:[#allocation86_spill]] }
  0x21   : > { %s7810_s3 = sld [smem:[#allocation88_spill]] }
  0x22   : > { %p5281_p12 = pnand %p7769_p9, %p4872_p11  ;;  %s7811_s4 = sld [smem:[#allocation89_spill]] }
  0x24   : > { %s318_s13 = sshll.u32 %s7807_s2, 4  ;;  %p4985_p0 = pneg %p5281_p12  ;;  %s319_s13 = int_to_ptr.vmem [resolvable:$true] %s318_s13 }
  0x25   : > { %s4983_s14 = scalar_lea.vmem %s319_s13, 16  ;;  %p4991_p3 = scmp.lt.s32.totalorder %s319_s13, %s319_s13 }
  0x26   : > { %s307_s16 = sshll.u32 %s7808_s1, 4  ;;  %p4984_p13 = scmp.ne.s32.totalorder %s319_s13, %s4983_s14  ;;  %s308_s16 = int_to_ptr.vmem [resolvable:$true] %s307_s16 }
  0x27   : > { %s329_s30 = sshll.u32 %s7810_s3, 4  ;;  %p4992_p4 = scmp.lt.s32.totalorder %s4983_s14, %s4983_s14  ;;  %s5288_s30 = int_to_ptr.vmem [resolvable:$true] %s329_s30 }
  0x28   : > { %s340_s26 = sshll.u32 %s7811_s4, 4  ;;  %p4986_p1 = pnand %p4985_p0, %p4984_p13  ;;  %s341_s26 = int_to_ptr.vmem [resolvable:$true] %s340_s26 }
  0x29   : > { %p4993_p7 = por %p4992_p4, %p4991_p3 }
  0x2a   : > { %p4987_p2 = pneg %p4986_p1 }
  0x2c   : > { %p4994_p8 = pnand %p4993_p7, %p4987_p2 }
  0x2e   : > { %4997 = shalt.err (!%p4994_p8)
}
  0x2f   : > { %s5117_s15 = smov [#allocation13]   ;;  %s4998_s2 = scalar_lea.vmem %s308_s16, 16 }
  0x30   : > { %4878 = dma.vmem_to_smem (!%p5281_p12), %s319_s13, 16, %s5117_s15, [#allocation14]  }
  0x31   : > { %p4999_p11 = scmp.ne.s32.totalorder %s308_s16, %s4998_s2  ;;  %p5006_p5 = scmp.lt.s32.totalorder %s308_s16, %s308_s16 }
  0x32   : > { %p5007_p10 = scmp.lt.s32.totalorder %s4998_s2, %s4998_s2 }
  0x33   : > { %p5001_p9 = pnand %p4999_p11, %p4985_p0 }
  0x34   : > { %p5008_p13 = por %p5007_p10, %p5006_p5 }
  0x35   : > { %p5002_p6 = pneg %p5001_p9 }
  0x37   : > { %p5009_p1 = pnand %p5008_p13, %p5002_p6 }
  0x39   : > { %5012 = shalt.err (!%p5009_p1)
}
  0x3a   : > { %s5118_s24 = smov [#allocation10]   ;;  %s5013_s13 = scalar_lea.vmem %s5288_s30, 48 }
  0x3b   : > { %4875 = dma.vmem_to_smem (!%p5281_p12), %s308_s16, 16, %s5118_s24, [#allocation12]  }
  0x3c   : > { %p5014_p2 = scmp.ne.s32.totalorder %s5288_s30, %s5013_s13  ;;  %s5020_s25 = scalar_lea.vmem %s5288_s30, 64 }
  0x3d   : > { %p5021_p5 = scmp.lt.s32.totalorder %s5288_s30, %s5288_s30  ;;  %p5022_p6 = scmp.lt.s32.totalorder %s5020_s25, %s5013_s13 }
  0x3e   : > { %p5016_p3 = pnand %p5014_p2, %p4985_p0 }
  0x3f   : > { %p5023_p10 = por %p5022_p6, %p5021_p5 }
  0x40   : > { %p5017_p9 = pneg %p5016_p3 }
  0x42   : > { %p5024_p4 = pnand %p5023_p10, %p5017_p9 }
  0x44   : > { %5027 = shalt.err (!%p5024_p4)
}
  0x45   : > { %s5119_s12 = smov [#allocation15]   ;;  %s5028_s15 = scalar_lea.vmem %s341_s26, 16 }
  0x46   : > { %4881 = dma.vmem_to_smem (!%p5281_p12), %s5288_s30, 48, %s5119_s12, [#allocation14]  }
  0x47   : > { %p5029_p7 = scmp.ne.s32.totalorder %s341_s26, %s5028_s15  ;;  %p5036_p13 = scmp.lt.s32.totalorder %s341_s26, %s341_s26 }
  0x48   : > { %p5037_p1 = scmp.lt.s32.totalorder %s5028_s15, %s5028_s15 }
  0x49   : > { %p5031_p8 = pnand %p5029_p7, %p4985_p0 }
  0x4a   : > { %p5038_p2 = por %p5037_p1, %p5036_p13 }
  0x4b   : > { %p5032_p11 = pneg %p5031_p8 }
  0x4d   : > { %p5039_p3 = pnand %p5038_p2, %p5032_p11 }
  0x4f   : > { %5042 = shalt.err (!%p5039_p3)
}
  0x50   : > { %s5120_s2 = smov [#allocation16]   ;;  %p7812_p9 = scmp.ne.s32.totalorder %s7806_s29, 0 }
  0x51   : > { %4884 = dma.vmem_to_smem (!%p5281_p12), %s341_s26, 16, %s5120_s2, [#allocation17]  }
  0x52   : > { %379 = sbr.rel (%p7812_p9) target bundleno = 2010 (0x7da), region = 64 }
  0x57   : > { %p7813_p5 = scmp.eq.s32.totalorder %s5239_s21, 0 }
  0x59   : > { %5086 = dma.done.wait (%p7813_p5), [#allocation12], 16   ;;  %p7814_p6 = pmov %p7813_p5 }
  0x5a   : > { %p7815_p0 = pmov %p7813_p5 }
  0x5b   : > { %5088 = vsyncadd (%p7814_p6), [#allocation12], 4294967280 }
  0x5c   : > { %5090 = dma.done.wait (%p7815_p0), [#allocation14], 64   ;;  %p7816_p10 = pmov %p7815_p0 }
  0x5d   : > { %p7817_p4 = pmov %p7815_p0 }
  0x5e   : > { %5092 = vsyncadd (%p7816_p10), [#allocation14], 4294967232 }
  0x5f   : > { %5094 = dma.done.wait (%p7817_p4), [#allocation17], 16   ;;  %p7818_p12 = pmov %p7815_p0 }
  0x61   : > { %5096 = vsyncadd (%p7818_p12), [#allocation17], 4294967280 }
  0x62   : > { %397 = sfence }
  0x63   : > { %p431_p7 = scmp.lt.s32.totalorder %s5239_s21, 1  ;;  %vm436_vm0 = vcmask 146432   ;;  %vm439_vm1 = vcmask 140288   ;;  %v7774_v0 = vmov 0.0   ;;  %s7819_s0 = sld [smem:[#allocation85_spill]]  ;;  %vm451_vm2 = vcmask 138248  }
  0x64   : > { %437 = vst.msk [vmem:[#allocation2] sm:$0xff] %vm436_vm0, %v7774_v0  ;;  %438 = vst.msk [vmem:[#allocation2 + $0x8] sm:$0xff] %vm436_vm0, %v7774_v0  ;;  %4801 = vmatprep.subr.mxu0 %v7774_v0  ;;  %4836 = vmatprep.subr.mxu1 %v7774_v0  ;;  %s5122_s13 = smov 1   ;;  %s4439_s25 = sld [smem:[#allocation10 + $0x2]]  ;;  %vm570_vm3 = vcmask 130048   ;;  %vm926_vm6 = vcmask 123904  }
  0x65   : > { %440 = vst.msk [vmem:[#allocation2 + $0x10] sm:$0x3] %vm439_vm1, %v7774_v0  ;;  %s432_s26 = scalar_select %p431_p7, %s5239_s21, 1  ;;  %vm955_vm7 = vcmask 122880   ;;  %vm1238_vm10 = vcmask 31760   ;;  %vm1216_vm11 = vcmask 15360  }
  0x66   : > { %s4438_s12 = sld [smem:[#allocation10 + $0x1]]  ;;  %s7772_s2 = smov 126   ;;  %vm1304_vm12 = vcmask 80960   ;;  %vm1260_vm13 = vcmask 48160   ;;  %vm1348_vm14 = vcmask 113760   ;;  %vm1282_vm15 = vcmask 64560  }
  0x67   : > { %s4775_s29 = sshll.u32 %s432_s26, 4  ;;  %s5349_s16 = sld [smem:[#allocation10 + $0x4]]  ;;  %vm1326_vm1 = vcmask 97360  }
  0x68   : > { %s5351_s14 = sld [smem:[#allocation10 + $0x5]]  ;;  %s7777_s26 = smov 127  }
  0x69   : > { %s435_s24 = scalar_lea.vmem %s7819_s0, %s4775_s29  ;;  %s5360_s15 = sld [smem:[#allocation10 + $0x7]] }
  0x6a   : > { %v441_v1 = vld [vmem:[%s435_s24] sm:$0xff]  ;;  %v442_v2 = vld [vmem:[%s435_s24 + $0x8] sm:$0xff]  ;;  %v479_v5 = vstv %s4439_s25  ;;  %s5369_s29 = sld [smem:[#allocation10 + $0x8]]  ;;  %s7856_s20 = smov 127  }
  0x6b   : > { %445 = vrot.lane.b32.xlu0 %v441_v1, %s5122_s13  ;;  %s4447_s22 = sld [smem:[#allocation10 + $0xa]] }
  0x6c   : > { %v465_v6 = vstv %s4438_s12  ;;  %s4448_s30 = sld [smem:[#allocation10 + $0xb]] }
  0x6d   : > { %v499_v11 = vstv %s5349_s16  ;;  %s4450_s24 = sld [smem:[#allocation10 + $0xd]] }
  0x6e   : > { %v513_v15 = vstv %s5351_s14  ;;  %s4453_s25 = sld [smem:[#allocation10 + $0x10]] }
  0x6f   : > { %447 = vrot.lane.b32.xlu0 %v442_v2, %s5122_s13  ;;  %v533_v20 = vstv %s5360_s15  ;;  %s4451_s13 = sld [smem:[#allocation10 + $0xe]] }
  0x70   : > { %v547_v23 = vstv %s5369_s29  ;;  %s4454_s12 = sld [smem:[#allocation10 + $0x11]] }
  0x71   : > { %v578_v27 = vstv %s4447_s22  ;;  %s4457_s16 = sld [smem:[#allocation10 + $0x13]] }
  0x72   : > { %v592_v30 = vstv %s4448_s30  ;;  %s4458_s14 = sld [smem:[#allocation10 + $0x14]] }
  0x73   : > { %v612_v33 = vstv %s4450_s24  ;;  %s4460_s15 = sld [smem:[#allocation10 + $0x16]] }
  0x74   : > { %v646_v39 = vstv %s4453_s25  ;;  %s4461_s29 = sld [smem:[#allocation10 + $0x17]] }
  0x75   : > { %v626_v36 = vstv %s4451_s13  ;;  %s4463_s22 = sld [smem:[#allocation10 + $0x19]] }
  0x76   : > { %v660_v42 = vstv %s4454_s12  ;;  %s4464_s30 = sld [smem:[#allocation10 + $0x1a]] }
  0x77   : > { %v691_v45 = vstv %s4457_s16  ;;  %s4467_s24 = sld [smem:[#allocation10 + $0x1c]] }
  0x78   : > { %v705_v48 = vstv %s4458_s14  ;;  %s4468_s13 = sld [smem:[#allocation10 + $0x1d]] }
  0x79   : > { %v725_v51 = vstv %s4460_s15  ;;  %s4470_s25 = sld [smem:[#allocation10 + $0x1f]] }
  0x7a   : > { %v739_v54 = vstv %s4461_s29  ;;  %s4471_s12 = sld [smem:[#allocation10 + $0x20]] }
  0x7b   : > { %v759_v57 = vstv %s4463_s22  ;;  %s4473_s16 = sld [smem:[#allocation10 + $0x22]] }
  0x7c   : > { %v773_v60 = vstv %s4464_s30  ;;  %s4474_s14 = sld [smem:[#allocation10 + $0x23]] }
  0x7d   : > { %v804_v63 = vstv %s4467_s24  ;;  %s460_s15 = sld [smem:[#allocation10]] }
  0x7e   : > { %s4440_s29 = sld [smem:[#allocation10 + $0x3]] }
  0x7f   : > { %s5469_s22 = sld [smem:[#allocation10 + $0x6]] }
  0x80   : > { %s5475_s30 = sld [smem:[#allocation13]] }
  0x81   : > { %s5479_s24 = sld [smem:[#allocation10 + $0x9]] }
  0x82   : > { %s5915_s0 = sld [smem:[#allocation15 + $0x48]] }
  0x83   : > { %s5922_s1 = sld [smem:[#allocation15 + $0x6]] }
  0x84   : > { %s5925_s3 = sld [smem:[#allocation15 + $0x9b]] }
  0x85   : > { %s6733_s4 = sld [smem:[#allocation15 + $0x57]] }
  0x86   : > { %s6747_s19 = sld [smem:[#allocation15 + $0x36]] }
  0x87   : > { %s6765_s23 = sld [smem:[#allocation15 + $0x7b]] }
  0x88   : > { %s6769_s28 = sld [smem:[#allocation15 + $0x15]] }
  0x89   : > { %s6783_s17 = sld [smem:[#allocation15 + $0x5a]] }
  0x8a   : > { %s6789_s11 = sld [smem:[#allocation15 + $0xc0]] }
  0x8b   : > { %s6805_s10 = sld [smem:[#allocation15 + $0x39]] }
  0x8c   : > { %s6824_s27 = sld [smem:[#allocation15 + $0x7e]] }
  0x8d   : > { %s6829_s8 = sld [smem:[#allocation15 + $0xe4]] }
  0x8e   : > { %s6845_s21 = sld [smem:[#allocation15 + $0x18]] }
  0xdd   : > { %v446_v3 = vpop.permute.xlu0 %445 }
  0xde   : > { %452 = vst.msk [vmem:[#allocation2 + $0x1] sm:$0xff] %vm451_vm2, %v446_v3  ;;  %v818_v3 = vstv %s4468_s13  ;;  %s5481_s13 = sld [smem:[#allocation10 + $0xc]] }
  0xe1   : > { %v448_v4 = vpop.permute.xlu0 %447 }
  0xe2   : > { %453 = vst.msk [vmem:[#allocation2 + $0x9] sm:$0xff] %vm451_vm2, %v448_v4  ;;  %vm1370_vm2 = vcmask 130160  }
  0xe5   : > { %v5353_v7 = vld [vmem:[#allocation2] sm:$0xff] }
  0xe6   : > { %v480_v8 = vmul.f32 %v479_v5, %v5353_v7  ;;  %v466_v9 = vmul.f32 %v465_v6, %v5353_v7  ;;  %v5357_v10 = vld [vmem:[#allocation2 + $0x1] sm:$0xff]  ;;  %v579_v28 = vmul.f32 %v578_v27, %v5353_v7  ;;  %v593_v31 = vmul.f32 %v592_v30, %v5353_v7 }
  0xe7   : > { %v500_v14 = vmul.f32 %v499_v11, %v5357_v10  ;;  %v514_v16 = vmul.f32 %v513_v15, %v5357_v10  ;;  %v613_v34 = vmul.f32 %v612_v33, %v5357_v10  ;;  %v627_v37 = vmul.f32 %v626_v36, %v5357_v10 }
  0xe8   : > { %484 = vrot.lane.b32.xlu0 %v480_v8, %s7772_s2  ;;  %470 = vrot.lane.b32.xlu1 %v466_v9, %s7777_s26  ;;  %v692_v46 = vmul.f32 %v691_v45, %v5353_v7  ;;  %v706_v49 = vmul.f32 %v705_v48, %v5353_v7  ;;  %v726_v52 = vmul.f32 %v725_v51, %v5357_v10 }
  0xe9   : > { %v5364_v12 = vld [vmem:[#allocation2 + $0x8] sm:$0xff]  ;;  %v740_v55 = vmul.f32 %v739_v54, %v5357_v10  ;;  %v805_v1 = vmul.f32 %v804_v63, %v5353_v7  ;;  %v819_v4 = vmul.f32 %v818_v3, %v5353_v7 }
  0xea   : > { %v467_v13 = vmul.f32 %v465_v6, %v5364_v12  ;;  %v481_v17 = vmul.f32 %v479_v5, %v5364_v12  ;;  %v5375_v18 = vld [vmem:[#allocation2 + $0x9] sm:$0xff]  ;;  %v580_v35 = vmul.f32 %v578_v27, %v5364_v12  ;;  %v594_v38 = vmul.f32 %v592_v30, %v5364_v12 }
  0xeb   : > { %v5377_v19 = vld [vmem:[#allocation2 + $0x2] sm:$0xff]  ;;  %v501_v22 = vmul.f32 %v499_v11, %v5375_v18  ;;  %v515_v25 = vmul.f32 %v513_v15, %v5375_v18  ;;  %v5389_v26 = vld [vmem:[#allocation2 + $0xa] sm:$0xff]  ;;  %v614_v41 = vmul.f32 %v612_v33, %v5375_v18  ;;  %v628_v44 = vmul.f32 %v626_v36, %v5375_v18 }
  0xec   : > { %504 = vrot.lane.b32.xlu0 %v500_v14, %s7777_s26  ;;  %472 = vrot.lane.b32.xlu1 %v467_v13, %s7777_s26  ;;  %v534_v21 = vmul.f32 %v533_v20, %v5377_v19  ;;  %v548_v24 = vmul.f32 %v547_v23, %v5377_v19  ;;  %v535_v29 = vmul.f32 %v533_v20, %v5389_v26  ;;  %v838_v6 = vstv %s4470_s25  ;;  %s5486_s25 = sld [smem:[#allocation10 + $0xf]] }
  0xed   : > { %v549_v32 = vmul.f32 %v547_v23, %v5389_v26  ;;  %v647_v40 = vmul.f32 %v646_v39, %v5377_v19  ;;  %v661_v43 = vmul.f32 %v660_v42, %v5377_v19  ;;  %v648_v47 = vmul.f32 %v646_v39, %v5389_v26 }
  0xee   : > { %v662_v50 = vmul.f32 %v660_v42, %v5389_v26  ;;  %v693_v53 = vmul.f32 %v691_v45, %v5364_v12  ;;  %v707_v56 = vmul.f32 %v705_v48, %v5364_v12  ;;  %v760_v58 = vmul.f32 %v759_v57, %v5377_v19 }
  0xef   : > { %v727_v59 = vmul.f32 %v725_v51, %v5375_v18  ;;  %v774_v61 = vmul.f32 %v773_v60, %v5377_v19  ;;  %v741_v62 = vmul.f32 %v739_v54, %v5375_v18  ;;  %v761_v2 = vmul.f32 %v759_v57, %v5389_v26 }
  0xf0   : > { %518 = vrot.lane.b32.xlu0 %v514_v16, %s7772_s2  ;;  %486 = vrot.lane.b32.xlu1 %v481_v17, %s7772_s2  ;;  %v775_v5 = vmul.f32 %v773_v60, %v5389_v26  ;;  %v839_v8 = vmul.f32 %v838_v6, %v5357_v10  ;;  %v806_v9 = vmul.f32 %v804_v63, %v5364_v12  ;;  %v852_v11 = vstv %s4471_s12  ;;  %s5492_s12 = sld [smem:[#allocation10 + $0x12]] }
  0xf1   : > { %v853_v13 = vmul.f32 %v852_v11, %v5357_v10  ;;  %v820_v14 = vmul.f32 %v818_v3, %v5364_v12  ;;  %v872_v15 = vstv %s4473_s16  ;;  %v840_v17 = vmul.f32 %v838_v6, %v5375_v18  ;;  %s5495_s16 = sld [smem:[#allocation10 + $0x15]] }
  0xf2   : > { %v873_v16 = vmul.f32 %v872_v15, %v5377_v19  ;;  %v886_v20 = vstv %s4474_s14  ;;  %v874_v23 = vmul.f32 %v872_v15, %v5389_v26  ;;  %v493_v30 = vstv %s4440_s29  ;;  %s5498_s14 = sld [smem:[#allocation10 + $0x18]] }
  0xf3   : > { %v494_v33 = vmul.f32 %v493_v30, %v5357_v10  ;;  %v495_v45 = vmul.f32 %v493_v30, %v5375_v18  ;;  %v561_v54 = vstv %s5475_s30  ;;  %v606_v3 = vstv %s5481_s13  ;;  %s5516_s29 = sld [smem:[#allocation10 + $0x1b]] }
  0xf4   : > { %538 = vrot.lane.b32.xlu0 %v534_v21, %s7777_s26  ;;  %506 = vrot.lane.b32.xlu1 %v501_v22, %s7777_s26  ;;  %v887_v21 = vmul.f32 %v886_v20, %v5377_v19  ;;  %v854_v22 = vmul.f32 %v852_v11, %v5375_v18  ;;  %s5522_s30 = sld [smem:[#allocation10 + $0x21]] }
  0xf5   : > { %s5619_s13 = sld [smem:[#allocation13 + $0x3]] }
  0xf8   : > { %552 = vrot.lane.b32.xlu0 %v548_v24, %s7772_s2  ;;  %520 = vrot.lane.b32.xlu1 %v515_v25, %s7772_s2  ;;  %v888_v24 = vmul.f32 %v886_v20, %v5389_v26  ;;  %v461_v25 = vstv %s460_s15  ;;  %s5500_s15 = sld [smem:[#allocation13 + $0x1]] }
  0xf9   : > { %v462_v27 = vmul.f32 %v461_v25, %v5353_v7  ;;  %v463_v36 = vmul.f32 %v461_v25, %v5364_v12 }
  0xfc   : > { %583 = vrot.lane.b32.xlu0 %v579_v28, %s7777_s26  ;;  %540 = vrot.lane.b32.xlu1 %v535_v29, %s7777_s26 }
 0x100   : > { %597 = vrot.lane.b32.xlu0 %v593_v31, %s7772_s2  ;;  %554 = vrot.lane.b32.xlu1 %v549_v32, %s7772_s2 }
 0x104   : > { %617 = vrot.lane.b32.xlu0 %v613_v34, %s7777_s26  ;;  %585 = vrot.lane.b32.xlu1 %v580_v35, %s7777_s26 }
 0x108   : > { %631 = vrot.lane.b32.xlu0 %v627_v37, %s7772_s2  ;;  %599 = vrot.lane.b32.xlu1 %v594_v38, %s7772_s2  ;;  %v527_v38 = vstv %s5469_s22  ;;  %s5518_s22 = sld [smem:[#allocation10 + $0x1e]] }
 0x10c   : > { %651 = vrot.lane.b32.xlu0 %v647_v40, %s7777_s26  ;;  %619 = vrot.lane.b32.xlu1 %v614_v41, %s7777_s26 }
 0x110   : > { %665 = vrot.lane.b32.xlu0 %v661_v43, %s7772_s2  ;;  %633 = vrot.lane.b32.xlu1 %v628_v44, %s7772_s2 }
 0x114   : > { %696 = vrot.lane.b32.xlu0 %v692_v46, %s7777_s26  ;;  %653 = vrot.lane.b32.xlu1 %v648_v47, %s7777_s26  ;;  %v528_v46 = vmul.f32 %v527_v38, %v5377_v19 }
 0x118   : > { %710 = vrot.lane.b32.xlu0 %v706_v49, %s7772_s2  ;;  %667 = vrot.lane.b32.xlu1 %v662_v50, %s7772_s2 }
 0x11c   : > { %730 = vrot.lane.b32.xlu0 %v726_v52, %s7777_s26  ;;  %698 = vrot.lane.b32.xlu1 %v693_v53, %s7777_s26 }
 0x120   : > { %744 = vrot.lane.b32.xlu0 %v740_v55, %s7772_s2  ;;  %712 = vrot.lane.b32.xlu1 %v707_v56, %s7772_s2 }
 0x124   : > { %764 = vrot.lane.b32.xlu0 %v760_v58, %s7777_s26  ;;  %732 = vrot.lane.b32.xlu1 %v727_v59, %s7777_s26  ;;  %v529_v58 = vmul.f32 %v527_v38, %v5389_v26  ;;  %v574_v59 = vstv %s5479_s24  ;;  %s5551_s24 = sld [smem:[#allocation13 + $0x2]] }
 0x128   : > { %778 = vrot.lane.b32.xlu0 %v774_v61, %s7772_s2  ;;  %746 = vrot.lane.b32.xlu1 %v741_v62, %s7772_s2 }
 0x12c   : > { %809 = vrot.lane.b32.xlu0 %v805_v1, %s7777_s26  ;;  %766 = vrot.lane.b32.xlu1 %v761_v2, %s7777_s26  ;;  %v575_v2 = vmul.f32 %v574_v59, %v5353_v7 }
 0x130   : > { %823 = vrot.lane.b32.xlu0 %v819_v4, %s7772_s2  ;;  %780 = vrot.lane.b32.xlu1 %v775_v5, %s7772_s2 }
 0x134   : > { %843 = vrot.lane.b32.xlu0 %v839_v8, %s7777_s26  ;;  %811 = vrot.lane.b32.xlu1 %v806_v9, %s7777_s26 }
 0x138   : > { %857 = vrot.lane.b32.xlu0 %v853_v13, %s7772_s2  ;;  %825 = vrot.lane.b32.xlu1 %v820_v14, %s7772_s2  ;;  %v607_v14 = vmul.f32 %v606_v3, %v5357_v10 }
 0x13c   : > { %877 = vrot.lane.b32.xlu0 %v873_v16, %s7777_s26  ;;  %845 = vrot.lane.b32.xlu1 %v840_v17, %s7777_s26 }
 0x140   : > { %891 = vrot.lane.b32.xlu0 %v887_v21, %s7772_s2  ;;  %859 = vrot.lane.b32.xlu1 %v854_v22, %s7772_s2  ;;  %v640_v21 = vstv %s5486_s25  ;;  %s4477_s25 = sld [smem:[#allocation15 + $0x2]] }
 0x144   : > { %879 = vrot.lane.b32.xlu1 %v874_v23, %s7777_s26  ;;  %v576_v23 = vmul.f32 %v574_v59, %v5364_v12  ;;  %v674_v59 = vstv %s5500_s15  ;;  %s4480_s15 = sld [smem:[#allocation15 + $0x5]] }
 0x148   : > { %893 = vrot.lane.b32.xlu1 %v888_v24, %s7772_s2 }
 0x15a   : > { %v471_v28 = vpop.permute.xlu1 %470  ;;  %v485_v29 = vpop.permute.xlu0 %484 }
 0x15b   : > { %v476_v31 = vadd.f32 %v471_v28, %v462_v27 }
 0x15d   : > { %v490_v32 = vadd.f32 %v485_v29, %v476_v31  ;;  %v608_v31 = vmul.f32 %v606_v3, %v5375_v18 }
 0x15e   : > { %v473_v34 = vpop.permute.xlu1 %472  ;;  %v505_v35 = vpop.permute.xlu0 %504 }
 0x15f   : > { %v496_v37 = vadd.f32 %v494_v33, %v490_v32  ;;  %v477_v39 = vadd.f32 %v473_v34, %v463_v36 }
 0x161   : > { %v510_v40 = vadd.f32 %v505_v35, %v496_v37  ;;  %v641_v35 = vmul.f32 %v640_v21, %v5377_v19 }
 0x162   : > { %v487_v41 = vpop.permute.xlu1 %486  ;;  %v519_v42 = vpop.permute.xlu0 %518 }
 0x163   : > { %v491_v43 = vadd.f32 %v487_v41, %v477_v39  ;;  %v524_v44 = vadd.f32 %v519_v42, %v510_v40 }
 0x165   : > { %v497_v47 = vadd.f32 %v495_v45, %v491_v43  ;;  %v530_v48 = vadd.f32 %v528_v46, %v524_v44 }
 0x166   : > { %v507_v49 = vpop.permute.xlu1 %506  ;;  %v539_v50 = vpop.permute.xlu0 %538 }
 0x167   : > { %v511_v51 = vadd.f32 %v507_v49, %v497_v47  ;;  %v544_v52 = vadd.f32 %v539_v50, %v530_v48 }
 0x16a   : > { %v521_v53 = vpop.permute.xlu1 %520  ;;  %v553_v55 = vpop.permute.xlu0 %552 }
 0x16b   : > { %v525_v56 = vadd.f32 %v521_v53, %v511_v51  ;;  %v558_v57 = vadd.f32 %v553_v55, %v544_v52  ;;  %v687_v51 = vstv %s5492_s12  ;;  %v719_v52 = vstv %s5495_s16  ;;  %s4476_s12 = sld [smem:[#allocation15 + $0x1]] }
 0x16c   : > { %v642_v55 = vmul.f32 %v640_v21, %v5389_v26  ;;  %s4479_s16 = sld [smem:[#allocation15 + $0x4]] }
 0x16d   : > { %v562_v60 = vadd.f32 %v561_v54, %v558_v57  ;;  %v531_v61 = vadd.f32 %v529_v58, %v525_v56  ;;  %v753_v56 = vstv %s5498_s14  ;;  %s4512_s14 = sld [smem:[#allocation15 + $0x25]] }
 0x16e   : > { %v541_v62 = vpop.permute.xlu1 %540  ;;  %v584_v63 = vpop.permute.xlu0 %583 }
 0x16f   : > { %vm564_vm4 = vcmp.ge.f32.partialorder %v562_v60, 0.0  ;;  %v566_v1 = vmul.f32 0.01, %v562_v60  ;;  %v545_v5 = vadd.f32 %v541_v62, %v531_v61  ;;  %v589_v6 = vadd.f32 %v584_v63, %v575_v2 }
 0x171   : > { %v568_v4 = vsel %vm564_vm4, %v562_v60, %v566_v1 }
 0x172   : > { %571 = vst.msk [vmem:[#allocation3] sm:$0xff] %vm570_vm3, %v568_v4  ;;  %v555_v8 = vpop.permute.xlu1 %554  ;;  %v598_v9 = vpop.permute.xlu0 %597 }
 0x173   : > { %v559_v11 = vadd.f32 %v555_v8, %v545_v5  ;;  %v603_v13 = vadd.f32 %v598_v9, %v589_v6 }
 0x175   : > { %v563_v15 = vadd.f32 %v561_v54, %v559_v11  ;;  %v609_v16 = vadd.f32 %v607_v14, %v603_v13 }
 0x176   : > { %v586_v17 = vpop.permute.xlu1 %585  ;;  %v618_v20 = vpop.permute.xlu0 %617 }
 0x177   : > { %vm565_vm5 = vcmp.ge.f32.partialorder %v563_v15, 0.0  ;;  %v567_v22 = vmul.f32 0.01, %v563_v15  ;;  %v590_v29 = vadd.f32 %v586_v17, %v576_v23  ;;  %v623_v30 = vadd.f32 %v618_v20, %v609_v16 }
 0x179   : > { %v922_v24 = vld [vmem:[#allocation3] sm:$0x3]  ;;  %v960_v25 = vld [vmem:[#allocation3 + $0x2] sm:$0x3]  ;;  %v996_v27 = vld [vmem:[#allocation3 + $0x4] sm:$0x3]  ;;  %v569_v28 = vsel %vm565_vm5, %v563_v15, %v567_v22 }
 0x17a   : > { %v1032_v32 = vld [vmem:[#allocation3 + $0x6] sm:$0x3]  ;;  %572 = vst.msk [vmem:[#allocation3 + $0x8] sm:$0xff] %vm570_vm3, %v569_v28  ;;  %v600_v33 = vpop.permute.xlu1 %599  ;;  %v632_v34 = vpop.permute.xlu0 %631  ;;  %v927_v36 = vsel %vm926_vm6, %v922_v24, -inf  ;;  %v964_v37 = vsel %vm926_vm6, %v960_v25, -inf  ;;  %v1000_v38 = vsel %vm926_vm6, %v996_v27, -inf }
 0x17b   : > { %v604_v39 = vadd.f32 %v600_v33, %v590_v29  ;;  %v637_v40 = vadd.f32 %v632_v34, %v623_v30  ;;  %v928_v41 = vrot.slane %v927_v36, 4  ;;  %v965_v42 = vrot.slane %v964_v37, 4 }
 0x17c   : > { %v1001_v43 = vrot.slane %v1000_v38, 4  ;;  %v1036_v44 = vsel %vm926_vm6, %v1032_v32, -inf  ;;  %vm912_vm5 = vcmask 80896  }
 0x17d   : > { %v610_v45 = vadd.f32 %v608_v31, %v604_v39  ;;  %v643_v46 = vadd.f32 %v641_v35, %v637_v40  ;;  %v929_v47 = vmax.f32 %v927_v36, %v928_v41  ;;  %v966_v48 = vmax.f32 %v964_v37, %v965_v42  ;;  %913 = vst.msk [vmem:[#allocation5] sm:$0xff] %vm912_vm5, %v7774_v0 }
 0x17e   : > { %v620_v49 = vpop.permute.xlu1 %619  ;;  %v652_v50 = vpop.permute.xlu0 %651  ;;  %v1002_v53 = vmax.f32 %v1000_v38, %v1001_v43  ;;  %v1037_v54 = vrot.slane %v1036_v44, 4  ;;  %v688_v39 = vmul.f32 %v687_v51, %v5353_v7  ;;  %916 = vst.msk [vmem:[#allocation5 + $0x10] sm:$0xff] %vm912_vm5, %v7774_v0  ;;  %918 = vst.msk [vmem:[#allocation5 + $0x20] sm:$0xff] %vm912_vm5, %v7774_v0 }
 0x17f   : > { %v930_v57 = vrot.slane %v929_v47, 2  ;;  %v967_v58 = vrot.slane %v966_v48, 2  ;;  %v624_v1 = vadd.f32 %v620_v49, %v610_v45  ;;  %v657_v2 = vadd.f32 %v652_v50, %v643_v46  ;;  %920 = vst.msk [vmem:[#allocation5 + $0x30] sm:$0xff] %vm912_vm5, %v7774_v0 }
 0x180   : > { %v1003_v60 = vrot.slane %v1002_v53, 2  ;;  %v1038_v61 = vmax.f32 %v1036_v44, %v1037_v54 }
 0x181   : > { %v1068_v62 = vld [vmem:[#allocation3 + $0x8] sm:$0x3]  ;;  %v1104_v63 = vld [vmem:[#allocation3 + $0xa] sm:$0x3]  ;;  %v931_v3 = vmax.f32 %v929_v47, %v930_v57  ;;  %v968_v4 = vmax.f32 %v966_v48, %v967_v58  ;;  %v1140_v24 = vld [vmem:[#allocation3 + $0xc] sm:$0x3] }
 0x182   : > { %v634_v5 = vpop.permute.xlu1 %633  ;;  %v666_v6 = vpop.permute.xlu0 %665  ;;  %v1004_v8 = vmax.f32 %v1002_v53, %v1003_v60  ;;  %v1039_v9 = vrot.slane %v1038_v61, 2  ;;  %v1072_v11 = vsel %vm926_vm6, %v1068_v62, -inf  ;;  %v1108_v13 = vsel %vm926_vm6, %v1104_v63, -inf  ;;  %v1176_v30 = vld [vmem:[#allocation3 + $0xe] sm:$0x3] }
 0x183   : > { %v638_v14 = vadd.f32 %v634_v5, %v624_v1  ;;  %v671_v15 = vadd.f32 %v666_v6, %v657_v2  ;;  %v932_v16 = vrot.slane %v931_v3, 1  ;;  %v969_v17 = vrot.slane %v968_v4, 1 }
 0x184   : > { %v1005_v20 = vrot.slane %v1004_v8, 1  ;;  %v1040_v21 = vmax.f32 %v1038_v61, %v1039_v9  ;;  %v1073_v22 = vrot.slane %v1072_v11, 4  ;;  %v1109_v23 = vrot.slane %v1108_v13, 4 }
 0x185   : > { %v675_v25 = vadd.f32 %v674_v59, %v671_v15  ;;  %v644_v27 = vadd.f32 %v642_v55, %v638_v14  ;;  %v933_v28 = vmax.f32 %v931_v3, %v932_v16  ;;  %v970_v29 = vmax.f32 %v968_v4, %v969_v17 }
 0x186   : > { %v654_v31 = vpop.permute.xlu1 %653  ;;  %v697_v32 = vpop.permute.xlu0 %696  ;;  %v1006_v33 = vmax.f32 %v1004_v8, %v1005_v20  ;;  %v1041_v34 = vrot.slane %v1040_v21, 1  ;;  %v1074_v35 = vmax.f32 %v1072_v11, %v1073_v22  ;;  %v1110_v36 = vmax.f32 %v1108_v13, %v1109_v23 }
 0x187   : > { %vm677_vm8 = vcmp.ge.f32.partialorder %v675_v25, 0.0  ;;  %v679_v37 = vmul.f32 0.01, %v675_v25  ;;  %v658_v38 = vadd.f32 %v654_v31, %v644_v27  ;;  %956 = vst.msk [vmem:[#allocation4] sm:$0x1] %vm955_vm7, %v933_v28  ;;  %v1144_v43 = vsel %vm926_vm6, %v1140_v24, -inf }
 0x188   : > { %992 = vst.msk [vmem:[#allocation4 + $0x1] sm:$0x1] %vm955_vm7, %v970_v29  ;;  %1028 = vst.msk [vmem:[#allocation4 + $0x2] sm:$0x1] %vm955_vm7, %v1006_v33  ;;  %v1042_v40 = vmax.f32 %v1040_v21, %v1041_v34  ;;  %v1075_v41 = vrot.slane %v1074_v35, 2  ;;  %v1111_v42 = vrot.slane %v1110_v36, 2  ;;  %v702_v45 = vadd.f32 %v697_v32, %v688_v39 }
 0x189   : > { %v681_v44 = vsel %vm677_vm8, %v675_v25, %v679_v37  ;;  %v1145_v46 = vrot.slane %v1144_v43, 4  ;;  %v1180_v47 = vsel %vm926_vm6, %v1176_v30, -inf  ;;  %v800_v55 = vstv %s5516_s29  ;;  %s4513_s29 = sld [smem:[#allocation15 + $0x26]] }
 0x18a   : > { %684 = vst.msk [vmem:[#allocation3 + $0x10] sm:$0xff] %vm570_vm3, %v681_v44  ;;  %v668_v48 = vpop.permute.xlu1 %667  ;;  %v711_v49 = vpop.permute.xlu0 %710  ;;  %v1076_v50 = vmax.f32 %v1074_v35, %v1075_v41  ;;  %v1112_v53 = vmax.f32 %v1110_v36, %v1111_v42  ;;  %v1181_v54 = vrot.slane %v1180_v47, 4  ;;  %v720_v60 = vmul.f32 %v719_v52, %v5357_v10 }
 0x18b   : > { %1064 = vst.msk [vmem:[#allocation4 + $0x3] sm:$0x1] %vm955_vm7, %v1042_v40  ;;  %v672_v57 = vadd.f32 %v668_v48, %v658_v38  ;;  %v716_v58 = vadd.f32 %v711_v49, %v702_v45  ;;  %v1146_v61 = vmax.f32 %v1144_v43, %v1145_v46  ;;  %v832_v2 = vstv %s5518_s22  ;;  %s5716_s22 = sld [smem:[#allocation15 + $0x4a]] }
 0x18c   : > { %v1077_v62 = vrot.slane %v1076_v50, 1  ;;  %v1113_v63 = vrot.slane %v1112_v53, 1  ;;  %v1182_v1 = vmax.f32 %v1180_v47, %v1181_v54  ;;  %v866_v6 = vstv %s5522_s30  ;;  %s4549_s30 = sld [smem:[#allocation15 + $0x49]] }
 0x18d   : > { %v676_v3 = vadd.f32 %v674_v59, %v672_v57  ;;  %v722_v4 = vadd.f32 %v720_v60, %v716_v58  ;;  %v1147_v5 = vrot.slane %v1146_v61, 2  ;;  %v689_v8 = vmul.f32 %v687_v51, %v5364_v12 }
 0x18e   : > { %v699_v9 = vpop.permute.xlu1 %698  ;;  %v731_v11 = vpop.permute.xlu0 %730  ;;  %v1078_v13 = vmax.f32 %v1076_v50, %v1077_v62  ;;  %v1114_v14 = vmax.f32 %v1112_v53, %v1113_v63  ;;  %v1183_v15 = vrot.slane %v1182_v1, 2  ;;  %v721_v17 = vmul.f32 %v719_v52, %v5375_v18 }
 0x18f   : > { %vm678_vm9 = vcmp.ge.f32.partialorder %v676_v3, 0.0  ;;  %v680_v16 = vmul.f32 0.01, %v676_v3  ;;  %v754_v59 = vmul.f32 %v753_v56, %v5377_v19  ;;  %v1148_v51 = vmax.f32 %v1146_v61, %v1147_v5 }
 0x190   : > { %1100 = vst.msk [vmem:[#allocation4 + $0x4] sm:$0x1] %vm955_vm7, %v1078_v13  ;;  %1136 = vst.msk [vmem:[#allocation4 + $0x5] sm:$0x1] %vm955_vm7, %v1114_v14  ;;  %v1184_v20 = vmax.f32 %v1182_v1, %v1183_v15  ;;  %v5558_v21 = vmul.f32 %v753_v56, %v5389_v26  ;;  %v5561_v22 = vmul.f32 %v800_v55, %v5353_v7  ;;  %v787_v53 = vstv %s5551_s24  ;;  %s5726_s24 = sld [smem:[#allocation15 + $0x6d]] }
 0x191   : > { %v923_v23 = vld [vmem:[#allocation3 + $0x10] sm:$0x3]  ;;  %v961_v52 = vld [vmem:[#allocation3 + $0x12] sm:$0x3]  ;;  %v997_v24 = vld [vmem:[#allocation3 + $0x14] sm:$0x3]  ;;  %v682_v25 = vsel %vm678_vm9, %v676_v3, %v680_v16  ;;  %v703_v27 = vadd.f32 %v699_v9, %v689_v8  ;;  %v736_v28 = vadd.f32 %v731_v11, %v722_v4  ;;  %v5564_v29 = vmul.f32 %v800_v55, %v5364_v12 }
 0x192   : > { %v1033_v30 = vld [vmem:[#allocation3 + $0x16] sm:$0x3]  ;;  %685 = vst.msk [vmem:[#allocation3 + $0x18] sm:$0xff] %vm570_vm3, %v682_v25  ;;  %v713_v31 = vpop.permute.xlu1 %712  ;;  %v745_v32 = vpop.permute.xlu0 %744  ;;  %v1149_v33 = vrot.slane %v1148_v51, 1  ;;  %v1185_v56 = vrot.slane %v1184_v20, 1  ;;  %v934_v34 = vsel %vm926_vm6, %v923_v23, -inf  ;;  %v5576_v48 = vmul.f32 %v832_v2, %v5357_v10 }
 0x193   : > { %v971_v7 = vsel %vm926_vm6, %v961_v52, -inf  ;;  %v717_v35 = vadd.f32 %v713_v31, %v703_v27  ;;  %v750_v36 = vadd.f32 %v745_v32, %v736_v28  ;;  %v935_v37 = vrot.slane %v934_v34, 4 }
 0x194   : > { %v972_v38 = vrot.slane %v971_v7, 4  ;;  %v1150_v39 = vmax.f32 %v1148_v51, %v1149_v33  ;;  %v1186_v40 = vmax.f32 %v1184_v20, %v1185_v56  ;;  %v1007_v12 = vsel %vm926_vm6, %v997_v24, -inf }
 0x195   : > { %v1043_v41 = vsel %vm926_vm6, %v1033_v30, -inf  ;;  %v723_v42 = vadd.f32 %v721_v17, %v717_v35  ;;  %v756_v43 = vadd.f32 %v754_v59, %v750_v36  ;;  %v936_v44 = vmax.f32 %v934_v34, %v935_v37 }
 0x196   : > { %v973_v45 = vmax.f32 %v971_v7, %v972_v38  ;;  %v733_v46 = vpop.permute.xlu1 %732  ;;  %v765_v47 = vpop.permute.xlu0 %764  ;;  %1172 = vst.msk [vmem:[#allocation4 + $0x6] sm:$0x1] %vm955_vm7, %v1150_v39  ;;  %1208 = vst.msk [vmem:[#allocation4 + $0x7] sm:$0x1] %vm955_vm7, %v1186_v40  ;;  %v1008_v49 = vrot.slane %v1007_v12, 4  ;;  %v1044_v50 = vrot.slane %v1043_v41, 4 }
 0x197   : > { %v937_v54 = vrot.slane %v936_v44, 2  ;;  %v737_v62 = vadd.f32 %v733_v46, %v723_v42  ;;  %v770_v63 = vadd.f32 %v765_v47, %v756_v43  ;;  %vm914_vm8 = vcmask 74752  }
 0x198   : > { %v974_v55 = vrot.slane %v973_v45, 2  ;;  %v1009_v57 = vmax.f32 %v1007_v12, %v1008_v49  ;;  %v1045_v58 = vmax.f32 %v1043_v41, %v1044_v50  ;;  %915 = vst.msk [vmem:[#allocation5 + $0x8] sm:$0x3] %vm914_vm8, %v7774_v0  ;;  %917 = vst.msk [vmem:[#allocation5 + $0x18] sm:$0x3] %vm914_vm8, %v7774_v0 }
 0x199   : > { %v1069_v60 = vld [vmem:[#allocation3 + $0x18] sm:$0x3]  ;;  %v1105_v61 = vld [vmem:[#allocation3 + $0x1a] sm:$0x3]  ;;  %v938_v1 = vmax.f32 %v936_v44, %v937_v54  ;;  %v1141_v27 = vld [vmem:[#allocation3 + $0x1c] sm:$0x3] }
 0x19a   : > { %v975_v3 = vmax.f32 %v973_v45, %v974_v55  ;;  %v747_v4 = vpop.permute.xlu1 %746  ;;  %v779_v10 = vpop.permute.xlu0 %778  ;;  %v1010_v5 = vrot.slane %v1009_v57, 2  ;;  %v1046_v8 = vrot.slane %v1045_v58, 2  ;;  %v1079_v9 = vsel %vm926_vm6, %v1069_v60, -inf  ;;  %v1177_v56 = vld [vmem:[#allocation3 + $0x1e] sm:$0x3] }
 0x19b   : > { %v1115_v11 = vsel %vm926_vm6, %v1105_v61, -inf  ;;  %v751_v13 = vadd.f32 %v747_v4, %v737_v62  ;;  %v784_v14 = vadd.f32 %v779_v10, %v770_v63  ;;  %v939_v15 = vrot.slane %v938_v1, 1  ;;  %919 = vst.msk [vmem:[#allocation5 + $0x28] sm:$0x3] %vm914_vm8, %v7774_v0  ;;  %921 = vst.msk [vmem:[#allocation5 + $0x38] sm:$0x3] %vm914_vm8, %v7774_v0 }
 0x19c   : > { %v976_v16 = vrot.slane %v975_v3, 1  ;;  %v1011_v17 = vmax.f32 %v1009_v57, %v1010_v5  ;;  %v1047_v59 = vmax.f32 %v1045_v58, %v1046_v8  ;;  %v1080_v51 = vrot.slane %v1079_v9, 4 }
 0x19d   : > { %v5581_v20 = vld [vmem:[#allocation4] sm:$0xff]  ;;  %v788_v23 = vadd.f32 %v787_v53, %v784_v14  ;;  %v757_v52 = vadd.f32 %v5558_v21, %v751_v13  ;;  %v940_v24 = vmax.f32 %v938_v1, %v939_v15  ;;  %v1116_v33 = vrot.slane %v1115_v11, 4 }
 0x19e   : > { %v977_v25 = vmax.f32 %v975_v3, %v976_v16  ;;  %v1239_v28 = vsel %vm1238_vm10, %v5581_v20, -inf  ;;  %v1217_v30 = vsel %vm1216_vm11, %v5581_v20, -inf  ;;  %v767_v31 = vpop.permute.xlu1 %766  ;;  %v810_v32 = vpop.permute.xlu0 %809  ;;  %v5593_v21 = vmul.f32 %v832_v2, %v5375_v18 }
 0x19f   : > { %1240 = vmax.xlane.f32.xlu1 %v1239_v28  ;;  %1218 = vmax.xlane.f32.xlu0 %v1217_v30  ;;  %vm790_vm0 = vcmp.ge.f32.partialorder %v788_v23, 0.0  ;;  %v792_v34 = vmul.f32 0.01, %v788_v23  ;;  %957 = vst.msk [vmem:[#allocation4 + $0x8] sm:$0x1] %vm955_vm7, %v940_v24  ;;  %v1305_v7 = vsel %vm1304_vm12, %v5581_v20, -inf  ;;  %v771_v35 = vadd.f32 %v767_v31, %v757_v52 }
 0x1a0   : > { %993 = vst.msk [vmem:[#allocation4 + $0x9] sm:$0x1] %vm955_vm7, %v977_v25  ;;  %v815_v36 = vadd.f32 %v810_v32, %v5561_v22  ;;  %v1012_v38 = vrot.slane %v1011_v17, 1  ;;  %v1048_v39 = vrot.slane %v1047_v59, 1  ;;  %v1081_v40 = vmax.f32 %v1079_v9, %v1080_v51 }
 0x1a1   : > { %v794_v37 = vsel %vm790_vm0, %v788_v23, %v792_v34  ;;  %v1261_v18 = vsel %vm1260_vm13, %v5581_v20, -inf  ;;  %v1117_v41 = vmax.f32 %v1115_v11, %v1116_v33  ;;  %v1151_v42 = vsel %vm926_vm6, %v1141_v27, -inf }
 0x1a2   : > { %797 = vst.msk [vmem:[#allocation3 + $0x20] sm:$0xff] %vm570_vm3, %v794_v37  ;;  %v781_v2 = vpop.permute.xlu1 %780  ;;  %v824_v12 = vpop.permute.xlu0 %823  ;;  %v1187_v43 = vsel %vm926_vm6, %v1177_v56, -inf  ;;  %v1013_v45 = vmax.f32 %v1011_v17, %v1012_v38  ;;  %v1082_v46 = vrot.slane %v1081_v40, 2  ;;  %v1049_v47 = vmax.f32 %v1047_v59, %v1048_v39 }
 0x1a3   : > { %1306 = vmax.xlane.f32.xlu1 %v1305_v7  ;;  %1262 = vmax.xlane.f32.xlu0 %v1261_v18  ;;  %v785_v22 = vadd.f32 %v781_v2, %v771_v35  ;;  %v829_v44 = vadd.f32 %v824_v12, %v815_v36  ;;  %v1118_v49 = vrot.slane %v1117_v41, 2  ;;  %v1152_v50 = vrot.slane %v1151_v42, 4 }
 0x1a4   : > { %v1188_v54 = vrot.slane %v1187_v43, 4  ;;  %v1349_v55 = vsel %vm1348_vm14, %v5581_v20, -inf  ;;  %1029 = vst.msk [vmem:[#allocation4 + $0xa] sm:$0x1] %vm955_vm7, %v1013_v45  ;;  %v1083_v60 = vmax.f32 %v1081_v40, %v1082_v46  ;;  %v1283_v61 = vsel %vm1282_vm15, %v5581_v20, -inf }
 0x1a5   : > { %v789_v57 = vadd.f32 %v787_v53, %v785_v22  ;;  %v835_v58 = vadd.f32 %v5576_v48, %v829_v44  ;;  %1065 = vst.msk [vmem:[#allocation4 + $0xb] sm:$0x1] %vm955_vm7, %v1049_v47  ;;  %v1119_v1 = vmax.f32 %v1117_v41, %v1118_v49  ;;  %v1153_v3 = vmax.f32 %v1151_v42, %v1152_v50 }
 0x1a6   : > { %v812_v62 = vpop.permute.xlu1 %811  ;;  %v844_v63 = vpop.permute.xlu0 %843  ;;  %v1189_v4 = vmax.f32 %v1187_v43, %v1188_v54  ;;  %v1327_v48 = vsel %vm1326_vm1, %v5581_v20, -inf  ;;  %v867_v10 = vmul.f32 %v866_v6, %v5377_v19  ;;  %v1084_v5 = vrot.slane %v1083_v60, 1 }
 0x1a7   : > { %1350 = vmax.xlane.f32.xlu1 %v1349_v55  ;;  %1284 = vmax.xlane.f32.xlu0 %v1283_v61  ;;  %vm791_vm4 = vcmp.ge.f32.partialorder %v789_v57, 0.0  ;;  %v793_v53 = vmul.f32 0.01, %v789_v57  ;;  %v1120_v8 = vrot.slane %v1119_v1, 1  ;;  %v1154_v9 = vrot.slane %v1153_v3, 2 }
 0x1a8   : > { %v1190_v11 = vrot.slane %v1189_v4, 2  ;;  %v816_v16 = vadd.f32 %v812_v62, %v5564_v29  ;;  %v849_v17 = vadd.f32 %v844_v63, %v835_v58  ;;  %v1371_v59 = vsel %vm1370_vm2, %v5581_v20, -inf }
 0x1a9   : > { %v924_v13 = vld [vmem:[#allocation3 + $0x20] sm:$0x3]  ;;  %v962_v14 = vld [vmem:[#allocation3 + $0x22] sm:$0x3]  ;;  %v795_v15 = vsel %vm791_vm4, %v789_v57, %v793_v53  ;;  %v998_v51 = vld [vmem:[#allocation3 + $0x24] sm:$0x3]  ;;  %v1085_v24 = vmax.f32 %v1083_v60, %v1084_v5  ;;  %v1121_v25 = vmax.f32 %v1119_v1, %v1120_v8  ;;  %v1155_v27 = vmax.f32 %v1153_v3, %v1154_v9 }
 0x1aa   : > { %v1034_v23 = vld [vmem:[#allocation3 + $0x26] sm:$0x3]  ;;  %798 = vst.msk [vmem:[#allocation3 + $0x28] sm:$0xff] %vm570_vm3, %v795_v15  ;;  %v826_v19 = vpop.permute.xlu1 %825  ;;  %v858_v52 = vpop.permute.xlu0 %857  ;;  %v1191_v28 = vmax.f32 %v1189_v4, %v1190_v11  ;;  %v941_v32 = vsel %vm926_vm6, %v924_v13, -inf  ;;  %v978_v29 = vsel %vm926_vm6, %v962_v14, -inf  ;;  %v1014_v36 = vsel %vm926_vm6, %v998_v51, -inf }
 0x1ab   : > { %1328 = vmax.xlane.f32.xlu0 %v1327_v48  ;;  %v830_v30 = vadd.f32 %v826_v19, %v816_v16  ;;  %v863_v31 = vadd.f32 %v858_v52, %v849_v17  ;;  %1101 = vst.msk [vmem:[#allocation4 + $0xc] sm:$0x1] %vm955_vm7, %v1085_v24  ;;  %1137 = vst.msk [vmem:[#allocation4 + $0xd] sm:$0x1] %vm955_vm7, %v1121_v25  ;;  %v1156_v20 = vrot.slane %v1155_v27, 1  ;;  %v942_v56 = vrot.slane %v941_v32, 4 }
 0x1ac   : > { %v1192_v33 = vrot.slane %v1191_v28, 1  ;;  %v979_v34 = vrot.slane %v978_v29, 4  ;;  %v1050_v37 = vsel %vm926_vm6, %v1034_v23, -inf  ;;  %v900_v41 = vstv %s5619_s13  ;;  %s4515_s13 = sld [smem:[#allocation15 + $0x28]] }
 0x1ad   : > { %v836_v7 = vadd.f32 %v5593_v21, %v830_v30  ;;  %v869_v35 = vadd.f32 %v867_v10, %v863_v31  ;;  %v1157_v40 = vmax.f32 %v1155_v27, %v1156_v20  ;;  %v943_v2 = vmax.f32 %v941_v32, %v942_v56 }
 0x1ae   : > { %v846_v38 = vpop.permute.xlu1 %845  ;;  %v878_v39 = vpop.permute.xlu0 %877  ;;  %v1193_v18 = vmax.f32 %v1191_v28, %v1192_v33  ;;  %v980_v12 = vmax.f32 %v978_v29, %v979_v34  ;;  %v868_v42 = vmul.f32 %v866_v6, %v5389_v26  ;;  %v1015_v43 = vrot.slane %v1014_v36, 4 }
 0x1af   : > { %1372 = vmax.xlane.f32.xlu0 %v1371_v59  ;;  %v1051_v22 = vrot.slane %v1050_v37, 4  ;;  %1173 = vst.msk [vmem:[#allocation4 + $0xe] sm:$0x1] %vm955_vm7, %v1157_v40  ;;  %v944_v21 = vrot.slane %v943_v2, 2  ;;  %v850_v47 = vadd.f32 %v846_v38, %v836_v7  ;;  %v883_v49 = vadd.f32 %v878_v39, %v869_v35 }
 0x1b0   : > { %1209 = vst.msk [vmem:[#allocation4 + $0xf] sm:$0x1] %vm955_vm7, %v1193_v18  ;;  %v981_v44 = vrot.slane %v980_v12, 2  ;;  %v1016_v50 = vmax.f32 %v1014_v36, %v1015_v43  ;;  %vm3387_vm4 = vcmask 58368   ;;  %vm3444_vm8 = vcmask 57344  }
 0x1b1   : > { %v1070_v45 = vld [vmem:[#allocation3 + $0x28] sm:$0x3]  ;;  %v1106_v46 = vld [vmem:[#allocation3 + $0x2a] sm:$0x3]  ;;  %v1052_v54 = vmax.f32 %v1050_v37, %v1051_v22  ;;  %v945_v55 = vmax.f32 %v943_v2, %v944_v21  ;;  %v1142_v23 = vld [vmem:[#allocation3 + $0x2c] sm:$0x3] }
 0x1b2   : > { %v860_v26 = vpop.permute.xlu1 %859  ;;  %v892_v6 = vpop.permute.xlu0 %891  ;;  %v982_v57 = vmax.f32 %v980_v12, %v981_v44  ;;  %v1086_v58 = vsel %vm926_vm6, %v1070_v45, -inf  ;;  %v1122_v60 = vsel %vm926_vm6, %v1106_v46, -inf  ;;  %v1017_v63 = vrot.slane %v1016_v50, 2  ;;  %v1178_v19 = vld [vmem:[#allocation3 + $0x2e] sm:$0x3] }
 0x1b3   : > { %v864_v61 = vadd.f32 %v860_v26, %v850_v47  ;;  %v897_v62 = vadd.f32 %v892_v6, %v883_v49  ;;  %v1053_v1 = vrot.slane %v1052_v54, 2  ;;  %v946_v3 = vrot.slane %v945_v55, 1 }
 0x1b4   : > { %v983_v4 = vrot.slane %v982_v57, 1  ;;  %v1087_v53 = vrot.slane %v1086_v58, 4  ;;  %v1123_v48 = vrot.slane %v1122_v60, 4  ;;  %v1018_v8 = vmax.f32 %v1016_v50, %v1017_v63 }
 0x1b5   : > { %v901_v10 = vadd.f32 %v900_v41, %v897_v62  ;;  %v870_v5 = vadd.f32 %v868_v42, %v864_v61  ;;  %v947_v11 = vmax.f32 %v945_v55, %v946_v3  ;;  %v1054_v14 = vmax.f32 %v1052_v54, %v1053_v1 }
 0x1b6   : > { %v880_v9 = vpop.permute.xlu1 %879  ;;  %v984_v13 = vmax.f32 %v982_v57, %v983_v4  ;;  %v1088_v15 = vmax.f32 %v1086_v58, %v1087_v53  ;;  %v1019_v59 = vrot.slane %v1018_v8, 1  ;;  %v1124_v51 = vmax.f32 %v1122_v60, %v1123_v48 }
 0x1b7   : > { %v1235_v16 = vld [vmem:[#allocation4 + $0x8] sm:$0xff]  ;;  %vm903_vm9 = vcmp.ge.f32.partialorder %v901_v10, 0.0  ;;  %v905_v17 = vmul.f32 0.01, %v901_v10  ;;  %958 = vst.msk [vmem:[#allocation4 + $0x10] sm:$0x1] %vm955_vm7, %v947_v11  ;;  %v884_v28 = vadd.f32 %v880_v9, %v870_v5 }
 0x1b8   : > { %v1242_v52 = vsel %vm1238_vm10, %v1235_v16, -inf  ;;  %v1220_v24 = vsel %vm1216_vm11, %v1235_v16, -inf  ;;  %994 = vst.msk [vmem:[#allocation4 + $0x11] sm:$0x1] %vm955_vm7, %v984_v13  ;;  %v1286_v27 = vsel %vm1282_vm15, %v1235_v16, -inf  ;;  %v1264_v30 = vsel %vm1260_vm13, %v1235_v16, -inf }
 0x1b9   : > { %1243 = vmax.xlane.f32.xlu0 %v1242_v52  ;;  %1221 = vmax.xlane.f32.xlu1 %v1220_v24  ;;  %v907_v25 = vsel %vm903_vm9, %v901_v10, %v905_v17  ;;  %v1020_v32 = vmax.f32 %v1018_v8, %v1019_v59  ;;  %v1055_v29 = vrot.slane %v1054_v14, 1  ;;  %v1089_v20 = vrot.slane %v1088_v15, 2 }
 0x1ba   : > { %910 = vst.msk [vmem:[#allocation3 + $0x30] sm:$0xff] %vm570_vm3, %v907_v25  ;;  %v894_v31 = vpop.permute.xlu1 %893  ;;  %v1125_v56 = vrot.slane %v1124_v51, 2  ;;  %v1158_v34 = vsel %vm926_vm6, %v1142_v23, -inf  ;;  %v1194_v7 = vsel %vm926_vm6, %v1178_v19, -inf  ;;  %v1330_v39 = vsel %vm1326_vm1, %v1235_v16, -inf }
 0x1bb   : > { %v898_v33 = vadd.f32 %v894_v31, %v884_v28  ;;  %1030 = vst.msk [vmem:[#allocation4 + $0x12] sm:$0x1] %vm955_vm7, %v1020_v32  ;;  %v1056_v35 = vmax.f32 %v1054_v14, %v1055_v29  ;;  %v1090_v36 = vmax.f32 %v1088_v15, %v1089_v20  ;;  %v1159_v37 = vrot.slane %v1158_v34, 4 }
 0x1bc   : > { %v1195_v38 = vrot.slane %v1194_v7, 4  ;;  %v1126_v18 = vmax.f32 %v1124_v51, %v1125_v56  ;;  %v1308_v2 = vsel %vm1304_vm12, %v1235_v16, -inf  ;;  %v1374_v21 = vsel %vm1370_vm2, %v1235_v16, -inf }
 0x1bd   : > { %1287 = vmax.xlane.f32.xlu0 %v1286_v27  ;;  %1265 = vmax.xlane.f32.xlu1 %v1264_v30  ;;  %v902_v40 = vadd.f32 %v900_v41, %v898_v33  ;;  %1066 = vst.msk [vmem:[#allocation4 + $0x13] sm:$0x1] %vm955_vm7, %v1056_v35  ;;  %v1091_v12 = vrot.slane %v1090_v36, 1  ;;  %v1160_v42 = vmax.f32 %v1158_v34, %v1159_v37  ;;  %v1352_v45 = vsel %vm1348_vm14, %v1235_v16, -inf }
 0x1be   : > { %v1196_v43 = vmax.f32 %v1194_v7, %v1195_v38  ;;  %v1127_v44 = vrot.slane %v1126_v18, 1 }
 0x1bf   : > { %vm904_vm0 = vcmp.ge.f32.partialorder %v902_v40, 0.0  ;;  %v906_v22 = vmul.f32 0.01, %v902_v40  ;;  %v1092_v46 = vmax.f32 %v1090_v36, %v1091_v12  ;;  %v1161_v47 = vrot.slane %v1160_v42, 2 }
 0x1c0   : > { %v1197_v49 = vrot.slane %v1196_v43, 2  ;;  %v1128_v6 = vmax.f32 %v1126_v18, %v1127_v44 }
 0x1c1   : > { %v925_v50 = vld [vmem:[#allocation3 + $0x30] sm:$0x3]  ;;  %v963_v41 = vld [vmem:[#allocation3 + $0x32] sm:$0x3]  ;;  %v999_v54 = vld [vmem:[#allocation3 + $0x34] sm:$0x3]  ;;  %1331 = vmax.xlane.f32.xlu0 %v1330_v39  ;;  %1309 = vmax.xlane.f32.xlu1 %v1308_v2  ;;  %v908_v26 = vsel %vm904_vm0, %v902_v40, %v906_v22  ;;  %v1162_v57 = vmax.f32 %v1160_v42, %v1161_v47 }
 0x1c2   : > { %v1035_v55 = vld [vmem:[#allocation3 + $0x36] sm:$0x3]  ;;  %911 = vst.msk [vmem:[#allocation3 + $0x38] sm:$0xff] %vm570_vm3, %v908_v26  ;;  %v1198_v58 = vmax.f32 %v1196_v43, %v1197_v49  ;;  %v948_v60 = vsel %vm926_vm6, %v925_v50, -inf  ;;  %v985_v61 = vsel %vm926_vm6, %v963_v41, -inf  ;;  %v1021_v1 = vsel %vm926_vm6, %v999_v54, -inf }
 0x1c3   : > { %1102 = vst.msk [vmem:[#allocation4 + $0x14] sm:$0x1] %vm955_vm7, %v1092_v46  ;;  %1138 = vst.msk [vmem:[#allocation4 + $0x15] sm:$0x1] %vm955_vm7, %v1128_v6  ;;  %v949_v62 = vrot.slane %v948_v60, 4  ;;  %v986_v63 = vrot.slane %v985_v61, 4 }
 0x1c4   : > { %v1057_v3 = vsel %vm926_vm6, %v1035_v55, -inf  ;;  %v1163_v4 = vrot.slane %v1162_v57, 1  ;;  %v1199_v53 = vrot.slane %v1198_v58, 1  ;;  %v1022_v48 = vrot.slane %v1021_v1, 4 }
 0x1c5   : > { %v1058_v10 = vrot.slane %v1057_v3, 4  ;;  %1375 = vmax.xlane.f32.xlu0 %v1374_v21  ;;  %1353 = vmax.xlane.f32.xlu1 %v1352_v45  ;;  %v950_v5 = vmax.f32 %v948_v60, %v949_v62  ;;  %v987_v8 = vmax.f32 %v985_v61, %v986_v63  ;;  %vm3719_vm0 = vcmask 27664  }
 0x1c6   : > { %v1164_v9 = vmax.f32 %v1162_v57, %v1163_v4  ;;  %v1200_v11 = vmax.f32 %v1198_v58, %v1199_v53  ;;  %v1023_v13 = vmax.f32 %v1021_v1, %v1022_v48 }
 0x1c7   : > { %v1059_v14 = vmax.f32 %v1057_v3, %v1058_v10  ;;  %v951_v15 = vrot.slane %v950_v5, 2  ;;  %v988_v16 = vrot.slane %v987_v8, 2 }
 0x1c8   : > { %1174 = vst.msk [vmem:[#allocation4 + $0x16] sm:$0x1] %vm955_vm7, %v1164_v9  ;;  %1210 = vst.msk [vmem:[#allocation4 + $0x17] sm:$0x1] %vm955_vm7, %v1200_v11  ;;  %v1024_v17 = vrot.slane %v1023_v13, 2 }
 0x1c9   : > { %v1060_v59 = vrot.slane %v1059_v14, 2  ;;  %v1071_v51 = vld [vmem:[#allocation3 + $0x38] sm:$0x3]  ;;  %v1107_v23 = vld [vmem:[#allocation3 + $0x3a] sm:$0x3]  ;;  %v952_v52 = vmax.f32 %v950_v5, %v951_v15  ;;  %v989_v24 = vmax.f32 %v987_v8, %v988_v16 }
 0x1ca   : > { %v1143_v19 = vld [vmem:[#allocation3 + $0x3c] sm:$0x3]  ;;  %v1179_v25 = vld [vmem:[#allocation3 + $0x3e] sm:$0x3]  ;;  %v1025_v27 = vmax.f32 %v1023_v13, %v1024_v17  ;;  %v1093_v30 = vsel %vm926_vm6, %v1071_v51, -inf  ;;  %v1129_v31 = vsel %vm926_vm6, %v1107_v23, -inf }
 0x1cb   : > { %v1061_v28 = vmax.f32 %v1059_v14, %v1060_v59  ;;  %v953_v32 = vrot.slane %v952_v52, 1  ;;  %v990_v29 = vrot.slane %v989_v24, 1  ;;  %v1094_v20 = vrot.slane %v1093_v30, 4 }
 0x1cc   : > { %v1130_v33 = vrot.slane %v1129_v31, 4  ;;  %v1026_v56 = vrot.slane %v1025_v27, 1  ;;  %v1165_v7 = vsel %vm926_vm6, %v1143_v19, -inf  ;;  %v1201_v35 = vsel %vm926_vm6, %v1179_v25, -inf }
 0x1cd   : > { %v1062_v34 = vrot.slane %v1061_v28, 1  ;;  %v954_v36 = vmax.f32 %v952_v52, %v953_v32  ;;  %v991_v37 = vmax.f32 %v989_v24, %v990_v29  ;;  %v1095_v38 = vmax.f32 %v1093_v30, %v1094_v20 }
 0x1ce   : > { %v1131_v39 = vmax.f32 %v1129_v31, %v1130_v33  ;;  %v1027_v40 = vmax.f32 %v1025_v27, %v1026_v56  ;;  %v1166_v2 = vrot.slane %v1165_v7, 4  ;;  %v1202_v12 = vrot.slane %v1201_v35, 4 }
 0x1cf   : > { %v1063_v18 = vmax.f32 %v1061_v28, %v1062_v34  ;;  %v1236_v42 = vld [vmem:[#allocation4 + $0x10] sm:$0xff]  ;;  %959 = vst.msk [vmem:[#allocation4 + $0x18] sm:$0x1] %vm955_vm7, %v954_v36  ;;  %995 = vst.msk [vmem:[#allocation4 + $0x19] sm:$0x1] %vm955_vm7, %v991_v37  ;;  %v1096_v43 = vrot.slane %v1095_v38, 2  ;;  %v1415_v28 = vstv %s4477_s25  ;;  %v1407_v30 = vstv %s4476_s12 }
 0x1d0   : > { %v1132_v22 = vrot.slane %v1131_v39, 2  ;;  %v1245_v21 = vsel %vm1238_vm10, %v1236_v42, -inf  ;;  %v1223_v44 = vsel %vm1216_vm11, %v1236_v42, -inf  ;;  %1031 = vst.msk [vmem:[#allocation4 + $0x1a] sm:$0x1] %vm955_vm7, %v1027_v40  ;;  %v1167_v47 = vmax.f32 %v1165_v7, %v1166_v2  ;;  %s5734_s25 = sld [smem:[#allocation15 + $0x4c]] }
 0x1d1   : > { %1067 = vst.msk [vmem:[#allocation4 + $0x1b] sm:$0x1] %vm955_vm7, %v1063_v18  ;;  %1246 = vmax.xlane.f32.xlu0 %v1245_v21  ;;  %1224 = vmax.xlane.f32.xlu1 %v1223_v44  ;;  %v1097_v45 = vmax.f32 %v1095_v38, %v1096_v43  ;;  %v1203_v49 = vmax.f32 %v1201_v35, %v1202_v12  ;;  %v1289_v50 = vsel %vm1282_vm15, %v1236_v42, -inf  ;;  %v1267_v41 = vsel %vm1260_vm13, %v1236_v42, -inf  ;;  %s4516_s12 = sld [smem:[#allocation15 + $0x29]] }
 0x1d2   : > { %v1133_v46 = vmax.f32 %v1131_v39, %v1132_v22  ;;  %v1168_v6 = vrot.slane %v1167_v47, 2  ;;  %v1333_v62 = vsel %vm1326_vm1, %v1236_v42, -inf  ;;  %v1311_v63 = vsel %vm1304_vm12, %v1236_v42, -inf }
 0x1d3   : > { %v1098_v54 = vrot.slane %v1097_v45, 1  ;;  %v1204_v55 = vrot.slane %v1203_v49, 2  ;;  %v1377_v48 = vsel %vm1370_vm2, %v1236_v42, -inf  ;;  %v1355_v10 = vsel %vm1348_vm14, %v1236_v42, -inf }
 0x1d4   : > { %v1134_v26 = vrot.slane %v1133_v46, 1  ;;  %v1169_v60 = vmax.f32 %v1167_v47, %v1168_v6  ;;  %vm1229_vm6 = vcmask 15368   ;;  %v1427_v34 = vstv %s4479_s16  ;;  %s4483_s16 = sld [smem:[#allocation15 + $0x8]] }
 0x1d5   : > { %1290 = vmax.xlane.f32.xlu0 %v1289_v50  ;;  %1268 = vmax.xlane.f32.xlu1 %v1267_v41  ;;  %v1099_v57 = vmax.f32 %v1097_v45, %v1098_v54  ;;  %v1205_v61 = vmax.f32 %v1203_v49, %v1204_v55  ;;  %v1654_v7 = vstv %s4512_s14  ;;  %v1435_v39 = vstv %s4480_s15  ;;  %s4482_s14 = sld [smem:[#allocation15 + $0x7]] }
 0x1d6   : > { %v1135_v58 = vmax.f32 %v1133_v46, %v1134_v26  ;;  %v1170_v1 = vrot.slane %v1169_v60, 1  ;;  %v1662_v40 = vstv %s4513_s29  ;;  %v1909_v43 = vstv %s5716_s22  ;;  %s4553_s15 = sld [smem:[#allocation15 + $0x4d]] }
 0x1d7   : > { %1103 = vst.msk [vmem:[#allocation4 + $0x1c] sm:$0x1] %vm955_vm7, %v1099_v57  ;;  %v1206_v3 = vrot.slane %v1205_v61, 1  ;;  %v1901_v22 = vstv %s4549_s30  ;;  %v2148_v47 = vstv %s5726_s24  ;;  %v1674_v49 = vstv %s4515_s13  ;;  %s4587_s29 = sld [smem:[#allocation15 + $0x6e]] }
 0x1d8   : > { %1139 = vst.msk [vmem:[#allocation4 + $0x1d] sm:$0x1] %vm955_vm7, %v1135_v58  ;;  %v1171_v4 = vmax.f32 %v1169_v60, %v1170_v1  ;;  %v1921_v54 = vstv %s5734_s25  ;;  %v1682_v26 = vstv %s4516_s12  ;;  %s5755_s22 = sld [smem:[#allocation15 + $0x2c]] }
 0x1d9   : > { %1334 = vmax.xlane.f32.xlu0 %v1333_v62  ;;  %1312 = vmax.xlane.f32.xlu1 %v1311_v63  ;;  %v1207_v53 = vmax.f32 %v1205_v61, %v1206_v3  ;;  %s4518_s30 = sld [smem:[#allocation15 + $0x2b]] }
 0x1da   : > { %1175 = vst.msk [vmem:[#allocation4 + $0x1e] sm:$0x1] %vm955_vm7, %v1171_v4  ;;  %v1455_v58 = vstv %s4483_s16  ;;  %s5763_s24 = sld [smem:[#allocation15 + $0x92]] }
 0x1db   : > { %1211 = vst.msk [vmem:[#allocation4 + $0x1f] sm:$0x1] %vm955_vm7, %v1207_v53  ;;  %vm1251_vm7 = vcmask 23568   ;;  %v1447_v60 = vstv %s4482_s14  ;;  %s4623_s13 = sld [smem:[#allocation15 + $0x91]] }
 0x1dc   : > { %v1929_v3 = vstv %s4553_s15  ;;  %s5771_s25 = sld [smem:[#allocation15 + $0x4f]] }
 0x1dd   : > { %1378 = vmax.xlane.f32.xlu0 %v1377_v48  ;;  %1356 = vmax.xlane.f32.xlu1 %v1355_v10  ;;  %v2156_v4 = vstv %s4587_s29  ;;  %s4589_s12 = sld [smem:[#allocation15 + $0x70]] }
 0x1de   : > { %s5780_s16 = sld [smem:[#allocation15 + $0xb5]] }
 0x1df   : > { %s4485_s14 = sld [smem:[#allocation15 + $0xa]] }
 0x1e0   : > { %s5789_s15 = sld [smem:[#allocation15 + $0x2e]] }
 0x1e1   : > { %s4590_s29 = sld [smem:[#allocation15 + $0x71]] }
 0x1e2   : > { %v1237_v5 = vld [vmem:[#allocation4 + $0x18] sm:$0xff] }
 0x1e3   : > { %v1248_v8 = vsel %vm1238_vm10, %v1237_v5, -inf  ;;  %v1226_v9 = vsel %vm1216_vm11, %v1237_v5, -inf  ;;  %v1292_v11 = vsel %vm1282_vm15, %v1237_v5, -inf  ;;  %v1270_v13 = vsel %vm1260_vm13, %v1237_v5, -inf }
 0x1e4   : > { %1249 = vmax.xlane.f32.xlu0 %v1248_v8  ;;  %1227 = vmax.xlane.f32.xlu1 %v1226_v9  ;;  %v1336_v14 = vsel %vm1326_vm1, %v1237_v5, -inf  ;;  %v1314_v15 = vsel %vm1304_vm12, %v1237_v5, -inf  ;;  %v1380_v16 = vsel %vm1370_vm2, %v1237_v5, -inf  ;;  %v1358_v17 = vsel %vm1348_vm14, %v1237_v5, -inf }
 0x1e5   : > { %vm1273_vm10 = vcmask 31768   ;;  %vm1295_vm11 = vcmask 39968   ;;  %vm1317_vm12 = vcmask 48168   ;;  %vm1339_vm13 = vcmask 56368  }
 0x1e6   : > { %vm1361_vm14 = vcmask 64568   ;;  %vm1383_vm15 = vcmask 72768   ;;  %v1702_v8 = vstv %s5755_s22  ;;  %v1694_v9 = vstv %s4518_s30  ;;  %s5798_s22 = sld [smem:[#allocation15 + $0x94]] }
 0x1e7   : > { %s4486_s30 = sld [smem:[#allocation15 + $0xb]]  ;;  %vm1648_vm1 = vcmask 64512  }
 0x1e8   : > { %1293 = vmax.xlane.f32.xlu0 %v1292_v11  ;;  %1271 = vmax.xlane.f32.xlu1 %v1270_v13 }
 0x1ec   : > { %1337 = vmax.xlane.f32.xlu0 %v1336_v14  ;;  %1315 = vmax.xlane.f32.xlu1 %v1314_v15 }
 0x1f0   : > { %1381 = vmax.xlane.f32.xlu0 %v1380_v16  ;;  %1359 = vmax.xlane.f32.xlu1 %v1358_v17  ;;  %v2403_v16 = vstv %s5763_s24  ;;  %v2395_v17 = vstv %s4623_s13  ;;  %s5807_s24 = sld [smem:[#allocation15 + $0x2f]] }
 0x1f1   : > { %s4556_s13 = sld [smem:[#allocation15 + $0x50]] }
 0x228   : > { %v1241_v59 = vpop.xlane.xlu1 %1240  ;;  %v1219_v51 = vpop.xlane.xlu0 %1218 }
 0x229   : > { %1230 = vst.msk [vmem:[#allocation5 + $0x1] sm:$0xff] %vm1229_vm6, %v1219_v51 }
 0x22a   : > { %1252 = vst.msk [vmem:[#allocation5 + $0x1] sm:$0xff] %vm1251_vm7, %v1241_v59 }
 0x22c   : > { %v1263_v23 = vpop.xlane.xlu0 %1262  ;;  %v1307_v19 = vpop.xlane.xlu1 %1306 }
 0x22d   : > { %1274 = vst.msk [vmem:[#allocation5 + $0x1] sm:$0xff] %vm1273_vm10, %v1263_v23 }
 0x230   : > { %v1285_v52 = vpop.xlane.xlu0 %1284  ;;  %v1351_v25 = vpop.xlane.xlu1 %1350 }
 0x231   : > { %1296 = vst.msk [vmem:[#allocation5 + $0x1] sm:$0xff] %vm1295_vm11, %v1285_v52  ;;  %v1941_v52 = vstv %s5771_s25  ;;  %s5816_s25 = sld [smem:[#allocation15 + $0x95]] }
 0x232   : > { %1318 = vst.msk [vmem:[#allocation5 + $0x1] sm:$0xff] %vm1317_vm12, %v1307_v19 }
 0x234   : > { %v1329_v24 = vpop.xlane.xlu0 %1328 }
 0x235   : > { %1340 = vst.msk [vmem:[#allocation5 + $0x1] sm:$0xff] %vm1339_vm13, %v1329_v24  ;;  %v2168_v24 = vstv %s4589_s12  ;;  %s4661_s12 = sld [smem:[#allocation15 + $0xb6]] }
 0x236   : > { %1362 = vst.msk [vmem:[#allocation5 + $0x1] sm:$0xff] %vm1361_vm14, %v1351_v25 }
 0x238   : > { %v1373_v27 = vpop.xlane.xlu0 %1372 }
 0x239   : > { %1384 = vst.msk [vmem:[#allocation5 + $0x1] sm:$0xff] %vm1383_vm15, %v1373_v27 }
 0x240   : > { %v5712_v31 = vld [vmem:[#allocation5] sm:$0xff] }
 0x241   : > { %v1416_v32 = vmul.f32 %v1415_v28, %v5712_v31  ;;  %v1408_v29 = vmul.f32 %v1407_v30, %v5712_v31  ;;  %v5718_v20 = vld [vmem:[#allocation5 + $0x1] sm:$0xff]  ;;  %v1655_v36 = vmul.f32 %v1654_v7, %v5712_v31  ;;  %v1663_v2 = vmul.f32 %v1662_v40, %v5712_v31 }
 0x242   : > { %v1222_v33 = vpop.xlane.xlu1 %1221  ;;  %v1244_v56 = vpop.xlane.xlu0 %1243  ;;  %v1428_v35 = vmul.f32 %v1427_v34, %v5718_v20  ;;  %v1436_v18 = vmul.f32 %v1435_v39, %v5718_v20  ;;  %v1910_v21 = vmul.f32 %v1909_v43, %v5712_v31  ;;  %v1902_v44 = vmul.f32 %v1901_v22, %v5712_v31  ;;  %v5757_v57 = vld [vmem:[#allocation5 + $0x2] sm:$0xff] }
 0x243   : > { %1231 = vst.msk [vmem:[#allocation5 + $0x11] sm:$0xff] %vm1229_vm6, %v1222_v33  ;;  %1418 = vrot.lane.b32.xlu0 %v1416_v32, %s7772_s2  ;;  %1410 = vrot.lane.b32.xlu1 %v1408_v29, %s7777_s26  ;;  %v2149_v50 = vmul.f32 %v2148_v47, %v5712_v31  ;;  %v1675_v41 = vmul.f32 %v1674_v49, %v5718_v20  ;;  %v2642_v30 = vstv %s5780_s16  ;;  %v1467_v32 = vstv %s4485_s14  ;;  %s5825_s16 = sld [smem:[#allocation15 + $0xd]] }
 0x244   : > { %1253 = vst.msk [vmem:[#allocation5 + $0x11] sm:$0xff] %vm1251_vm7, %v1244_v56  ;;  %v1922_v6 = vmul.f32 %v1921_v54, %v5718_v20  ;;  %v1683_v55 = vmul.f32 %v1682_v26, %v5718_v20  ;;  %v1456_v61 = vmul.f32 %v1455_v58, %v5757_v57  ;;  %v1448_v62 = vmul.f32 %v1447_v60, %v5757_v57  ;;  %s4592_s14 = sld [smem:[#allocation15 + $0x73]] }
 0x245   : > { %v1930_v53 = vmul.f32 %v1929_v3, %v5718_v20  ;;  %v2157_v48 = vmul.f32 %v2156_v4, %v5712_v31  ;;  %v1703_v11 = vmul.f32 %v1702_v8, %v5757_v57  ;;  %v1695_v13 = vmul.f32 %v1694_v9, %v5757_v57 }
 0x246   : > { %v1266_v37 = vpop.xlane.xlu1 %1265  ;;  %v1288_v38 = vpop.xlane.xlu0 %1287  ;;  %v2404_v59 = vmul.f32 %v2403_v16, %v5712_v31  ;;  %v2396_v51 = vmul.f32 %v2395_v17, %v5712_v31  ;;  %v1942_v25 = vmul.f32 %v1941_v52, %v5757_v57  ;;  %v2169_v27 = vmul.f32 %v2168_v24, %v5718_v20 }
 0x247   : > { %1275 = vst.msk [vmem:[#allocation5 + $0x11] sm:$0xff] %vm1273_vm10, %v1266_v37  ;;  %1430 = vrot.lane.b32.xlu0 %v1428_v35, %s7777_s26  ;;  %1657 = vrot.lane.b32.xlu1 %v1655_v36, %s7777_s26  ;;  %v2643_v29 = vmul.f32 %v2642_v30, %v5712_v31  ;;  %v1714_v7 = vstv %s5789_s15  ;;  %v2176_v35 = vstv %s4590_s29  ;;  %s4593_s15 = sld [smem:[#allocation15 + $0x74]] }
 0x248   : > { %1297 = vst.msk [vmem:[#allocation5 + $0x11] sm:$0xff] %vm1295_vm11, %v1288_v38  ;;  %v2177_v37 = vmul.f32 %v2176_v35, %v5718_v20  ;;  %v2415_v40 = vstv %s5798_s22  ;;  %v1722_v22 = vstv %s5807_s24  ;;  %v2423_v49 = vstv %s5816_s25  ;;  %s4697_s29 = sld [smem:[#allocation15 + $0xd9]] }
 0x249   : > { %s4698_s22 = sld [smem:[#allocation15 + $0xda]] }
 0x24a   : > { %v1310_v12 = vpop.xlane.xlu1 %1309  ;;  %v1332_v42 = vpop.xlane.xlu0 %1331  ;;  %s4524_s24 = sld [smem:[#allocation15 + $0x31]] }
 0x24b   : > { %1319 = vst.msk [vmem:[#allocation5 + $0x11] sm:$0xff] %vm1317_vm12, %v1310_v12  ;;  %1438 = vrot.lane.b32.xlu0 %v1436_v18, %s7772_s2  ;;  %1665 = vrot.lane.b32.xlu1 %v1663_v2, %s7772_s2  ;;  %v1475_v18 = vstv %s4486_s30  ;;  %v2416_v2 = vmul.f32 %v2415_v40, %v5718_v20  ;;  %s4558_s30 = sld [smem:[#allocation15 + $0x52]] }
 0x24c   : > { %1341 = vst.msk [vmem:[#allocation5 + $0x11] sm:$0xff] %vm1339_vm13, %v1332_v42  ;;  %s4629_s25 = sld [smem:[#allocation15 + $0x97]] }
 0x24e   : > { %v1354_v45 = vpop.xlane.xlu1 %1353  ;;  %v1376_v46 = vpop.xlane.xlu0 %1375 }
 0x24f   : > { %1363 = vst.msk [vmem:[#allocation5 + $0x11] sm:$0xff] %vm1361_vm14, %v1354_v45  ;;  %1912 = vrot.lane.b32.xlu0 %v1910_v21, %s7772_s2  ;;  %1904 = vrot.lane.b32.xlu1 %v1902_v44, %s7777_s26  ;;  %v1949_v21 = vstv %s4556_s13  ;;  %s4663_s13 = sld [smem:[#allocation15 + $0xb8]]  ;;  %v2897_v3 = vstv %s4698_s22 }
 0x250   : > { %1385 = vst.msk [vmem:[#allocation5 + $0x11] sm:$0xff] %vm1383_vm15, %v1376_v46  ;;  %v1950_v45 = vmul.f32 %v1949_v21, %v5757_v57  ;;  %s4700_s22 = sld [smem:[#allocation15 + $0xdc]] }
 0x251   : > { %v1961_v4 = vstv %s4558_s30  ;;  %s4525_s30 = sld [smem:[#allocation15 + $0x32]] }
 0x253   : > { %2151 = vrot.lane.b32.xlu0 %v2149_v50, %s7777_s26  ;;  %1677 = vrot.lane.b32.xlu1 %v1675_v41, %s7777_s26  ;;  %v2650_v50 = vstv %s4661_s12  ;;  %v2424_v41 = vmul.f32 %v2423_v49, %v5718_v20  ;;  %s4489_s12 = sld [smem:[#allocation15 + $0xe]] }
 0x254   : > { %v2651_v54 = vmul.f32 %v2650_v50, %v5712_v31 }
 0x257   : > { %1924 = vrot.lane.b32.xlu0 %v1922_v6, %s7777_s26  ;;  %1685 = vrot.lane.b32.xlu1 %v1683_v55, %s7772_s2  ;;  %v5800_v28 = vld [vmem:[#allocation5 + $0x10] sm:$0xff]  ;;  %v1487_v6 = vstv %s5825_s16  ;;  %v2188_v55 = vstv %s4592_s14  ;;  %s4734_s16 = sld [smem:[#allocation15 + $0xfd]] }
 0x258   : > { %v1468_v33 = vmul.f32 %v1467_v32, %v5800_v28  ;;  %v1715_v36 = vmul.f32 %v1714_v7, %v5800_v28  ;;  %v1476_v12 = vmul.f32 %v1475_v18, %v5800_v28  ;;  %v1723_v44 = vmul.f32 %v1722_v22, %v5800_v28  ;;  %v5841_v26 = vld [vmem:[#allocation5 + $0x11] sm:$0xff]  ;;  %s4559_s14 = sld [smem:[#allocation15 + $0x53]] }
 0x259   : > { %v1488_v58 = vmul.f32 %v1487_v6, %v5841_v26  ;;  %v2189_v60 = vmul.f32 %v2188_v55, %v5757_v57 }
 0x25a   : > { %v1225_v63 = vpop.xlane.xlu1 %1224  ;;  %v1247_v1 = vpop.xlane.xlu0 %1246 }
 0x25b   : > { %1232 = vst.msk [vmem:[#allocation5 + $0x21] sm:$0xff] %vm1229_vm6, %v1225_v63  ;;  %1458 = vrot.lane.b32.xlu0 %v1456_v61, %s7772_s2  ;;  %1450 = vrot.lane.b32.xlu1 %v1448_v62, %s7777_s26  ;;  %v2196_v61 = vstv %s4593_s15  ;;  %v2889_v62 = vstv %s4697_s29  ;;  %s4595_s15 = sld [smem:[#allocation15 + $0x76]] }
 0x25c   : > { %1254 = vst.msk [vmem:[#allocation5 + $0x21] sm:$0xff] %vm1251_vm7, %v1247_v1  ;;  %v2197_v63 = vmul.f32 %v2196_v61, %v5757_v57  ;;  %v2890_v1 = vmul.f32 %v2889_v62, %v5712_v31  ;;  %s4664_s29 = sld [smem:[#allocation15 + $0xb9]] }
 0x25d   : > { %v3136_v16 = vstv %s4734_s16  ;;  %s4701_s16 = sld [smem:[#allocation15 + $0xdd]] }
 0x25e   : > { %v1269_v10 = vpop.xlane.xlu1 %1268  ;;  %v1291_v5 = vpop.xlane.xlu0 %1290  ;;  %v1969_v17 = vstv %s4559_s14  ;;  %s4561_s14 = sld [smem:[#allocation15 + $0x55]] }
 0x25f   : > { %1276 = vst.msk [vmem:[#allocation5 + $0x21] sm:$0xff] %vm1273_vm10, %v1269_v10  ;;  %1932 = vrot.lane.b32.xlu0 %v1930_v53, %s7772_s2  ;;  %2159 = vrot.lane.b32.xlu1 %v2157_v48, %s7772_s2  ;;  %v2898_v53 = vmul.f32 %v2897_v3, %v5712_v31  ;;  %v1962_v48 = vmul.f32 %v1961_v4, %v5800_v28  ;;  %v1734_v10 = vstv %s4524_s24  ;;  %s4491_s24 = sld [smem:[#allocation15 + $0x10]] }
 0x260   : > { %1298 = vst.msk [vmem:[#allocation5 + $0x21] sm:$0xff] %vm1295_vm11, %v1291_v5  ;;  %v2662_v5 = vstv %s4663_s13  ;;  %v1735_v8 = vmul.f32 %v1734_v10, %v5841_v26  ;;  %s4630_s13 = sld [smem:[#allocation15 + $0x98]] }
 0x261   : > { %v2663_v9 = vmul.f32 %v2662_v5, %v5718_v20 }
 0x262   : > { %v1313_v14 = vpop.xlane.xlu1 %1312  ;;  %v1335_v15 = vpop.xlane.xlu0 %1334 }
 0x263   : > { %1320 = vst.msk [vmem:[#allocation5 + $0x21] sm:$0xff] %vm1317_vm12, %v1313_v14  ;;  %1705 = vrot.lane.b32.xlu0 %v1703_v11, %s7772_s2  ;;  %1697 = vrot.lane.b32.xlu1 %v1695_v13, %s7777_s26  ;;  %v2435_v11 = vstv %s4629_s25  ;;  %v1495_v13 = vstv %s4489_s12  ;;  %s4596_s25 = sld [smem:[#allocation15 + $0x77]] }
 0x264   : > { %1342 = vst.msk [vmem:[#allocation5 + $0x21] sm:$0xff] %vm1339_vm13, %v1335_v15  ;;  %v2436_v14 = vmul.f32 %v2435_v11, %v5757_v57  ;;  %v1496_v15 = vmul.f32 %v1495_v13, %v5841_v26  ;;  %s4735_s12 = sld [smem:[#allocation15 + $0xfe]]  ;;  %v1981_v40 = vstv %s4561_s14 }
 0x265   : > { %s5902_s14 = sld [smem:[#allocation15 + $0x79]] }
 0x266   : > { %v1357_v23 = vpop.xlane.xlu1 %1356  ;;  %v1379_v19 = vpop.xlane.xlu0 %1378 }
 0x267   : > { %1364 = vst.msk [vmem:[#allocation5 + $0x21] sm:$0xff] %vm1361_vm14, %v1357_v23  ;;  %2406 = vrot.lane.b32.xlu0 %v2404_v59, %s7772_s2  ;;  %2398 = vrot.lane.b32.xlu1 %v2396_v51, %s7777_s26  ;;  %v3137_v59 = vmul.f32 %v3136_v16, %v5712_v31  ;;  %v1970_v51 = vmul.f32 %v1969_v17, %v5800_v28  ;;  %v2208_v23 = vstv %s4595_s15  ;;  %s4527_s15 = sld [smem:[#allocation15 + $0x34]] }
 0x268   : > { %1386 = vst.msk [vmem:[#allocation5 + $0x21] sm:$0xff] %vm1383_vm15, %v1379_v19  ;;  %v2670_v19 = vstv %s4664_s29  ;;  %v2209_v52 = vmul.f32 %v2208_v23, %v5800_v28  ;;  %s4666_s29 = sld [smem:[#allocation15 + $0xbb]] }
 0x269   : > { %v2671_v24 = vmul.f32 %v2670_v19, %v5718_v20  ;;  %v2216_v35 = vstv %s4596_s25  ;;  %s4562_s25 = sld [smem:[#allocation15 + $0x56]] }
 0x26b   : > { %1944 = vrot.lane.b32.xlu0 %v1942_v25, %s7777_s26  ;;  %2171 = vrot.lane.b32.xlu1 %v2169_v27, %s7777_s26  ;;  %v2909_v25 = vstv %s4700_s22  ;;  %v1742_v27 = vstv %s4525_s30  ;;  %s4632_s22 = sld [smem:[#allocation15 + $0x9a]] }
 0x26c   : > { %v2910_v30 = vmul.f32 %v2909_v25, %v5718_v20  ;;  %v1743_v32 = vmul.f32 %v1742_v27, %v5841_v26  ;;  %s4492_s30 = sld [smem:[#allocation15 + $0x11]]  ;;  %v2228_v62 = vstv %s5902_s14 }
 0x26d   : > { %v1228_v56 = vpop.xlane.xlu1 %1227  ;;  %v1250_v34 = vpop.xlane.xlu0 %1249  ;;  %v2229_v10 = vmul.f32 %v2228_v62, %v5841_v26  ;;  %s5978_s14 = sld [smem:[#allocation15 + $0x37]] }
 0x26e   : > { %1233 = vst.msk [vmem:[#allocation5 + $0x31] sm:$0xff] %vm1229_vm6, %v1228_v56  ;;  %v2443_v56 = vstv %s4630_s13  ;;  %s5892_s13 = sld [smem:[#allocation15 + $0x100]]  ;;  %vm3677_vm6 = vcmask 11264  }
 0x26f   : > { %2645 = vrot.lane.b32.xlu0 %v2643_v29, %s7777_s26  ;;  %1470 = vrot.lane.b32.xlu1 %v1468_v33, %s7777_s26  ;;  %1255 = vst.msk [vmem:[#allocation5 + $0x31] sm:$0xff] %vm1251_vm7, %v1250_v34  ;;  %v5876_v29 = vld [vmem:[#allocation5 + $0x12] sm:$0xff]  ;;  %v1507_v33 = vstv %s4491_s24  ;;  %v2444_v7 = vmul.f32 %v2443_v56, %v5757_v57  ;;  %s5888_s24 = sld [smem:[#allocation15]]  ;;  %v1989_v50 = vstv %s4562_s25  ;;  %v5962_v27 = vld [vmem:[#allocation5 + $0x20] sm:$0xff]  ;;  %vm3803_vm7 = vcmask 60464  }
 0x270   : > { %v1508_v34 = vmul.f32 %v1507_v33, %v5876_v29  ;;  %s5942_s25 = sld [smem:[#allocation15 + $0x4b]] }
 0x271   : > { %v1272_v38 = vpop.xlane.xlu1 %1271  ;;  %v1294_v39 = vpop.xlane.xlu0 %1293  ;;  %v2455_v21 = vstv %s4632_s22  ;;  %s5918_s22 = sld [smem:[#allocation15 + $0x27]] }
 0x272   : > { %1277 = vst.msk [vmem:[#allocation5 + $0x31] sm:$0xff] %vm1273_vm10, %v1272_v38  ;;  %vm3761_vm10 = vcmask 44064  }
 0x273   : > { %1717 = vrot.lane.b32.xlu0 %v1715_v36, %s7777_s26  ;;  %2179 = vrot.lane.b32.xlu1 %v2177_v37, %s7772_s2  ;;  %1299 = vst.msk [vmem:[#allocation5 + $0x31] sm:$0xff] %vm1295_vm11, %v1294_v39  ;;  %v3144_v36 = vstv %s4735_s12  ;;  %v2217_v37 = vmul.f32 %v2216_v35, %v5800_v28  ;;  %v2917_v39 = vstv %s4701_s16  ;;  %s5896_s12 = sld [smem:[#allocation15 + $0x24]] }
 0x274   : > { %v3145_v38 = vmul.f32 %v3144_v36, %v5712_v31  ;;  %v2918_v18 = vmul.f32 %v2917_v39, %v5718_v20  ;;  %s5898_s16 = sld [smem:[#allocation15 + $0x3]]  ;;  %v3156_v49 = vstv %s5892_s13  ;;  %v1774_v62 = vstv %s5978_s14 }
 0x275   : > { %v1316_v42 = vpop.xlane.xlu1 %1315  ;;  %v1338_v43 = vpop.xlane.xlu0 %1337  ;;  %v3157_v55 = vmul.f32 %v3156_v49, %v5718_v20  ;;  %s5938_s13 = sld [smem:[#allocation15 + $0x101]] }
 0x276   : > { %1321 = vst.msk [vmem:[#allocation5 + $0x31] sm:$0xff] %vm1317_vm12, %v1316_v42  ;;  %v2682_v42 = vstv %s4666_s29  ;;  %s5908_s29 = sld [smem:[#allocation15 + $0xdf]] }
 0x277   : > { %2418 = vrot.lane.b32.xlu0 %v2416_v2, %s7777_s26  ;;  %1478 = vrot.lane.b32.xlu1 %v1476_v12, %s7772_s2  ;;  %1343 = vst.msk [vmem:[#allocation5 + $0x31] sm:$0xff] %vm1339_vm13, %v1338_v43  ;;  %v1982_v2 = vmul.f32 %v1981_v40, %v5841_v26  ;;  %v1754_v12 = vstv %s4527_s15  ;;  %v2683_v22 = vmul.f32 %v2682_v42, %v5757_v57  ;;  %s5904_s15 = sld [smem:[#allocation15 + $0xbc]]  ;;  %v1917_v40 = vstv %s5942_s25 }
 0x278   : > { %v1755_v43 = vmul.f32 %v1754_v12, %v5876_v29  ;;  %s6002_s25 = sld [smem:[#allocation15 + $0x4e]] }
 0x279   : > { %v1360_v46 = vpop.xlane.xlu1 %1359  ;;  %v1382_v47 = vpop.xlane.xlu0 %1381  ;;  %s6040_s14 = sld [smem:[#allocation15 + $0x93]] }
 0x27a   : > { %1365 = vst.msk [vmem:[#allocation5 + $0x31] sm:$0xff] %vm1361_vm14, %v1360_v46 }
 0x27b   : > { %1725 = vrot.lane.b32.xlu0 %v1723_v44, %s7772_s2  ;;  %1952 = vrot.lane.b32.xlu1 %v1950_v45, %s7772_s2  ;;  %1387 = vst.msk [vmem:[#allocation5 + $0x31] sm:$0xff] %vm1383_vm15, %v1382_v47  ;;  %v1515_v44 = vstv %s4492_s30  ;;  %v2456_v45 = vmul.f32 %v2455_v21, %v5800_v28  ;;  %v1404_v47 = vstv %s5888_s24  ;;  %s7820_s30 = smov 126   ;;  %s5930_s24 = sld [smem:[#allocation15 + $0x13]] }
 0x27c   : > { %v1516_v46 = vmul.f32 %v1515_v44, %v5876_v29  ;;  %v2929_v11 = vstv %s5908_s29  ;;  %s5986_s29 = sld [smem:[#allocation15 + $0x9d]] }
 0x27d   : > { %v2930_v19 = vmul.f32 %v2929_v11, %v5757_v57 }
 0x27f   : > { %2426 = vrot.lane.b32.xlu0 %v2424_v41, %s7772_s2  ;;  %2653 = vrot.lane.b32.xlu1 %v2651_v54, %s7772_s2  ;;  %v1405_v41 = vmul.f32 %v1404_v47, %v5712_v31 }
 0x281   : > { %v1527_v25 = vstv %s5930_s24  ;;  %s5993_s24 = sld [smem:[#allocation15 + $0x9]] }
 0x282   : > { %v1528_v39 = vmul.f32 %v1527_v25, %v5962_v27 }
 0x283   : > { %1490 = vrot.lane.b32.xlu0 %v1488_v58, %s7777_s26  ;;  %2191 = vrot.lane.b32.xlu1 %v2189_v60, %s7777_s26  ;;  %v1990_v58 = vmul.f32 %v1989_v50, %v5841_v26  ;;  %v1423_v60 = vstv %s5898_s16  ;;  %s5954_s16 = sld [smem:[#allocation15 + $0x6c]] }
 0x284   : > { %v1424_v4 = vmul.f32 %v1423_v60, %v5718_v20 }
 0x287   : > { %2199 = vrot.lane.b32.xlu0 %v2197_v63, %s7772_s2  ;;  %2892 = vrot.lane.b32.xlu1 %v2890_v1, %s7777_s26  ;;  %v2690_v63 = vstv %s5904_s15  ;;  %v1651_v1 = vstv %s5896_s12  ;;  %s5947_s12 = sld [smem:[#allocation15 + $0x7a]] }
 0x288   : > { %v2691_v5 = vmul.f32 %v2690_v63, %v5757_v57  ;;  %s5982_s15 = sld [smem:[#allocation15 + $0x14]] }
 0x28b   : > { %2900 = vrot.lane.b32.xlu0 %v2898_v53, %s7772_s2  ;;  %1964 = vrot.lane.b32.xlu1 %v1962_v48, %s7777_s26 }
 0x28d   : > { %v2236_v12 = vstv %s5947_s12  ;;  %s6006_s12 = sld [smem:[#allocation15 + $0x103]] }
 0x28f   : > { %1737 = vrot.lane.b32.xlu0 %v1735_v8, %s7777_s26  ;;  %2665 = vrot.lane.b32.xlu1 %v2663_v9, %s7777_s26  ;;  %v1652_v8 = vmul.f32 %v1651_v1, %v5712_v31  ;;  %v2145_v1 = vstv %s5954_s16  ;;  %s6022_s16 = sld [smem:[#allocation15 + $0x2d]] }
 0x293   : > { %2438 = vrot.lane.b32.xlu0 %v2436_v14, %s7777_s26  ;;  %1498 = vrot.lane.b32.xlu1 %v1496_v15, %s7772_s2  ;;  %v1670_v14 = vstv %s5918_s22  ;;  %v1443_v15 = vstv %s5922_s1  ;;  %s5970_s1 = sld [smem:[#allocation15 + $0x2a]] }
 0x294   : > { %v1671_v33 = vmul.f32 %v1670_v14, %v5718_v20  ;;  %v1444_v56 = vmul.f32 %v1443_v15, %v5757_v57  ;;  %s5989_s22 = sld [smem:[#allocation15 + $0x59]] }
 0x297   : > { %3139 = vrot.lane.b32.xlu0 %v3137_v59, %s7777_s26  ;;  %1972 = vrot.lane.b32.xlu1 %v1970_v51, %s7772_s2  ;;  %v1898_v59 = vstv %s5915_s0  ;;  %s5965_s0 = sld [smem:[#allocation15 + $0xe0]] }
 0x299   : > { %v1690_v50 = vstv %s5970_s1  ;;  %s6026_s1 = sld [smem:[#allocation15 + $0x7c]] }
 0x29a   : > { %v1691_v63 = vmul.f32 %v1690_v50, %v5757_v57  ;;  %v2009_v15 = vstv %s5989_s22  ;;  %s6059_s22 = sld [smem:[#allocation15 + $0x16]]  ;;  %v2411_v50 = vstv %s6040_s14 }
 0x29b   : > { %2211 = vrot.lane.b32.xlu0 %v2209_v52, %s7777_s26  ;;  %2673 = vrot.lane.b32.xlu1 %v2671_v24, %s7772_s2  ;;  %v2463_v24 = vstv %s5925_s3  ;;  %s5973_s3 = sld [smem:[#allocation15 + $0xbe]] }
 0x29c   : > { %s6112_s14 = sld [smem:[#allocation15 + $0x17]] }
 0x29d   : > { %v2937_v49 = vstv %s5965_s0  ;;  %s6016_s0 = sld [smem:[#allocation15 + $0xbf]] }
 0x29f   : > { %2912 = vrot.lane.b32.xlu0 %v2910_v30, %s7777_s26  ;;  %1745 = vrot.lane.b32.xlu1 %v1743_v32, %s7772_s2 }
 0x2a3   : > { %1510 = vrot.lane.b32.xlu0 %v1508_v34, %s7777_s26  ;;  %2446 = vrot.lane.b32.xlu1 %v2444_v7, %s7772_s2  ;;  %v1899_v34 = vmul.f32 %v1898_v59, %v5712_v31 }
 0x2a7   : > { %2219 = vrot.lane.b32.xlu0 %v2217_v37, %s7772_s2  ;;  %3147 = vrot.lane.b32.xlu1 %v3145_v38, %s7772_s2  ;;  %v2464_v38 = vmul.f32 %v2463_v24, %v5800_v28 }
 0x2ab   : > { %2920 = vrot.lane.b32.xlu0 %v2918_v18, %s7772_s2  ;;  %1984 = vrot.lane.b32.xlu1 %v1982_v2, %s7777_s26  ;;  %s5910_s2 = sld [smem:[#allocation15 + $0x35]]  ;;  %v3164_v2 = vstv %s5938_s13 }
 0x2ac   : > { %v3165_v44 = vmul.f32 %v3164_v2, %v5718_v20  ;;  %s5997_s13 = sld [smem:[#allocation15 + $0x6f]]  ;;  %v1710_v2 = vstv %s6022_s16 }
 0x2ad   : > { %s6101_s16 = sld [smem:[#allocation15 + $0xc1]] }
 0x2af   : > { %1757 = vrot.lane.b32.xlu0 %v1755_v43, %s7777_s26  ;;  %2685 = vrot.lane.b32.xlu1 %v2683_v22, %s7777_s26  ;;  %v1918_v43 = vmul.f32 %v1917_v40, %v5718_v20 }
 0x2b1   : > { %v1762_v13 = vstv %s5910_s2  ;;  %s5960_s2 = sld [smem:[#allocation15 + $0x58]] }
 0x2b2   : > { %v1763_v52 = vmul.f32 %v1762_v13, %v5876_v29  ;;  %v2475_v13 = vstv %s5986_s29  ;;  %v2164_v14 = vstv %s5997_s13  ;;  %s6054_s29 = sld [smem:[#allocation15 + $0x9e]] }
 0x2b3   : > { %2458 = vrot.lane.b32.xlu0 %v2456_v45, %s7777_s26  ;;  %1518 = vrot.lane.b32.xlu1 %v1516_v46, %s7820_s30  ;;  %v2237_v45 = vmul.f32 %v2236_v12, %v5841_v26  ;;  %v2476_v25 = vmul.f32 %v2475_v13, %v5841_v26  ;;  %s6074_s13 = sld [smem:[#allocation15 + $0x7d]] }
 0x2b5   : > { %v1411_v54 = vpop.permute.xlu1 %1410  ;;  %v1419_v6 = vpop.permute.xlu0 %1418 }
 0x2b6   : > { %v1413_v61 = vadd.f32 %v1411_v54, %v1405_v41 }
 0x2b7   : > { %3159 = vrot.lane.b32.xlu0 %v3157_v55, %s7777_s26  ;;  %1992 = vrot.lane.b32.xlu1 %v1990_v58, %s7820_s30  ;;  %v2001_v47 = vstv %s5960_s2  ;;  %v2938_v58 = vmul.f32 %v2937_v49, %v5757_v57  ;;  %s6014_s2 = sld [smem:[#allocation15 + $0x90]] }
 0x2b8   : > { %v1421_v3 = vadd.f32 %v1419_v6, %v1413_v61  ;;  %v2002_v55 = vmul.f32 %v2001_v47, %v5876_v29  ;;  %v2702_v61 = vstv %s5973_s3  ;;  %s6033_s3 = sld [smem:[#allocation15 + $0x38]] }
 0x2b9   : > { %v1658_v53 = vpop.permute.xlu1 %1657  ;;  %v1431_v48 = vpop.permute.xlu0 %1430 }
 0x2ba   : > { %v1425_v9 = vadd.f32 %v1424_v4, %v1421_v3  ;;  %v1660_v16 = vadd.f32 %v1658_v53, %v1652_v8  ;;  %v1463_v8 = vstv %s5993_s24  ;;  %s6067_s24 = sld [smem:[#allocation15 + $0x104]] }
 0x2bb   : > { %2231 = vrot.lane.b32.xlu0 %v2229_v10, %s7777_s26  ;;  %2693 = vrot.lane.b32.xlu1 %v2691_v5, %s7820_s30  ;;  %v1775_v10 = vmul.f32 %v1774_v62, %v5962_v27  ;;  %v1535_v5 = vstv %s5982_s15  ;;  %s6043_s15 = sld [smem:[#allocation15 + $0xe2]] }
 0x2bc   : > { %v1433_v17 = vadd.f32 %v1431_v48, %v1425_v9  ;;  %v2703_v48 = vmul.f32 %v2702_v61, %v5800_v28  ;;  %v2146_v9 = vmul.f32 %v2145_v1, %v5712_v31  ;;  %v1536_v24 = vmul.f32 %v1535_v5, %v5962_v27  ;;  %v6085_v1 = vld [vmem:[#allocation5 + $0x21] sm:$0xff] }
 0x2bd   : > { %v1666_v51 = vpop.permute.xlu1 %1665  ;;  %v1439_v23 = vpop.permute.xlu0 %1438 }
 0x2be   : > { %v1668_v30 = vadd.f32 %v1666_v51, %v1660_v16  ;;  %v1441_v32 = vadd.f32 %v1439_v23, %v1433_v17  ;;  %v1937_v16 = vstv %s6002_s25  ;;  %v1464_v23 = vmul.f32 %v1463_v8, %v5800_v28  ;;  %s6078_s25 = sld [smem:[#allocation15 + $0x72]] }
 0x2bf   : > { %2932 = vrot.lane.b32.xlu0 %v2930_v19, %s7777_s26  ;;  %1765 = vrot.lane.b32.xlu1 %v1763_v52, %s7820_s30 }
 0x2c0   : > { %v1672_v7 = vadd.f32 %v1671_v33, %v1668_v30  ;;  %v1445_v35 = vadd.f32 %v1444_v56, %v1441_v32  ;;  %v3176_v30 = vstv %s6006_s12  ;;  %v2165_v32 = vmul.f32 %v2164_v14, %v5718_v20  ;;  %s6083_s12 = sld [smem:[#allocation15 + $0x5b]] }
 0x2c1   : > { %v1905_v36 = vpop.permute.xlu1 %1904  ;;  %v1913_v37 = vpop.permute.xlu0 %1912  ;;  %v3177_v40 = vmul.f32 %v3176_v30, %v5757_v57  ;;  %v3184_v8 = vstv %s6067_s24  ;;  %s6131_s24 = sld [smem:[#allocation15 + $0x5c]] }
 0x2c2   : > { %v1907_v18 = vadd.f32 %v1905_v36, %v1899_v34  ;;  %v1938_v34 = vmul.f32 %v1937_v16, %v5757_v57  ;;  %v3185_v16 = vmul.f32 %v3184_v8, %v5757_v57 }
 0x2c3   : > { %2466 = vrot.lane.b32.xlu1 %v2464_v38, %s7820_s30  ;;  %1530 = vrot.lane.b32.xlu0 %v1528_v39, %s7777_s26  ;;  %v2010_v39 = vmul.f32 %v2009_v15, %v5876_v29 }
 0x2c4   : > { %v1915_v42 = vadd.f32 %v1913_v37, %v1907_v18  ;;  %v2392_v18 = vstv %s6014_s2  ;;  %s6091_s2 = sld [smem:[#allocation15 + $0xe3]] }
 0x2c5   : > { %v1678_v22 = vpop.permute.xlu1 %1677  ;;  %v2152_v21 = vpop.permute.xlu0 %2151 }
 0x2c6   : > { %v1919_v46 = vadd.f32 %v1918_v43, %v1915_v42  ;;  %v1680_v41 = vadd.f32 %v1678_v22, %v1672_v7  ;;  %v2154_v17 = vadd.f32 %v2152_v21, %v2146_v9  ;;  %v2710_v42 = vstv %s6016_s0  ;;  %s6095_s0 = sld [smem:[#allocation15 + $0xb4]] }
 0x2c7   : > { %3167 = vrot.lane.b32.xlu1 %v3165_v44, %s7820_s30  ;;  %2239 = vrot.lane.b32.xlu0 %v2237_v45, %s7820_s30  ;;  %v2248_v43 = vstv %s6026_s1  ;;  %v2393_v21 = vmul.f32 %v2392_v18, %v5712_v31  ;;  %v1711_v44 = vmul.f32 %v1710_v2, %v5800_v28  ;;  %v2711_v47 = vmul.f32 %v2710_v42, %v5800_v28  ;;  %s6105_s1 = sld [smem:[#allocation15 + $0x3a]] }
 0x2c8   : > { %v2249_v49 = vmul.f32 %v2248_v43, %v5876_v29  ;;  %v2256_v9 = vstv %s6074_s13  ;;  %s6137_s13 = sld [smem:[#allocation15 + $0x106]]  ;;  %v1555_v2 = vstv %s6112_s14 }
 0x2c9   : > { %v1686_v54 = vpop.permute.xlu1 %1685  ;;  %v1925_v6 = vpop.permute.xlu0 %1924  ;;  %s6195_s14 = sld [smem:[#allocation15 + $0xa1]] }
 0x2ca   : > { %v1688_v60 = vadd.f32 %v1686_v54, %v1680_v41  ;;  %v1927_v59 = vadd.f32 %v1925_v6, %v1919_v46  ;;  %v1782_v54 = vstv %s6033_s3  ;;  %v2949_v6 = vstv %s6043_s15  ;;  %s6110_s3 = sld [smem:[#allocation15 + $0x51]] }
 0x2cb   : > { %2004 = vrot.lane.b32.xlu1 %v2002_v55, %s7777_s26  ;;  %2940 = vrot.lane.b32.xlu0 %v2938_v58, %s7820_s30  ;;  %v2412_v58 = vmul.f32 %v2411_v50, %v5718_v20  ;;  %v1783_v62 = vmul.f32 %v1782_v54, %v5962_v27  ;;  %s6118_s15 = sld [smem:[#allocation15 + $0xa0]] }
 0x2cc   : > { %v1692_v3 = vadd.f32 %v1691_v63, %v1688_v60  ;;  %v2950_v63 = vmul.f32 %v2949_v6, %v5800_v28  ;;  %v2029_v6 = vstv %s6131_s24  ;;  %s6225_s24 = sld [smem:[#allocation15 + $0x5e]] }
 0x2cd   : > { %v1451_v4 = vpop.permute.xlu1 %1450  ;;  %v1459_v53 = vpop.permute.xlu0 %1458 }
 0x2ce   : > { %v1453_v11 = vadd.f32 %v1451_v4, %v1445_v35  ;;  %v1547_v4 = vstv %s6059_s22  ;;  %s6127_s22 = sld [smem:[#allocation15 + $0x96]] }
 0x2cf   : > { %2705 = vrot.lane.b32.xlu1 %v2703_v48, %s7777_s26  ;;  %1777 = vrot.lane.b32.xlu0 %v1775_v10, %s7777_s26  ;;  %v1548_v5 = vmul.f32 %v1547_v4, %v6085_v1 }
 0x2d0   : > { %v1461_v51 = vadd.f32 %v1459_v53, %v1453_v11  ;;  %v2184_v11 = vstv %s6078_s25  ;;  %s6146_s25 = sld [smem:[#allocation15 + $0xd8]] }
 0x2d1   : > { %v2160_v19 = vpop.permute.xlu1 %2159  ;;  %v1933_v52 = vpop.permute.xlu0 %1932 }
 0x2d2   : > { %v2162_v33 = vadd.f32 %v2160_v19, %v2154_v17  ;;  %v1935_v56 = vadd.f32 %v1933_v52, %v1927_v59  ;;  %v6045_v7 = vadd.f32 %v1464_v23, %v1461_v51  ;;  %v2257_v17 = vmul.f32 %v2256_v9, %v5876_v29 }
 0x2d3   : > { %1538 = vrot.lane.b32.xlu1 %v1536_v24, %s7820_s30  ;;  %2478 = vrot.lane.b32.xlu0 %v2476_v25, %s7777_s26  ;;  %v2021_v51 = vstv %s6083_s12  ;;  %v2957_v23 = vstv %s6091_s2  ;;  %v2185_v19 = vmul.f32 %v2184_v11, %v5757_v57  ;;  %s6153_s12 = sld [smem:[#allocation15 + $0xc2]] }
 0x2d4   : > { %v2166_v35 = vadd.f32 %v2165_v32, %v2162_v33  ;;  %v6049_v36 = vadd.f32 %v1938_v34, %v1935_v56  ;;  %v2022_v30 = vmul.f32 %v2021_v51, %v5962_v27  ;;  %v2958_v32 = vmul.f32 %v2957_v23, %v5800_v28  ;;  %s6159_s2 = sld [smem:[#allocation15 + $0x7f]] }
 0x2d5   : > { %v1698_v37 = vpop.permute.xlu1 %1697  ;;  %v1706_v38 = vpop.permute.xlu0 %1705  ;;  %v2722_v33 = vstv %s6101_s16  ;;  %v1794_v56 = vstv %s6105_s1  ;;  %v2639_v34 = vstv %s6095_s0  ;;  %s6166_s0 = sld [smem:[#allocation15 + $0x75]] }
 0x2d6   : > { %v1700_v12 = vadd.f32 %v1698_v37, %v1692_v3  ;;  %v2483_v3 = vstv %s6054_s29  ;;  %s6123_s29 = sld [smem:[#allocation15 + $0xb7]]  ;;  %v1795_v18 = vmul.f32 %v1794_v56, %v6085_v1  ;;  %v2886_v9 = vstv %s6146_s25 }
 0x2d7   : > { %2012 = vrot.lane.b32.xlu1 %v2010_v39, %s7820_s30  ;;  %3179 = vrot.lane.b32.xlu0 %v3177_v40, %s7777_s26  ;;  %v2484_v10 = vmul.f32 %v2483_v3, %v5841_v26  ;;  %v2723_v40 = vmul.f32 %v2722_v33, %v5841_v26  ;;  %s6175_s16 = sld [smem:[#allocation15 + $0x3b]] }
 0x2d8   : > { %v1708_v22 = vadd.f32 %v1706_v38, %v1700_v12  ;;  %v6155_v12 = vld [vmem:[#allocation5] sm:$0xff]  ;;  %s6177_s1 = sld [smem:[#allocation15 + $0xe5]] }
 0x2d9   : > { %v2399_v45 = vpop.permute.xlu1 %2398  ;;  %v2407_v46 = vpop.permute.xlu0 %2406  ;;  %v2640_v42 = vmul.f32 %v6155_v12, %v2639_v34  ;;  %v2887_v23 = vmul.f32 %v6155_v12, %v2886_v9  ;;  %s6240_s25 = sld [smem:[#allocation15 + $0xc4]] }
 0x2da   : > { %v2401_v41 = vadd.f32 %v2399_v45, %v2393_v21  ;;  %v6072_v55 = vadd.f32 %v1711_v44, %v1708_v22  ;;  %v2431_v44 = vstv %s6127_s22  ;;  %v2268_v8 = vstv %s6159_s2  ;;  %s6213_s22 = sld [smem:[#allocation15 + $0x80]] }
 0x2db   : > { %2713 = vrot.lane.b32.xlu1 %v2711_v47, %s7820_s30  ;;  %2251 = vrot.lane.b32.xlu0 %v2249_v49, %s7777_s26  ;;  %v2204_v11 = vstv %s6166_s0  ;;  %s6248_s2 = sld [smem:[#allocation15 + $0xba]] }
 0x2dc   : > { %v2409_v31 = vadd.f32 %v2407_v46, %v2401_v41  ;;  %v2658_v21 = vstv %s6123_s29  ;;  %v1556_v41 = vmul.f32 %v1555_v2, %v6085_v1  ;;  %s6209_s29 = sld [smem:[#allocation15 + $0x107]] }
 0x2dd   : > { %v2172_v60 = vpop.permute.xlu1 %2171  ;;  %v1945_v61 = vpop.permute.xlu0 %1944  ;;  %v1802_v51 = vstv %s6175_s16  ;;  %s6254_s0 = sld [smem:[#allocation15 + $0x1a]] }
 0x2de   : > { %v6089_v53 = vadd.f32 %v2412_v58, %v2409_v31  ;;  %v2174_v13 = vadd.f32 %v2172_v60, %v2166_v35  ;;  %v1957_v35 = vstv %s6110_s3  ;;  %v1947_v37 = vadd.f32 %v1945_v61, %v6049_v36  ;;  %v6179_v61 = vld [vmem:[#allocation5 + $0x1] sm:$0xff]  ;;  %s6185_s3 = sld [smem:[#allocation15 + $0xdb]] }
 0x2df   : > { %1785 = vrot.lane.b32.xlu1 %v1783_v62, %s7820_s30  ;;  %2952 = vrot.lane.b32.xlu0 %v2950_v63, %s7777_s26  ;;  %v2495_v36 = vstv %s6118_s15  ;;  %v1958_v22 = vmul.f32 %v1957_v35, %v5800_v28  ;;  %v3196_v31 = vstv %s6137_s13  ;;  %v2659_v62 = vmul.f32 %v6179_v61, %v2658_v21  ;;  %s6199_s15 = sld [smem:[#allocation15 + $0x19]] }
 0x2e0   : > { %v2496_v54 = vmul.f32 %v2495_v36, %v5876_v29  ;;  %v2432_v63 = vmul.f32 %v2431_v44, %v5757_v57  ;;  %v3197_v57 = vmul.f32 %v3196_v31, %v5800_v28  ;;  %v1803_v35 = vmul.f32 %v1802_v51, %v6085_v1  ;;  %s4710_s13 = sld [smem:[#allocation15 + $0xe6]] }
 0x2e1   : > { %v6097_v20 = vpop.permute.xlu1 %1470  ;;  %v2646_v48 = vpop.permute.xlu0 %2645  ;;  %s6257_s16 = sld [smem:[#allocation15 + $0xa3]] }
 0x2e2   : > { %v2648_v45 = vadd.f32 %v2646_v48, %v2640_v42 }
 0x2e3   : > { %2486 = vrot.lane.b32.xlu1 %v2484_v10, %s7820_s30  ;;  %1550 = vrot.lane.b32.xlu0 %v1548_v5, %s7777_s26  ;;  %v2030_v10 = vmul.f32 %v2029_v6, %v5962_v27  ;;  %v2730_v5 = vstv %s6153_s12  ;;  %s6244_s12 = sld [smem:[#allocation15 + $0x3d]]  ;;  %v2041_v6 = vstv %s6225_s24 }
 0x2e4   : > { %s6294_s24 = sld [smem:[#allocation15 + $0xff]] }
 0x2e5   : > { %v2180_v14 = vpop.permute.xlu1 %2179  ;;  %v6114_v15 = vpop.permute.xlu0 %1717  ;;  %v1567_v2 = vstv %s6199_s15  ;;  %s6276_s15 = sld [smem:[#allocation15 + $0x99]] }
 0x2e6   : > { %v2182_v59 = vadd.f32 %v2180_v14, %v2174_v13  ;;  %v2977_v31 = vstv %s4710_s13  ;;  %s6302_s13 = sld [smem:[#allocation15 + $0x3e]] }
 0x2e7   : > { %3187 = vrot.lane.b32.xlu1 %v3185_v16, %s7820_s30  ;;  %2259 = vrot.lane.b32.xlu0 %v2257_v17, %s7820_s30  ;;  %v2731_v17 = vmul.f32 %v2730_v5, %v5841_v26 }
 0x2e8   : > { %v6129_v52 = vadd.f32 %v2185_v19, %v2182_v59  ;;  %v2269_v59 = vmul.f32 %v2268_v8, %v5962_v27 }
 0x2e9   : > { %v6133_v24 = vpop.permute.xlu1 %1478  ;;  %v2419_v25 = vpop.permute.xlu0 %2418 }
 0x2ea   : > { %v2421_v46 = vadd.f32 %v2419_v25, %v6089_v53  ;;  %v2969_v25 = vstv %s6177_s1  ;;  %s6261_s1 = sld [smem:[#allocation15 + $0xfc]] }
 0x2eb   : > { %2024 = vrot.lane.b32.xlu1 %v2022_v30, %s7777_s26  ;;  %2960 = vrot.lane.b32.xlu0 %v2958_v32, %s7820_s30  ;;  %v2205_v30 = vmul.f32 %v2204_v11, %v5800_v28 }
 0x2ed   : > { %v1953_v38 = vpop.permute.xlu1 %1952  ;;  %v6148_v39 = vpop.permute.xlu0 %1725 }
 0x2ee   : > { %v1955_v43 = vadd.f32 %v1953_v38, %v1947_v37  ;;  %v2970_v37 = vmul.f32 %v2969_v25, %v5841_v26  ;;  %v6227_v38 = vld [vmem:[#allocation5 + $0x22] sm:$0xff] }
 0x2ef   : > { %2725 = vrot.lane.b32.xlu1 %v2723_v40, %s7777_s26  ;;  %1797 = vrot.lane.b32.xlu0 %v1795_v18, %s7777_s26  ;;  %v2503_v18 = vstv %s6195_s14  ;;  %v1568_v44 = vmul.f32 %v1567_v2, %v6227_v38  ;;  %s6271_s14 = sld [smem:[#allocation15 + $0x109]] }
 0x2f0   : > { %v6169_v47 = vadd.f32 %v1958_v22, %v1955_v43  ;;  %v2504_v21 = vmul.f32 %v2503_v18, %v5876_v29 }
 0x2f1   : > { %v2654_v49 = vpop.permute.xlu1 %2653  ;;  %v2427_v50 = vpop.permute.xlu0 %2426 }
 0x2f2   : > { %v2656_v58 = vadd.f32 %v2654_v49, %v2648_v45  ;;  %v2429_v60 = vadd.f32 %v2427_v50, %v2421_v46  ;;  %v3204_v45 = vstv %s6209_s29  ;;  %v2276_v46 = vstv %s6213_s22  ;;  %s6283_s29 = sld [smem:[#allocation15 + $0xc5]] }
 0x2f3   : > { %1558 = vrot.lane.b32.xlu1 %v1556_v41, %s7820_s30  ;;  %2498 = vrot.lane.b32.xlu0 %v2496_v54, %s7777_s26  ;;  %v3205_v41 = vmul.f32 %v3204_v45, %v5800_v28  ;;  %v2277_v54 = vmul.f32 %v2276_v46, %v5962_v27  ;;  %v2042_v28 = vmul.f32 %v2041_v6, %v6085_v1  ;;  %s6287_s22 = sld [smem:[#allocation15 + $0x82]]  ;;  %v6326_v45 = vld [vmem:[#allocation5 + $0x10] sm:$0xff] }
 0x2f4   : > { %v6187_v3 = vadd.f32 %v2659_v62, %v2656_v58  ;;  %v6189_v4 = vadd.f32 %v2432_v63, %v2429_v60  ;;  %v2978_v62 = vmul.f32 %v2977_v31, %v5841_v26  ;;  %v2742_v63 = vstv %s6240_s25  ;;  %s6307_s25 = sld [smem:[#allocation15 + $0xe8]] }
 0x2f5   : > { %v2192_v53 = vpop.permute.xlu1 %2191  ;;  %v6191_v48 = vpop.permute.xlu0 %1490  ;;  %v2743_v9 = vmul.f32 %v2742_v63, %v5876_v29 }
 0x2f6   : > { %v2194_v13 = vadd.f32 %v2192_v53, %v6129_v52  ;;  %v2905_v52 = vstv %s6185_s3  ;;  %s6267_s3 = sld [smem:[#allocation15 + $0x5f]]  ;;  %v1814_v53 = vstv %s6244_s12 }
 0x2f7   : > { %2032 = vrot.lane.b32.xlu1 %v2030_v10, %s7820_s30  ;;  %3199 = vrot.lane.b32.xlu0 %v3197_v57, %s7777_s26  ;;  %v2906_v42 = vmul.f32 %v6179_v61, %v2905_v52  ;;  %v2678_v10 = vstv %s6248_s2  ;;  %v1815_v11 = vmul.f32 %v1814_v53, %v6227_v38  ;;  %s6312_s12 = sld [smem:[#allocation15 + $0xde]] }
 0x2f8   : > { %s6320_s2 = sld [smem:[#allocation15 + $0xa4]] }
 0x2f9   : > { %v2893_v14 = vpop.permute.xlu1 %2892  ;;  %v2200_v16 = vpop.permute.xlu0 %2199 }
 0x2fa   : > { %v2202_v19 = vadd.f32 %v2200_v16, %v2194_v13  ;;  %v2895_v32 = vadd.f32 %v2893_v14, %v2887_v23  ;;  %v1575_v14 = vstv %s6254_s0  ;;  %v2515_v16 = vstv %s6257_s16  ;;  %s6324_s0 = sld [smem:[#allocation15 + $0x1c]] }
 0x2fb   : > { %2733 = vrot.lane.b32.xlu1 %v2731_v17, %s7820_s30  ;;  %2271 = vrot.lane.b32.xlu0 %v2269_v59, %s7777_s26  ;;  %v6289_v17 = vld [vmem:[#allocation5 + $0x2] sm:$0xff]  ;;  %v2516_v25 = vmul.f32 %v2515_v16, %v5962_v27  ;;  %s6338_s16 = sld [smem:[#allocation15 + $0x10a]] }
 0x2fc   : > { %v6219_v33 = vadd.f32 %v2205_v30, %v2202_v19  ;;  %v1576_v19 = vmul.f32 %v1575_v14, %v6227_v38  ;;  %v3133_v30 = vstv %s6261_s1  ;;  %v2049_v52 = vstv %s6267_s3  ;;  %s6342_s1 = sld [smem:[#allocation15 + $0x83]] }
 0x2fd   : > { %v6221_v56 = vpop.permute.xlu1 %1964  ;;  %v2901_v34 = vpop.permute.xlu0 %2900  ;;  %v2050_v2 = vmul.f32 %v2049_v52, %v6085_v1  ;;  %v2925_v63 = vstv %s6312_s12  ;;  %s6355_s3 = sld [smem:[#allocation15 + $0x61]] }
 0x2fe   : > { %v2903_v40 = vadd.f32 %v2901_v34, %v2895_v32  ;;  %v3216_v32 = vstv %s6271_s14  ;;  %v2451_v34 = vstv %s6276_s15  ;;  %v2523_v14 = vstv %s6320_s2  ;;  %s4713_s14 = sld [smem:[#allocation15 + $0xe9]] }
 0x2ff   : > { %1805 = vrot.lane.b32.xlu1 %v1803_v35, %s7820_s30  ;;  %2972 = vrot.lane.b32.xlu0 %v2970_v37, %s7777_s26  ;;  %v3134_v37 = vmul.f32 %v6155_v12, %v3133_v30  ;;  %v2452_v12 = vmul.f32 %v6326_v45, %v2451_v34  ;;  %s6370_s15 = sld [smem:[#allocation15 + $0xc7]] }
 0x300   : > { %v6234_v43 = vadd.f32 %v2906_v42, %v2903_v40  ;;  %v3217_v42 = vmul.f32 %v3216_v32, %v5841_v26  ;;  %v1587_v16 = vstv %s6324_s0  ;;  %s6400_s12 = sld [smem:[#allocation15 + $0x10c]] }
 0x301   : > { %v2666_v36 = vpop.permute.xlu1 %2665  ;;  %v6236_v22 = vpop.permute.xlu0 %1737  ;;  %v3224_v52 = vstv %s6338_s16  ;;  %s6410_s2 = sld [smem:[#allocation15 + $0xc8]] }
 0x302   : > { %v2668_v57 = vadd.f32 %v2666_v36, %v6187_v3  ;;  %v2679_v3 = vmul.f32 %v6289_v17, %v2678_v10  ;;  %v2296_v32 = vstv %s6342_s1  ;;  %s6414_s0 = sld [smem:[#allocation15 + $0x85]] }
 0x303   : > { %2506 = vrot.lane.b32.xlu1 %v2504_v21, %s7820_s30  ;;  %1570 = vrot.lane.b32.xlu0 %v1568_v44, %s7777_s26  ;;  %v2750_v21 = vstv %s6283_s29  ;;  %v2288_v44 = vstv %s6287_s22  ;;  %s4539_s29 = sld [smem:[#allocation15 + $0x40]] }
 0x304   : > { %v2289_v6 = vmul.f32 %v2288_v44, %v6085_v1  ;;  %s6376_s22 = sld [smem:[#allocation15 + $0xbd]] }
 0x305   : > { %v6250_v49 = vpop.permute.xlu1 %1498  ;;  %v2439_v50 = vpop.permute.xlu0 %2438  ;;  %s6419_s16 = sld [smem:[#allocation15 + $0x102]] }
 0x306   : > { %v2441_v35 = vadd.f32 %v2439_v50, %v6189_v4  ;;  %v3152_v4 = vstv %s6294_s24  ;;  %s6386_s24 = sld [smem:[#allocation15 + $0x1d]] }
 0x307   : > { %3207 = vrot.lane.b32.xlu1 %v3205_v41, %s7820_s30  ;;  %2279 = vrot.lane.b32.xlu0 %v2277_v54, %s7820_s30  ;;  %v2751_v54 = vmul.f32 %v2750_v21, %v5876_v29  ;;  %s6427_s1 = sld [smem:[#allocation15 + $0x41]] }
 0x309   : > { %v6263_v58 = vpop.permute.xlu1 %1972  ;;  %v3140_v60 = vpop.permute.xlu0 %3139 }
 0x30a   : > { %v3142_v26 = vadd.f32 %v3140_v60, %v3134_v37  ;;  %v3153_v60 = vmul.f32 %v6179_v61, %v3152_v4  ;;  %v6357_v61 = vld [vmem:[#allocation5 + $0x30] sm:$0xff] }
 0x30b   : > { %2044 = vrot.lane.b32.xlu1 %v2042_v28, %s7777_s26  ;;  %2980 = vrot.lane.b32.xlu0 %v2978_v62, %s7820_s30  ;;  %v1822_v28 = vstv %s6302_s13  ;;  %v2989_v62 = vstv %s6307_s25  ;;  %v1588_v30 = vmul.f32 %v1587_v16, %v6357_v61  ;;  %v6382_v37 = vld [vmem:[#allocation5 + $0x11] sm:$0xff]  ;;  %s6389_s13 = sld [smem:[#allocation15 + $0xa6]] }
 0x30c   : > { %s6397_s25 = sld [smem:[#allocation15 + $0x62]] }
 0x30d   : > { %v2674_v5 = vpop.permute.xlu1 %2673  ;;  %v6279_v8 = vpop.permute.xlu0 %2211 }
 0x30e   : > { %v2676_v13 = vadd.f32 %v2674_v5, %v2668_v57 }
 0x30f   : > { %2745 = vrot.lane.b32.xlu1 %v2743_v9, %s7777_s26  ;;  %1817 = vrot.lane.b32.xlu0 %v1815_v11, %s7777_s26  ;;  %v1823_v9 = vmul.f32 %v1822_v28, %v6227_v38  ;;  %v2990_v11 = vmul.f32 %v2989_v62, %v5876_v29 }
 0x310   : > { %v6296_v59 = vadd.f32 %v2679_v3, %v2676_v13 }
 0x311   : > { %v6298_v51 = vpop.permute.xlu1 %1745  ;;  %v2913_v23 = vpop.permute.xlu0 %2912 }
 0x312   : > { %v2915_v53 = vadd.f32 %v2913_v23, %v6234_v43  ;;  %v2926_v43 = vmul.f32 %v6289_v17, %v2925_v63  ;;  %v1595_v63 = vstv %s6386_s24  ;;  %v2069_v16 = vstv %s6397_s25  ;;  %s6463_s24 = sld [smem:[#allocation15 + $0x86]] }
 0x313   : > { %1578 = vrot.lane.b32.xlu1 %v1576_v19, %s7820_s30  ;;  %2518 = vrot.lane.b32.xlu0 %v2516_v25, %s7777_s26  ;;  %v2524_v25 = vmul.f32 %v2523_v14, %v5962_v27  ;;  %s4716_s25 = sld [smem:[#allocation15 + $0xec]] }
 0x315   : > { %v2447_v40 = vpop.permute.xlu1 %2446  ;;  %v6316_v18 = vpop.permute.xlu0 %1510 }
 0x316   : > { %v2449_v36 = vadd.f32 %v2447_v40, %v2441_v35  ;;  %v3225_v40 = vmul.f32 %v6382_v37, %v3224_v52  ;;  %v6442_v52 = vld [vmem:[#allocation5 + $0x12] sm:$0xff] }
 0x317   : > { %2052 = vrot.lane.b32.xlu1 %v2050_v2, %s7820_s30  ;;  %3219 = vrot.lane.b32.xlu0 %v3217_v42, %s7777_s26  ;;  %v2297_v2 = vmul.f32 %v2296_v32, %v6085_v1  ;;  %v2061_v42 = vstv %s6355_s3  ;;  %s6431_s3 = sld [smem:[#allocation15 + $0xeb]] }
 0x318   : > { %v6332_v46 = vadd.f32 %v2452_v12, %v2449_v36  ;;  %v2997_v36 = vstv %s4713_s14  ;;  %v2062_v12 = vmul.f32 %v2061_v42, %v6227_v38  ;;  %s6435_s14 = sld [smem:[#allocation15 + $0xe1]]  ;;  %v3172_v42 = vstv %s6419_s16 }
 0x319   : > { %v3148_v50 = vpop.permute.xlu1 %3147  ;;  %v6334_v41 = vpop.permute.xlu0 %2219  ;;  %v2998_v4 = vmul.f32 %v2997_v36, %v5876_v29  ;;  %s4647_s16 = sld [smem:[#allocation15 + $0xa9]] }
 0x31a   : > { %v3150_v31 = vadd.f32 %v3148_v50, %v3142_v26  ;;  %v2762_v26 = vstv %s6370_s15  ;;  %v1834_v50 = vstv %s4539_s29  ;;  %s6445_s15 = sld [smem:[#allocation15 + $0xa7]] }
 0x31b   : > { %2753 = vrot.lane.b32.xlu1 %v2751_v54, %s7820_s30  ;;  %2291 = vrot.lane.b32.xlu0 %v2289_v6, %s7777_s26  ;;  %v2698_v54 = vstv %s6376_s22  ;;  %v2763_v62 = vmul.f32 %v2762_v26, %v5962_v27  ;;  %v1835_v29 = vmul.f32 %v1834_v50, %v6357_v61  ;;  %s6449_s29 = sld [smem:[#allocation15 + $0x1f]] }
 0x31c   : > { %v6349_v10 = vadd.f32 %v3153_v60, %v3150_v31  ;;  %s6459_s22 = sld [smem:[#allocation15 + $0x10d]] }
 0x31d   : > { %v6351_v57 = vpop.permute.xlu1 %1984  ;;  %v2921_v5 = vpop.permute.xlu0 %2920 }
 0x31e   : > { %v2923_v13 = vadd.f32 %v2921_v5, %v2915_v53  ;;  %v2535_v53 = vstv %s6389_s13  ;;  %v2699_v5 = vmul.f32 %v6326_v45, %v2698_v54  ;;  %s6476_s13 = sld [smem:[#allocation15 + $0x64]] }
 0x31f   : > { %1825 = vrot.lane.b32.xlu1 %v1823_v9, %s7820_s30  ;;  %2992 = vrot.lane.b32.xlu0 %v2990_v11, %s7777_s26  ;;  %v2536_v14 = vmul.f32 %v2535_v53, %v6085_v1 }
 0x320   : > { %v6364_v3 = vadd.f32 %v2926_v43, %v2923_v13  ;;  %v1596_v13 = vmul.f32 %v1595_v63, %v6357_v61  ;;  %v3236_v43 = vstv %s6400_s12  ;;  %s4681_s12 = sld [smem:[#allocation15 + $0xca]] }
 0x321   : > { %v2686_v23 = vpop.permute.xlu1 %2685  ;;  %v6366_v19 = vpop.permute.xlu0 %1757  ;;  %v3237_v32 = vmul.f32 %v6442_v52, %v3236_v43 }
 0x322   : > { %v2688_v6 = vadd.f32 %v2686_v23, %v6296_v59 }
 0x323   : > { %2526 = vrot.lane.b32.xlu1 %v2524_v25, %s7820_s30  ;;  %1590 = vrot.lane.b32.xlu0 %v1588_v30, %s7777_s26  ;;  %v2070_v30 = vmul.f32 %v2069_v16, %v6227_v38  ;;  %v1607_v16 = vstv %s6449_s29  ;;  %s6522_s29 = sld [smem:[#allocation15 + $0x105]] }
 0x325   : > { %v6378_v34 = vpop.permute.xlu1 %1518  ;;  %v6380_v35 = vpop.permute.xlu0 %2458 }
 0x327   : > { %3227 = vrot.lane.b32.xlu1 %v3225_v40, %s7820_s30  ;;  %2299 = vrot.lane.b32.xlu0 %v2297_v2, %s7820_s30  ;;  %v2770_v40 = vstv %s6410_s2  ;;  %v2308_v2 = vstv %s6414_s0  ;;  %s4542_s2 = sld [smem:[#allocation15 + $0x43]] }
 0x328   : > { %v2771_v26 = vmul.f32 %v2770_v40, %v5962_v27  ;;  %v2309_v50 = vmul.f32 %v2308_v2, %v6227_v38  ;;  %v3244_v2 = vstv %s6459_s22  ;;  %s4507_s0 = sld [smem:[#allocation15 + $0x20]] }
 0x329   : > { %v6393_v21 = vpop.permute.xlu1 %1992  ;;  %v3160_v44 = vpop.permute.xlu0 %3159  ;;  %s6530_s22 = sld [smem:[#allocation15 + $0x44]] }
 0x32a   : > { %v3162_v36 = vadd.f32 %v3160_v44, %v6349_v10  ;;  %v2945_v10 = vstv %s6435_s14  ;;  %s6518_s14 = sld [smem:[#allocation15 + $0xcb]] }
 0x32b   : > { %2064 = vrot.lane.b32.xlu1 %v2062_v12, %s7777_s26  ;;  %3000 = vrot.lane.b32.xlu0 %v2998_v4, %s7820_s30 }
 0x32d   : > { %v2694_v31 = vpop.permute.xlu1 %2693  ;;  %v6406_v28 = vpop.permute.xlu0 %2231 }
 0x32e   : > { %v2696_v60 = vadd.f32 %v2694_v31, %v2688_v6  ;;  %v1842_v6 = vstv %s6427_s1  ;;  %v3009_v31 = vstv %s6431_s3  ;;  %s4577_s1 = sld [smem:[#allocation15 + $0x65]] }
 0x32f   : > { %2765 = vrot.lane.b32.xlu1 %v2763_v62, %s7777_s26  ;;  %1837 = vrot.lane.b32.xlu0 %v1835_v29, %s7777_s26  ;;  %v3173_v62 = vmul.f32 %v6289_v17, %v3172_v42  ;;  %v1843_v53 = vmul.f32 %v1842_v6, %v6357_v61  ;;  %v6478_v17 = vld [vmem:[#allocation5 + $0x31] sm:$0xff]  ;;  %v2316_v42 = vstv %s6463_s24  ;;  %v3017_v6 = vstv %s4716_s25  ;;  %s4752_s3 = sld [smem:[#allocation15 + $0x10f]] }
 0x330   : > { %v6421_v59 = vadd.f32 %v2699_v5, %v2696_v60  ;;  %v3010_v5 = vmul.f32 %v3009_v31, %v5962_v27  ;;  %v1608_v40 = vmul.f32 %v1607_v16, %v6478_v17  ;;  %s6532_s24 = sld [smem:[#allocation15 + $0xee]]  ;;  %v1862_v0 = vstv %s6530_s22 }
 0x331   : > { %v6423_v9 = vpop.permute.xlu1 %1765  ;;  %v2933_v11 = vpop.permute.xlu0 %2932  ;;  %s6547_s25 = sld [smem:[#allocation15 + $0x22]] }
 0x332   : > { %v2935_v44 = vadd.f32 %v2933_v11, %v6364_v3  ;;  %v2946_v3 = vmul.f32 %v6326_v45, %v2945_v10  ;;  %s4755_s22 = sld [smem:[#allocation15 + $0x112]] }
 0x333   : > { %1598 = vrot.lane.b32.xlu1 %v1596_v13, %s7820_s30  ;;  %2538 = vrot.lane.b32.xlu0 %v2536_v14, %s7777_s26  ;;  %v2543_v14 = vstv %s6445_s15  ;;  %s4613_s15 = sld [smem:[#allocation15 + $0x88]] }
 0x335   : > { %v6437_v23 = vpop.permute.xlu1 %2466  ;;  %v6439_v25 = vpop.permute.xlu0 %1530 }
 0x337   : > { %2072 = vrot.lane.b32.xlu1 %v2070_v30, %s7820_s30  ;;  %3239 = vrot.lane.b32.xlu0 %v3237_v32, %s7777_s26  ;;  %v2544_v32 = vmul.f32 %v2543_v14, %v6085_v1 }
 0x339   : > { %v3168_v12 = vpop.permute.xlu1 %3167  ;;  %v6455_v4 = vpop.permute.xlu0 %2239 }
 0x33a   : > { %v3170_v54 = vadd.f32 %v3168_v12, %v3162_v36 }
 0x33b   : > { %2773 = vrot.lane.b32.xlu1 %v2771_v26, %s7820_s30  ;;  %2311 = vrot.lane.b32.xlu0 %v2309_v50, %s7777_s26  ;;  %v3245_v26 = vmul.f32 %v6442_v52, %v3244_v2  ;;  %v2317_v50 = vmul.f32 %v2316_v42, %v6227_v38 }
 0x33c   : > { %v6470_v29 = vadd.f32 %v3173_v62, %v3170_v54  ;;  %v2081_v54 = vstv %s6476_s13  ;;  %s6544_s13 = sld [smem:[#allocation15 + $0xaa]] }
 0x33d   : > { %v6472_v60 = vpop.permute.xlu1 %2004  ;;  %v2941_v63 = vpop.permute.xlu0 %2940  ;;  %v2082_v10 = vmul.f32 %v2081_v54, %v6357_v61 }
 0x33e   : > { %v2943_v13 = vadd.f32 %v2941_v63, %v2935_v44  ;;  %v3018_v44 = vmul.f32 %v3017_v6, %v5962_v27  ;;  %v2782_v63 = vstv %s4681_s12  ;;  %v2555_v27 = vstv %s4647_s16  ;;  %s6557_s12 = sld [smem:[#allocation15 + $0x110]] }
 0x33f   : > { %1845 = vrot.lane.b32.xlu1 %v1843_v53, %s7820_s30  ;;  %3012 = vrot.lane.b32.xlu0 %v3010_v5, %s7777_s26  ;;  %v1854_v53 = vstv %s4542_s2  ;;  %v2783_v14 = vmul.f32 %v2782_v63, %v6085_v1  ;;  %v2556_v42 = vmul.f32 %v2555_v27, %v6227_v38  ;;  %s4614_s2 = sld [smem:[#allocation15 + $0x89]] }
 0x340   : > { %v6485_v11 = vadd.f32 %v2946_v3, %v2943_v13  ;;  %v1855_v16 = vmul.f32 %v1854_v53, %v6478_v17  ;;  %v1615_v3 = vstv %s4507_s0  ;;  %v2790_v53 = vstv %s6518_s14  ;;  %s4579_s0 = sld [smem:[#allocation15 + $0x67]] }
 0x341   : > { %v6487_v43 = vpop.permute.xlu1 %2705  ;;  %v6489_v30 = vpop.permute.xlu0 %1777  ;;  %v1616_v2 = vmul.f32 %v1615_v3, %v6478_v17  ;;  %s4719_s16 = sld [smem:[#allocation15 + $0xef]] }
 0x342   : > { %7821 = vst [vmem:[#allocation31_spill] sm:$0xff] %v6485_v11  ;;  %s4510_s14 = sld [smem:[#allocation15 + $0x23]] }
 0x343   : > { %2546 = vrot.lane.b32.xlu1 %v2544_v32, %s7820_s30  ;;  %1610 = vrot.lane.b32.xlu0 %v1608_v40, %s7777_s26 }
 0x345   : > { %v6497_v36 = vpop.permute.xlu1 %1538  ;;  %v6499_v12 = vpop.permute.xlu0 %2478 }
 0x347   : > { %3247 = vrot.lane.b32.xlu1 %v3245_v26, %s7820_s30  ;;  %2319 = vrot.lane.b32.xlu0 %v2317_v50, %s7820_s30  ;;  %v2089_v26 = vstv %s4577_s1  ;;  %v3256_v50 = vstv %s4752_s3  ;;  %s4684_s1 = sld [smem:[#allocation15 + $0xcd]] }
 0x348   : > { %s4545_s3 = sld [smem:[#allocation15 + $0x46]] }
 0x349   : > { %v6506_v31 = vpop.permute.xlu1 %2012  ;;  %v3180_v62 = vpop.permute.xlu0 %3179 }
 0x34a   : > { %v3182_v3 = vadd.f32 %v3180_v62, %v6470_v29 }
 0x34b   : > { %2084 = vrot.lane.b32.xlu1 %v2082_v10, %s7777_s26  ;;  %3020 = vrot.lane.b32.xlu0 %v3018_v44, %s7820_s30  ;;  %v2090_v10 = vmul.f32 %v2089_v26, %v6357_v61  ;;  %v6541_v44 = vld [vmem:[#allocation5 + $0x20] sm:$0xff] }
 0x34c   : > { %v3257_v63 = vmul.f32 %v6541_v44, %v3256_v50 }
 0x34d   : > { %v6512_v5 = vpop.permute.xlu1 %2713  ;;  %v6514_v13 = vpop.permute.xlu0 %2251 }
 0x34e   : > { %7822 = vst [vmem:[#allocation32_spill] sm:$0xff] %v6512_v5  ;;  %7823 = vst [vmem:[#allocation33_spill] sm:$0xff] %v6514_v13 }
 0x34f   : > { %2785 = vrot.lane.b32.xlu1 %v2783_v14, %s7777_s26  ;;  %1857 = vrot.lane.b32.xlu0 %v1855_v16, %s7777_s26  ;;  %v2328_v14 = vstv %s4613_s15  ;;  %v3192_v16 = vstv %s6522_s29  ;;  %s4650_s15 = sld [smem:[#allocation15 + $0xac]] }
 0x350   : > { %v2329_v26 = vmul.f32 %v2328_v14, %v6357_v61  ;;  %s4580_s29 = sld [smem:[#allocation15 + $0x68]] }
 0x351   : > { %v6524_v32 = vpop.permute.xlu1 %1785  ;;  %v6526_v40 = vpop.permute.xlu0 %2952 }
 0x352   : > { %7824 = vst [vmem:[#allocation34_spill] sm:$0xff] %v6526_v40  ;;  %v3029_v40 = vstv %s6532_s24  ;;  %s4685_s24 = sld [smem:[#allocation15 + $0xce]] }
 0x353   : > { %1618 = vrot.lane.b32.xlu1 %v1616_v2, %s7820_s30  ;;  %2558 = vrot.lane.b32.xlu0 %v2556_v42, %s7777_s26  ;;  %v2791_v42 = vmul.f32 %v2790_v53, %v6085_v1  ;;  %v1863_v53 = vmul.f32 %v1862_v0, %v6478_v17  ;;  %v3030_v14 = vmul.f32 %v3029_v40, %v6085_v1  ;;  %v3264_v40 = vstv %s6557_s12  ;;  %s4721_s12 = sld [smem:[#allocation15 + $0xf1]] }
 0x355   : > { %v6536_v54 = vpop.permute.xlu1 %2486  ;;  %v6538_v6 = vpop.permute.xlu0 %1550  ;;  %v2575_v11 = vstv %s4650_s15  ;;  %s6649_s15 = sld [smem:[#allocation15 + $0xf2]] }
 0x356   : > { %7825 = vst [vmem:[#allocation35_spill] sm:$0xff] %v6536_v54 }
 0x357   : > { %2092 = vrot.lane.b32.xlu1 %v2090_v10, %s7820_s30  ;;  %3259 = vrot.lane.b32.xlu0 %v3257_v63, %s7777_s26  ;;  %v3193_v10 = vmul.f32 %v6326_v45, %v3192_v16  ;;  %v1627_v45 = vstv %s6547_s25  ;;  %s4546_s25 = sld [smem:[#allocation15 + $0x47]] }
 0x359   : > { %v3188_v27 = vpop.permute.xlu1 %3187  ;;  %v6553_v2 = vpop.permute.xlu0 %2259  ;;  %v3049_v54 = vstv %s4721_s12  ;;  %s6676_s12 = sld [smem:[#allocation15 + $0xc]] }
 0x35a   : > { %7826 = vst [vmem:[#allocation36_spill] sm:$0xff] %v6553_v2  ;;  %v3190_v50 = vadd.f32 %v3188_v27, %v3182_v3  ;;  %v6572_v3 = vld [vmem:[#allocation5 + $0x32] sm:$0xff]  ;;  %v2563_v27 = vstv %s6544_s13  ;;  %s4616_s13 = sld [smem:[#allocation15 + $0x8b]] }
 0x35b   : > { %2793 = vrot.lane.b32.xlu1 %v2791_v42, %s7820_s30  ;;  %2331 = vrot.lane.b32.xlu0 %v2329_v26, %s7777_s26  ;;  %v2564_v26 = vmul.f32 %v2563_v27, %v6227_v38  ;;  %v1628_v0 = vmul.f32 %v1627_v45, %v6572_v3  ;;  %v2101_v27 = vstv %s4579_s0  ;;  %s4582_s0 = sld [smem:[#allocation15 + $0x6a]] }
 0x35c   : > { %v6564_v29 = vadd.f32 %v3193_v10, %v3190_v50  ;;  %v2336_v50 = vstv %s4614_s2  ;;  %s4651_s2 = sld [smem:[#allocation15 + $0xad]] }
 0x35d   : > { %v6566_v62 = vpop.permute.xlu1 %2024  ;;  %v6568_v63 = vpop.permute.xlu0 %2960 }
 0x35e   : > { %7827 = vst [vmem:[#allocation37_spill] sm:$0xff] %v6564_v29  ;;  %7828 = vst [vmem:[#allocation38_spill] sm:$0xff] %v6568_v63  ;;  %v2337_v29 = vmul.f32 %v2336_v50, %v6357_v61  ;;  %v1874_v63 = vstv %s4545_s3  ;;  %s4617_s3 = sld [smem:[#allocation15 + $0x8c]] }
 0x35f   : > { %1865 = vrot.lane.b32.xlu1 %v1863_v53, %s7820_s30  ;;  %3032 = vrot.lane.b32.xlu0 %v3030_v14, %s7777_s26  ;;  %v3265_v14 = vmul.f32 %v6541_v44, %v3264_v40  ;;  %v2802_v40 = vstv %s4684_s1  ;;  %s4687_s1 = sld [smem:[#allocation15 + $0xd0]] }
 0x360   : > { %v2348_v2 = vstv %s4616_s13  ;;  %s6671_s13 = sld [smem:[#allocation15 + $0x115]] }
 0x361   : > { %v6578_v16 = vpop.permute.xlu1 %2725  ;;  %v6580_v42 = vpop.permute.xlu0 %1797 }
 0x362   : > { %7829 = vst [vmem:[#allocation39_spill] sm:$0xff] %v6578_v16  ;;  %v3037_v16 = vstv %s4719_s16  ;;  %s4756_s16 = sld [smem:[#allocation15 + $0x113]] }
 0x363   : > { %2566 = vrot.lane.b32.xlu1 %v2564_v26, %s7820_s30  ;;  %1630 = vrot.lane.b32.xlu0 %v1628_v0, %s7777_s26  ;;  %v2102_v0 = vmul.f32 %v2101_v27, %v6478_v17  ;;  %v1635_v27 = vstv %s4510_s14  ;;  %s4583_s14 = sld [smem:[#allocation15 + $0x6b]] }
 0x365   : > { %v6587_v10 = vpop.permute.xlu1 %1558  ;;  %v6589_v53 = vpop.permute.xlu0 %2498 }
 0x366   : > { %7830 = vst [vmem:[#allocation40_spill] sm:$0xff] %v6589_v53  ;;  %v3038_v53 = vmul.f32 %v3037_v16, %v6085_v1 }
 0x367   : > { %3267 = vrot.lane.b32.xlu1 %v3265_v14, %s7820_s30  ;;  %2339 = vrot.lane.b32.xlu0 %v2337_v29, %s7820_s30  ;;  %v2803_v29 = vmul.f32 %v2802_v40, %v6227_v38  ;;  %v2109_v40 = vstv %s4580_s29  ;;  %s4688_s29 = sld [smem:[#allocation15 + $0xd1]] }
 0x369   : > { %v6595_v45 = vpop.permute.xlu1 %2032  ;;  %v6597_v26 = vpop.permute.xlu0 %3199 }
 0x36a   : > { %7831 = vst [vmem:[#allocation41_spill] sm:$0xff] %v6597_v26  ;;  %v1875_v26 = vmul.f32 %v1874_v63, %v6572_v3 }
 0x36b   : > { %2104 = vrot.lane.b32.xlu1 %v2102_v0, %s7777_s26  ;;  %3040 = vrot.lane.b32.xlu0 %v3038_v53, %s7820_s30  ;;  %v1636_v53 = vmul.f32 %v1635_v27, %v6572_v3  ;;  %v2810_v27 = vstv %s4685_s24  ;;  %s4619_s24 = sld [smem:[#allocation15 + $0x8e]] }
 0x36d   : > { %v6603_v50 = vpop.permute.xlu1 %2733  ;;  %v6605_v14 = vpop.permute.xlu0 %2271 }
 0x36e   : > { %7832 = vst [vmem:[#allocation42_spill] sm:$0xff] %v6603_v50  ;;  %7833 = vst [vmem:[#allocation43_spill] sm:$0xff] %v6605_v14  ;;  %v2576_v14 = vmul.f32 %v2575_v11, %v6357_v61  ;;  %v3276_v50 = vstv %s4755_s22  ;;  %s6661_s22 = sld [smem:[#allocation15 + $0xaf]] }
 0x36f   : > { %2805 = vrot.lane.b32.xlu1 %v2803_v29, %s7777_s26  ;;  %1877 = vrot.lane.b32.xlu0 %v1875_v26, %s7777_s26  ;;  %v2110_v26 = vmul.f32 %v2109_v40, %v6478_v17  ;;  %v1882_v40 = vstv %s4546_s25  ;;  %s6674_s25 = sld [smem:[#allocation15 + $0xf4]] }
 0x371   : > { %v6611_v16 = vpop.permute.xlu1 %1805  ;;  %v6613_v0 = vpop.permute.xlu0 %2972 }
 0x372   : > { %7834 = vst [vmem:[#allocation44_spill] sm:$0xff] %v6613_v0  ;;  %v3277_v0 = vmul.f32 %v3276_v50, %v6085_v1 }
 0x373   : > { %1638 = vrot.lane.b32.xlu1 %v1636_v53, %s7820_s30  ;;  %2578 = vrot.lane.b32.xlu0 %v2576_v14, %s7777_s26  ;;  %v2811_v14 = vmul.f32 %v2810_v27, %v6227_v38  ;;  %v2583_v27 = vstv %s4651_s2  ;;  %s6680_s2 = sld [smem:[#allocation15 + $0x30]] }
 0x375   : > { %v6619_v63 = vpop.permute.xlu1 %2506  ;;  %v6621_v29 = vpop.permute.xlu0 %1570 }
 0x376   : > { %7835 = vst [vmem:[#allocation45_spill] sm:$0xff] %v6619_v63  ;;  %v2349_v63 = vmul.f32 %v2348_v2, %v6478_v17 }
 0x377   : > { %2112 = vrot.lane.b32.xlu1 %v2110_v26, %s7820_s30  ;;  %3279 = vrot.lane.b32.xlu0 %v3277_v0, %s7777_s26  ;;  %v1883_v0 = vmul.f32 %v1882_v40, %v6572_v3  ;;  %v3050_v26 = vmul.f32 %v3049_v54, %v6227_v38  ;;  %v3284_v40 = vstv %s4756_s16  ;;  %v2822_v54 = vstv %s4687_s1  ;;  %s6691_s16 = sld [smem:[#allocation15 + $0x8f]] }
 0x378   : > { %s6693_s1 = sld [smem:[#allocation15 + $0xf]] }
 0x379   : > { %v6627_v11 = vpop.permute.xlu1 %3207  ;;  %v6629_v53 = vpop.permute.xlu0 %2279 }
 0x37a   : > { %7836 = vst [vmem:[#allocation46_spill] sm:$0xff] %v6627_v11  ;;  %7837 = vst [vmem:[#allocation47_spill] sm:$0xff] %v6629_v53  ;;  %v2121_v53 = vstv %s4582_s0  ;;  %v2356_v11 = vstv %s4617_s3  ;;  %s6688_s0 = sld [smem:[#allocation15 + $0xb0]] }
 0x37b   : > { %2813 = vrot.lane.b32.xlu1 %v2811_v14, %s7820_s30  ;;  %2351 = vrot.lane.b32.xlu0 %v2349_v63, %s7777_s26  ;;  %v2584_v63 = vmul.f32 %v2583_v27, %v6357_v61  ;;  %s6697_s3 = sld [smem:[#allocation15 + $0x54]] }
 0x37d   : > { %v6635_v1 = vpop.permute.xlu1 %2044  ;;  %v6637_v50 = vpop.permute.xlu0 %2980 }
 0x37e   : > { %7838 = vst [vmem:[#allocation48_spill] sm:$0xff] %v6635_v1  ;;  %7839 = vst [vmem:[#allocation49_spill] sm:$0xff] %v6637_v50  ;;  %v2122_v50 = vmul.f32 %v2121_v53, %v6572_v3  ;;  %v2823_v53 = vmul.f32 %v2822_v54, %v6357_v61  ;;  %v2129_v1 = vstv %s4583_s14  ;;  %v3057_v54 = vstv %s6649_s15  ;;  %s6705_s14 = sld [smem:[#allocation15 + $0x116]] }
 0x37f   : > { %1885 = vrot.lane.b32.xlu1 %v1883_v0, %s7820_s30  ;;  %3052 = vrot.lane.b32.xlu0 %v3050_v26, %s7777_s26  ;;  %s6709_s15 = sld [smem:[#allocation15 + $0xf5]] }
 0x381   : > { %v6643_v2 = vpop.permute.xlu1 %2745  ;;  %v6645_v14 = vpop.permute.xlu0 %1817 }
 0x382   : > { %7840 = vst [vmem:[#allocation50_spill] sm:$0xff] %v6643_v2  ;;  %7841 = vst [vmem:[#allocation51_spill] sm:$0xff] %v6645_v14  ;;  %v6657_v2 = vld [vmem:[#allocation5 + $0x21] sm:$0xff]  ;;  %v2830_v14 = vstv %s4688_s29  ;;  %s6711_s29 = sld [smem:[#allocation15 + $0x33]] }
 0x383   : > { %2586 = vrot.lane.b32.xlu1 %v2584_v63, %s7820_s30  ;;  %2124 = vrot.lane.b32.xlu0 %v2122_v50, %s7777_s26  ;;  %v3285_v27 = vmul.f32 %v6657_v2, %v3284_v40  ;;  %v2130_v40 = vmul.f32 %v2129_v1, %v6572_v3  ;;  %v2831_v1 = vmul.f32 %v2830_v14, %v6357_v61 }
 0x385   : > { %v6653_v0 = vpop.permute.xlu1 %1578  ;;  %v6655_v26 = vpop.permute.xlu0 %2518  ;;  %v3077_v13 = vstv %s6709_s15  ;;  %s6763_s15 = sld [smem:[#allocation15 + $0x119]] }
 0x386   : > { %7842 = vst [vmem:[#allocation52_spill] sm:$0xff] %v6655_v26  ;;  %v2357_v26 = vmul.f32 %v2356_v11, %v6478_v17  ;;  %v3058_v11 = vmul.f32 %v3057_v54, %v6227_v38 }
 0x387   : > { %3287 = vrot.lane.b32.xlu1 %v3285_v27, %s7820_s30  ;;  %2825 = vrot.lane.b32.xlu0 %v2823_v53, %s7777_s26 }
 0x389   : > { %v6665_v50 = vpop.permute.xlu1 %2052  ;;  %v6667_v63 = vpop.permute.xlu0 %3219 }
 0x38a   : > { %7843 = vst [vmem:[#allocation53_spill] sm:$0xff] %v6665_v50  ;;  %7844 = vst [vmem:[#allocation54_spill] sm:$0xff] %v6667_v63  ;;  %v2595_v63 = vstv %s6661_s22  ;;  %v2368_v50 = vstv %s4619_s24  ;;  %s6715_s22 = sld [smem:[#allocation15 + $0x78]] }
 0x38b   : > { %2359 = vrot.lane.b32.xlu1 %v2357_v26, %s7820_s30  ;;  %2132 = vrot.lane.b32.xlu0 %v2130_v40, %s7820_s30  ;;  %v2596_v14 = vmul.f32 %v2595_v63, %v6478_v17  ;;  %v2369_v54 = vmul.f32 %v2368_v50, %v6572_v3  ;;  %s6723_s24 = sld [smem:[#allocation15 + $0xd3]] }
 0x38d   : > { %v6682_v27 = vpop.permute.xlu1 %2753  ;;  %v6684_v53 = vpop.permute.xlu0 %2291 }
 0x38e   : > { %7845 = vst [vmem:[#allocation55_spill] sm:$0xff] %v6682_v27  ;;  %7846 = vst [vmem:[#allocation56_spill] sm:$0xff] %v6684_v53  ;;  %v3296_v53 = vstv %s6671_s13  ;;  %v3069_v27 = vstv %s6674_s25  ;;  %s6727_s13 = sld [smem:[#allocation15 + $0xd4]] }
 0x38f   : > { %3060 = vrot.lane.b32.xlu1 %v3058_v11, %s7820_s30  ;;  %2833 = vrot.lane.b32.xlu0 %v2831_v1, %s7820_s30  ;;  %v3297_v50 = vmul.f32 %v3296_v53, %v6227_v38  ;;  %v3070_v1 = vmul.f32 %v3069_v27, %v6357_v61  ;;  %s6729_s25 = sld [smem:[#allocation15 + $0x12]] }
 0x391   : > { %v6699_v26 = vpop.permute.xlu1 %1825  ;;  %v6701_v40 = vpop.permute.xlu0 %2992 }
 0x392   : > { %7847 = vst [vmem:[#allocation57_spill] sm:$0xff] %v6699_v26  ;;  %7848 = vst [vmem:[#allocation58_spill] sm:$0xff] %v6701_v40  ;;  %v2603_v40 = vstv %s6688_s0  ;;  %v2376_v26 = vstv %s6691_s16  ;;  %s6741_s0 = sld [smem:[#allocation15 + $0xb2]] }
 0x393   : > { %2598 = vrot.lane.b32.xlu1 %v2596_v14, %s7777_s26  ;;  %2371 = vrot.lane.b32.xlu0 %v2369_v54, %s7777_s26  ;;  %v2604_v27 = vmul.f32 %v2603_v40, %v6478_v17  ;;  %v2377_v54 = vmul.f32 %v2376_v26, %v6572_v3  ;;  %s6745_s16 = sld [smem:[#allocation15 + $0xb3]] }
 0x395   : > { %v6717_v11 = vpop.permute.xlu1 %2526  ;;  %v6719_v63 = vpop.permute.xlu0 %1590 }
 0x396   : > { %7849 = vst [vmem:[#allocation59_spill] sm:$0xff] %v6717_v11  ;;  %v3304_v11 = vstv %s6705_s14  ;;  %s6759_s14 = sld [smem:[#allocation15 + $0x118]] }
 0x397   : > { %3299 = vrot.lane.b32.xlu1 %v3297_v50, %s7777_s26  ;;  %3072 = vrot.lane.b32.xlu0 %v3070_v1, %s7777_s26  ;;  %s6751_s26 = sld [smem:[#allocation15 + $0x9c]]  ;;  %v3305_v26 = vmul.f32 %v3304_v11, %v6227_v38  ;;  %v3078_v1 = vmul.f32 %v3077_v13, %v6357_v61 }
 0x399   : > { %v6735_v14 = vpop.permute.xlu1 %3227  ;;  %v6737_v53 = vpop.permute.xlu0 %2299 }
 0x39a   : > { %7850 = vst [vmem:[#allocation60_spill] sm:$0xff] %v6735_v14  ;;  %7851 = vst [vmem:[#allocation61_spill] sm:$0xff] %v6737_v53  ;;  %v2842_v53 = vstv %s6723_s24  ;;  %v2850_v14 = vstv %s6727_s13  ;;  %s6777_s24 = sld [smem:[#allocation15 + $0xf7]] }
 0x39b   : > { %2606 = vrot.lane.b32.xlu1 %v2604_v27, %s7820_s30  ;;  %2379 = vrot.lane.b32.xlu0 %v2377_v54, %s7820_s30  ;;  %v2843_v13 = vmul.f32 %v2842_v53, %v6478_v17  ;;  %v2851_v11 = vmul.f32 %v2850_v14, %v6478_v17  ;;  %v2615_v54 = vstv %s6741_s0  ;;  %s6781_s13 = sld [smem:[#allocation15 + $0xf8]]  ;;  %v1483_v14 = vstv %s6676_s12 }
 0x39c   : > { %s6798_s0 = sld [smem:[#allocation15 + $0xd6]] }
 0x39d   : > { %v6753_v50 = vpop.permute.xlu1 %2064  ;;  %v6755_v40 = vpop.permute.xlu0 %3000  ;;  %s6810_s12 = sld [smem:[#allocation15 + $0x9f]] }
 0x39e   : > { %7852 = vst [vmem:[#allocation62_spill] sm:$0xff] %v6753_v50  ;;  %7853 = vst [vmem:[#allocation63_spill] sm:$0xff] %v6755_v40  ;;  %v2623_v40 = vstv %s6745_s16  ;;  %s6803_s16 = sld [smem:[#allocation15 + $0x11b]] }
 0x39f   : > { %3307 = vrot.lane.b32.xlu1 %v3305_v26, %s7820_s30  ;;  %3080 = vrot.lane.b32.xlu0 %v3078_v1, %s7820_s30  ;;  %v1473_v26 = vadd.f32 %v6097_v20, %v6045_v7  ;;  %v2624_v50 = vmul.f32 %v2623_v40, %v6572_v3  ;;  %v1484_v7 = vmul.f32 %v6382_v37, %v1483_v14 }
 0x3a1   : > { %v6771_v27 = vpop.permute.xlu1 %2765  ;;  %v6773_v38 = vpop.permute.xlu0 %1837 }
 0x3a2   : > { %7854 = vst [vmem:[#allocation64_spill] sm:$0xff] %v6771_v27  ;;  %7855 = vst [vmem:[#allocation65_spill] sm:$0xff] %v6773_v38  ;;  %v2616_v27 = vmul.f32 %v2615_v54, %v6572_v3  ;;  %v3324_v38 = vstv %s6763_s15  ;;  %s6822_s15 = sld [smem:[#allocation15 + $0x11c]] }
 0x3a3   : > { %2845 = vrot.lane.b32.xlu1 %v2843_v13, %s7856_s20  ;;  %2853 = vrot.lane.b32.xlu0 %v2851_v11, %s7820_s30  ;;  %v1481_v13 = vadd.f32 %v6133_v24, %v1473_v26  ;;  %v3316_v11 = vstv %s6759_s14  ;;  %v3325_v54 = vmul.f32 %v3324_v38, %v6357_v61  ;;  %s6818_s14 = sld [smem:[#allocation15 + $0xd7]] }
 0x3a4   : > { %v3317_v24 = vmul.f32 %v3316_v11, %v6357_v61  ;;  %v1503_v61 = vstv %s6693_s1  ;;  %s6853_s1 = sld [smem:[#allocation15 + $0x5d]] }
 0x3a5   : > { %v6792_v53 = vpop.permute.xlu1 %1598  ;;  %v6794_v1 = vpop.permute.xlu0 %2538  ;;  %v1485_v26 = vadd.f32 %v1484_v7, %v1481_v13 }
 0x3a6   : > { %7857 = vst [vmem:[#allocation66_spill] sm:$0xff] %v6794_v1 }
 0x3a7   : > { %2618 = vrot.lane.b32.xlu1 %v2616_v27, %s7856_s20  ;;  %2626 = vrot.lane.b32.xlu0 %v2624_v50, %s7820_s30  ;;  %v3089_v27 = vstv %s6777_s24  ;;  %v3097_v50 = vstv %s6781_s13  ;;  %v1493_v14 = vadd.f32 %v6191_v48, %v1485_v26  ;;  %s6838_s24 = sld [smem:[#allocation15 + $0xfa]]  ;;  %v1720_v48 = vadd.f32 %v6114_v15, %v6072_v55 }
 0x3a8   : > { %v3090_v11 = vmul.f32 %v3089_v27, %v6478_v17  ;;  %v3098_v7 = vmul.f32 %v3097_v50, %v6478_v17  ;;  %s6843_s13 = sld [smem:[#allocation15 + $0x11e]]  ;;  %v1730_v26 = vstv %s6680_s2  ;;  %v1504_v27 = vmul.f32 %v6442_v52, %v1503_v61 }
 0x3a9   : > { %v6812_v20 = vpop.permute.xlu1 %2072  ;;  %v6814_v40 = vpop.permute.xlu0 %3239  ;;  %v1728_v55 = vadd.f32 %v6148_v39, %v1720_v48  ;;  %v2870_v61 = vstv %s6818_s14  ;;  %s6867_s2 = sld [smem:[#allocation15 + $0xfb]]  ;;  %v1997_v39 = vstv %s6733_s4  ;;  %v1523_v48 = vstv %s6729_s25 }
 0x3aa   : > { %7858 = vst [vmem:[#allocation67_spill] sm:$0xff] %v6812_v20  ;;  %7859 = vst [vmem:[#allocation68_spill] sm:$0xff] %v6814_v40  ;;  %v3336_v40 = vstv %s6803_s16  ;;  %s6878_s16 = sld [smem:[#allocation15 + $0xa2]] }
 0x3ab   : > { %3319 = vrot.lane.b32.xlu1 %v3317_v24, %s7856_s20  ;;  %3327 = vrot.lane.b32.xlu0 %v3325_v54, %s7820_s30  ;;  %v1501_v24 = vadd.f32 %v6250_v49, %v1493_v14  ;;  %v2862_v54 = vstv %s6798_s0  ;;  %v1977_v49 = vstv %s6697_s3  ;;  %s6856_s0 = sld [smem:[#allocation15 + $0xc3]] }
 0x3ac   : > { %s6870_s3 = sld [smem:[#allocation15 + $0x3c]] }
 0x3ad   : > { %v6832_v38 = vpop.permute.xlu1 %2773  ;;  %v6834_v13 = vpop.permute.xlu0 %2311  ;;  %v1505_v15 = vadd.f32 %v1504_v27, %v1501_v24  ;;  %v6881_v24 = vmul.f32 %v6382_v37, %v1977_v49  ;;  %s6884_s14 = sld [smem:[#allocation15 + $0x108]]  ;;  %v3109_v1 = vstv %s6838_s24 }
 0x3ae   : > { %7860 = vst [vmem:[#allocation69_spill] sm:$0xff] %v6832_v38  ;;  %7861 = vst [vmem:[#allocation70_spill] sm:$0xff] %v6834_v13  ;;  %v3344_v13 = vstv %s6822_s15  ;;  %v1731_v38 = vmul.f32 %v6382_v37, %v1730_v26  ;;  %v3356_v49 = vstv %s6843_s13  ;;  %s6895_s4 = sld [smem:[#allocation15 + $0x11f]] }
 0x3af   : > { %3092 = vrot.lane.b32.xlu1 %v3090_v11, %s7856_s20  ;;  %3100 = vrot.lane.b32.xlu0 %v3098_v7, %s7820_s30  ;;  %v2863_v11 = vmul.f32 %v2862_v54, %v6572_v3  ;;  %v3337_v7 = vmul.f32 %v3336_v40, %v6478_v17  ;;  %v1513_v40 = vadd.f32 %v6316_v18, %v1505_v15  ;;  %v1750_v54 = vstv %s6711_s29  ;;  %s6905_s29 = sld [smem:[#allocation15 + $0x81]] }
 0x3b0   : > { %v3345_v18 = vmul.f32 %v3344_v13, %v6478_v17  ;;  %v1751_v20 = vmul.f32 %v6442_v52, %v1750_v54  ;;  %v2471_v13 = vstv %s6751_s26  ;;  %s6992_s26 = sld [smem:[#allocation15 + $0x1e]] }
 0x3b1   : > { %v6858_v50 = vpop.permute.xlu1 %1845  ;;  %v6860_v14 = vpop.permute.xlu0 %3012  ;;  %v1521_v15 = vadd.f32 %v6378_v34, %v1513_v40  ;;  %v2017_v40 = vstv %s6783_s17  ;;  %s6940_s17 = sld [smem:[#allocation15 + $0xc6]] }
 0x3b2   : > { %7862 = vst [vmem:[#allocation71_spill] sm:$0xff] %v6858_v50  ;;  %7863 = vst [vmem:[#allocation72_spill] sm:$0xff] %v6860_v14  ;;  %v2224_v14 = vstv %s6715_s22  ;;  %v1770_v50 = vstv %s6747_s19  ;;  %s6913_s22 = sld [smem:[#allocation15 + $0xe7]] }
 0x3b3   : > { %2865 = vrot.lane.b32.xlu1 %v2863_v11, %s7856_s20  ;;  %3339 = vrot.lane.b32.xlu0 %v3337_v7, %s7856_s20  ;;  %v2871_v11 = vmul.f32 %v2870_v61, %v6572_v3  ;;  %v1732_v7 = vadd.f32 %v1731_v38, %v1728_v55  ;;  %v6902_v61 = vmul.f32 %v6442_v52, %v1997_v39  ;;  %v2244_v55 = vstv %s6765_s23  ;;  %s6917_s19 = sld [smem:[#allocation15 + $0x1b]] }
 0x3b4   : > { %v1524_v38 = vmul.f32 %v6541_v44, %v1523_v48  ;;  %s6927_s23 = sld [smem:[#allocation15 + $0x60]]  ;;  %v6931_v5 = vmul.f32 %v6541_v44, %v1770_v50 }
 0x3b5   : > { %v6886_v26 = vpop.permute.xlu1 %2546  ;;  %v6888_v27 = vpop.permute.xlu0 %1610  ;;  %v1740_v34 = vadd.f32 %v6236_v22, %v1732_v7  ;;  %v3357_v22 = vmul.f32 %v3356_v49, %v6572_v3  ;;  %v2718_v7 = vstv %s6789_s11  ;;  %v2264_v49 = vstv %s6824_s27  ;;  %s6949_s11 = sld [smem:[#allocation15 + $0x3f]] }
 0x3b6   : > { %7864 = vst [vmem:[#allocation73_spill] sm:$0xff] %v6886_v26  ;;  %7865 = vst [vmem:[#allocation74_spill] sm:$0xff] %v6888_v27  ;;  %v6899_v26 = vmul.f32 %v6382_v37, %v2224_v14  ;;  %v1543_v14 = vstv %s6769_s28  ;;  %v3117_v27 = vstv %s6867_s2  ;;  %s6980_s27 = sld [smem:[#allocation15 + $0x84]] }
 0x3b7   : > { %2873 = vrot.lane.b32.xlu1 %v2871_v11, %s7820_s30  ;;  %3347 = vrot.lane.b32.xlu0 %v3345_v18, %s7820_s30  ;;  %v3110_v11 = vmul.f32 %v3109_v1, %v6572_v3  ;;  %v1748_v48 = vadd.f32 %v6298_v51, %v1740_v34  ;;  %v1525_v18 = vadd.f32 %v1524_v38, %v1521_v15  ;;  %v1790_v1 = vstv %s6805_s10  ;;  %s6958_s10 = sld [smem:[#allocation15 + $0xa5]] }
 0x3b8   : > { %v1967_v51 = vadd.f32 %v6221_v56, %v6169_v47  ;;  %v2491_v15 = vstv %s6810_s12  ;;  %v1544_v34 = vmul.f32 %v6657_v2, %v1543_v14  ;;  %v6953_v38 = vmul.f32 %v6541_v44, %v2017_v40  ;;  %s6987_s28 = sld [smem:[#allocation15 + $0xea]] }
 0x3b9   : > { %v6919_v54 = vpop.permute.xlu1 %3247  ;;  %v6921_v39 = vpop.permute.xlu0 %2319  ;;  %v1533_v50 = vadd.f32 %v6439_v25, %v1525_v18  ;;  %v3118_v25 = vmul.f32 %v3117_v27, %v6572_v3  ;;  %v1752_v14 = vadd.f32 %v1751_v20, %v1748_v48  ;;  %v6974_v18 = vmul.f32 %v6442_v52, %v2491_v15  ;;  %s7025_s25 = sld [smem:[#allocation15 + $0x42]] }
 0x3ba   : > { %7866 = vst [vmem:[#allocation75_spill] sm:$0xff] %v6919_v54  ;;  %7867 = vst [vmem:[#allocation76_spill] sm:$0xff] %v6921_v39  ;;  %v6934_v54 = vmul.f32 %v6382_v37, %v2471_v13  ;;  %v6937_v39 = vmul.f32 %v6442_v52, %v2244_v55  ;;  %v6956_v13 = vmul.f32 %v6382_v37, %v2718_v7  ;;  %v2965_v27 = vstv %s6829_s8  ;;  %s7002_s8 = sld [smem:[#allocation15 + $0x63]] }
 0x3bb   : > { %3112 = vrot.lane.b32.xlu1 %v3110_v11, %s7856_s20  ;;  %3359 = vrot.lane.b32.xlu0 %v3357_v22, %s7856_s20  ;;  %v1975_v55 = vadd.f32 %v6263_v58, %v1967_v51  ;;  %v1541_v40 = vadd.f32 %v6497_v36, %v1533_v50  ;;  %s6967_s20 = sld [smem:[#allocation15 + $0x10b]]  ;;  %v3364_v11 = vstv %s6895_s4  ;;  %v6971_v22 = vmul.f32 %v6657_v2, %v1790_v1 }
 0x3bc   : > { %7870 = vst [vmem:[#allocation79_spill] sm:$0xff] %v6974_v18  ;;  %v6977_v7 = vmul.f32 %v6541_v44, %v2264_v49  ;;  %v1760_v58 = vadd.f32 %v6366_v19, %v1752_v14  ;;  %v1563_v36 = vstv %s6845_s21  ;;  %v2037_v20 = vstv %s6853_s1  ;;  %v7007_v18 = vld [vmem:[#allocation5 + $0x22] sm:$0xff]  ;;  %s7016_s21 = sld [smem:[#allocation15 + $0xc9]] }
 0x3bd   : > { %v6960_v47 = vpop.permute.xlu1 %2084  ;;  %v6962_v56 = vpop.permute.xlu0 %3020  ;;  %v2738_v48 = vstv %s6856_s0  ;;  %v1810_v1 = vstv %s6870_s3  ;;  %v2511_v51 = vstv %s6878_s16  ;;  %v3212_v50 = vstv %s6884_s14  ;;  %s7046_s12 = sld [smem:[#allocation15 + $0x10e]] }
 0x3be   : > { %7868 = vst [vmem:[#allocation77_spill] sm:$0xff] %v6960_v47  ;;  %7869 = vst [vmem:[#allocation78_spill] sm:$0xff] %v6962_v56  ;;  %v3365_v56 = vmul.f32 %v3364_v11, %v6572_v3  ;;  %v1768_v19 = vadd.f32 %v6423_v9, %v1760_v58  ;;  %v1545_v14 = vadd.f32 %v1544_v34, %v1541_v40  ;;  %v2284_v47 = vstv %s6905_s29  ;;  %v4979_v40 = vld [vmem:[#allocation5 + $0x11] sm:$0xff]  ;;  %s7055_s15 = sld [smem:[#allocation15 + $0x87]] }
 0x3bf   : > { %7871 = vst [vmem:[#allocation80_spill] sm:$0xff] %v6977_v7  ;;  %3120 = vrot.lane.b32.xlu1 %v3118_v25, %s7820_s30  ;;  %v1979_v25 = vadd.f32 %v6881_v24, %v1975_v55  ;;  %v7005_v7 = vmul.f32 %v6382_v37, %v2965_v27  ;;  %v7014_v11 = vmul.f32 %v6442_v52, %v2738_v48  ;;  %v2985_v34 = vstv %s6913_s22  ;;  %s7061_s24 = sld [smem:[#allocation15 + $0xed]] }
 0x3c0   : > { %v1553_v37 = vadd.f32 %v6538_v6, %v1545_v14  ;;  %v7022_v24 = vmul.f32 %v7007_v18, %v1810_v1  ;;  %v7028_v55 = vmul.f32 %v6541_v44, %v2511_v51  ;;  %v7030_v27 = vmul.f32 %v4979_v40, %v3212_v50  ;;  %s7080_s13 = sld [smem:[#allocation15 + $0x21]] }
 0x3c1   : > { %v6994_v15 = vpop.permute.xlu1 %2785  ;;  %v6996_v49 = vpop.permute.xlu0 %1857  ;;  %v1987_v9 = vadd.f32 %v6351_v57, %v1979_v25  ;;  %v1583_v57 = vstv %s6917_s19  ;;  %v2057_v1 = vstv %s6927_s23  ;;  %v7051_v51 = vmul.f32 %v6442_v52, %v2985_v34  ;;  %s7094_s1 = sld [smem:[#allocation15 + $0x66]] }
 0x3c2   : > { %7872 = vst [vmem:[#allocation81_spill] sm:$0xff] %v6994_v15  ;;  %7873 = vst [vmem:[#allocation82_spill] sm:$0xff] %v6996_v49  ;;  %v1564_v15 = vmul.f32 %v7007_v18, %v1563_v36  ;;  %v7011_v49 = vmul.f32 %v6657_v2, %v2037_v20  ;;  %v1772_v20 = vadd.f32 %v6931_v5, %v1768_v19  ;;  %v2758_v50 = vstv %s6940_s17  ;;  %s7102_s0 = sld [smem:[#allocation15 + $0xcc]] }
 0x3c3   : > { %3367 = vrot.lane.b32.xlu1 %v3365_v56, %s7820_s30  ;;  %v7033_v56 = vmul.f32 %v6657_v2, %v2284_v47  ;;  %s7038_s30 = sld [smem:[#allocation15 + $0xa8]]  ;;  %v1995_v36 = vadd.f32 %v6393_v21, %v1987_v9  ;;  %v1561_v48 = vadd.f32 %v6587_v10, %v1553_v37  ;;  %v2214_v47 = vadd.f32 %v6279_v8, %v6219_v33  ;;  %v7064_v9 = vld [vmem:[#allocation5 + $0x30] sm:$0xff] }
 0x3c4   : > { %v1830_v25 = vstv %s6949_s11  ;;  %v1780_v21 = vadd.f32 %v6489_v30, %v1772_v20  ;;  %v2531_v14 = vstv %s6958_s10  ;;  %v3232_v5 = vstv %s6967_s20  ;;  %s7112_s2 = sld [smem:[#allocation15 + $0x45]] }
 0x3c5   : > { %v7036_v6 = vpop.permute.xlu1 %1618  ;;  %v7040_v58 = vpop.permute.xlu0 %2558  ;;  %v2304_v19 = vstv %s6980_s27  ;;  %v2222_v10 = vadd.f32 %v6334_v41, %v2214_v47  ;;  %v1584_v33 = vmul.f32 %v7064_v9, %v1583_v57  ;;  %v7068_v8 = vmul.f32 %v7007_v18, %v2057_v1  ;;  %s7119_s3 = sld [smem:[#allocation15 + $0xab]] }
 0x3c6   : > { %v3005_v37 = vstv %s6987_s28  ;;  %v1999_v30 = vadd.f32 %v6902_v61, %v1995_v36  ;;  %v1788_v20 = vadd.f32 %v6524_v32, %v1780_v21  ;;  %v1565_v41 = vadd.f32 %v1564_v15, %v1561_v48  ;;  %s7125_s16 = sld [smem:[#allocation15 + $0x111]] }
 0x3c7   : > { %v7078_v47 = vmul.f32 %v6541_v44, %v2758_v50  ;;  %v7083_v57 = vmul.f32 %v7064_v9, %v1830_v25  ;;  %v7086_v1 = vmul.f32 %v6657_v2, %v2531_v14  ;;  %v7092_v61 = vmul.f32 %v7007_v18, %v2304_v19  ;;  %s7131_s14 = sld [smem:[#allocation15 + $0x8a]] }
 0x3c8   : > { %v2007_v32 = vadd.f32 %v6472_v60, %v1999_v30  ;;  %v1573_v15 = vadd.f32 %v6621_v29, %v1565_v41  ;;  %v7099_v36 = vmul.f32 %v6541_v44, %v3005_v37  ;;  %v1603_v48 = vstv %s6992_s26  ;;  %s7166_s4 = sld [smem:[#allocation15 + $0xf0]] }
 0x3c9   : > { %v7071_v34 = vpop.permute.xlu1 %2092  ;;  %v7073_v40 = vpop.permute.xlu0 %3259  ;;  %v2077_v50 = vstv %s7002_s8  ;;  %v2778_v25 = vstv %s7016_s21  ;;  %v1850_v21 = vstv %s7025_s25  ;;  %v2461_v29 = vadd.f32 %v6380_v35, %v6332_v46  ;;  %s7177_s29 = sld [smem:[#allocation15 + $0x69]] }
 0x3ca   : > { %7874 = vst [vmem:[#allocation83_spill] sm:$0xff] %v7073_v40  ;;  %v7089_v40 = vmul.f32 %v6442_v52, %v3232_v5  ;;  %v2226_v52 = vadd.f32 %v6899_v26, %v2222_v10  ;;  %v2015_v5 = vadd.f32 %v6506_v31, %v2007_v32  ;;  %v1792_v19 = vadd.f32 %v6971_v22, %v1788_v20  ;;  %s7187_s22 = sld [smem:[#allocation15 + $0xcf]] }
 0x3cb   : > { %v1581_v26 = vadd.f32 %v6653_v0, %v1573_v15  ;;  %v1604_v37 = vmul.f32 %v1603_v48, %v6478_v17  ;;  %v2551_v30 = vstv %s7038_s30  ;;  %v3252_v41 = vstv %s7046_s12  ;;  %s7193_s19 = sld [smem:[#allocation15 + $0xae]] }
 0x3cc   : > { %v2234_v10 = vadd.f32 %v6406_v28, %v2226_v52  ;;  %v1800_v46 = vadd.f32 %v6580_v42, %v1792_v19  ;;  %v2324_v35 = vstv %s7055_s15  ;;  %v3025_v31 = vstv %s7061_s24  ;;  %s7225_s23 = sld [smem:[#allocation15 + $0x8d]] }
 0x3cd   : > { %v7108_v14 = vpop.permute.xlu1 %2793  ;;  %v7110_v60 = vpop.permute.xlu0 %2331  ;;  %v7135_v22 = vmul.f32 %v7064_v9, %v2077_v50  ;;  %v7138_v28 = vmul.f32 %v6657_v2, %v2778_v25  ;;  %v7141_v20 = vmul.f32 %v1850_v21, %v6478_v17  ;;  %v2019_v32 = vadd.f32 %v6953_v38, %v2015_v5  ;;  %s7230_s17 = sld [smem:[#allocation16]] }
 0x3ce   : > { %7875 = vst [vmem:[#allocation84_spill] sm:$0xff] %v7110_v60  ;;  %v2469_v60 = vadd.f32 %v6437_v23, %v2461_v29  ;;  %v2242_v0 = vadd.f32 %v6455_v4, %v2234_v10  ;;  %v1808_v15 = vadd.f32 %v6611_v16, %v1800_v46  ;;  %v1585_v4 = vadd.f32 %v1584_v33, %v1581_v26  ;;  %v7877_v10 = vld [vmem:[#allocation33_spill] sm:$0xff]  ;;  %s7256_s11 = sld [smem:[#allocation15 + $0x114]] }
 0x3cf   : > { %v7150_v48 = vmul.f32 %v7007_v18, %v2551_v30  ;;  %v7153_v52 = vmul.f32 %v6541_v44, %v3252_v41  ;;  %v7156_v17 = vmul.f32 %v7064_v9, %v2324_v35  ;;  %v7159_v50 = vmul.f32 %v6657_v2, %v3025_v31  ;;  %v7878_v35 = vld [vmem:[#allocation35_spill] sm:$0xff]  ;;  %s7273_s10 = sld [smem:[#allocation15 + $0xf3]] }
 0x3d0   : > { %v1623_v25 = vstv %s7080_s13  ;;  %v2473_v38 = vadd.f32 %v6934_v54, %v2469_v60  ;;  %v2027_v16 = vadd.f32 %v6566_v62, %v2019_v32  ;;  %v1593_v33 = vadd.f32 %v6719_v63, %v1585_v4  ;;  %s7281_s20 = sld [smem:[#allocation15 + $0xd2]] }
 0x3d1   : > { %v7143_v23 = vpop.permute.xlu1 %1865  ;;  %v7145_v42 = vpop.permute.xlu0 %3032  ;;  %v2097_v21 = vstv %s7094_s1  ;;  %v2708_v44 = vadd.f32 %v6487_v43, %v6421_v59  ;;  %v2246_v29 = vadd.f32 %v6937_v39, %v2242_v0  ;;  %v2798_v54 = vstv %s7102_s0  ;;  %v7876_v43 = vld [vmem:[#allocation32_spill] sm:$0xff]  ;;  %v7879_v0 = vld [vmem:[#allocation51_spill] sm:$0xff]  ;;  %s7293_s27 = sld [smem:[#allocation15 + $0xb1]] }
 0x3d2   : > { %v1870_v60 = vstv %s7112_s2  ;;  %v2481_v62 = vadd.f32 %v6499_v12, %v2473_v38  ;;  %v2035_v63 = vadd.f32 %v6595_v45, %v2027_v16  ;;  %v1812_v26 = vadd.f32 %v7022_v24, %v1808_v15  ;;  %v7880_v45 = vld [vmem:[#allocation36_spill] sm:$0xff]  ;;  %s7309_s28 = sld [smem:[#allocation15 + $0x117]] }
 0x3d3   : > { %v1601_v59 = vadd.f32 %v6792_v53, %v1593_v33  ;;  %v2716_v39 = vadd.f32 %v7876_v43, %v2708_v44  ;;  %v2254_v30 = vadd.f32 %v7877_v10, %v2246_v29  ;;  %v1624_v41 = vmul.f32 %v1623_v25, %v6572_v3  ;;  %v7200_v38 = vld [vmem:[#allocation5 + $0x31] sm:$0xff]  ;;  %v7885_v10 = vld [vmem:[#allocation31_spill] sm:$0xff]  ;;  %s7318_s26 = sld [smem:[#allocation16 + $0x1]] }
 0x3d4   : > { %v2571_v46 = vstv %s7119_s3  ;;  %v2489_v31 = vadd.f32 %v7878_v35, %v2481_v62  ;;  %v1820_v32 = vadd.f32 %v7879_v0, %v1812_v26  ;;  %v3272_v12 = vstv %s7125_s16  ;;  %v7883_v29 = vld [vmem:[#allocation57_spill] sm:$0xff]  ;;  %s7322_s8 = sld [smem:[#allocation15 + $0xf6]]  ;;  %s5125_s3 = smov 8  }
 0x3d5   : > { %v7171_v5 = vpop.permute.xlu1 %2566  ;;  %v7173_v19 = vpop.permute.xlu0 %1630  ;;  %v2344_v4 = vstv %s7131_s14  ;;  %v2262_v24 = vadd.f32 %v7880_v45, %v2254_v30  ;;  %v7203_v25 = vmul.f32 %v7200_v38, %v2097_v21  ;;  %v7206_v16 = vmul.f32 %v7007_v18, %v2798_v54  ;;  %v7886_v30 = vld [vmem:[#allocation34_spill] sm:$0xff]  ;;  %s7325_s21 = sld [smem:[#allocation16 + $0x2]]  ;;  %s5126_s16 = smov 4  }
 0x3d6   : > { %v7209_v33 = vmul.f32 %v1870_v60, %v6572_v3  ;;  %v2039_v44 = vadd.f32 %v7011_v49, %v2035_v63  ;;  %v1828_v62 = vadd.f32 %v7883_v29, %v1820_v32  ;;  %v1605_v26 = vadd.f32 %v1604_v37, %v1601_v59  ;;  %v7889_v49 = vld [vmem:[#allocation79_spill] sm:$0xff]  ;;  %v7890_v37 = vld [vmem:[#allocation48_spill] sm:$0xff]  ;;  %v7892_v45 = vld [vmem:[#allocation38_spill] sm:$0xff]  ;;  %s7419_s25 = sld [smem:[#allocation16 + $0x3]]  ;;  %s5127_s14 = smov 12  }
 0x3d7   : > { %7882 = vst [vmem:[#allocation33_spill] sm:$0xff] %v7206_v16  ;;  %v7214_v43 = vmul.f32 %v7064_v9, %v2571_v46  ;;  %v2955_v21 = vadd.f32 %v7886_v30, %v7885_v10  ;;  %v2720_v35 = vadd.f32 %v6956_v13, %v2716_v39  ;;  %v7220_v54 = vmul.f32 %v6657_v2, %v3272_v12  ;;  %v7891_v46 = vld [vmem:[#allocation74_spill] sm:$0xff]  ;;  %v7893_v39 = vld [vmem:[#allocation39_spill] sm:$0xff]  ;;  %v7894_v12 = vld [vmem:[#allocation80_spill] sm:$0xff]  ;;  %s7445_s30 = sld [smem:[#allocation15 + $0xd5]] }
 0x3d8   : > { %v7223_v60 = vmul.f32 %v7200_v38, %v2344_v4  ;;  %v2493_v63 = vadd.f32 %v7889_v49, %v2489_v31  ;;  %v2047_v59 = vadd.f32 %v7890_v37, %v2039_v44  ;;  %v1613_v0 = vadd.f32 %v7891_v46, %v1605_v26  ;;  %v7896_v30 = vld [vmem:[#allocation40_spill] sm:$0xff]  ;;  %v7897_v49 = vld [vmem:[#allocation53_spill] sm:$0xff]  ;;  %s7450_s12 = sld [smem:[#allocation15 + $0x11a]] }
 0x3d9   : > { %v7196_v53 = vpop.permute.xlu1 %3267  ;;  %v7198_v15 = vpop.permute.xlu0 %2339  ;;  %7884 = vst [vmem:[#allocation35_spill] sm:$0xff] %v7214_v43  ;;  %7887 = vst [vmem:[#allocation51_spill] sm:$0xff] %v7220_v54  ;;  %v3045_v32 = vstv %s7166_s4  ;;  %v2963_v13 = vadd.f32 %v7892_v45, %v2955_v21  ;;  %v2728_v2 = vadd.f32 %v7893_v39, %v2720_v35  ;;  %v2266_v4 = vadd.f32 %v7894_v12, %v2262_v24  ;;  %v7898_v54 = vld [vmem:[#allocation37_spill] sm:$0xff]  ;;  %v7900_v35 = vld [vmem:[#allocation42_spill] sm:$0xff]  ;;  %s7464_s15 = sld [smem:[#allocation16 + $0x4]]  ;;  %s5128_s4 = smov 20  }
 0x3da   : > { %7881 = vst [vmem:[#allocation32_spill] sm:$0xff] %v7196_v53  ;;  %7888 = vst [vmem:[#allocation36_spill] sm:$0xff] %v7223_v60  ;;  %v2117_v31 = vstv %s7177_s29  ;;  %v2501_v44 = vadd.f32 %v7896_v30, %v2493_v63  ;;  %v2055_v26 = vadd.f32 %v7897_v49, %v2047_v59  ;;  %v1832_v37 = vadd.f32 %v7083_v57, %v1828_v62  ;;  %v7899_v21 = vld [vmem:[#allocation41_spill] sm:$0xff]  ;;  %v7901_v60 = vld [vmem:[#allocation43_spill] sm:$0xff]  ;;  %s7466_s24 = sld [smem:[#allocation15 + $0xf9]]  ;;  %s5129_s29 = smov 16  }
 0x3db   : > { %v1621_v46 = vadd.f32 %v7036_v6, %v1613_v0  ;;  %v3202_v45 = vadd.f32 %v7899_v21, %v7898_v54  ;;  %v2736_v39 = vadd.f32 %v7900_v35, %v2728_v2  ;;  %v2274_v24 = vadd.f32 %v7901_v60, %v2266_v4  ;;  %v7902_v53 = vld [vmem:[#allocation45_spill] sm:$0xff]  ;;  %v7904_v57 = vld [vmem:[#allocation46_spill] sm:$0xff]  ;;  %v7905_v54 = vld [vmem:[#allocation47_spill] sm:$0xff]  ;;  %s7479_s13 = sld [smem:[#allocation15 + $0x11d]] }
 0x3dc   : > { %v2818_v12 = vstv %s7187_s22  ;;  %v2509_v43 = vadd.f32 %v7902_v53, %v2501_v44  ;;  %v7253_v63 = vmul.f32 %v7007_v18, %v3045_v32  ;;  %v2591_v59 = vstv %s7193_s19  ;;  %v7906_v4 = vld [vmem:[#allocation71_spill] sm:$0xff]  ;;  %s7493_s1 = sld [smem:[#allocation16 + $0x5]]  ;;  %s5130_s22 = smov 28  }
 0x3dd   : > { %v7236_v29 = vpop.permute.xlu1 %2104  ;;  %v7238_v10 = vpop.permute.xlu0 %3040  ;;  %v2967_v6 = vadd.f32 %v7005_v7, %v2963_v13  ;;  %v3210_v62 = vadd.f32 %v7904_v57, %v3202_v45  ;;  %v2282_v0 = vadd.f32 %v7905_v54, %v2274_v24  ;;  %v7266_v53 = vmul.f32 %v2117_v31, %v6572_v3  ;;  %v7907_v7 = vld [vmem:[#allocation44_spill] sm:$0xff]  ;;  %v7910_v45 = vld [vmem:[#allocation50_spill] sm:$0xff]  ;;  %s7515_s0 = sld [smem:[#allocation16 + $0x6]]  ;;  %s5131_s19 = smov 24  }
 0x3de   : > { %7895 = vst [vmem:[#allocation57_spill] sm:$0xff] %v7238_v10  ;;  %v7903_v10 = vld [vmem:[#allocation65_spill] sm:$0xff]  ;;  %v2059_v32 = vadd.f32 %v7068_v8, %v2055_v26  ;;  %v1625_v30 = vadd.f32 %v1624_v41, %v1621_v46  ;;  %v7271_v44 = vmul.f32 %v7064_v9, %v2818_v12  ;;  %v2740_v49 = vadd.f32 %v7014_v11, %v2736_v39  ;;  %v7908_v8 = vld [vmem:[#allocation62_spill] sm:$0xff]  ;;  %s7519_s2 = sld [smem:[#allocation16 + $0x7]] }
 0x3df   : > { %v1840_v16 = vadd.f32 %v7903_v10, %v1832_v37  ;;  %v2975_v13 = vadd.f32 %v7907_v7, %v2967_v6  ;;  %v7278_v37 = vmul.f32 %v7200_v38, %v2591_v59  ;;  %v2364_v21 = vstv %s7225_s23  ;;  %v7909_v26 = vld [vmem:[#allocation49_spill] sm:$0xff]  ;;  %v7912_v59 = vld [vmem:[#allocation67_spill] sm:$0xff]  ;;  %v7913_v54 = vld [vmem:[#allocation54_spill] sm:$0xff]  ;;  %s5132_s23 = smov 36  }
 0x3e0   : > { %v2513_v3 = vadd.f32 %v7028_v55, %v2509_v43  ;;  %v1633_v41 = vadd.f32 %v7173_v19, %v1625_v30  ;;  %v1643_v31 = vstv %s7230_s17  ;;  %v2748_v35 = vadd.f32 %v7910_v45, %v2740_v49  ;;  %v7911_v55 = vld [vmem:[#allocation52_spill] sm:$0xff]  ;;  %v7916_v7 = vld [vmem:[#allocation59_spill] sm:$0xff]  ;;  %v7917_v49 = vld [vmem:[#allocation82_spill] sm:$0xff]  ;;  %s5133_s17 = smov 32  }
 0x3e1   : > { %v7261_v2 = vpop.permute.xlu1 %2805  ;;  %v7263_v60 = vpop.permute.xlu0 %1877  ;;  %v1848_v10 = vadd.f32 %v7906_v4, %v1840_v16  ;;  %v2067_v16 = vadd.f32 %v7908_v8, %v2059_v32  ;;  %v2983_v46 = vadd.f32 %v7909_v26, %v2975_v13  ;;  %v3214_v24 = vadd.f32 %v7030_v27, %v3210_v62  ;;  %v7914_v4 = vld [vmem:[#allocation55_spill] sm:$0xff]  ;;  %v7915_v27 = vld [vmem:[#allocation56_spill] sm:$0xff]  ;;  %v7919_v26 = vld [vmem:[#allocation61_spill] sm:$0xff] }
 0x3e2   : > { %v2286_v11 = vadd.f32 %v7033_v56, %v2282_v0  ;;  %v2521_v43 = vadd.f32 %v7911_v55, %v2513_v3  ;;  %v2756_v30 = vadd.f32 %v7914_v4, %v2748_v35  ;;  %v7301_v56 = vld [vmem:[#allocation5 + $0x32] sm:$0xff]  ;;  %v2838_v55 = vstv %s7281_s20  ;;  %s5136_s20 = smov 52  }
 0x3e3   : > { %v2075_v6 = vadd.f32 %v7912_v59, %v2067_v16  ;;  %v1852_v19 = vadd.f32 %v7141_v20, %v1848_v10  ;;  %v3222_v32 = vadd.f32 %v7913_v54, %v3214_v24  ;;  %v7304_v0 = vmul.f32 %v7301_v56, %v2364_v21  ;;  %v7918_v10 = vld [vmem:[#allocation60_spill] sm:$0xff] }
 0x3e4   : > { %v2294_v62 = vadd.f32 %v7915_v27, %v2286_v11  ;;  %v2529_v13 = vadd.f32 %v7916_v7, %v2521_v43  ;;  %v3292_v16 = vstv %s7256_s11  ;;  %v2987_v20 = vadd.f32 %v7051_v51, %v2983_v46  ;;  %v7920_v43 = vld [vmem:[#allocation58_spill] sm:$0xff]  ;;  %v7923_v27 = vld [vmem:[#allocation63_spill] sm:$0xff]  ;;  %s5134_s11 = smov 44  }
 0x3e5   : > { %v1639_v39 = vpop.permute.xlu1 %1638  ;;  %v7291_v12 = vpop.permute.xlu0 %2578  ;;  %v1860_v3 = vadd.f32 %v7917_v49, %v1852_v19  ;;  %v2760_v51 = vadd.f32 %v7078_v47, %v2756_v30  ;;  %v7328_v46 = vmul.f32 %v7007_v18, %v3292_v16  ;;  %v2611_v30 = vstv %s7293_s27  ;;  %s5137_s27 = smov 48  }
 0x3e6   : > { %v1641_v57 = vadd.f32 %v1639_v39, %v1633_v41  ;;  %v3230_v41 = vadd.f32 %v7918_v10, %v3222_v32  ;;  %v2302_v45 = vadd.f32 %v7919_v26, %v2294_v62  ;;  %v3065_v39 = vstv %s7273_s10  ;;  %v7924_v62 = vld [vmem:[#allocation66_spill] sm:$0xff]  ;;  %v7928_v26 = vld [vmem:[#allocation73_spill] sm:$0xff]  ;;  %s5135_s10 = smov 40  }
 0x3e7   : > { %v1868_v24 = vadd.f32 %v7143_v23, %v1860_v3  ;;  %v2995_v59 = vadd.f32 %v7920_v43, %v2987_v20  ;;  %v7351_v16 = vmul.f32 %v7064_v9, %v3065_v39  ;;  %v7354_v20 = vmul.f32 %v7200_v38, %v2838_v55  ;;  %v7927_v10 = vld [vmem:[#allocation70_spill] sm:$0xff] }
 0x3e8   : > { %v1644_v8 = vadd.f32 %v1643_v31, %v1641_v57  ;;  %v2079_v31 = vadd.f32 %v7135_v22, %v2075_v6  ;;  %v2533_v22 = vadd.f32 %v7086_v1, %v2529_v13  ;;  %v7921_v6 = vld [vmem:[#allocation77_spill] sm:$0xff]  ;;  %v7922_v57 = vld [vmem:[#allocation64_spill] sm:$0xff]  ;;  %v3234_v32 = vadd.f32 %v7089_v40, %v3230_v41 }
 0x3e9   : > { %v7314_v35 = vpop.permute.xlu1 %2112  ;;  %v7316_v21 = vpop.permute.xlu0 %3279  ;;  %v2768_v54 = vadd.f32 %v7922_v57, %v2760_v51  ;;  %v2306_v47 = vadd.f32 %v7092_v61, %v2302_v45  ;;  %v3003_v1 = vadd.f32 %v7923_v27, %v2995_v59  ;;  %v1872_v49 = vadd.f32 %v7209_v33, %v1868_v24  ;;  %v7925_v40 = vld [vmem:[#allocation68_spill] sm:$0xff]  ;;  %v7926_v61 = vld [vmem:[#allocation69_spill] sm:$0xff]  ;;  %v7929_v33 = vld [vmem:[#allocation75_spill] sm:$0xff] }
 0x3ea   : > { %vm1645_vm2 = vcmp.ge.f32.partialorder %v1644_v8, 0.0  ;;  %v1646_v11 = vmul.f32 0.01, %v1644_v8  ;;  %v2087_v23 = vadd.f32 %v7921_v6, %v2079_v31  ;;  %v2541_v7 = vadd.f32 %v7924_v62, %v2533_v22  ;;  %v7930_v59 = vld [vmem:[#allocation76_spill] sm:$0xff] }
 0x3eb   : > { %v3242_v3 = vadd.f32 %v7925_v40, %v3234_v32  ;;  %v2314_v41 = vadd.f32 %v7927_v10, %v2306_v47  ;;  %v3312_v31 = vstv %s7309_s28  ;;  %v7365_v39 = vmul.f32 %v7301_v56, %v2611_v30  ;;  %v7931_v32 = vld [vmem:[#allocation72_spill] sm:$0xff]  ;;  %s5138_s28 = smov 60  }
 0x3ec   : > { %v1647_v19 = vsel %vm1645_vm2, %v1644_v8, %v1646_v11  ;;  %v2095_v13 = vadd.f32 %v7071_v34, %v2087_v23  ;;  %v2776_v8 = vadd.f32 %v7926_v61, %v2768_v54  ;;  %v2549_v45 = vadd.f32 %v7928_v26, %v2541_v7  ;;  %v7932_v26 = vld [vmem:[#allocation78_spill] sm:$0xff] }
 0x3ed   : > { %1649 = vst.msk [vmem:[#allocation6] sm:$0xff] %vm1648_vm1, %v1647_v19  ;;  %v7339_v18 = vpop.permute.xlu1 %2813  ;;  %v7341_v4 = vpop.permute.xlu0 %2351  ;;  %v1880_v34 = vadd.f32 %v7263_v60, %v1872_v49  ;;  %v3250_v24 = vadd.f32 %v7929_v33, %v3242_v3  ;;  %v1890_v11 = vstv %s7318_s26  ;;  %v3007_v55 = vadd.f32 %v7099_v36, %v3003_v1  ;;  %s5139_s26 = smov 56  }
 0x3ee   : > { %v2322_v22 = vadd.f32 %v7930_v59, %v2314_v41  ;;  %v2099_v6 = vadd.f32 %v7203_v25, %v2095_v13  ;;  %v2780_v60 = vadd.f32 %v7138_v28, %v2776_v8  ;;  %v2137_v19 = vstv %s7325_s21 }
 0x3ef   : > { %v7373_v57 = vmul.f32 %v7064_v9, %v3312_v31  ;;  %v3085_v54 = vstv %s7322_s8  ;;  %v3015_v47 = vadd.f32 %v7931_v32, %v3007_v55  ;;  %v2553_v27 = vadd.f32 %v7150_v48, %v2549_v45 }
 0x3f0   : > { %v2107_v30 = vadd.f32 %v7236_v29, %v2099_v6  ;;  %v3254_v25 = vadd.f32 %v7153_v52, %v3250_v24  ;;  %v2326_v48 = vadd.f32 %v7156_v17, %v2322_v22  ;;  %v7934_v6 = vld [vmem:[#allocation84_spill] sm:$0xff]  ;;  %vm3744_vm2 = vcmask 11272  }
 0x3f1   : > { %v1886_v51 = vpop.permute.xlu1 %1885  ;;  %v7362_v43 = vpop.permute.xlu0 %3052  ;;  %v3023_v45 = vadd.f32 %v7932_v26, %v3015_v47 }
 0x3f2   : > { %v1888_v23 = vadd.f32 %v1886_v51, %v1880_v34  ;;  %v2115_v29 = vadd.f32 %v7314_v35, %v2107_v30  ;;  %v7933_v34 = vld [vmem:[#allocation81_spill] sm:$0xff] }
 0x3f3   : > { %v2788_v31 = vadd.f32 %v7933_v34, %v2780_v60 }
 0x3f4   : > { %v3379_v62 = vld [vmem:[#allocation6] sm:$0x3]  ;;  %v3453_v36 = vld [vmem:[#allocation6 + $0x2] sm:$0x3]  ;;  %v3525_v1 = vld [vmem:[#allocation6 + $0x4] sm:$0x3]  ;;  %v1891_v7 = vadd.f32 %v1890_v11, %v1888_v23  ;;  %v2561_v11 = vadd.f32 %v7040_v58, %v2553_v27  ;;  %v2334_v23 = vadd.f32 %v7934_v6, %v2326_v48  ;;  %v2119_v32 = vadd.f32 %v7266_v53, %v2115_v29 }
 0x3f5   : > { %v3597_v13 = vld [vmem:[#allocation6 + $0x6] sm:$0x3]  ;;  %v7380_v49 = vpop.permute.xlu1 %2586  ;;  %v2125_v28 = vpop.permute.xlu0 %2124  ;;  %v3388_v9 = vsel %vm3387_vm4, %v3379_v62, -inf  ;;  %v3461_v40 = vsel %vm3387_vm4, %v3453_v36, -inf  ;;  %v3533_v3 = vsel %vm3387_vm4, %v3525_v1, -inf  ;;  %v2796_v22 = vadd.f32 %v7108_v14, %v2788_v31  ;;  %v7936_v29 = vld [vmem:[#allocation33_spill] sm:$0xff] }
 0x3f6   : > { %vm1892_vm5 = vcmp.ge.f32.partialorder %v1891_v7, 0.0  ;;  %v1893_v61 = vmul.f32 0.01, %v1891_v7  ;;  %v3389_v8 = vrot.slane %v3388_v9, 4  ;;  %v3462_v10 = vrot.slane %v3461_v40, 4 }
 0x3f7   : > { %v3534_v41 = vrot.slane %v3533_v3, 4  ;;  %v3605_v52 = vsel %vm3387_vm4, %v3597_v13, -inf  ;;  %v2569_v47 = vadd.f32 %v7171_v5, %v2561_v11  ;;  %v3027_v62 = vadd.f32 %v7159_v50, %v3023_v45  ;;  %v7937_v50 = vld [vmem:[#allocation35_spill] sm:$0xff]  ;;  %v7939_v45 = vld [vmem:[#allocation36_spill] sm:$0xff] }
 0x3f8   : > { %v1894_v33 = vsel %vm1892_vm5, %v1891_v7, %v1893_v61  ;;  %v3606_v24 = vrot.slane %v3605_v52, 4  ;;  %v3390_v51 = vmax.f32 %v3388_v9, %v3389_v8  ;;  %v3463_v55 = vmax.f32 %v3461_v40, %v3462_v10 }
 0x3f9   : > { %1896 = vst.msk [vmem:[#allocation6 + $0x8] sm:$0xff] %vm1648_vm1, %v1894_v33  ;;  %v7392_v17 = vpop.permute.xlu1 %3287  ;;  %v7394_v35 = vpop.permute.xlu0 %2825  ;;  %v3535_v59 = vmax.f32 %v3533_v3, %v3534_v41  ;;  %v2342_v36 = vadd.f32 %v7198_v15, %v2334_v23  ;;  %v2127_v1 = vadd.f32 %v2125_v28, %v2119_v32  ;;  %v7935_v3 = vld [vmem:[#allocation83_spill] sm:$0xff]  ;;  %v3035_v5 = vadd.f32 %v7145_v42, %v3027_v62  ;;  %v7940_v32 = vld [vmem:[#allocation57_spill] sm:$0xff] }
 0x3fa   : > { %v3607_v60 = vmax.f32 %v3605_v52, %v3606_v24  ;;  %v3391_v30 = vrot.slane %v3390_v51, 2  ;;  %v3464_v58 = vrot.slane %v3463_v55, 2  ;;  %v3262_v48 = vadd.f32 %v7935_v3, %v3254_v25  ;;  %v7938_v52 = vld [vmem:[#allocation32_spill] sm:$0xff] }
 0x3fb   : > { %v3536_v27 = vrot.slane %v3535_v59, 2  ;;  %v2800_v61 = vadd.f32 %v7936_v29, %v2796_v22  ;;  %v2573_v10 = vadd.f32 %v7937_v50, %v2569_v47  ;;  %v2346_v34 = vadd.f32 %v7939_v45, %v2342_v36 }
 0x3fc   : > { %v3608_v7 = vrot.slane %v3607_v60, 2  ;;  %v3392_v14 = vmax.f32 %v3390_v51, %v3391_v30  ;;  %v3465_v40 = vmax.f32 %v3463_v55, %v3464_v58  ;;  %v3270_v26 = vadd.f32 %v7938_v52, %v3262_v48 }
 0x3fd   : > { %v7402_v13 = vpop.permute.xlu1 %2359  ;;  %v2133_v9 = vpop.permute.xlu0 %2132  ;;  %v3537_v53 = vmax.f32 %v3535_v59, %v3536_v27  ;;  %v3043_v47 = vadd.f32 %v7940_v32, %v3035_v5  ;;  %v2808_v36 = vadd.f32 %v7261_v2, %v2800_v61  ;;  %v2354_v45 = vadd.f32 %v7341_v4, %v2346_v34 }
 0x3fe   : > { %v2135_v8 = vadd.f32 %v2133_v9, %v2127_v1  ;;  %v3393_v15 = vrot.slane %v3392_v14, 1  ;;  %v3466_v28 = vrot.slane %v3465_v40, 1  ;;  %v3609_v25 = vmax.f32 %v3607_v60, %v3608_v7 }
 0x3ff   : > { %v3538_v41 = vrot.slane %v3537_v53, 1  ;;  %v2816_v52 = vadd.f32 %v7339_v18, %v2808_v36  ;;  %v2362_v4 = vadd.f32 %v7402_v13, %v2354_v45  ;;  %vm3828_vm5 = vcmask 27672  }
 0x400   : > { %v3380_v31 = vld [vmem:[#allocation6 + $0x8] sm:$0x3]  ;;  %v3454_v33 = vld [vmem:[#allocation6 + $0xa] sm:$0x3]  ;;  %v3526_v24 = vld [vmem:[#allocation6 + $0xc] sm:$0x3]  ;;  %v2138_v11 = vadd.f32 %v2137_v19, %v2135_v8  ;;  %v3394_v23 = vmax.f32 %v3392_v14, %v3393_v15  ;;  %v3467_v1 = vmax.f32 %v3465_v40, %v3466_v28  ;;  %v2581_v15 = vadd.f32 %v7291_v12, %v2573_v10 }
 0x401   : > { %v3395_v42 = vsel %vm3387_vm4, %v3380_v31, -inf  ;;  %v3468_v51 = vsel %vm3387_vm4, %v3454_v33, -inf  ;;  %v3540_v55 = vsel %vm3387_vm4, %v3526_v24, -inf  ;;  %v3598_v59 = vld [vmem:[#allocation6 + $0xe] sm:$0x3]  ;;  %v3061_v22 = vpop.permute.xlu1 %3060  ;;  %v7415_v6 = vpop.permute.xlu0 %2833  ;;  %v3539_v7 = vmax.f32 %v3537_v53, %v3538_v41  ;;  %v7941_v14 = vld [vmem:[#allocation51_spill] sm:$0xff] }
 0x402   : > { %v3396_v30 = vrot.slane %v3395_v42, 4  ;;  %v3469_v58 = vrot.slane %v3468_v51, 4  ;;  %v3612_v27 = vsel %vm3387_vm4, %v3598_v59, -inf  ;;  %v3541_v19 = vrot.slane %v3540_v55, 4  ;;  %3445 = vst.msk [vmem:[#allocation7] sm:$0x1] %vm3444_vm8, %v3394_v23 }
 0x403   : > { %v3613_v60 = vrot.slane %v3612_v27, 4  ;;  %vm2139_vm9 = vcmp.ge.f32.partialorder %v2138_v11, 0.0  ;;  %v2140_v62 = vmul.f32 0.01, %v2138_v11  ;;  %v3610_v9 = vrot.slane %v3609_v25, 1 }
 0x404   : > { %v3274_v3 = vadd.f32 %v7941_v14, %v3270_v26  ;;  %v3397_v8 = vmax.f32 %v3395_v42, %v3396_v30  ;;  %v3470_v50 = vmax.f32 %v3468_v51, %v3469_v58  ;;  %3517 = vst.msk [vmem:[#allocation7 + $0x1] sm:$0x1] %vm3444_vm8, %v3467_v1  ;;  %3589 = vst.msk [vmem:[#allocation7 + $0x2] sm:$0x1] %vm3444_vm8, %v3539_v7 }
 0x405   : > { %v2141_v48 = vsel %vm2139_vm9, %v2138_v11, %v2140_v62  ;;  %v7424_v5 = vpop.permute.xlu1 %2598  ;;  %v2372_v29 = vpop.permute.xlu0 %2371  ;;  %v3611_v2 = vmax.f32 %v3609_v25, %v3610_v9  ;;  %v3542_v61 = vmax.f32 %v3540_v55, %v3541_v19  ;;  %v3614_v28 = vmax.f32 %v3612_v27, %v3613_v60 }
 0x406   : > { %2143 = vst.msk [vmem:[#allocation6 + $0x10] sm:$0xff] %vm1648_vm1, %v2141_v48  ;;  %v3398_v40 = vrot.slane %v3397_v8, 2  ;;  %v3471_v53 = vrot.slane %v3470_v50, 2  ;;  %v3282_v41 = vadd.f32 %v7316_v21, %v3274_v3  ;;  %v3047_v12 = vadd.f32 %v7253_v63, %v3043_v47 }
 0x407   : > { %v2589_v18 = vadd.f32 %v7380_v49, %v2581_v15  ;;  %3661 = vst.msk [vmem:[#allocation7 + $0x3] sm:$0x1] %vm3444_vm8, %v3611_v2  ;;  %v3543_v33 = vrot.slane %v3542_v61, 2  ;;  %v3615_v24 = vrot.slane %v3614_v28, 2  ;;  %v2820_v21 = vadd.f32 %v7271_v44, %v2816_v52 }
 0x408   : > { %v3399_v34 = vmax.f32 %v3397_v8, %v3398_v40  ;;  %v3472_v31 = vmax.f32 %v3470_v50, %v3471_v53  ;;  %v3055_v11 = vadd.f32 %v7362_v43, %v3047_v12  ;;  %v2384_v25 = vstv %s7419_s25  ;;  %s5157_s25 = smov [#allocation18]  }
 0x409   : > { %v7437_v10 = vpop.permute.xlu1 %3299  ;;  %v7439_v26 = vpop.permute.xlu0 %3072  ;;  %v3290_v63 = vadd.f32 %v7392_v17, %v3282_v41  ;;  %v2828_v42 = vadd.f32 %v7394_v35, %v2820_v21  ;;  %v2593_v55 = vadd.f32 %v7278_v37, %v2589_v18  ;;  %v2366_v59 = vadd.f32 %v7304_v0, %v2362_v4 }
 0x40a   : > { %v3400_v49 = vrot.slane %v3399_v34, 1  ;;  %v3473_v13 = vrot.slane %v3472_v31, 1  ;;  %v3063_v51 = vadd.f32 %v3061_v22, %v3055_v11  ;;  %v3544_v58 = vmax.f32 %v3542_v61, %v3543_v33 }
 0x40b   : > { %v3616_v27 = vmax.f32 %v3614_v28, %v3615_v24  ;;  %v2374_v60 = vadd.f32 %v2372_v29, %v2366_v59  ;;  %v3294_v1 = vadd.f32 %v7328_v46, %v3290_v63  ;;  %v2601_v14 = vadd.f32 %v7424_v5, %v2593_v55 }
 0x40c   : > { %v3401_v17 = vmax.f32 %v3399_v34, %v3400_v49  ;;  %v3474_v30 = vmax.f32 %v3472_v31, %v3473_v13  ;;  %v3545_v2 = vrot.slane %v3544_v58, 1  ;;  %v2836_v53 = vadd.f32 %v7415_v6, %v2828_v42 }
 0x40d   : > { %v3381_v43 = vld [vmem:[#allocation6 + $0x10] sm:$0x3]  ;;  %v3455_v44 = vld [vmem:[#allocation6 + $0x12] sm:$0x3]  ;;  %v3527_v23 = vld [vmem:[#allocation6 + $0x14] sm:$0x3]  ;;  %v2607_v32 = vpop.permute.xlu1 %2606  ;;  %v2380_v47 = vpop.permute.xlu0 %2379  ;;  %v3067_v61 = vadd.f32 %v7351_v16, %v3063_v51  ;;  %v3302_v63 = vadd.f32 %v7437_v10, %v3294_v1  ;;  %v3086_v42 = vmul.f32 %v7200_v38, %v3085_v54 }
 0x40e   : > { %v3402_v19 = vsel %vm3387_vm4, %v3381_v43, -inf  ;;  %v3475_v35 = vsel %vm3387_vm4, %v3455_v44, -inf  ;;  %v3547_v22 = vsel %vm3387_vm4, %v3527_v23, -inf  ;;  %v3599_v37 = vld [vmem:[#allocation6 + $0x16] sm:$0x3]  ;;  %v2382_v8 = vadd.f32 %v2380_v47, %v2374_v60 }
 0x40f   : > { %v3403_v0 = vrot.slane %v3402_v19, 4  ;;  %v3476_v62 = vrot.slane %v3475_v35, 4  ;;  %v3619_v36 = vsel %vm3387_vm4, %v3599_v37, -inf  ;;  %v3711_v7 = vld [vmem:[#allocation7] sm:$0xf]  ;;  %v3548_v9 = vrot.slane %v3547_v22, 4 }
 0x410   : > { %3446 = vst.msk [vmem:[#allocation7 + $0x4] sm:$0x1] %vm3444_vm8, %v3401_v17  ;;  %3518 = vst.msk [vmem:[#allocation7 + $0x5] sm:$0x1] %vm3444_vm8, %v3474_v30  ;;  %v3720_v3 = vsel %vm3719_vm0, %v3711_v7, -inf  ;;  %v3620_v29 = vrot.slane %v3619_v36, 4  ;;  %v2609_v5 = vadd.f32 %v2607_v32, %v2601_v14  ;;  %v2385_v28 = vadd.f32 %v2384_v25, %v2382_v8 }
 0x411   : > { %v3669_v48 = vld [vmem:[#allocation7] sm:$0xf]  ;;  %3721 = vmax.xlane.f32.xlu1 %v3720_v3  ;;  %v3308_v45 = vpop.permute.xlu1 %3307  ;;  %v3081_v46 = vpop.permute.xlu0 %3080  ;;  %v3617_v40 = vrot.slane %v3616_v27, 1  ;;  %v3546_v41 = vmax.f32 %v3544_v58, %v3545_v2  ;;  %v3404_v18 = vmax.f32 %v3402_v19, %v3403_v0  ;;  %v3477_v4 = vmax.f32 %v3475_v35, %v3476_v62 }
 0x412   : > { %v3795_v50 = vld [vmem:[#allocation7] sm:$0xf]  ;;  %v3678_v15 = vsel %vm3677_vm6, %v3669_v48, -inf  ;;  %vm2386_vm11 = vcmp.ge.f32.partialorder %v2385_v28, 0.0  ;;  %v2387_v34 = vmul.f32 0.01, %v2385_v28  ;;  %v3549_v21 = vmax.f32 %v3547_v22, %v3548_v9 }
 0x413   : > { %v3753_v52 = vld [vmem:[#allocation7] sm:$0xf]  ;;  %3679 = vmax.xlane.f32.xlu0 %v3678_v15  ;;  %v3618_v12 = vmax.f32 %v3616_v27, %v3617_v40  ;;  %v3804_v31 = vsel %vm3803_vm7, %v3795_v50, -inf  ;;  %3590 = vst.msk [vmem:[#allocation7 + $0x6] sm:$0x1] %vm3444_vm8, %v3546_v41  ;;  %v3405_v24 = vrot.slane %v3404_v18, 2  ;;  %v3621_v25 = vmax.f32 %v3619_v36, %v3620_v29 }
 0x414   : > { %v3762_v6 = vsel %vm3761_vm10, %v3753_v52, -inf  ;;  %v3478_v11 = vrot.slane %v3477_v4, 2  ;;  %v3075_v49 = vadd.f32 %v7439_v26, %v3067_v61  ;;  %v2388_v13 = vsel %vm2386_vm11, %v2385_v28, %v2387_v34 }
 0x415   : > { %3805 = vmax.xlane.f32.xlu1 %v3804_v31  ;;  %v2846_v16 = vpop.permute.xlu1 %2845  ;;  %v7470_v33 = vpop.permute.xlu0 %2853  ;;  %3662 = vst.msk [vmem:[#allocation7 + $0x7] sm:$0x1] %vm3444_vm8, %v3618_v12  ;;  %v3406_v51 = vmax.f32 %v3404_v18, %v3405_v24  ;;  %v3550_v59 = vrot.slane %v3549_v21, 2  ;;  %v3622_v43 = vrot.slane %v3621_v25, 2  ;;  %v3310_v44 = vadd.f32 %v3308_v45, %v3302_v63 }
 0x416   : > { %2390 = vst.msk [vmem:[#allocation6 + $0x18] sm:$0xff] %vm1648_vm1, %v2388_v13  ;;  %v3479_v55 = vmax.f32 %v3477_v4, %v3478_v11  ;;  %v3083_v23 = vadd.f32 %v3081_v46, %v3075_v49  ;;  %v2840_v10 = vadd.f32 %v7354_v20, %v2836_v53  ;;  %v2613_v26 = vadd.f32 %v7365_v39, %v2609_v5 }
 0x417   : > { %3763 = vmax.xlane.f32.xlu0 %v3762_v6  ;;  %v3407_v17 = vrot.slane %v3406_v51, 1  ;;  %v3551_v30 = vmax.f32 %v3549_v21, %v3550_v59  ;;  %v3623_v58 = vmax.f32 %v3621_v25, %v3622_v43  ;;  %v2631_v35 = vstv %s7464_s15  ;;  %s5149_s15 = smov 96  }
 0x418   : > { %v3480_v54 = vrot.slane %v3479_v55, 1  ;;  %v2848_v27 = vadd.f32 %v2846_v16, %v2840_v10  ;;  %v2858_v22 = vstv %s7445_s30  ;;  %v3314_v39 = vadd.f32 %v7373_v57, %v3310_v44  ;;  %s5047_s30 = sshll.u32 %s5157_s25, 4  ;;  %s5048_s30 = int_to_ptr.vmem [resolvable:$false] %s5047_s30 }
 0x419   : > { %v2619_v32 = vpop.permute.xlu1 %2618  ;;  %v2627_v47 = vpop.permute.xlu0 %2626  ;;  %v3408_v37 = vmax.f32 %v3406_v51, %v3407_v17  ;;  %v3552_v0 = vrot.slane %v3551_v30, 1  ;;  %v3624_v62 = vrot.slane %v3623_v58, 1  ;;  %v3332_v7 = vstv %s7450_s12  ;;  %s5148_s12 = smov 100  }
 0x41a   : > { %v2621_v19 = vadd.f32 %v2619_v32, %v2613_v26  ;;  %v3481_v60 = vmax.f32 %v3479_v55, %v3480_v54  ;;  %v3105_v9 = vstv %s7466_s24  ;;  %v3087_v29 = vadd.f32 %v3086_v42, %v3083_v23  ;;  %s5140_s24 = smov 68  }
 0x41b   : > { %3447 = vst.msk [vmem:[#allocation7 + $0x8] sm:$0x1] %vm3444_vm8, %v3408_v37  ;;  %v3553_v15 = vmax.f32 %v3551_v30, %v3552_v0  ;;  %v3625_v40 = vmax.f32 %v3623_v58, %v3624_v62  ;;  %v3352_v53 = vstv %s7479_s13  ;;  %v2856_v12 = vadd.f32 %v7470_v33, %v2848_v27  ;;  %s5141_s13 = smov 64  }
 0x41c   : > { %v3754_v36 = vld [vmem:[#allocation7 + $0x4] sm:$0xf]  ;;  %v2629_v1 = vadd.f32 %v2627_v47, %v2621_v19  ;;  %3519 = vst.msk [vmem:[#allocation7 + $0x9] sm:$0x1] %vm3444_vm8, %v3481_v60  ;;  %v2859_v55 = vmul.f32 %v7301_v56, %v2858_v22  ;;  %v3333_v43 = vmul.f32 %v7200_v38, %v3332_v7  ;;  %v3106_v17 = vmul.f32 %v7301_v56, %v3105_v9 }
 0x41d   : > { %v3670_v20 = vld [vmem:[#allocation7 + $0x4] sm:$0xf]  ;;  %v3765_v14 = vsel %vm3761_vm10, %v3754_v36, -inf  ;;  %v3320_v8 = vpop.permute.xlu1 %3319  ;;  %v3328_v50 = vpop.permute.xlu0 %3327  ;;  %v3382_v52 = vld [vmem:[#allocation6 + $0x18] sm:$0x3]  ;;  %v7510_v54 = vmul.f32 %v7301_v56, %v3352_v53  ;;  %v2878_v19 = vstv %s7493_s1  ;;  %vm5150_vm9 = vmmov 0  }
 0x41e   : > { %v3681_v3 = vsel %vm3677_vm6, %v3670_v20, -inf  ;;  %v3712_v48 = vld [vmem:[#allocation7 + $0x4] sm:$0xf]  ;;  %v3456_v57 = vld [vmem:[#allocation6 + $0x1a] sm:$0x3]  ;;  %3766 = vmax.xlane.f32.xlu1 %v3765_v14  ;;  %v2632_v46 = vadd.f32 %v2631_v35, %v2629_v1  ;;  %v3322_v2 = vadd.f32 %v3320_v8, %v3314_v39  ;;  %v3409_v61 = vsel %vm3387_vm4, %v3382_v52, -inf }
 0x41f   : > { %v3528_v45 = vld [vmem:[#allocation6 + $0x1c] sm:$0x3]  ;;  %3682 = vmax.xlane.f32.xlu0 %v3681_v3  ;;  %v3482_v5 = vsel %vm3387_vm4, %v3456_v57, -inf  ;;  %v3600_v41 = vld [vmem:[#allocation6 + $0x1e] sm:$0x3]  ;;  %v3410_v18 = vrot.slane %v3409_v61, 4  ;;  %v2860_v58 = vadd.f32 %v2859_v55, %v2856_v12 }
 0x420   : > { %v3554_v28 = vsel %vm3387_vm4, %v3528_v45, -inf  ;;  %3591 = vst.msk [vmem:[#allocation7 + $0xa] sm:$0x1] %vm3444_vm8, %v3553_v15  ;;  %v3483_v4 = vrot.slane %v3482_v5, 4  ;;  %v3626_v31 = vsel %vm3387_vm4, %v3600_v41, -inf  ;;  %vm2633_vm12 = vcmp.ge.f32.partialorder %v2632_v46, 0.0 }
 0x421   : > { %v3555_v34 = vrot.slane %v3554_v28, 4  ;;  %3663 = vst.msk [vmem:[#allocation7 + $0xb] sm:$0x1] %vm3444_vm8, %v3625_v40  ;;  %v3627_v6 = vrot.slane %v3626_v31, 4  ;;  %v2634_v16 = vmul.f32 0.01, %v2632_v46  ;;  %v3093_v11 = vpop.permute.xlu1 %3092  ;;  %v3101_v21 = vpop.permute.xlu0 %3100  ;;  %v3330_v25 = vadd.f32 %v3328_v50, %v3322_v2 }
 0x422   : > { %v3723_v24 = vsel %vm3719_vm0, %v3712_v48, -inf  ;;  %v3796_v63 = vld [vmem:[#allocation7 + $0x4] sm:$0xf]  ;;  %v3411_v33 = vmax.f32 %v3409_v61, %v3410_v18  ;;  %v3484_v49 = vmax.f32 %v3482_v5, %v3483_v4  ;;  %v3095_v51 = vadd.f32 %v3093_v11, %v3087_v29  ;;  %s5151_s1 = smov 108  }
 0x423   : > { %3724 = vmax.xlane.f32.xlu0 %v3723_v24  ;;  %v3556_v13 = vmax.f32 %v3554_v28, %v3555_v34  ;;  %v2635_v42 = vsel %vm2633_vm12, %v2632_v46, %v2634_v16  ;;  %v3628_v59 = vmax.f32 %v3626_v31, %v3627_v6  ;;  %v3807_v26 = vsel %vm3803_vm7, %v3796_v63, -inf }
 0x424   : > { %2637 = vst.msk [vmem:[#allocation6 + $0x20] sm:$0xff] %vm1648_vm1, %v2635_v42  ;;  %v3412_v44 = vrot.slane %v3411_v33, 2  ;;  %v3485_v23 = vrot.slane %v3484_v49, 2  ;;  %v3334_v27 = vadd.f32 %v3333_v43, %v3330_v25  ;;  %v3103_v22 = vadd.f32 %v3101_v21, %v3095_v51 }
 0x425   : > { %v3557_v10 = vrot.slane %v3556_v13, 2  ;;  %v2866_v32 = vpop.permute.xlu1 %2865  ;;  %v3340_v47 = vpop.permute.xlu0 %3339  ;;  %v3629_v30 = vrot.slane %v3628_v59, 2  ;;  %v3125_v43 = vstv %s7515_s0  ;;  %s5152_s0 = smov 104   ;;  %vm3874_vm11 = vcmask 188576  }
 0x426   : > { %v3413_v35 = vmax.f32 %v3411_v33, %v3412_v44  ;;  %v3486_v0 = vmax.f32 %v3484_v49, %v3485_v23  ;;  %v2868_v39 = vadd.f32 %v2866_v32, %v2860_v58  ;;  %v3342_v9 = vadd.f32 %v3340_v47, %v3334_v27 }
 0x427   : > { %3808 = vmax.xlane.f32.xlu0 %v3807_v26  ;;  %v3558_v62 = vmax.f32 %v3556_v13, %v3557_v10  ;;  %v3630_v36 = vmax.f32 %v3628_v59, %v3629_v30  ;;  %v3107_v25 = vadd.f32 %v3106_v17, %v3103_v22  ;;  %vm3881_vm12 = vcmask 221376  }
 0x428   : > { %v3713_v38 = vld [vmem:[#allocation7 + $0x8] sm:$0xf]  ;;  %v3414_v7 = vrot.slane %v3413_v35, 1  ;;  %v3487_v48 = vrot.slane %v3486_v0, 1 }
 0x429   : > { %v3671_v37 = vld [vmem:[#allocation7 + $0x8] sm:$0xf]  ;;  %v3726_v20 = vsel %vm3719_vm0, %v3713_v38, -inf  ;;  %v2874_v14 = vpop.permute.xlu1 %2873  ;;  %v3348_v3 = vpop.permute.xlu0 %3347  ;;  %v3559_v8 = vrot.slane %v3558_v62, 1  ;;  %v3631_v50 = vrot.slane %v3630_v36, 1 }
 0x42a   : > { %v3797_v60 = vld [vmem:[#allocation7 + $0x8] sm:$0xf]  ;;  %v3684_v1 = vsel %vm3677_vm6, %v3671_v37, -inf  ;;  %v2876_v52 = vadd.f32 %v2874_v14, %v2868_v39  ;;  %v3415_v57 = vmax.f32 %v3413_v35, %v3414_v7  ;;  %v3350_v40 = vadd.f32 %v3348_v3, %v3342_v9 }
 0x42b   : > { %v3755_v56 = vld [vmem:[#allocation7 + $0x8] sm:$0xf]  ;;  %3685 = vmax.xlane.f32.xlu1 %v3684_v1  ;;  %3727 = vmax.xlane.f32.xlu0 %v3726_v20  ;;  %v3810_v29 = vsel %vm3803_vm7, %v3797_v60, -inf  ;;  %v3383_v45 = vld [vmem:[#allocation6 + $0x20] sm:$0x3]  ;;  %v3488_v53 = vmax.f32 %v3486_v0, %v3487_v48  ;;  %v3560_v61 = vmax.f32 %v3558_v62, %v3559_v8  ;;  %v3632_v5 = vmax.f32 %v3630_v36, %v3631_v50 }
 0x42c   : > { %v3768_v15 = vsel %vm3761_vm10, %v3755_v56, -inf  ;;  %v3457_v46 = vld [vmem:[#allocation6 + $0x22] sm:$0x3]  ;;  %v3529_v2 = vld [vmem:[#allocation6 + $0x24] sm:$0x3]  ;;  %v3416_v28 = vsel %vm3387_vm4, %v3383_v45, -inf  ;;  %v2879_v4 = vadd.f32 %v2878_v19, %v2876_v52  ;;  %v3354_v51 = vadd.f32 %v7510_v54, %v3350_v40 }
 0x42d   : > { %v3489_v41 = vsel %vm3387_vm4, %v3457_v46, -inf  ;;  %v3561_v12 = vsel %vm3387_vm4, %v3529_v2, -inf  ;;  %v3601_v18 = vld [vmem:[#allocation6 + $0x26] sm:$0x3]  ;;  %3448 = vst.msk [vmem:[#allocation7 + $0xc] sm:$0x1] %vm3444_vm8, %v3415_v57  ;;  %v3113_v24 = vpop.permute.xlu1 %3112  ;;  %v3360_v59 = vpop.permute.xlu0 %3359  ;;  %v3372_v54 = vstv %s7519_s2 }
 0x42e   : > { %v3417_v34 = vrot.slane %v3416_v28, 4  ;;  %v3490_v31 = vrot.slane %v3489_v41, 4  ;;  %v3562_v6 = vrot.slane %v3561_v12, 4  ;;  %v3633_v16 = vsel %vm3387_vm4, %v3601_v18, -inf  ;;  %3520 = vst.msk [vmem:[#allocation7 + $0xd] sm:$0x1] %vm3444_vm8, %v3488_v53 }
 0x42f   : > { %3769 = vmax.xlane.f32.xlu1 %v3768_v15  ;;  %3592 = vst.msk [vmem:[#allocation7 + $0xe] sm:$0x1] %vm3444_vm8, %v3560_v61  ;;  %3664 = vst.msk [vmem:[#allocation7 + $0xf] sm:$0x1] %vm3444_vm8, %v3632_v5  ;;  %v3634_v11 = vrot.slane %v3633_v16, 4  ;;  %3811 = vmax.xlane.f32.xlu0 %v3810_v29  ;;  %vm2880_vm13 = vcmp.ge.f32.partialorder %v2879_v4, 0.0  ;;  %v3115_v42 = vadd.f32 %v3113_v24, %v3107_v25 }
 0x430   : > { %v2881_v21 = vmul.f32 0.01, %v2879_v4  ;;  %v3418_v63 = vmax.f32 %v3416_v28, %v3417_v34  ;;  %v3491_v33 = vmax.f32 %v3489_v41, %v3490_v31  ;;  %v3563_v49 = vmax.f32 %v3561_v12, %v3562_v6 }
 0x431   : > { %v3635_v55 = vmax.f32 %v3633_v16, %v3634_v11  ;;  %v3121_v44 = vpop.permute.xlu1 %3120  ;;  %v3362_v27 = vadd.f32 %v3360_v59, %v3354_v51 }
 0x432   : > { %v2882_v13 = vsel %vm2880_vm13, %v2879_v4, %v2881_v21  ;;  %v3419_v23 = vrot.slane %v3418_v63, 2  ;;  %v3492_v10 = vrot.slane %v3491_v33, 2  ;;  %v3564_v26 = vrot.slane %v3563_v49, 2 }
 0x433   : > { %2884 = vst.msk [vmem:[#allocation6 + $0x28] sm:$0xff] %vm1648_vm1, %v2882_v13  ;;  %v3123_v32 = vadd.f32 %v3121_v44, %v3115_v42  ;;  %v3636_v47 = vrot.slane %v3635_v55, 2  ;;  %vm3888_vm13 = vcmask 254176  }
 0x434   : > { %v3420_v17 = vmax.f32 %v3418_v63, %v3419_v23  ;;  %v3493_v30 = vmax.f32 %v3491_v33, %v3492_v10  ;;  %v3565_v58 = vmax.f32 %v3563_v49, %v3564_v26 }
 0x435   : > { %v3126_v19 = vadd.f32 %v3125_v43, %v3123_v32  ;;  %v3637_v37 = vmax.f32 %v3635_v55, %v3636_v47  ;;  %v3368_v62 = vpop.permute.xlu1 %3367 }
 0x436   : > { %v3714_v35 = vld [vmem:[#allocation7 + $0xc] sm:$0xf]  ;;  %v3421_v1 = vrot.slane %v3420_v17, 1  ;;  %v3370_v56 = vadd.f32 %v3368_v62, %v3362_v27  ;;  %v3494_v14 = vrot.slane %v3493_v30, 1  ;;  %v3566_v3 = vrot.slane %v3565_v58, 1 }
 0x437   : > { %v3672_v22 = vld [vmem:[#allocation7 + $0xc] sm:$0xf]  ;;  %v3729_v60 = vsel %vm3719_vm0, %v3714_v35, -inf  ;;  %vm3127_vm14 = vcmp.ge.f32.partialorder %v3126_v19, 0.0  ;;  %v3128_v39 = vmul.f32 0.01, %v3126_v19 }
 0x438   : > { %v3798_v38 = vld [vmem:[#allocation7 + $0xc] sm:$0xf]  ;;  %v3687_v0 = vsel %vm3677_vm6, %v3672_v22, -inf  ;;  %3730 = vmax.xlane.f32.xlu0 %v3729_v60  ;;  %v3422_v9 = vmax.f32 %v3420_v17, %v3421_v1  ;;  %v3638_v48 = vrot.slane %v3637_v37, 1  ;;  %v3373_v52 = vadd.f32 %v3372_v54, %v3370_v56 }
 0x439   : > { %v3813_v36 = vsel %vm3803_vm7, %v3798_v38, -inf  ;;  %v3756_v20 = vld [vmem:[#allocation7 + $0xc] sm:$0xf]  ;;  %3688 = vmax.xlane.f32.xlu1 %v3687_v0  ;;  %v3129_v15 = vsel %vm3127_vm14, %v3126_v19, %v3128_v39  ;;  %v3495_v40 = vmax.f32 %v3493_v30, %v3494_v14  ;;  %v3567_v18 = vmax.f32 %v3565_v58, %v3566_v3 }
 0x43a   : > { %v3771_v7 = vsel %vm3761_vm10, %v3756_v20, -inf  ;;  %v3384_v8 = vld [vmem:[#allocation6 + $0x28] sm:$0x3]  ;;  %v3458_v50 = vld [vmem:[#allocation6 + $0x2a] sm:$0x3]  ;;  %3131 = vst.msk [vmem:[#allocation6 + $0x30] sm:$0xff] %vm1648_vm1, %v3129_v15  ;;  %v3639_v4 = vmax.f32 %v3637_v37, %v3638_v48 }
 0x43b   : > { %v3530_v29 = vld [vmem:[#allocation6 + $0x2c] sm:$0x3]  ;;  %v3423_v57 = vsel %vm3387_vm4, %v3384_v8, -inf  ;;  %v3496_v45 = vsel %vm3387_vm4, %v3458_v50, -inf  ;;  %v3602_v2 = vld [vmem:[#allocation6 + $0x2e] sm:$0x3] }
 0x43c   : > { %v3568_v46 = vsel %vm3387_vm4, %v3530_v29, -inf  ;;  %3449 = vst.msk [vmem:[#allocation7 + $0x10] sm:$0x1] %vm3444_vm8, %v3422_v9  ;;  %v3424_v53 = vrot.slane %v3423_v57, 4  ;;  %v3497_v61 = vrot.slane %v3496_v45, 4  ;;  %v3640_v28 = vsel %vm3387_vm4, %v3602_v2, -inf  ;;  %3814 = vmax.xlane.f32.xlu0 %v3813_v36 }
 0x43d   : > { %v3569_v5 = vrot.slane %v3568_v46, 4  ;;  %3772 = vmax.xlane.f32.xlu1 %v3771_v7  ;;  %v3641_v41 = vrot.slane %v3640_v28, 4  ;;  %vm3374_vm15 = vcmp.ge.f32.partialorder %v3373_v52, 0.0  ;;  %v3375_v12 = vmul.f32 0.01, %v3373_v52 }
 0x43e   : > { %3521 = vst.msk [vmem:[#allocation7 + $0x11] sm:$0x1] %vm3444_vm8, %v3495_v40  ;;  %v3425_v34 = vmax.f32 %v3423_v57, %v3424_v53  ;;  %v3498_v31 = vmax.f32 %v3496_v45, %v3497_v61  ;;  %3593 = vst.msk [vmem:[#allocation7 + $0x12] sm:$0x1] %vm3444_vm8, %v3567_v18  ;;  %vm3896_vm14 = vcmask 286976  }
 0x43f   : > { %v3570_v6 = vmax.f32 %v3568_v46, %v3569_v5  ;;  %v3376_v16 = vsel %vm3374_vm15, %v3373_v52, %v3375_v12  ;;  %v3642_v24 = vmax.f32 %v3640_v28, %v3641_v41  ;;  %3665 = vst.msk [vmem:[#allocation7 + $0x13] sm:$0x1] %vm3444_vm8, %v3639_v4  ;;  %vm3903_vm15 = vcmask 319776  }
 0x440   : > { %3378 = vst.msk [vmem:[#allocation6 + $0x38] sm:$0xff] %vm1648_vm1, %v3376_v16  ;;  %v3426_v11 = vrot.slane %v3425_v34, 2  ;;  %v3499_v21 = vrot.slane %v3498_v31, 2  ;;  %vm3702_vm1 = vcmask 3072  }
 0x441   : > { %v3571_v25 = vrot.slane %v3570_v6, 2  ;;  %v3643_v63 = vrot.slane %v3642_v24, 2  ;;  %v3385_v33 = vld [vmem:[#allocation6 + $0x30] sm:$0x3]  ;;  %v3459_v49 = vld [vmem:[#allocation6 + $0x32] sm:$0x3] }
 0x442   : > { %v3531_v13 = vld [vmem:[#allocation6 + $0x34] sm:$0x3]  ;;  %v3427_v42 = vmax.f32 %v3425_v34, %v3426_v11  ;;  %v3500_v51 = vmax.f32 %v3498_v31, %v3499_v21  ;;  %v3430_v59 = vsel %vm3387_vm4, %v3385_v33, -inf  ;;  %v3503_v43 = vsel %vm3387_vm4, %v3459_v49, -inf  ;;  %v3603_v23 = vld [vmem:[#allocation6 + $0x36] sm:$0x3] }
 0x443   : > { %v3572_v55 = vmax.f32 %v3570_v6, %v3571_v25  ;;  %v3575_v44 = vsel %vm3387_vm4, %v3531_v13, -inf  ;;  %v3644_v10 = vmax.f32 %v3642_v24, %v3643_v63  ;;  %v3431_v26 = vrot.slane %v3430_v59, 4 }
 0x444   : > { %v3504_v32 = vrot.slane %v3503_v43, 4  ;;  %v3576_v47 = vrot.slane %v3575_v44, 4  ;;  %v3647_v17 = vsel %vm3387_vm4, %v3603_v23, -inf  ;;  %v3428_v58 = vrot.slane %v3427_v42, 1 }
 0x445   : > { %v3648_v30 = vrot.slane %v3647_v17, 4  ;;  %v3501_v27 = vrot.slane %v3500_v51, 1  ;;  %v3573_v19 = vrot.slane %v3572_v55, 1  ;;  %v3645_v35 = vrot.slane %v3644_v10, 1 }
 0x446   : > { %v3432_v22 = vmax.f32 %v3430_v59, %v3431_v26  ;;  %v3505_v54 = vmax.f32 %v3503_v43, %v3504_v32  ;;  %v3577_v38 = vmax.f32 %v3575_v44, %v3576_v47  ;;  %v3429_v62 = vmax.f32 %v3427_v42, %v3428_v58  ;;  %v3715_v29 = vld [vmem:[#allocation7 + $0x10] sm:$0xf] }
 0x447   : > { %v3386_v37 = vld [vmem:[#allocation6 + $0x38] sm:$0x3]  ;;  %v3460_v60 = vld [vmem:[#allocation6 + $0x3a] sm:$0x3]  ;;  %v3532_v0 = vld [vmem:[#allocation6 + $0x3c] sm:$0x3]  ;;  %v3502_v36 = vmax.f32 %v3500_v51, %v3501_v27  ;;  %v3574_v20 = vmax.f32 %v3572_v55, %v3573_v19  ;;  %v3649_v1 = vmax.f32 %v3647_v17, %v3648_v30  ;;  %v3646_v14 = vmax.f32 %v3644_v10, %v3645_v35 }
 0x448   : > { %v3437_v39 = vsel %vm3387_vm4, %v3386_v37, -inf  ;;  %v3510_v56 = vsel %vm3387_vm4, %v3460_v60, -inf  ;;  %v3582_v7 = vsel %vm3387_vm4, %v3532_v0, -inf  ;;  %v3604_v9 = vld [vmem:[#allocation6 + $0x3e] sm:$0x3]  ;;  %v3732_v52 = vsel %vm3719_vm0, %v3715_v29, -inf }
 0x449   : > { %v3438_v3 = vrot.slane %v3437_v39, 4  ;;  %v3511_v48 = vrot.slane %v3510_v56, 4  ;;  %v3583_v8 = vrot.slane %v3582_v7, 4  ;;  %v3654_v50 = vsel %vm3387_vm4, %v3604_v9, -inf  ;;  %3450 = vst.msk [vmem:[#allocation7 + $0x14] sm:$0x1] %vm3444_vm8, %v3429_v62  ;;  %3733 = vmax.xlane.f32.xlu0 %v3732_v52 }
 0x44a   : > { %3522 = vst.msk [vmem:[#allocation7 + $0x15] sm:$0x1] %vm3444_vm8, %v3502_v36  ;;  %3594 = vst.msk [vmem:[#allocation7 + $0x16] sm:$0x1] %vm3444_vm8, %v3574_v20  ;;  %v3655_v15 = vrot.slane %v3654_v50, 4  ;;  %v3433_v53 = vrot.slane %v3432_v22, 2 }
 0x44b   : > { %v3673_v57 = vld [vmem:[#allocation7 + $0x10] sm:$0xf]  ;;  %3666 = vst.msk [vmem:[#allocation7 + $0x17] sm:$0x1] %vm3444_vm8, %v3646_v14  ;;  %v3506_v61 = vrot.slane %v3505_v54, 2  ;;  %v3578_v28 = vrot.slane %v3577_v38, 2  ;;  %v3439_v12 = vmax.f32 %v3437_v39, %v3438_v3  ;;  %v3512_v34 = vmax.f32 %v3510_v56, %v3511_v48 }
 0x44c   : > { %v3799_v45 = vld [vmem:[#allocation7 + $0x10] sm:$0xf]  ;;  %v3690_v46 = vsel %vm3677_vm6, %v3673_v57, -inf  ;;  %v3650_v41 = vrot.slane %v3649_v1, 2  ;;  %v3434_v18 = vmax.f32 %v3432_v22, %v3433_v53  ;;  %v3584_v31 = vmax.f32 %v3582_v7, %v3583_v8 }
 0x44d   : > { %v3816_v2 = vsel %vm3803_vm7, %v3799_v45, -inf  ;;  %v3757_v40 = vld [vmem:[#allocation7 + $0x10] sm:$0xf]  ;;  %3691 = vmax.xlane.f32.xlu1 %v3690_v46  ;;  %v3507_v4 = vmax.f32 %v3505_v54, %v3506_v61  ;;  %v3579_v6 = vmax.f32 %v3577_v38, %v3578_v28  ;;  %v3440_v24 = vrot.slane %v3439_v12, 2 }
 0x44e   : > { %v3774_v5 = vsel %vm3761_vm10, %v3757_v40, -inf  ;;  %v3651_v16 = vmax.f32 %v3649_v1, %v3650_v41  ;;  %v3656_v11 = vmax.f32 %v3654_v50, %v3655_v15  ;;  %3817 = vmax.xlane.f32.xlu0 %v3816_v2  ;;  %v3435_v21 = vrot.slane %v3434_v18, 1 }
 0x44f   : > { %v3508_v25 = vrot.slane %v3507_v4, 1  ;;  %v3513_v63 = vrot.slane %v3512_v34, 2  ;;  %v3585_v33 = vrot.slane %v3584_v31, 2  ;;  %v3580_v49 = vrot.slane %v3579_v6, 1 }
 0x450   : > { %v3652_v13 = vrot.slane %v3651_v16, 1  ;;  %v3441_v42 = vmax.f32 %v3439_v12, %v3440_v24  ;;  %v3657_v51 = vrot.slane %v3656_v11, 2  ;;  %v3436_v43 = vmax.f32 %v3434_v18, %v3435_v21 }
 0x451   : > { %3775 = vmax.xlane.f32.xlu1 %v3774_v5  ;;  %v3509_v44 = vmax.f32 %v3507_v4, %v3508_v25  ;;  %v3514_v23 = vmax.f32 %v3512_v34, %v3513_v63  ;;  %v3586_v10 = vmax.f32 %v3584_v31, %v3585_v33  ;;  %v3581_v47 = vmax.f32 %v3579_v6, %v3580_v49 }
 0x452   : > { %v3716_v55 = vld [vmem:[#allocation7 + $0x14] sm:$0xf]  ;;  %3451 = vst.msk [vmem:[#allocation7 + $0x18] sm:$0x1] %vm3444_vm8, %v3436_v43  ;;  %v3653_v30 = vmax.f32 %v3651_v16, %v3652_v13  ;;  %v3442_v58 = vrot.slane %v3441_v42, 1  ;;  %v3658_v22 = vmax.f32 %v3656_v11, %v3657_v51  ;;  %vm3786_vm4 = vcmask 19472  }
 0x453   : > { %v3674_v59 = vld [vmem:[#allocation7 + $0x14] sm:$0xf]  ;;  %v3735_v26 = vsel %vm3719_vm0, %v3716_v55, -inf  ;;  %3523 = vst.msk [vmem:[#allocation7 + $0x19] sm:$0x1] %vm3444_vm8, %v3509_v44  ;;  %v3515_v27 = vrot.slane %v3514_v23, 1 }
 0x454   : > { %v3693_v32 = vsel %vm3677_vm6, %v3674_v59, -inf  ;;  %3736 = vmax.xlane.f32.xlu0 %v3735_v26  ;;  %v3800_v17 = vld [vmem:[#allocation7 + $0x14] sm:$0xf]  ;;  %3595 = vst.msk [vmem:[#allocation7 + $0x1a] sm:$0x1] %vm3444_vm8, %v3581_v47  ;;  %v3587_v35 = vrot.slane %v3586_v10, 1  ;;  %v3443_v54 = vmax.f32 %v3441_v42, %v3442_v58 }
 0x455   : > { %3694 = vmax.xlane.f32.xlu1 %v3693_v32  ;;  %v3758_v19 = vld [vmem:[#allocation7 + $0x14] sm:$0xf]  ;;  %3667 = vst.msk [vmem:[#allocation7 + $0x1b] sm:$0x1] %vm3444_vm8, %v3653_v30  ;;  %v3516_v38 = vmax.f32 %v3514_v23, %v3515_v27  ;;  %v3819_v37 = vsel %vm3803_vm7, %v3800_v17, -inf  ;;  %v3659_v0 = vrot.slane %v3658_v22, 1 }
 0x456   : > { %v3588_v60 = vmax.f32 %v3586_v10, %v3587_v35  ;;  %v3777_v62 = vsel %vm3761_vm10, %v3758_v19, -inf  ;;  %3452 = vst.msk [vmem:[#allocation7 + $0x1c] sm:$0x1] %vm3444_vm8, %v3443_v54  ;;  %v4080_v58 = vld [vmem:[%s7762_s5 + $0x78] sm:$0xff]  ;;  %v7942_v35 = vmov 0.0   ;;  %v4078_v54 = vld [vmem:[%s7762_s5 + $0x68] sm:$0xff] }
 0x457   : > { %3524 = vst.msk [vmem:[#allocation7 + $0x1d] sm:$0x1] %vm3444_vm8, %v3516_v38  ;;  %v3660_v36 = vmax.f32 %v3658_v22, %v3659_v0  ;;  %4802 = vmatpush3.msra.mxu0 %v4080_v58  ;;  %v4079_v22 = vld [vmem:[%s7762_s5 + $0x70] sm:$0xff]  ;;  %4833 = vmatprep.mubr.msk.f32.mxu0 %vm5150_vm9, %v7942_v35 }
 0x458   : > { %3820 = vmax.xlane.f32.xlu0 %v3819_v37  ;;  %3596 = vst.msk [vmem:[#allocation7 + $0x1e] sm:$0x1] %vm3444_vm8, %v3588_v60  ;;  %4803 = vmatprep.subr.mxu0 %v7942_v35 }
 0x459   : > { %3778 = vmax.xlane.f32.xlu1 %v3777_v62  ;;  %3668 = vst.msk [vmem:[#allocation7 + $0x1f] sm:$0x1] %vm3444_vm8, %v3660_v36  ;;  %vm3838_vm8 = vcmask 24576   ;;  %4804 = vmatpush3.msra.mxu0 %v4079_v22  ;;  %v4077_v62 = vld [vmem:[%s7762_s5 + $0x60] sm:$0xff]  ;;  %v4076_v36 = vld [vmem:[%s7762_s5 + $0x58] sm:$0xff] }
 0x45a   : > { %4805 = vmatprep.subr.mxu0 %v7942_v35  ;;  %4844 = vmatprep.mubr.msk.f32.mxu1 %vm5150_vm9, %v7942_v35 }
 0x45b   : > { %4806 = vmatpush3.msra.mxu0 %v4078_v54 }
 0x45c   : > { %v3717_v20 = vld [vmem:[#allocation7 + $0x18] sm:$0xf]  ;;  %4807 = vmatprep.subr.mxu0 %v7942_v35 }
 0x45d   : > { %v3675_v1 = vld [vmem:[#allocation7 + $0x18] sm:$0xf]  ;;  %v3738_v39 = vsel %vm3719_vm0, %v3717_v20, -inf  ;;  %4808 = vmatpush3.msra.mxu0 %v4077_v62 }
 0x45e   : > { %v3696_v56 = vsel %vm3677_vm6, %v3675_v1, -inf  ;;  %3739 = vmax.xlane.f32.xlu0 %v3738_v39  ;;  %v3801_v7 = vld [vmem:[#allocation7 + $0x18] sm:$0xf]  ;;  %4809 = vmatprep.subr.mxu0 %v7942_v35 }
 0x45f   : > { %3697 = vmax.xlane.f32.xlu1 %v3696_v56  ;;  %v3759_v9 = vld [vmem:[#allocation7 + $0x18] sm:$0xf]  ;;  %v3822_v14 = vsel %vm3803_vm7, %v3801_v7, -inf  ;;  %4810 = vmatpush3.msra.mxu0 %v4076_v36 }
 0x460   : > { %v3780_v3 = vsel %vm3761_vm10, %v3759_v9, -inf  ;;  %v3718_v48 = vld [vmem:[#allocation7 + $0x1c] sm:$0xf]  ;;  %4811 = vmatprep.subr.mxu0 %v7942_v35 }
 0x461   : > { %v3676_v8 = vld [vmem:[#allocation7 + $0x1c] sm:$0xf]  ;;  %v3741_v50 = vsel %vm3719_vm0, %v3718_v48, -inf  ;;  %vm3845_vm0 = vcmask 57376  }
 0x462   : > { %3823 = vmax.xlane.f32.xlu0 %v3822_v14  ;;  %v3699_v29 = vsel %vm3677_vm6, %v3676_v8, -inf  ;;  %v3802_v15 = vld [vmem:[#allocation7 + $0x1c] sm:$0xf]  ;;  %vm3852_vm6 = vcmask 90176  }
 0x463   : > { %3781 = vmax.xlane.f32.xlu1 %v3780_v3  ;;  %v3760_v52 = vld [vmem:[#allocation7 + $0x1c] sm:$0xf]  ;;  %v3825_v57 = vsel %vm3803_vm7, %v3802_v15, -inf  ;;  %v4074_v3 = vld [vmem:[%s7762_s5 + $0x48] sm:$0xff]  ;;  %vm3859_vm7 = vcmask 122976  }
 0x464   : > { %v3783_v45 = vsel %vm3761_vm10, %v3760_v52, -inf  ;;  %v4075_v7 = vld [vmem:[%s7762_s5 + $0x50] sm:$0xff]  ;;  %vm3867_vm10 = vcmask 155776  }
 0x465   : > { %4812 = vmatpush3.msra.mxu0 %v4075_v7  ;;  %v4156_v7 = vld [vmem:[%s7764_s7 + $0x8] sm:$0xff] }
 0x466   : > { %3742 = vmax.xlane.f32.xlu0 %v3741_v50  ;;  %4813 = vmatprep.subr.mxu0 %v7942_v35  ;;  %v4073_v50 = vld [vmem:[%s7762_s5 + $0x40] sm:$0xff] }
 0x467   : > { %3700 = vmax.xlane.f32.xlu1 %v3699_v29  ;;  %4814 = vmatpush3.msra.mxu0 %v4074_v3 }
 0x468   : > { %4815 = vmatprep.subr.mxu0 %v7942_v35 }
 0x469   : > { %4816 = vmatpush3.msra.mxu0 %v4073_v50 }
 0x46a   : > { %3826 = vmax.xlane.f32.xlu0 %v3825_v57  ;;  %4817 = vmatprep.subr.mxu0 %v7942_v35 }
 0x46b   : > { %3784 = vmax.xlane.f32.xlu1 %v3783_v45  ;;  %v4072_v45 = vld [vmem:[%s7762_s5 + $0x38] sm:$0xff] }
 0x46c   : > { %4818 = vmatpush3.msra.mxu0 %v4072_v45 }
 0x46d   : > { %4819 = vmatprep.subr.mxu0 %v7942_v35 }
 0x49a   : > { %v3722_v46 = vpop.xlane.xlu1 %3721 }
 0x49c   : > { %v3680_v2 = vpop.xlane.xlu0 %3679 }
 0x49d   : > { %3703 = vst.msk [vmem:[#allocation8] sm:$0xf] %vm3702_vm1, %v3680_v2 }
 0x49e   : > { %3745 = vst.msk [vmem:[#allocation8] sm:$0xf] %vm3744_vm2, %v3722_v46  ;;  %v3806_v40 = vpop.xlane.xlu1 %3805  ;;  %v4071_v46 = vld [vmem:[%s7762_s5 + $0x30] sm:$0xff] }
 0x49f   : > { %4820 = vmatpush3.msra.mxu0 %v4071_v46 }
 0x4a0   : > { %v3764_v53 = vpop.xlane.xlu0 %3763  ;;  %4821 = vmatprep.subr.mxu0 %v7942_v35 }
 0x4a1   : > { %3787 = vst.msk [vmem:[#allocation8] sm:$0xf] %vm3786_vm4, %v3764_v53 }
 0x4a2   : > { %3829 = vst.msk [vmem:[#allocation8] sm:$0xf] %vm3828_vm5, %v3806_v40 }
 0x4a7   : > { %v3767_v18 = vpop.xlane.xlu1 %3766 }
 0x4a8   : > { %v3683_v61 = vpop.xlane.xlu0 %3682 }
 0x4a9   : > { %3704 = vst.msk [vmem:[#allocation8 + $0x4] sm:$0xf] %vm3702_vm1, %v3683_v61  ;;  %v3847_v5 = vld [vmem:[#allocation8 + $0x2] sm:$0x1]  ;;  %v3840_v28 = vld [vmem:[#allocation8 + $0x1] sm:$0x1] }
 0x4aa   : > { %3849 = vrot.lane.b32.xlu0 %v3847_v5, %s5125_s3  ;;  %3842 = vrot.lane.b32.xlu1 %v3840_v28, %s5126_s16  ;;  %v3837_v41 = vld [vmem:[#allocation8] sm:$0x1]  ;;  %v3854_v4 = vld [vmem:[#allocation8 + $0x3] sm:$0x1]  ;;  %s5142_s16 = smov 76   ;;  %v4070_v5 = vld [vmem:[%s7762_s5 + $0x28] sm:$0xff] }
 0x4ab   : > { %3839 = vst.msk [vmem:[#allocation9] sm:$0x1] %vm3838_vm8, %v3837_v41  ;;  %4822 = vmatpush3.msra.mxu0 %v4070_v5  ;;  %v4069_v28 = vld [vmem:[%s7762_s5 + $0x20] sm:$0xff]  ;;  %vm3939_vm8 = vcmask 483776  }
 0x4ac   : > { %v3725_v12 = vpop.xlane.xlu0 %3724  ;;  %4823 = vmatprep.subr.mxu0 %v7942_v35 }
 0x4ad   : > { %3746 = vst.msk [vmem:[#allocation8 + $0x4] sm:$0xf] %vm3744_vm2, %v3725_v12  ;;  %4824 = vmatpush3.msra.mxu0 %v4069_v28 }
 0x4ae   : > { %3788 = vst.msk [vmem:[#allocation8 + $0x4] sm:$0xf] %vm3786_vm4, %v3767_v18  ;;  %3856 = vrot.lane.b32.xlu1 %v3854_v4, %s5127_s14  ;;  %s5143_s14 = smov 72   ;;  %v4068_v18 = vld [vmem:[%s7762_s5 + $0x18] sm:$0xff]  ;;  %4825 = vmatprep.subr.mxu0 %v7942_v35 }
 0x4af   : > { %4826 = vmatpush3.msra.mxu0 %v4068_v18 }
 0x4b0   : > { %v3809_v34 = vpop.xlane.xlu0 %3808  ;;  %4827 = vmatprep.subr.mxu0 %v7942_v35 }
 0x4b1   : > { %3830 = vst.msk [vmem:[#allocation8 + $0x4] sm:$0xf] %vm3828_vm5, %v3809_v34 }
 0x4b4   : > { %v3686_v31 = vpop.xlane.xlu1 %3685  ;;  %v3728_v6 = vpop.xlane.xlu0 %3727 }
 0x4b5   : > { %3705 = vst.msk [vmem:[#allocation8 + $0x8] sm:$0xf] %vm3702_vm1, %v3686_v31  ;;  %v4067_v31 = vld [vmem:[%s7762_s5 + $0x10] sm:$0xff] }
 0x4b6   : > { %3747 = vst.msk [vmem:[#allocation8 + $0x8] sm:$0xf] %vm3744_vm2, %v3728_v6  ;;  %v4158_v6 = vld [vmem:[%s7764_s7 + $0x18] sm:$0xff]  ;;  %4828 = vmatpush3.msra.mxu0 %v4067_v31 }
 0x4b7   : > { %4837 = vmatpush3.msra.mxu1 %v4158_v6  ;;  %4829 = vmatprep.subr.mxu0 %v7942_v35 }
 0x4b8   : > { %v3770_v16 = vpop.xlane.xlu1 %3769  ;;  %v3812_v24 = vpop.xlane.xlu0 %3811  ;;  %v3869_v11 = vld [vmem:[#allocation8 + $0x5] sm:$0x1]  ;;  %v3862_v21 = vld [vmem:[#allocation8 + $0x4] sm:$0x1]  ;;  %v3883_v25 = vld [vmem:[#allocation8 + $0x7] sm:$0x1]  ;;  %4838 = vmatprep.subr.mxu1 %v7942_v35 }
 0x4b9   : > { %3789 = vst.msk [vmem:[#allocation8 + $0x8] sm:$0xf] %vm3786_vm4, %v3770_v16  ;;  %3871 = vrot.lane.b32.xlu0 %v3869_v11, %s5128_s4  ;;  %3864 = vrot.lane.b32.xlu1 %v3862_v21, %s5129_s29  ;;  %v3876_v63 = vld [vmem:[#allocation8 + $0x6] sm:$0x1]  ;;  %s5153_s4 = smov 116   ;;  %s5154_s29 = smov 112  }
 0x4ba   : > { %3831 = vst.msk [vmem:[#allocation8 + $0x8] sm:$0xf] %vm3828_vm5, %v3812_v24  ;;  %v4066_v16 = vld [vmem:[%s7762_s5 + $0x8] sm:$0xff]  ;;  %v4065_v21 = vld [vmem:[%s7762_s5] sm:$0xff] }
 0x4bb   : > { %4830 = vmatpush3.msra.mxu0 %v4066_v16 }
 0x4bc   : > { %4831 = vmatprep.subr.mxu0 %v7942_v35 }
 0x4bd   : > { %3885 = vrot.lane.b32.xlu0 %v3883_v25, %s5130_s22  ;;  %3878 = vrot.lane.b32.xlu1 %v3876_v63, %s5131_s19 }
 0x4be   : > { %4832 = vmatpush3.msra.mxu0 %v4065_v21 }
 0x4c1   : > { %v3898_v33 = vld [vmem:[#allocation8 + $0x9] sm:$0x1]  ;;  %v3891_v49 = vld [vmem:[#allocation8 + $0x8] sm:$0x1]  ;;  %v3731_v42 = vpop.xlane.xlu0 %3730  ;;  %v3912_v51 = vld [vmem:[#allocation8 + $0xb] sm:$0x1] }
 0x4c2   : > { %v3689_v13 = vpop.xlane.xlu1 %3688  ;;  %3900 = vrot.lane.b32.xlu0 %v3898_v33, %s5132_s23  ;;  %3893 = vrot.lane.b32.xlu1 %v3891_v49, %s5133_s17  ;;  %v3905_v55 = vld [vmem:[#allocation8 + $0xa] sm:$0x1]  ;;  %s5144_s23 = smov 84   ;;  %s5145_s17 = smov 80  }
 0x4c3   : > { %3706 = vst.msk [vmem:[#allocation8 + $0xc] sm:$0xf] %vm3702_vm1, %v3689_v13 }
 0x4c4   : > { %3748 = vst.msk [vmem:[#allocation8 + $0xc] sm:$0xf] %vm3744_vm2, %v3731_v42 }
 0x4c5   : > { %v3815_v43 = vpop.xlane.xlu0 %3814 }
 0x4c6   : > { %v3773_v59 = vpop.xlane.xlu1 %3772  ;;  %3914 = vrot.lane.b32.xlu0 %v3912_v51, %s5134_s11  ;;  %3907 = vrot.lane.b32.xlu1 %v3905_v55, %s5135_s10  ;;  %s5155_s11 = smov 124   ;;  %s5156_s10 = smov 120  }
 0x4c7   : > { %3790 = vst.msk [vmem:[#allocation8 + $0xc] sm:$0xf] %vm3786_vm4, %v3773_v59 }
 0x4c8   : > { %3832 = vst.msk [vmem:[#allocation8 + $0xc] sm:$0xf] %vm3828_vm5, %v3815_v43 }
 0x4cf   : > { %v3927_v44 = vld [vmem:[#allocation8 + $0xd] sm:$0x1]  ;;  %v3920_v23 = vld [vmem:[#allocation8 + $0xc] sm:$0x1]  ;;  %v3941_v10 = vld [vmem:[#allocation8 + $0xf] sm:$0x1] }
 0x4d0   : > { %3929 = vrot.lane.b32.xlu0 %v3927_v44, %s5136_s20  ;;  %3922 = vrot.lane.b32.xlu1 %v3920_v23, %s5137_s27  ;;  %v3934_v26 = vld [vmem:[#allocation8 + $0xe] sm:$0x1]  ;;  %s5146_s20 = smov 92   ;;  %s5147_s27 = smov 88  }
 0x4d2   : > { %v3734_v32 = vpop.xlane.xlu0 %3733 }
 0x4d4   : > { %3943 = vrot.lane.b32.xlu0 %v3941_v10, %s5138_s28  ;;  %3936 = vrot.lane.b32.xlu1 %v3934_v26, %s5139_s26  ;;  %s7947_s28 = sld [smem:[#allocation92_spill]] }
 0x4d6   : > { %v3692_v47 = vpop.xlane.xlu1 %3691 }
 0x4d7   : > { %3707 = vst.msk [vmem:[#allocation8 + $0x10] sm:$0xf] %vm3702_vm1, %v3692_v47  ;;  %v3818_v17 = vpop.xlane.xlu0 %3817 }
 0x4d8   : > { %3749 = vst.msk [vmem:[#allocation8 + $0x10] sm:$0xf] %vm3744_vm2, %v3734_v32 }
 0x4da   : > { %v3776_v30 = vpop.xlane.xlu1 %3775 }
 0x4db   : > { %3791 = vst.msk [vmem:[#allocation8 + $0x10] sm:$0xf] %vm3786_vm4, %v3776_v30 }
 0x4dc   : > { %3833 = vst.msk [vmem:[#allocation8 + $0x10] sm:$0xf] %vm3828_vm5, %v3818_v17 }
 0x4dd   : > { %v3737_v27 = vpop.xlane.xlu0 %3736 }
 0x4de   : > { %v3695_v19 = vpop.xlane.xlu1 %3694 }
 0x4df   : > { %3708 = vst.msk [vmem:[#allocation8 + $0x14] sm:$0xf] %vm3702_vm1, %v3695_v19 }
 0x4e0   : > { %3750 = vst.msk [vmem:[#allocation8 + $0x14] sm:$0xf] %vm3744_vm2, %v3737_v27 }
 0x4e1   : > { %v3821_v38 = vpop.xlane.xlu0 %3820 }
 0x4e2   : > { %v3779_v37 = vpop.xlane.xlu1 %3778 }
 0x4e3   : > { %v3956_v60 = vld [vmem:[#allocation8 + $0x11] sm:$0x1]  ;;  %v3949_v0 = vld [vmem:[#allocation8 + $0x10] sm:$0x1]  ;;  %3792 = vst.msk [vmem:[#allocation8 + $0x14] sm:$0xf] %vm3786_vm4, %v3779_v37 }
 0x4e4   : > { %3958 = vrot.lane.b32.xlu0 %v3956_v60, %s5140_s24  ;;  %3951 = vrot.lane.b32.xlu1 %v3949_v0, %s5141_s13  ;;  %3834 = vst.msk [vmem:[#allocation8 + $0x14] sm:$0xf] %vm3828_vm5, %v3821_v38  ;;  %v3970_v20 = vld [vmem:[#allocation8 + $0x13] sm:$0x1]  ;;  %v3963_v1 = vld [vmem:[#allocation8 + $0x12] sm:$0x1] }
 0x4e7   : > { %v3740_v56 = vpop.xlane.xlu0 %3739 }
 0x4e8   : > { %3972 = vrot.lane.b32.xlu0 %v3970_v20, %s5142_s16  ;;  %3965 = vrot.lane.b32.xlu1 %v3963_v1, %s5143_s14  ;;  %v3698_v39 = vpop.xlane.xlu1 %3697  ;;  %s7944_s14 = sld [smem:[#allocation90_spill]] }
 0x4e9   : > { %3709 = vst.msk [vmem:[#allocation8 + $0x18] sm:$0xf] %vm3702_vm1, %v3698_v39 }
 0x4ea   : > { %3751 = vst.msk [vmem:[#allocation8 + $0x18] sm:$0xf] %vm3744_vm2, %v3740_v56  ;;  %v4157_v56 = vld [vmem:[%s7764_s7 + $0x10] sm:$0xff] }
 0x4eb   : > { %v3985_v9 = vld [vmem:[#allocation8 + $0x15] sm:$0x1]  ;;  %v3978_v14 = vld [vmem:[#allocation8 + $0x14] sm:$0x1]  ;;  %v3824_v8 = vpop.xlane.xlu0 %3823  ;;  %v3999_v29 = vld [vmem:[#allocation8 + $0x17] sm:$0x1]  ;;  %4839 = vmatpush3.msra.mxu1 %v4157_v56 }
 0x4ec   : > { %v3782_v48 = vpop.xlane.xlu1 %3781  ;;  %3987 = vrot.lane.b32.xlu0 %v3985_v9, %s5144_s23  ;;  %3980 = vrot.lane.b32.xlu1 %v3978_v14, %s5145_s17  ;;  %v3992_v15 = vld [vmem:[#allocation8 + $0x16] sm:$0x1]  ;;  %v4155_v9 = vld [vmem:[%s7764_s7] sm:$0xff]  ;;  %s7946_s23 = sld [smem:[#allocation91_spill]] }
 0x4ed   : > { %3793 = vst.msk [vmem:[#allocation8 + $0x18] sm:$0xf] %vm3786_vm4, %v3782_v48  ;;  %4840 = vmatprep.subr.mxu1 %v7942_v35  ;;  %v4081_v14 = vld [vmem:[%s7763_s6] sm:$0x1] }
 0x4ee   : > { %3835 = vst.msk [vmem:[#allocation8 + $0x18] sm:$0xf] %vm3828_vm5, %v3824_v8  ;;  %4841 = vmatpush3.msra.mxu1 %v4156_v7 }
 0x4ef   : > { %v3743_v57 = vpop.xlane.xlu0 %3742  ;;  %4842 = vmatprep.subr.mxu1 %v7942_v35 }
 0x4f0   : > { %v3701_v52 = vpop.xlane.xlu1 %3700  ;;  %4001 = vrot.lane.b32.xlu0 %v3999_v29, %s5146_s20  ;;  %3994 = vrot.lane.b32.xlu1 %v3992_v15, %s5147_s27  ;;  %v4238_v15 = vld [vmem:[%s7766_s9 + $0x8] sm:$0xff] }
 0x4f1   : > { %3710 = vst.msk [vmem:[#allocation8 + $0x1c] sm:$0xf] %vm3702_vm1, %v3701_v52  ;;  %vm3910_vm1 = vcmask 352576   ;;  %4843 = vmatpush3.msra.mxu1 %v4155_v9  ;;  %v4237_v52 = vld [vmem:[%s7766_s9] sm:$0xff] }
 0x4f2   : > { %3752 = vst.msk [vmem:[#allocation8 + $0x1c] sm:$0xf] %vm3744_vm2, %v3743_v57  ;;  %vm3917_vm2 = vcmask 385376   ;;  %4847 = vmatprep.subr.mxu1 %v7942_v35  ;;  %v4159_v57 = vld [vmem:[%s7944_s14] sm:$0x1] }
 0x4f3   : > { %v3827_v40 = vpop.xlane.xlu0 %3826 }
 0x4f4   : > { %v3785_v2 = vpop.xlane.xlu1 %3784 }
 0x4f5   : > { %3794 = vst.msk [vmem:[#allocation8 + $0x1c] sm:$0xf] %vm3786_vm4, %v3785_v2  ;;  %v4014_v53 = vld [vmem:[#allocation8 + $0x19] sm:$0x1]  ;;  %v4007_v61 = vld [vmem:[#allocation8 + $0x18] sm:$0x1] }
 0x4f6   : > { %3836 = vst.msk [vmem:[#allocation8 + $0x1c] sm:$0xf] %vm3828_vm5, %v3827_v40  ;;  %4016 = vrot.lane.b32.xlu0 %v4014_v53, %s5148_s12  ;;  %4009 = vrot.lane.b32.xlu1 %v4007_v61, %s5149_s15  ;;  %v4028_v41 = vld [vmem:[#allocation8 + $0x1b] sm:$0x1]  ;;  %v4021_v12 = vld [vmem:[#allocation8 + $0x1a] sm:$0x1] }
 0x4f7   : > { %vm3925_vm4 = vcmask 418176   ;;  %vm3932_vm5 = vcmask 450976   ;;  %v4239_v61 = vld [vmem:[%s7946_s23] sm:$0x1]  ;;  %s5049_s12 = scalar_lea.vmem %s5048_s30, 32 }
 0x4fa   : > { %4030 = vrot.lane.b32.xlu0 %v4028_v41, %s5151_s1  ;;  %4023 = vrot.lane.b32.xlu1 %v4021_v12, %s5152_s0  ;;  %s7943_s1 = sld [smem:[#allocation26_spill]] }
 0x4fd   : > { %v4043_v4 = vld [vmem:[#allocation8 + $0x1d] sm:$0x1]  ;;  %v4036_v34 = vld [vmem:[#allocation8 + $0x1c] sm:$0x1]  ;;  %v4057_v24 = vld [vmem:[#allocation8 + $0x1f] sm:$0x1] }
 0x4fe   : > { %4045 = vrot.lane.b32.xlu0 %v4043_v4, %s5153_s4  ;;  %4038 = vrot.lane.b32.xlu1 %v4036_v34, %s5154_s29  ;;  %v4050_v11 = vld [vmem:[#allocation8 + $0x1e] sm:$0x1]  ;;  %s7945_s4 = sld [smem:[#allocation29_spill]]  ;;  %s429_s29 = sand.u32 1, %s5107_s18  }
 0x4ff   : > { %s4316_s8 = scalar_lea.sflag [#allocation11], %s429_s29 }
 0x500   : > { %s4772_s17 = sshll.u32 %s7943_s1, 4 }
 0x501   : > { %s7722_s26 = scalar_lea.hbm %s7947_s28, %s4772_s17 }
 0x502   : > { %4059 = vrot.lane.b32.xlu0 %v4057_v24, %s5155_s11  ;;  %4052 = vrot.lane.b32.xlu1 %v4050_v11, %s5156_s10  ;;  %s430_s11 = scalar_lea.vmem [#allocation18], %s429_s29 }
 0x503   : > { %s4328_s10 = sshll.u32 %s430_s11, 4  ;;  %s4329_s10 = int_to_ptr.vmem [resolvable:$true] %s4328_s10 }
 0x504   : > { %s5043_s21 = scalar_lea.vmem %s4329_s10, 16  ;;  %p7948_p11 = scmp.ne.s32.totalorder %s7945_s4, 0 }
 0x505   : > { %p5044_p8 = scmp.ne.s32.totalorder %s4329_s10, %s5043_s21  ;;  %p5050_p2 = scmp.lt.s32.totalorder %s4329_s10, %s5048_s30 }
 0x506   : > { %p5051_p3 = scmp.lt.s32.totalorder %s5049_s12, %s5043_s21 }
 0x507   : > { %p5045_p13 = pnand %p5044_p8, %p7948_p11 }
 0x508   : > { %p5052_p9 = por %p5051_p3, %p5050_p2 }
 0x509   : > { %p5046_p1 = pneg %p5045_p13 }
 0x50b   : > { %p5053_p5 = pnand %p5052_p9, %p5046_p1 }
 0x51c   : > { %v3843_v25 = vpop.permute.xlu1 %3842  ;;  %v3850_v63 = vpop.permute.xlu0 %3849 }
 0x51d   : > { %3846 = vst.msk [vmem:[#allocation9] sm:$0x1] %vm3845_vm0, %v3843_v25  ;;  %vm3946_vm0 = vcmask 516576  }
 0x51e   : > { %3853 = vst.msk [vmem:[#allocation9] sm:$0x1] %vm3852_vm6, %v3850_v63  ;;  %vm3954_vm6 = vcmask 549376  }
 0x520   : > { %v3857_v33 = vpop.permute.xlu1 %3856 }
 0x521   : > { %3860 = vst.msk [vmem:[#allocation9] sm:$0x1] %vm3859_vm7, %v3857_v33  ;;  %vm3961_vm7 = vcmask 582176  }
 0x52b   : > { %v3865_v49 = vpop.permute.xlu1 %3864  ;;  %v3872_v13 = vpop.permute.xlu0 %3871 }
 0x52c   : > { %3868 = vst.msk [vmem:[#allocation9] sm:$0x1] %vm3867_vm10, %v3865_v49  ;;  %vm3968_vm10 = vcmask 614976  }
 0x52d   : > { %3875 = vst.msk [vmem:[#allocation9] sm:$0x1] %vm3874_vm11, %v3872_v13  ;;  %vm3975_vm11 = vcmask 647776  }
 0x52f   : > { %v3879_v42 = vpop.permute.xlu1 %3878  ;;  %v3886_v51 = vpop.permute.xlu0 %3885 }
 0x530   : > { %3882 = vst.msk [vmem:[#allocation9] sm:$0x1] %vm3881_vm12, %v3879_v42  ;;  %vm3983_vm12 = vcmask 680576  }
 0x531   : > { %3889 = vst.msk [vmem:[#allocation9] sm:$0x1] %vm3888_vm13, %v3886_v51  ;;  %vm3990_vm13 = vcmask 713376  }
 0x534   : > { %v3894_v55 = vpop.permute.xlu1 %3893  ;;  %v3901_v59 = vpop.permute.xlu0 %3900 }
 0x535   : > { %3897 = vst.msk [vmem:[#allocation9] sm:$0x1] %vm3896_vm14, %v3894_v55  ;;  %vm3997_vm14 = vcmask 746176  }
 0x536   : > { %3904 = vst.msk [vmem:[#allocation9] sm:$0x1] %vm3903_vm15, %v3901_v59  ;;  %vm4004_vm15 = vcmask 778976  }
 0x538   : > { %v3908_v43 = vpop.permute.xlu1 %3907  ;;  %v3915_v44 = vpop.permute.xlu0 %3914 }
 0x539   : > { %3911 = vst.msk [vmem:[#allocation9] sm:$0x1] %vm3910_vm1, %v3908_v43  ;;  %vm4012_vm1 = vcmask 811776  }
 0x53a   : > { %3918 = vst.msk [vmem:[#allocation9] sm:$0x1] %vm3917_vm2, %v3915_v44  ;;  %vm4019_vm2 = vcmask 844576  }
 0x542   : > { %v3923_v23 = vpop.permute.xlu1 %3922  ;;  %v3930_v10 = vpop.permute.xlu0 %3929 }
 0x543   : > { %3926 = vst.msk [vmem:[#allocation9] sm:$0x1] %vm3925_vm4, %v3923_v23  ;;  %vm4026_vm4 = vcmask 877376  }
 0x544   : > { %3933 = vst.msk [vmem:[#allocation9] sm:$0x1] %vm3932_vm5, %v3930_v10  ;;  %vm4033_vm5 = vcmask 910176  }
 0x546   : > { %v3937_v26 = vpop.permute.xlu1 %3936  ;;  %v3944_v32 = vpop.permute.xlu0 %3943 }
 0x547   : > { %3940 = vst.msk [vmem:[#allocation9] sm:$0x1] %vm3939_vm8, %v3937_v26  ;;  %vm4041_vm8 = vcmask 942976  }
 0x548   : > { %3947 = vst.msk [vmem:[#allocation9] sm:$0x1] %vm3946_vm0, %v3944_v32  ;;  %vm4048_vm0 = vcmask 975776  }
 0x556   : > { %v3952_v47 = vpop.permute.xlu1 %3951  ;;  %v3959_v17 = vpop.permute.xlu0 %3958 }
 0x557   : > { %3955 = vst.msk [vmem:[#allocation9] sm:$0x1] %vm3954_vm6, %v3952_v47  ;;  %vm4055_vm6 = vcmask 1008576  }
 0x558   : > { %3962 = vst.msk [vmem:[#allocation9] sm:$0x1] %vm3961_vm7, %v3959_v17  ;;  %vm4062_vm7 = vcmask 1041376  }
 0x55a   : > { %v3966_v30 = vpop.permute.xlu1 %3965  ;;  %v3973_v58 = vpop.permute.xlu0 %3972 }
 0x55b   : > { %3969 = vst.msk [vmem:[#allocation9] sm:$0x1] %vm3968_vm10, %v3966_v30 }
 0x55c   : > { %3976 = vst.msk [vmem:[#allocation9] sm:$0x1] %vm3975_vm11, %v3973_v58  ;;  %vm4160_vm11 = vcmask 261120  }
 0x55e   : > { %v3981_v27 = vpop.permute.xlu1 %3980  ;;  %v3988_v19 = vpop.permute.xlu0 %3987 }
 0x55f   : > { %3984 = vst.msk [vmem:[#allocation9] sm:$0x1] %vm3983_vm12, %v3981_v27  ;;  %vm4313_vm12 = vcmask 73728  }
 0x560   : > { %3991 = vst.msk [vmem:[#allocation9] sm:$0x1] %vm3990_vm13, %v3988_v19 }
 0x562   : > { %v3995_v22 = vpop.permute.xlu1 %3994  ;;  %v4002_v54 = vpop.permute.xlu0 %4001 }
 0x563   : > { %3998 = vst.msk [vmem:[#allocation9] sm:$0x1] %vm3997_vm14, %v3995_v22 }
 0x564   : > { %4005 = vst.msk [vmem:[#allocation9] sm:$0x1] %vm4004_vm15, %v4002_v54 }
 0x568   : > { %v4010_v38 = vpop.permute.xlu1 %4009  ;;  %v4017_v37 = vpop.permute.xlu0 %4016 }
 0x569   : > { %4013 = vst.msk [vmem:[#allocation9] sm:$0x1] %vm4012_vm1, %v4010_v38 }
 0x56a   : > { %4020 = vst.msk [vmem:[#allocation9] sm:$0x1] %vm4019_vm2, %v4017_v37 }
 0x56c   : > { %v4024_v60 = vpop.permute.xlu1 %4023  ;;  %v4031_v0 = vpop.permute.xlu0 %4030 }
 0x56d   : > { %4027 = vst.msk [vmem:[#allocation9] sm:$0x1] %vm4026_vm4, %v4024_v60 }
 0x56e   : > { %4034 = vst.msk [vmem:[#allocation9] sm:$0x1] %vm4033_vm5, %v4031_v0 }
 0x570   : > { %v4039_v62 = vpop.permute.xlu1 %4038  ;;  %v4046_v36 = vpop.permute.xlu0 %4045 }
 0x571   : > { %4042 = vst.msk [vmem:[#allocation9] sm:$0x1] %vm4041_vm8, %v4039_v62 }
 0x572   : > { %4049 = vst.msk [vmem:[#allocation9] sm:$0x1] %vm4048_vm0, %v4046_v36 }
 0x574   : > { %v4053_v20 = vpop.permute.xlu1 %4052  ;;  %v4060_v1 = vpop.permute.xlu0 %4059 }
 0x575   : > { %4056 = vst.msk [vmem:[#allocation9] sm:$0x1] %vm4055_vm6, %v4053_v20 }
 0x576   : > { %4063 = vst.msk [vmem:[#allocation9] sm:$0x1] %vm4062_vm7, %v4060_v1 }
 0x57d   : > { %v4064_v39 = vld [vmem:[#allocation9] sm:$0x1] }
 0x57e   : > { %4834 = vmatmul.mubr.f32.vlgmr.msra.gmra.mxu0 %v4064_v39 }
 0x63e   : > { %v4148_v3 = vpop.f32.mrf.mxu0 }
 0x63f   : > { %v4149_v48 = vadd.f32 %v4148_v3, %v4081_v14 }
 0x640   : > { %v4835_v8 = vpop.f32.mrf.mxu0 }
 0x641   : > { %vm4152_vm10 = vcmp.ge.f32.partialorder %v4149_v48, 0.0  ;;  %v4153_v50 = vmul.f32 0.01, %v4149_v48 }
 0x643   : > { %v4154_v29 = vsel %vm4152_vm10, %v4149_v48, %v4153_v50 }
 0x644   : > { %4845 = vmatmul.mubr.msk.f32.vlgmr.msra.gmra.mxu1 %vm4160_vm11, %v4154_v29 }
 0x645   : > { %4851 = vmatprep.mubr.msk.f32.mxu1 %vm5150_vm9, %v7942_v35  ;;  %4848 = vmatpush3.msra.mxu1 %v4238_v15 }
 0x646   : > { %4849 = vmatprep.subr.mxu1 %v7942_v35 }
 0x647   : > { %4850 = vmatpush3.msra.mxu1 %v4237_v52 }
 0x704   : > { %v4230_v45 = vpop.f32.mrf.mxu1 }
 0x705   : > { %v4231_v46 = vadd.f32 %v4230_v45, %v4159_v57 }
 0x706   : > { %v4846_v2 = vpop.f32.mrf.mxu1 }
 0x707   : > { %vm4234_vm9 = vcmp.ge.f32.partialorder %v4231_v46, 0.0  ;;  %v4235_v40 = vmul.f32 0.01, %v4231_v46 }
 0x709   : > { %v4236_v53 = vsel %vm4234_vm9, %v4231_v46, %v4235_v40 }
 0x70a   : > { %4852 = vmatmul.mubr.msk.f32.vlgmr.msra.gmra.mxu1 %vm570_vm3, %v4236_v53 }
 0x7ca   : > { %v4309_v35 = vpop.f32.mrf.mxu1 }
 0x7cb   : > { %v4310_v5 = vadd.f32 %v4309_v35, %v4239_v61 }
 0x7cc   : > { %v4853_v28 = vpop.f32.mrf.mxu1 }
 0x7cd   : > { %4314 = vst.msk [vmem:[%s430_s11] sm:$0x1] %vm4313_vm12, %v4310_v5 }
 0x7ce   : > { %5056 = shalt.err (!%p5053_p5)
}
 0x7cf   : > { %s5057_s15 = scalar_lea.hbm %s7722_s26, 16  ;;  %s5061_s1 = scalar_lea.hbm %s7947_s28, 32 }
 0x7d0   : > { %p5058_p6 = scmp.ne.s32.totalorder %s7722_s26, %s5057_s15  ;;  %p5062_p4 = scmp.lt.s32.totalorder %s7722_s26, %s7947_s28 }
 0x7d1   : > { %p5063_p12 = scmp.lt.s32.totalorder %s5061_s1, %s5057_s15 }
 0x7d2   : > { %p5059_p0 = pnand %p5058_p6, %p7948_p11 }
 0x7d3   : > { %p5064_p7 = por %p5063_p12, %p5062_p4 }
 0x7d4   : > { %p5060_p10 = pneg %p5059_p0 }
 0x7d6   : > { %p5065_p8 = pnand %p5064_p7, %p5060_p10 }
 0x7d8   : > { %5068 = shalt.err (!%p5065_p8)
}
 0x7d9   : > { %4870 = dma.vmem_to_hbm [thread:$0]  (%p7948_p11), %s4329_s10, 16, %s7722_s26, %s4316_s8  }
 0x7da PF: > { %s7949_s3 = sld [smem:[#allocation25_spill]] }
 0x7db   : > { %s7950_s16 = sld [smem:[#allocation23_spill]] }
 0x7dc   : > { %s7951_s14 = sld [smem:[#allocation30_spill]] }
 0x7e0   : > { %p4897_p13 = scmp.ge.s32.totalorder %s7949_s3, 2 }
 0x7e1   : > { %s4340_s29 = sand.u32 1, %s7950_s16  }
 0x7e2   : > { %p7952_p1 = scmp.ne.s32.totalorder %s7951_s14, 0  ;;  %s4341_s22 = scalar_lea.sflag [#allocation11], %s4340_s29 }
 0x7e4   : > { %p4886_p2 = pnand %p4897_p13, %p7952_p1 }
 0x7e6   : > { %p4887_p3 = pneg %p4886_p2 }
 0x7e8   : > { %5098 = dma.done.wait (%p4887_p3), %s4341_s22, 16  }
 0x7e9   : > { %5100 = vsyncadd (%p4887_p3), %s4341_s22, 4294967280  ;;  %s7953_s20 = sld [smem:[#allocation27_spill]]  ;;  %s7956_s17 = smov %s5107_s18 }
 0x7ea   : > { %s7954_s19 = sld [smem:[#allocation24_spill]] }
 0x7eb   : > { %s7955_s23 = sld [smem:[#allocation28_spill]] }
 0x7ef   : > { %p24_p9 = scmp.ge.s32.totalorder %s7953_s20, 4  }
 0x7f0   : > { %s7957_s18 = smov %s7954_s19 }
 0x7f1   : > { %s7958_s19 = smov %s7955_s23  ;;  %26 = sbr.rel (!%p24_p9) target bundleno = 15 (0xf), region = 136 }
 0x7f6   :  { %4345 = vsyncpa [#allocation11], 1 }
 0x7f7   :  { %4347 = vsyncpa [#allocation11 + $0x1], 1 }
 0x7f8   :  { %4348 = vsyncpa [#allocation12], 1 }
 0x7f9   :  { %4350 = vsyncpa [#allocation12 + $0x1], 1 }
 0x7fa   :  { %4351 = vsyncpa [#allocation14], 1 }
 0x7fb   :  { %4352 = vsyncpa [#allocation17], 1 }

</bundles_post_ra>
